<compile_context>
chip_gen: v7x
topology: tpu7x:2x2x1
jax: 0.10.0
libtpu: 0.0.40
codegen_flags: <defaults>
</compile_context>

<pallas_src>
import jax
import jax.numpy as jnp
from jax.experimental import pallas as pl
from jax.experimental.pallas import tpu as pltpu

_GUARD = 8  # extra zero rows per activation slab so (strided) tap reads stay in bounds


# ---------------------------------------------------------------------------
# Static geometry (all Python ints, computed once).
# ---------------------------------------------------------------------------
def _conv_geom(hp, wp, stride):
    """3x3 'valid' conv over an already padded (hp, wp) slab.

    Output is computed on a 'wide' row grid of width wp: wide row k = oh*wp + ow;
    tap (i, j) reads flattened slab row (i*wp + j) + stride*k.  Columns
    ow in [wo, wp) are junk and are dropped at write-back.  m = number of wide
    rows actually computed (chosen so every tap read stays inside the slab).
    """
    ho = (hp - 3) // stride + 1
    wo = (wp - 3) // stride + 1
    m = (ho - 1) * wp + wo
    taps = tuple(i * wp + j for i in range(3) for j in range(3))
    return ho, wo, m, taps


def make_plan(*, depth, nb_filters, num_classes, inp_channels, k, pad_conv1,
              h_img, w_img):
    assert (depth - 2) % 6 == 0, "resnet depth should be 6n+2"
    n = (depth - 2) // 6
    nf = [nb_filters, nb_filters * k, 2 * nb_filters * k, 4 * nb_filters * k]

    hp0, wp0 = h_img + 2 * pad_conv1, w_img + 2 * pad_conv1
    ho, wo, m1, taps1 = _conv_geom(hp0, wp0, 1)
    plan = dict(h_img=h_img, w_img=w_img, pad1=pad_conv1, num_classes=num_classes,
                conv1=dict(hp=hp0, wp=wp0, cin=inp_channels, cout=nf[0],
                           ho=ho, wo=wo, m=m1, taps=taps1))

    blocks = []
    h, w, cprev = ho, wo, nf[0]
    for stage in range(3):
        ccur = nf[stage + 1]
        for i in range(n):
            s = 1 if (i > 0 or stage == 0) else 2
            hpA, wpA = h + 2, w + 2
            ho2, wo2, m2, taps2 = _conv_geom(hpA, wpA, s)
            hpB, wpB = ho2 + 2, wo2 + 2
            _, _, m3, taps3 = _conv_geom(hpB, wpB, 1)
            identity = (s == 1 and cprev == ccur)
            msc = (ho2 - 1) * wpA + wo2          # shortcut rows on A's wide grid
            blocks.append(dict(s=s, cin=cprev, cout=ccur, identity=identity,
                               hpA=hpA, wpA=wpA, hpB=hpB, wpB=wpB,
                               h_out=ho2, w_out=wo2, m2=m2, taps2=taps2,
                               m3=m3, taps3=taps3, msc=msc))
            h, w, cprev = ho2, wo2, ccur
    plan["blocks"] = blocks
    plan["c_last"] = cprev
    plan["hw_last"] = h * w
    return plan


# ---------------------------------------------------------------------------
# Fully fused per-image kernel.
# ---------------------------------------------------------------------------
def _make_kernel(plan):
    blocks = plan["blocks"]
    c1 = plan["conv1"]
    f32 = jnp.float32

    def _conv_taps(src_ref, w_ref, taps, m, stride, cout):
        # 3x3 conv via tap-wise MXU accumulation over the flattened padded slab.
        acc = jnp.zeros((m, cout), f32)
        for t, off in enumerate(taps):
            if stride == 1:
                xs = src_ref[off:off + m, :]
            else:
                xs = src_ref[pl.ds(off, m, stride=stride), :]
            acc = acc + jnp.dot(xs, w_ref[t], preferred_element_type=f32)
        return acc

    def kernel(*refs):
        it = iter(refs)
        x_ref = next(it)
        w1_ref = next(it)
        blk_w = []
        for blk in blocks:
            w2 = next(it)
            w3 = next(it)
            wsc = None if blk["identity"] else next(it)
            blk_w.append((w2, w3, wsc))
        wfc_ref = next(it)
        o_ref = next(it)
        in_slab = next(it) if plan["pad1"] > 0 else None
        slabs = [(next(it), next(it), next(it)) for _ in blocks]   # (A, R, B)
        conv_buf = next(it)
        sc_buf = next(it)
        assert not list(it)

        # -------- conv1 (bn1 = identity; no activation before blocks) -------
        if in_slab is None:                       # pad_conv1 == 0
            src1 = x_ref
        else:
            in_slab[...] = jnp.zeros(in_slab.shape, f32)
            p, wimg, wp0 = plan["pad1"], plan["w_img"], c1["wp"]
            for r in range(plan["h_img"]):
                d0 = (r + p) * wp0 + p
                in_slab[d0:d0 + wimg, :] = x_ref[r * wimg:(r + 1) * wimg, :]
            src1 = in_slab
        acc1 = _conv_taps(src1, w1_ref, c1["taps"], c1["m"], 1, c1["cout"])
        conv_buf[0:c1["m"], 0:c1["cout"]] = acc1

        # scatter valid columns into block 0's zero-halo input slab
        a0 = slabs[0][0]
        a0[...] = jnp.zeros(a0.shape, f32)
        wp_a0 = blocks[0]["wpA"]
        for oh in range(c1["ho"]):
            d0 = (oh + 1) * wp_a0 + 1
            a0[d0:d0 + c1["wo"], :] = conv_buf[
                oh * c1["wp"]:oh * c1["wp"] + c1["wo"], 0:c1["cout"]]

        # -------- residual blocks -------------------------------------------
        feat_sum = None
        for bi, blk in enumerate(blocks):
            a_ref, r_ref, b_ref = slabs[bi]
            w2, w3, wsc = blk_w[bi]
            s, wpA, wpB = blk["s"], blk["wpA"], blk["wpB"]
            cout, h_out, w_out = blk["cout"], blk["h_out"], blk["w_out"]

            # out = ACT(bn1(x)): ReLU hoisted, applied once to the whole slab.
            r_ref[...] = jnp.maximum(a_ref[...], 0.0)

            # out = ACT(bn2(conv2(out)))  (stride handled by strided tap reads)
            acc2 = jnp.maximum(
                _conv_taps(r_ref, w2, blk["taps2"], blk["m2"], s, cout), 0.0)
            conv_buf[0:blk["m2"], 0:cout] = acc2
            b_ref[...] = jnp.zeros(b_ref.shape, f32)
            for oh in range(h_out):
                d0 = (oh + 1) * wpB + 1
                b_ref[d0:d0 + w_out, :] = conv_buf[oh * wpA:oh * wpA + w_out, 0:cout]

            # out = conv3(out)
            acc3 = _conv_taps(b_ref, w3, blk["taps3"], blk["m3"], 1, cout)

            # shortcut(x) from the *raw* input slab
            use_sc_buf = s > 1
            if not use_sc_buf:
                res = a_ref[wpA + 1:wpA + 1 + blk["m3"], :]
                if blk["identity"]:
                    acc3 = acc3 + res                     # plain add, no eye matmul
                else:
                    acc3 = acc3 + jnp.dot(res, wsc[...], preferred_element_type=f32)
            else:
                sc = jnp.dot(a_ref[pl.ds(wpA + 1, blk["msc"], stride=s), :],
                             wsc[...], preferred_element_type=f32)
                sc_buf[0:blk["msc"], 0:cout] = sc
            conv_buf[0:blk["m3"], 0:cout] = acc3

            last = bi == len(blocks) - 1
            if last:
                feat_sum = jnp.zeros((1, cout), f32)
            else:
                a_next = slabs[bi + 1][0]
                a_next[...] = jnp.zeros(a_next.shape, f32)
                wp_next = blocks[bi + 1]["wpA"]

            for oh in range(h_out):
                row = conv_buf[oh * wpB:oh * wpB + w_out, 0:cout]
                if use_sc_buf:
                    row = row + sc_buf[oh * wpA:oh * wpA + w_out, 0:cout]
                if last:
                    feat_sum = feat_sum + jnp.sum(row, axis=0, keepdims=True)
                else:
                    d0 = (oh + 1) * wp_next + 1
                    a_next[d0:d0 + w_out, :] = row

        # -------- head: global spatial mean + FC (bias=False) ---------------
        # NOTE: MLPLayer is built with bn='none' (truthy) in the reference; the
        # intent is clearly "no BN", so the head is a plain Linear here.
        feat = feat_sum * (1.0 / float(plan["hw_last"]))
        o_ref[...] = jnp.dot(feat, wfc_ref[...], preferred_element_type=f32)

    return kernel


def _scratch_shapes(plan):
    f32 = jnp.float32
    c1 = plan["conv1"]
    shapes = []
    if plan["pad1"] > 0:
        shapes.append(pltpu.VMEM((c1["hp"] * c1["wp"] + _GUARD, c1["cin"]), f32))
    max_m, max_c, max_msc = c1["m"], c1["cout"], 8
    for blk in plan["blocks"]:
        rows_a = blk["hpA"] * blk["wpA"] + _GUARD
        rows_b = blk["hpB"] * blk["wpB"] + _GUARD
        shapes.append(pltpu.VMEM((rows_a, blk["cin"]), f32))     # A  (raw input)
        shapes.append(pltpu.VMEM((rows_a, blk["cin"]), f32))     # R  (ReLU(A))
        shapes.append(pltpu.VMEM((rows_b, blk["cout"]), f32))    # B  (conv3 input)
        max_m = max(max_m, blk["m2"], blk["m3"])
        max_c = max(max_c, blk["cout"])
        if blk["s"] > 1:
            max_msc = max(max_msc, blk["msc"])
    shapes.append(pltpu.VMEM((max_m, max_c), f32))               # wide conv output
    shapes.append(pltpu.VMEM((max_msc, max_c), f32))             # strided shortcut
    return shapes


# ---------------------------------------------------------------------------
# Parameters (same shapes as the PyTorch module, stored kernel-ready).
# ---------------------------------------------------------------------------
def init_params(key, plan):
    keys = iter(jax.random.split(key, 8 + 4 * len(plan["blocks"])))

    def conv3x3(cin, cout):
        w = jax.random.normal(next(keys), (cout, cin, 3, 3), jnp.float32)
        w = w * (1.0 / jnp.sqrt(cin * 9.0))
        return jnp.transpose(w, (2, 3, 1, 0)).reshape(9, cin, cout)   # (tap, Cin, Cout)

    def conv1x1(cin, cout):
        w = jax.random.normal(next(keys), (cout, cin), jnp.float32) / jnp.sqrt(cin)
        return jnp.transpose(w)                                        # (Cin, Cout)

    params = {"conv1": conv3x3(plan["conv1"]["cin"], plan["conv1"]["cout"])}
    bps = []
    for blk in plan["blocks"]:
        bp = {"conv2": conv3x3(blk["cin"], blk["cout"]),
              "conv3": conv3x3(blk["cout"], blk["cout"])}
        if not blk["identity"]:
            bp["w_sc"] = conv1x1(blk["cin"], blk["cout"])
        bps.append(bp)
    params["blocks"] = bps
    wfc = jax.random.normal(next(keys), (plan["num_classes"], plan["c_last"]),
                            jnp.float32) / jnp.sqrt(plan["c_last"])
    params["fc"] = jnp.transpose(wfc)                                   # (Cin, ncls)
    return params


# ---------------------------------------------------------------------------
# Wrapper: one pallas_call for the whole forward pass.
# ---------------------------------------------------------------------------
def build_forward(plan, params):
    c1 = plan["conv1"]
    ncls = plan["num_classes"]
    hw, cin = plan["h_img"] * plan["w_img"], c1["cin"]

    weights = [params["conv1"]]
    for bi, blk in enumerate(plan["blocks"]):
        bp = params["blocks"][bi]
        weights += [bp["conv2"], bp["conv3"]]
        if not blk["identity"]:
            weights.append(bp["w_sc"])
    weights.append(params["fc"])

    def _full_spec(a):
        nd = a.ndim
        return pl.BlockSpec(a.shape, lambda b: (0,) * nd)

    in_specs = [pl.BlockSpec((None, hw, cin), lambda b: (b, 0, 0))]
    in_specs += [_full_spec(w) for w in weights]

    kernel = _make_kernel(plan)
    scratch = _scratch_shapes(plan)

    def forward(x_nchw):
        n = x_nchw.shape[0]
        if x_nchw.shape[1] == 1:   # reference: ones(N,3,H,W) * x broadcast
            x_nchw = jnp.broadcast_to(x_nchw, (n, 3) + x_nchw.shape[2:])
        # TODO(synk): inp_noise>0 (randn_like) and the VIB reparameterize head are
        # disabled by this config (inp_noise=0, VIB=False) and not implemented.
        x = jnp.transpose(x_nchw, (0, 2, 3, 1)).astype(jnp.float32)   # NCHW -> NHWC
        x = x.reshape(n, hw, cin)

        out = pl.pallas_call(
            kernel,
            grid=(n,),
            in_specs=in_specs,
            out_specs=pl.BlockSpec((None, 1, ncls), lambda b: (b, 0, 0)),
            out_shape=jax.ShapeDtypeStruct((n, 1, ncls), jnp.float32),
            scratch_shapes=scratch,
            compiler_params=pltpu.CompilerParams(
                dimension_semantics=("parallel",)),     # v7x: 2 TCs over batch
        )(x, *weights)
        return out.reshape(n, ncls)

    return forward


# ---------------------------------------------------------------------------
# Pure-JAX reference (mirrors the PyTorch module) for a tolerance check.
# ---------------------------------------------------------------------------
def ref_forward(x_nchw, params, plan):
    if x_nchw.shape[1] == 1:
        x_nchw = jnp.broadcast_to(x_nchw, (x_nchw.shape[0], 3) + x_nchw.shape[2:])
    x = jnp.transpose(x_nchw, (0, 2, 3, 1)).astype(jnp.float32)
    dn = ("NHWC", "HWIO", "NHWC")
    hi = jax.lax.Precision.HIGHEST

    def conv3x3(v, w9, stride, pad):
        w = w9.reshape(3, 3, w9.shape[1], w9.shape[2])
        return jax.lax.conv_general_dilated(v, w, (stride, stride),
                                            [(pad, pad), (pad, pad)],
                                            dimension_numbers=dn, precision=hi)

    out = conv3x3(x, params["conv1"], 1, plan["pad1"])
    for bi, blk in enumerate(plan["blocks"]):
        bp = params["blocks"][bi]
        s = blk["s"]
        h = jax.nn.relu(out)
        h = jax.nn.relu(conv3x3(h, bp["conv2"], s, 1))
        h = conv3x3(h, bp["conv3"], 1, 1)
        if blk["identity"]:
            short = out
        else:
            wsc = bp["w_sc"].reshape(1, 1, blk["cin"], blk["cout"])
            short = jax.lax.conv_general_dilated(out, wsc, (s, s), [(0, 0), (0, 0)],
                                                 dimension_numbers=dn, precision=hi)
        out = h + short
    feat = jnp.mean(out.reshape(out.shape[0], -1, out.shape[-1]), axis=1)
    return feat @ params["fc"]


# ---------------------------------------------------------------------------
if __name__ == "__main__":
    key = jax.random.PRNGKey(0)
    k_param, k_x = jax.random.split(key)

    # depth=8 (n=1), nb_filters=8, num_classes=10, inp_channels=3, pad_conv1=0,
    # bn=False, bias=False  -- small but structurally faithful config.
    plan = make_plan(depth=8, nb_filters=8, num_classes=10, inp_channels=3,
                     k=1, pad_conv1=0, h_img=16, w_img=16)
    params = init_params(k_param, plan)

    x = jax.random.normal(k_x, (2, 3, 16, 16), jnp.float32)   # NCHW, like PyTorch

    fwd = jax.jit(build_forward(plan, params))
    logits = jax.block_until_ready(fwd(x))
    assert logits.shape == (2, 10) and logits.dtype == jnp.float32

    ref = jax.block_until_ready(ref_forward(x, params, plan))
    assert bool(jnp.all(jnp.isfinite(logits)))
    assert bool(jnp.allclose(logits, ref, atol=5e-2, rtol=5e-2)), (logits, ref)

    print("KERNEL_OK")
</pallas_src>

<mosaic_0001>
module attributes {stable_mosaic.version = 11 : i64} {
  func.func @kernel(%arg0: i32, %arg1: memref<1x256x3xf32, #tpu.memory_space<vmem>>, %arg2: memref<9x3x8xf32, #tpu.memory_space<vmem>>, %arg3: memref<9x8x8xf32, #tpu.memory_space<vmem>>, %arg4: memref<9x8x8xf32, #tpu.memory_space<vmem>>, %arg5: memref<9x8x16xf32, #tpu.memory_space<vmem>>, %arg6: memref<9x16x16xf32, #tpu.memory_space<vmem>>, %arg7: memref<8x16xf32, #tpu.memory_space<vmem>>, %arg8: memref<9x16x32xf32, #tpu.memory_space<vmem>>, %arg9: memref<9x32x32xf32, #tpu.memory_space<vmem>>, %arg10: memref<16x32xf32, #tpu.memory_space<vmem>>, %arg11: memref<32x10xf32, #tpu.memory_space<vmem>>, %arg12: memref<1x1x10xf32, #tpu.memory_space<vmem>>, %arg13: memref<264x8xf32, #tpu.memory_space<vmem>>, %arg14: memref<264x8xf32, #tpu.memory_space<vmem>>, %arg15: memref<264x8xf32, #tpu.memory_space<vmem>>, %arg16: memref<264x8xf32, #tpu.memory_space<vmem>>, %arg17: memref<264x8xf32, #tpu.memory_space<vmem>>, %arg18: memref<89x16xf32, #tpu.memory_space<vmem>>, %arg19: memref<89x16xf32, #tpu.memory_space<vmem>>, %arg20: memref<89x16xf32, #tpu.memory_space<vmem>>, %arg21: memref<44x32xf32, #tpu.memory_space<vmem>>, %arg22: memref<222x32xf32, #tpu.memory_space<vmem>>, %arg23: memref<103x32xf32, #tpu.memory_space<vmem>>) attributes {dimension_semantics = [#tpu.dimension_semantics<parallel>], iteration_bounds = array<i64: 2>, scalar_prefetch = 0 : i64, scratch_operands = 11 : i64, tpu.core_type = #tpu.core_type<tc>, window_params = [{transform_indices = @transform_0, window_bounds = array<i64: 1, 256, 3>}, {pipeline_mode = #tpu.pipeline_mode<synchronous>, transform_indices = @transform_1, window_bounds = array<i64: 9, 3, 8>}, {pipeline_mode = #tpu.pipeline_mode<synchronous>, transform_indices = @transform_2, window_bounds = array<i64: 9, 8, 8>}, {pipeline_mode = #tpu.pipeline_mode<synchronous>, transform_indices = @transform_3, window_bounds = array<i64: 9, 8, 8>}, {pipeline_mode = #tpu.pipeline_mode<synchronous>, transform_indices = @transform_4, window_bounds = array<i64: 9, 8, 16>}, {pipeline_mode = #tpu.pipeline_mode<synchronous>, transform_indices = @transform_5, window_bounds = array<i64: 9, 16, 16>}, {pipeline_mode = #tpu.pipeline_mode<synchronous>, transform_indices = @transform_6, window_bounds = array<i64: 8, 16>}, {pipeline_mode = #tpu.pipeline_mode<synchronous>, transform_indices = @transform_7, window_bounds = array<i64: 9, 16, 32>}, {pipeline_mode = #tpu.pipeline_mode<synchronous>, transform_indices = @transform_8, window_bounds = array<i64: 9, 32, 32>}, {pipeline_mode = #tpu.pipeline_mode<synchronous>, transform_indices = @transform_9, window_bounds = array<i64: 16, 32>}, {pipeline_mode = #tpu.pipeline_mode<synchronous>, transform_indices = @transform_10, window_bounds = array<i64: 32, 10>}, {transform_indices = @transform_11, window_bounds = array<i64: 1, 1, 10>}]} {
    %cst = arith.constant 0.000000e+00 : f32
    %0 = vector.broadcast %cst : f32 to vector<222x8xf32>
    %c0 = arith.constant 0 : index
    %c0_0 = arith.constant 0 : index
    %c0_1 = arith.constant 0 : index
    %1 = vector.load %arg1[%c0, %c0_0, %c0_1] : memref<1x256x3xf32, #tpu.memory_space<vmem>>, vector<1x222x3xf32>
    %2 = vector.shape_cast %1 : vector<1x222x3xf32> to vector<222x3xf32>
    %c0_2 = arith.constant 0 : index
    %c0_3 = arith.constant 0 : index
    %c0_4 = arith.constant 0 : index
    %3 = vector.load %arg2[%c0_2, %c0_3, %c0_4] : memref<9x3x8xf32, #tpu.memory_space<vmem>>, vector<1x3x8xf32>
    %4 = vector.shape_cast %3 : vector<1x3x8xf32> to vector<3x8xf32>
    %cst_5 = arith.constant dense<0.000000e+00> : vector<222x8xf32>
    %5 = tpu.matmul %2, %4, %cst_5 {dimension_numbers = #tpu.dot_dimension_numbers<[1], [0], [0], [1], [0, 0, 1, 1], [], []>} : vector<222x3xf32>, vector<3x8xf32>, vector<222x8xf32> -> vector<222x8xf32>
    %6 = arith.addf %0, %5 : vector<222x8xf32>
    %c0_6 = arith.constant 0 : index
    %c1 = arith.constant 1 : index
    %c0_7 = arith.constant 0 : index
    %7 = vector.load %arg1[%c0_6, %c1, %c0_7] : memref<1x256x3xf32, #tpu.memory_space<vmem>>, vector<1x222x3xf32>
    %8 = vector.shape_cast %7 : vector<1x222x3xf32> to vector<222x3xf32>
    %c1_8 = arith.constant 1 : index
    %c0_9 = arith.constant 0 : index
    %c0_10 = arith.constant 0 : index
    %9 = vector.load %arg2[%c1_8, %c0_9, %c0_10] : memref<9x3x8xf32, #tpu.memory_space<vmem>>, vector<1x3x8xf32>
    %10 = vector.shape_cast %9 : vector<1x3x8xf32> to vector<3x8xf32>
    %cst_11 = arith.constant dense<0.000000e+00> : vector<222x8xf32>
    %11 = tpu.matmul %8, %10, %cst_11 {dimension_numbers = #tpu.dot_dimension_numbers<[1], [0], [0], [1], [0, 0, 1, 1], [], []>} : vector<222x3xf32>, vector<3x8xf32>, vector<222x8xf32> -> vector<222x8xf32>
    %12 = arith.addf %6, %11 : vector<222x8xf32>
    %c0_12 = arith.constant 0 : index
    %c2 = arith.constant 2 : index
    %c0_13 = arith.constant 0 : index
    %13 = vector.load %arg1[%c0_12, %c2, %c0_13] : memref<1x256x3xf32, #tpu.memory_space<vmem>>, vector<1x222x3xf32>
    %14 = vector.shape_cast %13 : vector<1x222x3xf32> to vector<222x3xf32>
    %c2_14 = arith.constant 2 : index
    %c0_15 = arith.constant 0 : index
    %c0_16 = arith.constant 0 : index
    %15 = vector.load %arg2[%c2_14, %c0_15, %c0_16] : memref<9x3x8xf32, #tpu.memory_space<vmem>>, vector<1x3x8xf32>
    %16 = vector.shape_cast %15 : vector<1x3x8xf32> to vector<3x8xf32>
    %cst_17 = arith.constant dense<0.000000e+00> : vector<222x8xf32>
    %17 = tpu.matmul %14, %16, %cst_17 {dimension_numbers = #tpu.dot_dimension_numbers<[1], [0], [0], [1], [0, 0, 1, 1], [], []>} : vector<222x3xf32>, vector<3x8xf32>, vector<222x8xf32> -> vector<222x8xf32>
    %18 = arith.addf %12, %17 : vector<222x8xf32>
    %c0_18 = arith.constant 0 : index
    %c16 = arith.constant 16 : index
    %c0_19 = arith.constant 0 : index
    %19 = vector.load %arg1[%c0_18, %c16, %c0_19] : memref<1x256x3xf32, #tpu.memory_space<vmem>>, vector<1x222x3xf32>
    %20 = vector.shape_cast %19 : vector<1x222x3xf32> to vector<222x3xf32>
    %c3 = arith.constant 3 : index
    %c0_20 = arith.constant 0 : index
    %c0_21 = arith.constant 0 : index
    %21 = vector.load %arg2[%c3, %c0_20, %c0_21] : memref<9x3x8xf32, #tpu.memory_space<vmem>>, vector<1x3x8xf32>
    %22 = vector.shape_cast %21 : vector<1x3x8xf32> to vector<3x8xf32>
    %cst_22 = arith.constant dense<0.000000e+00> : vector<222x8xf32>
    %23 = tpu.matmul %20, %22, %cst_22 {dimension_numbers = #tpu.dot_dimension_numbers<[1], [0], [0], [1], [0, 0, 1, 1], [], []>} : vector<222x3xf32>, vector<3x8xf32>, vector<222x8xf32> -> vector<222x8xf32>
    %24 = arith.addf %18, %23 : vector<222x8xf32>
    %c0_23 = arith.constant 0 : index
    %c17 = arith.constant 17 : index
    %c0_24 = arith.constant 0 : index
    %25 = vector.load %arg1[%c0_23, %c17, %c0_24] : memref<1x256x3xf32, #tpu.memory_space<vmem>>, vector<1x222x3xf32>
    %26 = vector.shape_cast %25 : vector<1x222x3xf32> to vector<222x3xf32>
    %c4 = arith.constant 4 : index
    %c0_25 = arith.constant 0 : index
    %c0_26 = arith.constant 0 : index
    %27 = vector.load %arg2[%c4, %c0_25, %c0_26] : memref<9x3x8xf32, #tpu.memory_space<vmem>>, vector<1x3x8xf32>
    %28 = vector.shape_cast %27 : vector<1x3x8xf32> to vector<3x8xf32>
    %cst_27 = arith.constant dense<0.000000e+00> : vector<222x8xf32>
    %29 = tpu.matmul %26, %28, %cst_27 {dimension_numbers = #tpu.dot_dimension_numbers<[1], [0], [0], [1], [0, 0, 1, 1], [], []>} : vector<222x3xf32>, vector<3x8xf32>, vector<222x8xf32> -> vector<222x8xf32>
    %30 = arith.addf %24, %29 : vector<222x8xf32>
    %c0_28 = arith.constant 0 : index
    %c18 = arith.constant 18 : index
    %c0_29 = arith.constant 0 : index
    %31 = vector.load %arg1[%c0_28, %c18, %c0_29] : memref<1x256x3xf32, #tpu.memory_space<vmem>>, vector<1x222x3xf32>
    %32 = vector.shape_cast %31 : vector<1x222x3xf32> to vector<222x3xf32>
    %c5 = arith.constant 5 : index
    %c0_30 = arith.constant 0 : index
    %c0_31 = arith.constant 0 : index
    %33 = vector.load %arg2[%c5, %c0_30, %c0_31] : memref<9x3x8xf32, #tpu.memory_space<vmem>>, vector<1x3x8xf32>
    %34 = vector.shape_cast %33 : vector<1x3x8xf32> to vector<3x8xf32>
    %cst_32 = arith.constant dense<0.000000e+00> : vector<222x8xf32>
    %35 = tpu.matmul %32, %34, %cst_32 {dimension_numbers = #tpu.dot_dimension_numbers<[1], [0], [0], [1], [0, 0, 1, 1], [], []>} : vector<222x3xf32>, vector<3x8xf32>, vector<222x8xf32> -> vector<222x8xf32>
    %36 = arith.addf %30, %35 : vector<222x8xf32>
    %c0_33 = arith.constant 0 : index
    %c32 = arith.constant 32 : index
    %c0_34 = arith.constant 0 : index
    %37 = vector.load %arg1[%c0_33, %c32, %c0_34] : memref<1x256x3xf32, #tpu.memory_space<vmem>>, vector<1x222x3xf32>
    %38 = vector.shape_cast %37 : vector<1x222x3xf32> to vector<222x3xf32>
    %c6 = arith.constant 6 : index
    %c0_35 = arith.constant 0 : index
    %c0_36 = arith.constant 0 : index
    %39 = vector.load %arg2[%c6, %c0_35, %c0_36] : memref<9x3x8xf32, #tpu.memory_space<vmem>>, vector<1x3x8xf32>
    %40 = vector.shape_cast %39 : vector<1x3x8xf32> to vector<3x8xf32>
    %cst_37 = arith.constant dense<0.000000e+00> : vector<222x8xf32>
    %41 = tpu.matmul %38, %40, %cst_37 {dimension_numbers = #tpu.dot_dimension_numbers<[1], [0], [0], [1], [0, 0, 1, 1], [], []>} : vector<222x3xf32>, vector<3x8xf32>, vector<222x8xf32> -> vector<222x8xf32>
    %42 = arith.addf %36, %41 : vector<222x8xf32>
    %c0_38 = arith.constant 0 : index
    %c33 = arith.constant 33 : index
    %c0_39 = arith.constant 0 : index
    %43 = vector.load %arg1[%c0_38, %c33, %c0_39] : memref<1x256x3xf32, #tpu.memory_space<vmem>>, vector<1x222x3xf32>
    %44 = vector.shape_cast %43 : vector<1x222x3xf32> to vector<222x3xf32>
    %c7 = arith.constant 7 : index
    %c0_40 = arith.constant 0 : index
    %c0_41 = arith.constant 0 : index
    %45 = vector.load %arg2[%c7, %c0_40, %c0_41] : memref<9x3x8xf32, #tpu.memory_space<vmem>>, vector<1x3x8xf32>
    %46 = vector.shape_cast %45 : vector<1x3x8xf32> to vector<3x8xf32>
    %cst_42 = arith.constant dense<0.000000e+00> : vector<222x8xf32>
    %47 = tpu.matmul %44, %46, %cst_42 {dimension_numbers = #tpu.dot_dimension_numbers<[1], [0], [0], [1], [0, 0, 1, 1], [], []>} : vector<222x3xf32>, vector<3x8xf32>, vector<222x8xf32> -> vector<222x8xf32>
    %48 = arith.addf %42, %47 : vector<222x8xf32>
    %c0_43 = arith.constant 0 : index
    %c34 = arith.constant 34 : index
    %c0_44 = arith.constant 0 : index
    %49 = vector.load %arg1[%c0_43, %c34, %c0_44] : memref<1x256x3xf32, #tpu.memory_space<vmem>>, vector<1x222x3xf32>
    %50 = vector.shape_cast %49 : vector<1x222x3xf32> to vector<222x3xf32>
    %c8 = arith.constant 8 : index
    %c0_45 = arith.constant 0 : index
    %c0_46 = arith.constant 0 : index
    %51 = vector.load %arg2[%c8, %c0_45, %c0_46] : memref<9x3x8xf32, #tpu.memory_space<vmem>>, vector<1x3x8xf32>
    %52 = vector.shape_cast %51 : vector<1x3x8xf32> to vector<3x8xf32>
    %cst_47 = arith.constant dense<0.000000e+00> : vector<222x8xf32>
    %53 = tpu.matmul %50, %52, %cst_47 {dimension_numbers = #tpu.dot_dimension_numbers<[1], [0], [0], [1], [0, 0, 1, 1], [], []>} : vector<222x3xf32>, vector<3x8xf32>, vector<222x8xf32> -> vector<222x8xf32>
    %54 = arith.addf %48, %53 : vector<222x8xf32>
    %c0_48 = arith.constant 0 : index
    %c0_49 = arith.constant 0 : index
    %55 = vector.load %arg22[%c0_48, %c0_49] : memref<222x32xf32, #tpu.memory_space<vmem>>, vector<222x8xf32>
    tpu.vector_store %arg22[%c0_48, %c0_49], %54 {strides = array<i32>} : memref<222x32xf32, #tpu.memory_space<vmem>>, vector<222x8xf32>,
    %cst_50 = arith.constant 0.000000e+00 : f32
    %56 = vector.broadcast %cst_50 : f32 to vector<264x8xf32>
    %c0_51 = arith.constant 0 : index
    %c0_52 = arith.constant 0 : index
    %57 = vector.load %arg13[%c0_51, %c0_52] : memref<264x8xf32, #tpu.memory_space<vmem>>, vector<264x8xf32>
    tpu.vector_store %arg13[%c0_51, %c0_52], %56 {strides = array<i32>} : memref<264x8xf32, #tpu.memory_space<vmem>>, vector<264x8xf32>,
    %c0_53 = arith.constant 0 : index
    %c0_54 = arith.constant 0 : index
    %58 = vector.load %arg22[%c0_53, %c0_54] : memref<222x32xf32, #tpu.memory_space<vmem>>, vector<14x8xf32>
    %c17_55 = arith.constant 17 : index
    %c0_56 = arith.constant 0 : index
    %59 = vector.load %arg13[%c17_55, %c0_56] : memref<264x8xf32, #tpu.memory_space<vmem>>, vector<14x8xf32>
    tpu.vector_store %arg13[%c17_55, %c0_56], %58 {strides = array<i32>} : memref<264x8xf32, #tpu.memory_space<vmem>>, vector<14x8xf32>,
    %c16_57 = arith.constant 16 : index
    %c0_58 = arith.constant 0 : index
    %60 = vector.load %arg22[%c16_57, %c0_58] : memref<222x32xf32, #tpu.memory_space<vmem>>, vector<14x8xf32>
    %c33_59 = arith.constant 33 : index
    %c0_60 = arith.constant 0 : index
    %61 = vector.load %arg13[%c33_59, %c0_60] : memref<264x8xf32, #tpu.memory_space<vmem>>, vector<14x8xf32>
    tpu.vector_store %arg13[%c33_59, %c0_60], %60 {strides = array<i32>} : memref<264x8xf32, #tpu.memory_space<vmem>>, vector<14x8xf32>,
    %c32_61 = arith.constant 32 : index
    %c0_62 = arith.constant 0 : index
    %62 = vector.load %arg22[%c32_61, %c0_62] : memref<222x32xf32, #tpu.memory_space<vmem>>, vector<14x8xf32>
    %c49 = arith.constant 49 : index
    %c0_63 = arith.constant 0 : index
    %63 = vector.load %arg13[%c49, %c0_63] : memref<264x8xf32, #tpu.memory_space<vmem>>, vector<14x8xf32>
    tpu.vector_store %arg13[%c49, %c0_63], %62 {strides = array<i32>} : memref<264x8xf32, #tpu.memory_space<vmem>>, vector<14x8xf32>,
    %c48 = arith.constant 48 : index
    %c0_64 = arith.constant 0 : index
    %64 = vector.load %arg22[%c48, %c0_64] : memref<222x32xf32, #tpu.memory_space<vmem>>, vector<14x8xf32>
    %c65 = arith.constant 65 : index
    %c0_65 = arith.constant 0 : index
    %65 = vector.load %arg13[%c65, %c0_65] : memref<264x8xf32, #tpu.memory_space<vmem>>, vector<14x8xf32>
    tpu.vector_store %arg13[%c65, %c0_65], %64 {strides = array<i32>} : memref<264x8xf32, #tpu.memory_space<vmem>>, vector<14x8xf32>,
    %c64 = arith.constant 64 : index
    %c0_66 = arith.constant 0 : index
    %66 = vector.load %arg22[%c64, %c0_66] : memref<222x32xf32, #tpu.memory_space<vmem>>, vector<14x8xf32>
    %c81 = arith.constant 81 : index
    %c0_67 = arith.constant 0 : index
    %67 = vector.load %arg13[%c81, %c0_67] : memref<264x8xf32, #tpu.memory_space<vmem>>, vector<14x8xf32>
    tpu.vector_store %arg13[%c81, %c0_67], %66 {strides = array<i32>} : memref<264x8xf32, #tpu.memory_space<vmem>>, vector<14x8xf32>,
    %c80 = arith.constant 80 : index
    %c0_68 = arith.constant 0 : index
    %68 = vector.load %arg22[%c80, %c0_68] : memref<222x32xf32, #tpu.memory_space<vmem>>, vector<14x8xf32>
    %c97 = arith.constant 97 : index
    %c0_69 = arith.constant 0 : index
    %69 = vector.load %arg13[%c97, %c0_69] : memref<264x8xf32, #tpu.memory_space<vmem>>, vector<14x8xf32>
    tpu.vector_store %arg13[%c97, %c0_69], %68 {strides = array<i32>} : memref<264x8xf32, #tpu.memory_space<vmem>>, vector<14x8xf32>,
    %c96 = arith.constant 96 : index
    %c0_70 = arith.constant 0 : index
    %70 = vector.load %arg22[%c96, %c0_70] : memref<222x32xf32, #tpu.memory_space<vmem>>, vector<14x8xf32>
    %c113 = arith.constant 113 : index
    %c0_71 = arith.constant 0 : index
    %71 = vector.load %arg13[%c113, %c0_71] : memref<264x8xf32, #tpu.memory_space<vmem>>, vector<14x8xf32>
    tpu.vector_store %arg13[%c113, %c0_71], %70 {strides = array<i32>} : memref<264x8xf32, #tpu.memory_space<vmem>>, vector<14x8xf32>,
    %c112 = arith.constant 112 : index
    %c0_72 = arith.constant 0 : index
    %72 = vector.load %arg22[%c112, %c0_72] : memref<222x32xf32, #tpu.memory_space<vmem>>, vector<14x8xf32>
    %c129 = arith.constant 129 : index
    %c0_73 = arith.constant 0 : index
    %73 = vector.load %arg13[%c129, %c0_73] : memref<264x8xf32, #tpu.memory_space<vmem>>, vector<14x8xf32>
    tpu.vector_store %arg13[%c129, %c0_73], %72 {strides = array<i32>} : memref<264x8xf32, #tpu.memory_space<vmem>>, vector<14x8xf32>,
    %c128 = arith.constant 128 : index
    %c0_74 = arith.constant 0 : index
    %74 = vector.load %arg22[%c128, %c0_74] : memref<222x32xf32, #tpu.memory_space<vmem>>, vector<14x8xf32>
    %c145 = arith.constant 145 : index
    %c0_75 = arith.constant 0 : index
    %75 = vector.load %arg13[%c145, %c0_75] : memref<264x8xf32, #tpu.memory_space<vmem>>, vector<14x8xf32>
    tpu.vector_store %arg13[%c145, %c0_75], %74 {strides = array<i32>} : memref<264x8xf32, #tpu.memory_space<vmem>>, vector<14x8xf32>,
    %c144 = arith.constant 144 : index
    %c0_76 = arith.constant 0 : index
    %76 = vector.load %arg22[%c144, %c0_76] : memref<222x32xf32, #tpu.memory_space<vmem>>, vector<14x8xf32>
    %c161 = arith.constant 161 : index
    %c0_77 = arith.constant 0 : index
    %77 = vector.load %arg13[%c161, %c0_77] : memref<264x8xf32, #tpu.memory_space<vmem>>, vector<14x8xf32>
    tpu.vector_store %arg13[%c161, %c0_77], %76 {strides = array<i32>} : memref<264x8xf32, #tpu.memory_space<vmem>>, vector<14x8xf32>,
    %c160 = arith.constant 160 : index
    %c0_78 = arith.constant 0 : index
    %78 = vector.load %arg22[%c160, %c0_78] : memref<222x32xf32, #tpu.memory_space<vmem>>, vector<14x8xf32>
    %c177 = arith.constant 177 : index
    %c0_79 = arith.constant 0 : index
    %79 = vector.load %arg13[%c177, %c0_79] : memref<264x8xf32, #tpu.memory_space<vmem>>, vector<14x8xf32>
    tpu.vector_store %arg13[%c177, %c0_79], %78 {strides = array<i32>} : memref<264x8xf32, #tpu.memory_space<vmem>>, vector<14x8xf32>,
    %c176 = arith.constant 176 : index
    %c0_80 = arith.constant 0 : index
    %80 = vector.load %arg22[%c176, %c0_80] : memref<222x32xf32, #tpu.memory_space<vmem>>, vector<14x8xf32>
    %c193 = arith.constant 193 : index
    %c0_81 = arith.constant 0 : index
    %81 = vector.load %arg13[%c193, %c0_81] : memref<264x8xf32, #tpu.memory_space<vmem>>, vector<14x8xf32>
    tpu.vector_store %arg13[%c193, %c0_81], %80 {strides = array<i32>} : memref<264x8xf32, #tpu.memory_space<vmem>>, vector<14x8xf32>,
    %c192 = arith.constant 192 : index
    %c0_82 = arith.constant 0 : index
    %82 = vector.load %arg22[%c192, %c0_82] : memref<222x32xf32, #tpu.memory_space<vmem>>, vector<14x8xf32>
    %c209 = arith.constant 209 : index
    %c0_83 = arith.constant 0 : index
    %83 = vector.load %arg13[%c209, %c0_83] : memref<264x8xf32, #tpu.memory_space<vmem>>, vector<14x8xf32>
    tpu.vector_store %arg13[%c209, %c0_83], %82 {strides = array<i32>} : memref<264x8xf32, #tpu.memory_space<vmem>>, vector<14x8xf32>,
    %c208 = arith.constant 208 : index
    %c0_84 = arith.constant 0 : index
    %84 = vector.load %arg22[%c208, %c0_84] : memref<222x32xf32, #tpu.memory_space<vmem>>, vector<14x8xf32>
    %c225 = arith.constant 225 : index
    %c0_85 = arith.constant 0 : index
    %85 = vector.load %arg13[%c225, %c0_85] : memref<264x8xf32, #tpu.memory_space<vmem>>, vector<14x8xf32>
    tpu.vector_store %arg13[%c225, %c0_85], %84 {strides = array<i32>} : memref<264x8xf32, #tpu.memory_space<vmem>>, vector<14x8xf32>,
    %c0_86 = arith.constant 0 : index
    %c0_87 = arith.constant 0 : index
    %86 = vector.load %arg13[%c0_86, %c0_87] : memref<264x8xf32, #tpu.memory_space<vmem>>, vector<264x8xf32>
    %cst_88 = arith.constant 0.000000e+00 : f32
    %87 = vector.broadcast %cst_88 : f32 to vector<264x8xf32>
    %88 = arith.maximumf %86, %87 : vector<264x8xf32>
    %c0_89 = arith.constant 0 : index
    %c0_90 = arith.constant 0 : index
    %89 = vector.load %arg14[%c0_89, %c0_90] : memref<264x8xf32, #tpu.memory_space<vmem>>, vector<264x8xf32>
    tpu.vector_store %arg14[%c0_89, %c0_90], %88 {strides = array<i32>} : memref<264x8xf32, #tpu.memory_space<vmem>>, vector<264x8xf32>,
    %cst_91 = arith.constant 0.000000e+00 : f32
    %90 = vector.broadcast %cst_91 : f32 to vector<222x8xf32>
    %c0_92 = arith.constant 0 : index
    %c0_93 = arith.constant 0 : index
    %91 = vector.load %arg14[%c0_92, %c0_93] : memref<264x8xf32, #tpu.memory_space<vmem>>, vector<222x8xf32>
    %c0_94 = arith.constant 0 : index
    %c0_95 = arith.constant 0 : index
    %c0_96 = arith.constant 0 : index
    %92 = vector.load %arg3[%c0_94, %c0_95, %c0_96] : memref<9x8x8xf32, #tpu.memory_space<vmem>>, vector<1x8x8xf32>
    %93 = vector.shape_cast %92 : vector<1x8x8xf32> to vector<8x8xf32>
    %cst_97 = arith.constant dense<0.000000e+00> : vector<222x8xf32>
    %94 = tpu.matmul %91, %93, %cst_97 {dimension_numbers = #tpu.dot_dimension_numbers<[1], [0], [0], [1], [0, 0, 1, 1], [], []>} : vector<222x8xf32>, vector<8x8xf32>, vector<222x8xf32> -> vector<222x8xf32>
    %95 = arith.addf %90, %94 : vector<222x8xf32>
    %c1_98 = arith.constant 1 : index
    %c0_99 = arith.constant 0 : index
    %96 = vector.load %arg14[%c1_98, %c0_99] : memref<264x8xf32, #tpu.memory_space<vmem>>, vector<222x8xf32>
    %c1_100 = arith.constant 1 : index
    %c0_101 = arith.constant 0 : index
    %c0_102 = arith.constant 0 : index
    %97 = vector.load %arg3[%c1_100, %c0_101, %c0_102] : memref<9x8x8xf32, #tpu.memory_space<vmem>>, vector<1x8x8xf32>
    %98 = vector.shape_cast %97 : vector<1x8x8xf32> to vector<8x8xf32>
    %cst_103 = arith.constant dense<0.000000e+00> : vector<222x8xf32>
    %99 = tpu.matmul %96, %98, %cst_103 {dimension_numbers = #tpu.dot_dimension_numbers<[1], [0], [0], [1], [0, 0, 1, 1], [], []>} : vector<222x8xf32>, vector<8x8xf32>, vector<222x8xf32> -> vector<222x8xf32>
    %100 = arith.addf %95, %99 : vector<222x8xf32>
    %c2_104 = arith.constant 2 : index
    %c0_105 = arith.constant 0 : index
    %101 = vector.load %arg14[%c2_104, %c0_105] : memref<264x8xf32, #tpu.memory_space<vmem>>, vector<222x8xf32>
    %c2_106 = arith.constant 2 : index
    %c0_107 = arith.constant 0 : index
    %c0_108 = arith.constant 0 : index
    %102 = vector.load %arg3[%c2_106, %c0_107, %c0_108] : memref<9x8x8xf32, #tpu.memory_space<vmem>>, vector<1x8x8xf32>
    %103 = vector.shape_cast %102 : vector<1x8x8xf32> to vector<8x8xf32>
    %cst_109 = arith.constant dense<0.000000e+00> : vector<222x8xf32>
    %104 = tpu.matmul %101, %103, %cst_109 {dimension_numbers = #tpu.dot_dimension_numbers<[1], [0], [0], [1], [0, 0, 1, 1], [], []>} : vector<222x8xf32>, vector<8x8xf32>, vector<222x8xf32> -> vector<222x8xf32>
    %105 = arith.addf %100, %104 : vector<222x8xf32>
    %c16_110 = arith.constant 16 : index
    %c0_111 = arith.constant 0 : index
    %106 = vector.load %arg14[%c16_110, %c0_111] : memref<264x8xf32, #tpu.memory_space<vmem>>, vector<222x8xf32>
    %c3_112 = arith.constant 3 : index
    %c0_113 = arith.constant 0 : index
    %c0_114 = arith.constant 0 : index
    %107 = vector.load %arg3[%c3_112, %c0_113, %c0_114] : memref<9x8x8xf32, #tpu.memory_space<vmem>>, vector<1x8x8xf32>
    %108 = vector.shape_cast %107 : vector<1x8x8xf32> to vector<8x8xf32>
    %cst_115 = arith.constant dense<0.000000e+00> : vector<222x8xf32>
    %109 = tpu.matmul %106, %108, %cst_115 {dimension_numbers = #tpu.dot_dimension_numbers<[1], [0], [0], [1], [0, 0, 1, 1], [], []>} : vector<222x8xf32>, vector<8x8xf32>, vector<222x8xf32> -> vector<222x8xf32>
    %110 = arith.addf %105, %109 : vector<222x8xf32>
    %c17_116 = arith.constant 17 : index
    %c0_117 = arith.constant 0 : index
    %111 = vector.load %arg14[%c17_116, %c0_117] : memref<264x8xf32, #tpu.memory_space<vmem>>, vector<222x8xf32>
    %c4_118 = arith.constant 4 : index
    %c0_119 = arith.constant 0 : index
    %c0_120 = arith.constant 0 : index
    %112 = vector.load %arg3[%c4_118, %c0_119, %c0_120] : memref<9x8x8xf32, #tpu.memory_space<vmem>>, vector<1x8x8xf32>
    %113 = vector.shape_cast %112 : vector<1x8x8xf32> to vector<8x8xf32>
    %cst_121 = arith.constant dense<0.000000e+00> : vector<222x8xf32>
    %114 = tpu.matmul %111, %113, %cst_121 {dimension_numbers = #tpu.dot_dimension_numbers<[1], [0], [0], [1], [0, 0, 1, 1], [], []>} : vector<222x8xf32>, vector<8x8xf32>, vector<222x8xf32> -> vector<222x8xf32>
    %115 = arith.addf %110, %114 : vector<222x8xf32>
    %c18_122 = arith.constant 18 : index
    %c0_123 = arith.constant 0 : index
    %116 = vector.load %arg14[%c18_122, %c0_123] : memref<264x8xf32, #tpu.memory_space<vmem>>, vector<222x8xf32>
    %c5_124 = arith.constant 5 : index
    %c0_125 = arith.constant 0 : index
    %c0_126 = arith.constant 0 : index
    %117 = vector.load %arg3[%c5_124, %c0_125, %c0_126] : memref<9x8x8xf32, #tpu.memory_space<vmem>>, vector<1x8x8xf32>
    %118 = vector.shape_cast %117 : vector<1x8x8xf32> to vector<8x8xf32>
    %cst_127 = arith.constant dense<0.000000e+00> : vector<222x8xf32>
    %119 = tpu.matmul %116, %118, %cst_127 {dimension_numbers = #tpu.dot_dimension_numbers<[1], [0], [0], [1], [0, 0, 1, 1], [], []>} : vector<222x8xf32>, vector<8x8xf32>, vector<222x8xf32> -> vector<222x8xf32>
    %120 = arith.addf %115, %119 : vector<222x8xf32>
    %c32_128 = arith.constant 32 : index
    %c0_129 = arith.constant 0 : index
    %121 = vector.load %arg14[%c32_128, %c0_129] : memref<264x8xf32, #tpu.memory_space<vmem>>, vector<222x8xf32>
    %c6_130 = arith.constant 6 : index
    %c0_131 = arith.constant 0 : index
    %c0_132 = arith.constant 0 : index
    %122 = vector.load %arg3[%c6_130, %c0_131, %c0_132] : memref<9x8x8xf32, #tpu.memory_space<vmem>>, vector<1x8x8xf32>
    %123 = vector.shape_cast %122 : vector<1x8x8xf32> to vector<8x8xf32>
    %cst_133 = arith.constant dense<0.000000e+00> : vector<222x8xf32>
    %124 = tpu.matmul %121, %123, %cst_133 {dimension_numbers = #tpu.dot_dimension_numbers<[1], [0], [0], [1], [0, 0, 1, 1], [], []>} : vector<222x8xf32>, vector<8x8xf32>, vector<222x8xf32> -> vector<222x8xf32>
    %125 = arith.addf %120, %124 : vector<222x8xf32>
    %c33_134 = arith.constant 33 : index
    %c0_135 = arith.constant 0 : index
    %126 = vector.load %arg14[%c33_134, %c0_135] : memref<264x8xf32, #tpu.memory_space<vmem>>, vector<222x8xf32>
    %c7_136 = arith.constant 7 : index
    %c0_137 = arith.constant 0 : index
    %c0_138 = arith.constant 0 : index
    %127 = vector.load %arg3[%c7_136, %c0_137, %c0_138] : memref<9x8x8xf32, #tpu.memory_space<vmem>>, vector<1x8x8xf32>
    %128 = vector.shape_cast %127 : vector<1x8x8xf32> to vector<8x8xf32>
    %cst_139 = arith.constant dense<0.000000e+00> : vector<222x8xf32>
    %129 = tpu.matmul %126, %128, %cst_139 {dimension_numbers = #tpu.dot_dimension_numbers<[1], [0], [0], [1], [0, 0, 1, 1], [], []>} : vector<222x8xf32>, vector<8x8xf32>, vector<222x8xf32> -> vector<222x8xf32>
    %130 = arith.addf %125, %129 : vector<222x8xf32>
    %c34_140 = arith.constant 34 : index
    %c0_141 = arith.constant 0 : index
    %131 = vector.load %arg14[%c34_140, %c0_141] : memref<264x8xf32, #tpu.memory_space<vmem>>, vector<222x8xf32>
    %c8_142 = arith.constant 8 : index
    %c0_143 = arith.constant 0 : index
    %c0_144 = arith.constant 0 : index
    %132 = vector.load %arg3[%c8_142, %c0_143, %c0_144] : memref<9x8x8xf32, #tpu.memory_space<vmem>>, vector<1x8x8xf32>
    %133 = vector.shape_cast %132 : vector<1x8x8xf32> to vector<8x8xf32>
    %cst_145 = arith.constant dense<0.000000e+00> : vector<222x8xf32>
    %134 = tpu.matmul %131, %133, %cst_145 {dimension_numbers = #tpu.dot_dimension_numbers<[1], [0], [0], [1], [0, 0, 1, 1], [], []>} : vector<222x8xf32>, vector<8x8xf32>, vector<222x8xf32> -> vector<222x8xf32>
    %135 = arith.addf %130, %134 : vector<222x8xf32>
    %cst_146 = arith.constant 0.000000e+00 : f32
    %136 = vector.broadcast %cst_146 : f32 to vector<222x8xf32>
    %137 = arith.maximumf %135, %136 : vector<222x8xf32>
    %c0_147 = arith.constant 0 : index
    %c0_148 = arith.constant 0 : index
    %138 = vector.load %arg22[%c0_147, %c0_148] : memref<222x32xf32, #tpu.memory_space<vmem>>, vector<222x8xf32>
    tpu.vector_store %arg22[%c0_147, %c0_148], %137 {strides = array<i32>} : memref<222x32xf32, #tpu.memory_space<vmem>>, vector<222x8xf32>,
    %cst_149 = arith.constant 0.000000e+00 : f32
    %139 = vector.broadcast %cst_149 : f32 to vector<264x8xf32>
    %c0_150 = arith.constant 0 : index
    %c0_151 = arith.constant 0 : index
    %140 = vector.load %arg15[%c0_150, %c0_151] : memref<264x8xf32, #tpu.memory_space<vmem>>, vector<264x8xf32>
    tpu.vector_store %arg15[%c0_150, %c0_151], %139 {strides = array<i32>} : memref<264x8xf32, #tpu.memory_space<vmem>>, vector<264x8xf32>,
    %c0_152 = arith.constant 0 : index
    %c0_153 = arith.constant 0 : index
    %141 = vector.load %arg22[%c0_152, %c0_153] : memref<222x32xf32, #tpu.memory_space<vmem>>, vector<14x8xf32>
    %c17_154 = arith.constant 17 : index
    %c0_155 = arith.constant 0 : index
    %142 = vector.load %arg15[%c17_154, %c0_155] : memref<264x8xf32, #tpu.memory_space<vmem>>, vector<14x8xf32>
    tpu.vector_store %arg15[%c17_154, %c0_155], %141 {strides = array<i32>} : memref<264x8xf32, #tpu.memory_space<vmem>>, vector<14x8xf32>,
    %c16_156 = arith.constant 16 : index
    %c0_157 = arith.constant 0 : index
    %143 = vector.load %arg22[%c16_156, %c0_157] : memref<222x32xf32, #tpu.memory_space<vmem>>, vector<14x8xf32>
    %c33_158 = arith.constant 33 : index
    %c0_159 = arith.constant 0 : index
    %144 = vector.load %arg15[%c33_158, %c0_159] : memref<264x8xf32, #tpu.memory_space<vmem>>, vector<14x8xf32>
    tpu.vector_store %arg15[%c33_158, %c0_159], %143 {strides = array<i32>} : memref<264x8xf32, #tpu.memory_space<vmem>>, vector<14x8xf32>,
    %c32_160 = arith.constant 32 : index
    %c0_161 = arith.constant 0 : index
    %145 = vector.load %arg22[%c32_160, %c0_161] : memref<222x32xf32, #tpu.memory_space<vmem>>, vector<14x8xf32>
    %c49_162 = arith.constant 49 : index
    %c0_163 = arith.constant 0 : index
    %146 = vector.load %arg15[%c49_162, %c0_163] : memref<264x8xf32, #tpu.memory_space<vmem>>, vector<14x8xf32>
    tpu.vector_store %arg15[%c49_162, %c0_163], %145 {strides = array<i32>} : memref<264x8xf32, #tpu.memory_space<vmem>>, vector<14x8xf32>,
    %c48_164 = arith.constant 48 : index
    %c0_165 = arith.constant 0 : index
    %147 = vector.load %arg22[%c48_164, %c0_165] : memref<222x32xf32, #tpu.memory_space<vmem>>, vector<14x8xf32>
    %c65_166 = arith.constant 65 : index
    %c0_167 = arith.constant 0 : index
    %148 = vector.load %arg15[%c65_166, %c0_167] : memref<264x8xf32, #tpu.memory_space<vmem>>, vector<14x8xf32>
    tpu.vector_store %arg15[%c65_166, %c0_167], %147 {strides = array<i32>} : memref<264x8xf32, #tpu.memory_space<vmem>>, vector<14x8xf32>,
    %c64_168 = arith.constant 64 : index
    %c0_169 = arith.constant 0 : index
    %149 = vector.load %arg22[%c64_168, %c0_169] : memref<222x32xf32, #tpu.memory_space<vmem>>, vector<14x8xf32>
    %c81_170 = arith.constant 81 : index
    %c0_171 = arith.constant 0 : index
    %150 = vector.load %arg15[%c81_170, %c0_171] : memref<264x8xf32, #tpu.memory_space<vmem>>, vector<14x8xf32>
    tpu.vector_store %arg15[%c81_170, %c0_171], %149 {strides = array<i32>} : memref<264x8xf32, #tpu.memory_space<vmem>>, vector<14x8xf32>,
    %c80_172 = arith.constant 80 : index
    %c0_173 = arith.constant 0 : index
    %151 = vector.load %arg22[%c80_172, %c0_173] : memref<222x32xf32, #tpu.memory_space<vmem>>, vector<14x8xf32>
    %c97_174 = arith.constant 97 : index
    %c0_175 = arith.constant 0 : index
    %152 = vector.load %arg15[%c97_174, %c0_175] : memref<264x8xf32, #tpu.memory_space<vmem>>, vector<14x8xf32>
    tpu.vector_store %arg15[%c97_174, %c0_175], %151 {strides = array<i32>} : memref<264x8xf32, #tpu.memory_space<vmem>>, vector<14x8xf32>,
    %c96_176 = arith.constant 96 : index
    %c0_177 = arith.constant 0 : index
    %153 = vector.load %arg22[%c96_176, %c0_177] : memref<222x32xf32, #tpu.memory_space<vmem>>, vector<14x8xf32>
    %c113_178 = arith.constant 113 : index
    %c0_179 = arith.constant 0 : index
    %154 = vector.load %arg15[%c113_178, %c0_179] : memref<264x8xf32, #tpu.memory_space<vmem>>, vector<14x8xf32>
    tpu.vector_store %arg15[%c113_178, %c0_179], %153 {strides = array<i32>} : memref<264x8xf32, #tpu.memory_space<vmem>>, vector<14x8xf32>,
    %c112_180 = arith.constant 112 : index
    %c0_181 = arith.constant 0 : index
    %155 = vector.load %arg22[%c112_180, %c0_181] : memref<222x32xf32, #tpu.memory_space<vmem>>, vector<14x8xf32>
    %c129_182 = arith.constant 129 : index
    %c0_183 = arith.constant 0 : index
    %156 = vector.load %arg15[%c129_182, %c0_183] : memref<264x8xf32, #tpu.memory_space<vmem>>, vector<14x8xf32>
    tpu.vector_store %arg15[%c129_182, %c0_183], %155 {strides = array<i32>} : memref<264x8xf32, #tpu.memory_space<vmem>>, vector<14x8xf32>,
    %c128_184 = arith.constant 128 : index
    %c0_185 = arith.constant 0 : index
    %157 = vector.load %arg22[%c128_184, %c0_185] : memref<222x32xf32, #tpu.memory_space<vmem>>, vector<14x8xf32>
    %c145_186 = arith.constant 145 : index
    %c0_187 = arith.constant 0 : index
    %158 = vector.load %arg15[%c145_186, %c0_187] : memref<264x8xf32, #tpu.memory_space<vmem>>, vector<14x8xf32>
    tpu.vector_store %arg15[%c145_186, %c0_187], %157 {strides = array<i32>} : memref<264x8xf32, #tpu.memory_space<vmem>>, vector<14x8xf32>,
    %c144_188 = arith.constant 144 : index
    %c0_189 = arith.constant 0 : index
    %159 = vector.load %arg22[%c144_188, %c0_189] : memref<222x32xf32, #tpu.memory_space<vmem>>, vector<14x8xf32>
    %c161_190 = arith.constant 161 : index
    %c0_191 = arith.constant 0 : index
    %160 = vector.load %arg15[%c161_190, %c0_191] : memref<264x8xf32, #tpu.memory_space<vmem>>, vector<14x8xf32>
    tpu.vector_store %arg15[%c161_190, %c0_191], %159 {strides = array<i32>} : memref<264x8xf32, #tpu.memory_space<vmem>>, vector<14x8xf32>,
    %c160_192 = arith.constant 160 : index
    %c0_193 = arith.constant 0 : index
    %161 = vector.load %arg22[%c160_192, %c0_193] : memref<222x32xf32, #tpu.memory_space<vmem>>, vector<14x8xf32>
    %c177_194 = arith.constant 177 : index
    %c0_195 = arith.constant 0 : index
    %162 = vector.load %arg15[%c177_194, %c0_195] : memref<264x8xf32, #tpu.memory_space<vmem>>, vector<14x8xf32>
    tpu.vector_store %arg15[%c177_194, %c0_195], %161 {strides = array<i32>} : memref<264x8xf32, #tpu.memory_space<vmem>>, vector<14x8xf32>,
    %c176_196 = arith.constant 176 : index
    %c0_197 = arith.constant 0 : index
    %163 = vector.load %arg22[%c176_196, %c0_197] : memref<222x32xf32, #tpu.memory_space<vmem>>, vector<14x8xf32>
    %c193_198 = arith.constant 193 : index
    %c0_199 = arith.constant 0 : index
    %164 = vector.load %arg15[%c193_198, %c0_199] : memref<264x8xf32, #tpu.memory_space<vmem>>, vector<14x8xf32>
    tpu.vector_store %arg15[%c193_198, %c0_199], %163 {strides = array<i32>} : memref<264x8xf32, #tpu.memory_space<vmem>>, vector<14x8xf32>,
    %c192_200 = arith.constant 192 : index
    %c0_201 = arith.constant 0 : index
    %165 = vector.load %arg22[%c192_200, %c0_201] : memref<222x32xf32, #tpu.memory_space<vmem>>, vector<14x8xf32>
    %c209_202 = arith.constant 209 : index
    %c0_203 = arith.constant 0 : index
    %166 = vector.load %arg15[%c209_202, %c0_203] : memref<264x8xf32, #tpu.memory_space<vmem>>, vector<14x8xf32>
    tpu.vector_store %arg15[%c209_202, %c0_203], %165 {strides = array<i32>} : memref<264x8xf32, #tpu.memory_space<vmem>>, vector<14x8xf32>,
    %c208_204 = arith.constant 208 : index
    %c0_205 = arith.constant 0 : index
    %167 = vector.load %arg22[%c208_204, %c0_205] : memref<222x32xf32, #tpu.memory_space<vmem>>, vector<14x8xf32>
    %c225_206 = arith.constant 225 : index
    %c0_207 = arith.constant 0 : index
    %168 = vector.load %arg15[%c225_206, %c0_207] : memref<264x8xf32, #tpu.memory_space<vmem>>, vector<14x8xf32>
    tpu.vector_store %arg15[%c225_206, %c0_207], %167 {strides = array<i32>} : memref<264x8xf32, #tpu.memory_space<vmem>>, vector<14x8xf32>,
    %cst_208 = arith.constant 0.000000e+00 : f32
    %169 = vector.broadcast %cst_208 : f32 to vector<222x8xf32>
    %c0_209 = arith.constant 0 : index
    %c0_210 = arith.constant 0 : index
    %170 = vector.load %arg15[%c0_209, %c0_210] : memref<264x8xf32, #tpu.memory_space<vmem>>, vector<222x8xf32>
    %c0_211 = arith.constant 0 : index
    %c0_212 = arith.constant 0 : index
    %c0_213 = arith.constant 0 : index
    %171 = vector.load %arg4[%c0_211, %c0_212, %c0_213] : memref<9x8x8xf32, #tpu.memory_space<vmem>>, vector<1x8x8xf32>
    %172 = vector.shape_cast %171 : vector<1x8x8xf32> to vector<8x8xf32>
    %cst_214 = arith.constant dense<0.000000e+00> : vector<222x8xf32>
    %173 = tpu.matmul %170, %172, %cst_214 {dimension_numbers = #tpu.dot_dimension_numbers<[1], [0], [0], [1], [0, 0, 1, 1], [], []>} : vector<222x8xf32>, vector<8x8xf32>, vector<222x8xf32> -> vector<222x8xf32>
    %174 = arith.addf %169, %173 : vector<222x8xf32>
    %c1_215 = arith.constant 1 : index
    %c0_216 = arith.constant 0 : index
    %175 = vector.load %arg15[%c1_215, %c0_216] : memref<264x8xf32, #tpu.memory_space<vmem>>, vector<222x8xf32>
    %c1_217 = arith.constant 1 : index
    %c0_218 = arith.constant 0 : index
    %c0_219 = arith.constant 0 : index
    %176 = vector.load %arg4[%c1_217, %c0_218, %c0_219] : memref<9x8x8xf32, #tpu.memory_space<vmem>>, vector<1x8x8xf32>
    %177 = vector.shape_cast %176 : vector<1x8x8xf32> to vector<8x8xf32>
    %cst_220 = arith.constant dense<0.000000e+00> : vector<222x8xf32>
    %178 = tpu.matmul %175, %177, %cst_220 {dimension_numbers = #tpu.dot_dimension_numbers<[1], [0], [0], [1], [0, 0, 1, 1], [], []>} : vector<222x8xf32>, vector<8x8xf32>, vector<222x8xf32> -> vector<222x8xf32>
    %179 = arith.addf %174, %178 : vector<222x8xf32>
    %c2_221 = arith.constant 2 : index
    %c0_222 = arith.constant 0 : index
    %180 = vector.load %arg15[%c2_221, %c0_222] : memref<264x8xf32, #tpu.memory_space<vmem>>, vector<222x8xf32>
    %c2_223 = arith.constant 2 : index
    %c0_224 = arith.constant 0 : index
    %c0_225 = arith.constant 0 : index
    %181 = vector.load %arg4[%c2_223, %c0_224, %c0_225] : memref<9x8x8xf32, #tpu.memory_space<vmem>>, vector<1x8x8xf32>
    %182 = vector.shape_cast %181 : vector<1x8x8xf32> to vector<8x8xf32>
    %cst_226 = arith.constant dense<0.000000e+00> : vector<222x8xf32>
    %183 = tpu.matmul %180, %182, %cst_226 {dimension_numbers = #tpu.dot_dimension_numbers<[1], [0], [0], [1], [0, 0, 1, 1], [], []>} : vector<222x8xf32>, vector<8x8xf32>, vector<222x8xf32> -> vector<222x8xf32>
    %184 = arith.addf %179, %183 : vector<222x8xf32>
    %c16_227 = arith.constant 16 : index
    %c0_228 = arith.constant 0 : index
    %185 = vector.load %arg15[%c16_227, %c0_228] : memref<264x8xf32, #tpu.memory_space<vmem>>, vector<222x8xf32>
    %c3_229 = arith.constant 3 : index
    %c0_230 = arith.constant 0 : index
    %c0_231 = arith.constant 0 : index
    %186 = vector.load %arg4[%c3_229, %c0_230, %c0_231] : memref<9x8x8xf32, #tpu.memory_space<vmem>>, vector<1x8x8xf32>
    %187 = vector.shape_cast %186 : vector<1x8x8xf32> to vector<8x8xf32>
    %cst_232 = arith.constant dense<0.000000e+00> : vector<222x8xf32>
    %188 = tpu.matmul %185, %187, %cst_232 {dimension_numbers = #tpu.dot_dimension_numbers<[1], [0], [0], [1], [0, 0, 1, 1], [], []>} : vector<222x8xf32>, vector<8x8xf32>, vector<222x8xf32> -> vector<222x8xf32>
    %189 = arith.addf %184, %188 : vector<222x8xf32>
    %c17_233 = arith.constant 17 : index
    %c0_234 = arith.constant 0 : index
    %190 = vector.load %arg15[%c17_233, %c0_234] : memref<264x8xf32, #tpu.memory_space<vmem>>, vector<222x8xf32>
    %c4_235 = arith.constant 4 : index
    %c0_236 = arith.constant 0 : index
    %c0_237 = arith.constant 0 : index
    %191 = vector.load %arg4[%c4_235, %c0_236, %c0_237] : memref<9x8x8xf32, #tpu.memory_space<vmem>>, vector<1x8x8xf32>
    %192 = vector.shape_cast %191 : vector<1x8x8xf32> to vector<8x8xf32>
    %cst_238 = arith.constant dense<0.000000e+00> : vector<222x8xf32>
    %193 = tpu.matmul %190, %192, %cst_238 {dimension_numbers = #tpu.dot_dimension_numbers<[1], [0], [0], [1], [0, 0, 1, 1], [], []>} : vector<222x8xf32>, vector<8x8xf32>, vector<222x8xf32> -> vector<222x8xf32>
    %194 = arith.addf %189, %193 : vector<222x8xf32>
    %c18_239 = arith.constant 18 : index
    %c0_240 = arith.constant 0 : index
    %195 = vector.load %arg15[%c18_239, %c0_240] : memref<264x8xf32, #tpu.memory_space<vmem>>, vector<222x8xf32>
    %c5_241 = arith.constant 5 : index
    %c0_242 = arith.constant 0 : index
    %c0_243 = arith.constant 0 : index
    %196 = vector.load %arg4[%c5_241, %c0_242, %c0_243] : memref<9x8x8xf32, #tpu.memory_space<vmem>>, vector<1x8x8xf32>
    %197 = vector.shape_cast %196 : vector<1x8x8xf32> to vector<8x8xf32>
    %cst_244 = arith.constant dense<0.000000e+00> : vector<222x8xf32>
    %198 = tpu.matmul %195, %197, %cst_244 {dimension_numbers = #tpu.dot_dimension_numbers<[1], [0], [0], [1], [0, 0, 1, 1], [], []>} : vector<222x8xf32>, vector<8x8xf32>, vector<222x8xf32> -> vector<222x8xf32>
    %199 = arith.addf %194, %198 : vector<222x8xf32>
    %c32_245 = arith.constant 32 : index
    %c0_246 = arith.constant 0 : index
    %200 = vector.load %arg15[%c32_245, %c0_246] : memref<264x8xf32, #tpu.memory_space<vmem>>, vector<222x8xf32>
    %c6_247 = arith.constant 6 : index
    %c0_248 = arith.constant 0 : index
    %c0_249 = arith.constant 0 : index
    %201 = vector.load %arg4[%c6_247, %c0_248, %c0_249] : memref<9x8x8xf32, #tpu.memory_space<vmem>>, vector<1x8x8xf32>
    %202 = vector.shape_cast %201 : vector<1x8x8xf32> to vector<8x8xf32>
    %cst_250 = arith.constant dense<0.000000e+00> : vector<222x8xf32>
    %203 = tpu.matmul %200, %202, %cst_250 {dimension_numbers = #tpu.dot_dimension_numbers<[1], [0], [0], [1], [0, 0, 1, 1], [], []>} : vector<222x8xf32>, vector<8x8xf32>, vector<222x8xf32> -> vector<222x8xf32>
    %204 = arith.addf %199, %203 : vector<222x8xf32>
    %c33_251 = arith.constant 33 : index
    %c0_252 = arith.constant 0 : index
    %205 = vector.load %arg15[%c33_251, %c0_252] : memref<264x8xf32, #tpu.memory_space<vmem>>, vector<222x8xf32>
    %c7_253 = arith.constant 7 : index
    %c0_254 = arith.constant 0 : index
    %c0_255 = arith.constant 0 : index
    %206 = vector.load %arg4[%c7_253, %c0_254, %c0_255] : memref<9x8x8xf32, #tpu.memory_space<vmem>>, vector<1x8x8xf32>
    %207 = vector.shape_cast %206 : vector<1x8x8xf32> to vector<8x8xf32>
    %cst_256 = arith.constant dense<0.000000e+00> : vector<222x8xf32>
    %208 = tpu.matmul %205, %207, %cst_256 {dimension_numbers = #tpu.dot_dimension_numbers<[1], [0], [0], [1], [0, 0, 1, 1], [], []>} : vector<222x8xf32>, vector<8x8xf32>, vector<222x8xf32> -> vector<222x8xf32>
    %209 = arith.addf %204, %208 : vector<222x8xf32>
    %c34_257 = arith.constant 34 : index
    %c0_258 = arith.constant 0 : index
    %210 = vector.load %arg15[%c34_257, %c0_258] : memref<264x8xf32, #tpu.memory_space<vmem>>, vector<222x8xf32>
    %c8_259 = arith.constant 8 : index
    %c0_260 = arith.constant 0 : index
    %c0_261 = arith.constant 0 : index
    %211 = vector.load %arg4[%c8_259, %c0_260, %c0_261] : memref<9x8x8xf32, #tpu.memory_space<vmem>>, vector<1x8x8xf32>
    %212 = vector.shape_cast %211 : vector<1x8x8xf32> to vector<8x8xf32>
    %cst_262 = arith.constant dense<0.000000e+00> : vector<222x8xf32>
    %213 = tpu.matmul %210, %212, %cst_262 {dimension_numbers = #tpu.dot_dimension_numbers<[1], [0], [0], [1], [0, 0, 1, 1], [], []>} : vector<222x8xf32>, vector<8x8xf32>, vector<222x8xf32> -> vector<222x8xf32>
    %214 = arith.addf %209, %213 : vector<222x8xf32>
    %c17_263 = arith.constant 17 : index
    %c0_264 = arith.constant 0 : index
    %215 = vector.load %arg13[%c17_263, %c0_264] : memref<264x8xf32, #tpu.memory_space<vmem>>, vector<222x8xf32>
    %216 = arith.addf %214, %215 : vector<222x8xf32>
    %c0_265 = arith.constant 0 : index
    %c0_266 = arith.constant 0 : index
    %217 = vector.load %arg22[%c0_265, %c0_266] : memref<222x32xf32, #tpu.memory_space<vmem>>, vector<222x8xf32>
    tpu.vector_store %arg22[%c0_265, %c0_266], %216 {strides = array<i32>} : memref<222x32xf32, #tpu.memory_space<vmem>>, vector<222x8xf32>,
    %cst_267 = arith.constant 0.000000e+00 : f32
    %218 = vector.broadcast %cst_267 : f32 to vector<264x8xf32>
    %c0_268 = arith.constant 0 : index
    %c0_269 = arith.constant 0 : index
    %219 = vector.load %arg16[%c0_268, %c0_269] : memref<264x8xf32, #tpu.memory_space<vmem>>, vector<264x8xf32>
    tpu.vector_store %arg16[%c0_268, %c0_269], %218 {strides = array<i32>} : memref<264x8xf32, #tpu.memory_space<vmem>>, vector<264x8xf32>,
    %c0_270 = arith.constant 0 : index
    %c0_271 = arith.constant 0 : index
    %220 = vector.load %arg22[%c0_270, %c0_271] : memref<222x32xf32, #tpu.memory_space<vmem>>, vector<14x8xf32>
    %c17_272 = arith.constant 17 : index
    %c0_273 = arith.constant 0 : index
    %221 = vector.load %arg16[%c17_272, %c0_273] : memref<264x8xf32, #tpu.memory_space<vmem>>, vector<14x8xf32>
    tpu.vector_store %arg16[%c17_272, %c0_273], %220 {strides = array<i32>} : memref<264x8xf32, #tpu.memory_space<vmem>>, vector<14x8xf32>,
    %c16_274 = arith.constant 16 : index
    %c0_275 = arith.constant 0 : index
    %222 = vector.load %arg22[%c16_274, %c0_275] : memref<222x32xf32, #tpu.memory_space<vmem>>, vector<14x8xf32>
    %c33_276 = arith.constant 33 : index
    %c0_277 = arith.constant 0 : index
    %223 = vector.load %arg16[%c33_276, %c0_277] : memref<264x8xf32, #tpu.memory_space<vmem>>, vector<14x8xf32>
    tpu.vector_store %arg16[%c33_276, %c0_277], %222 {strides = array<i32>} : memref<264x8xf32, #tpu.memory_space<vmem>>, vector<14x8xf32>,
    %c32_278 = arith.constant 32 : index
    %c0_279 = arith.constant 0 : index
    %224 = vector.load %arg22[%c32_278, %c0_279] : memref<222x32xf32, #tpu.memory_space<vmem>>, vector<14x8xf32>
    %c49_280 = arith.constant 49 : index
    %c0_281 = arith.constant 0 : index
    %225 = vector.load %arg16[%c49_280, %c0_281] : memref<264x8xf32, #tpu.memory_space<vmem>>, vector<14x8xf32>
    tpu.vector_store %arg16[%c49_280, %c0_281], %224 {strides = array<i32>} : memref<264x8xf32, #tpu.memory_space<vmem>>, vector<14x8xf32>,
    %c48_282 = arith.constant 48 : index
    %c0_283 = arith.constant 0 : index
    %226 = vector.load %arg22[%c48_282, %c0_283] : memref<222x32xf32, #tpu.memory_space<vmem>>, vector<14x8xf32>
    %c65_284 = arith.constant 65 : index
    %c0_285 = arith.constant 0 : index
    %227 = vector.load %arg16[%c65_284, %c0_285] : memref<264x8xf32, #tpu.memory_space<vmem>>, vector<14x8xf32>
    tpu.vector_store %arg16[%c65_284, %c0_285], %226 {strides = array<i32>} : memref<264x8xf32, #tpu.memory_space<vmem>>, vector<14x8xf32>,
    %c64_286 = arith.constant 64 : index
    %c0_287 = arith.constant 0 : index
    %228 = vector.load %arg22[%c64_286, %c0_287] : memref<222x32xf32, #tpu.memory_space<vmem>>, vector<14x8xf32>
    %c81_288 = arith.constant 81 : index
    %c0_289 = arith.constant 0 : index
    %229 = vector.load %arg16[%c81_288, %c0_289] : memref<264x8xf32, #tpu.memory_space<vmem>>, vector<14x8xf32>
    tpu.vector_store %arg16[%c81_288, %c0_289], %228 {strides = array<i32>} : memref<264x8xf32, #tpu.memory_space<vmem>>, vector<14x8xf32>,
    %c80_290 = arith.constant 80 : index
    %c0_291 = arith.constant 0 : index
    %230 = vector.load %arg22[%c80_290, %c0_291] : memref<222x32xf32, #tpu.memory_space<vmem>>, vector<14x8xf32>
    %c97_292 = arith.constant 97 : index
    %c0_293 = arith.constant 0 : index
    %231 = vector.load %arg16[%c97_292, %c0_293] : memref<264x8xf32, #tpu.memory_space<vmem>>, vector<14x8xf32>
    tpu.vector_store %arg16[%c97_292, %c0_293], %230 {strides = array<i32>} : memref<264x8xf32, #tpu.memory_space<vmem>>, vector<14x8xf32>,
    %c96_294 = arith.constant 96 : index
    %c0_295 = arith.constant 0 : index
    %232 = vector.load %arg22[%c96_294, %c0_295] : memref<222x32xf32, #tpu.memory_space<vmem>>, vector<14x8xf32>
    %c113_296 = arith.constant 113 : index
    %c0_297 = arith.constant 0 : index
    %233 = vector.load %arg16[%c113_296, %c0_297] : memref<264x8xf32, #tpu.memory_space<vmem>>, vector<14x8xf32>
    tpu.vector_store %arg16[%c113_296, %c0_297], %232 {strides = array<i32>} : memref<264x8xf32, #tpu.memory_space<vmem>>, vector<14x8xf32>,
    %c112_298 = arith.constant 112 : index
    %c0_299 = arith.constant 0 : index
    %234 = vector.load %arg22[%c112_298, %c0_299] : memref<222x32xf32, #tpu.memory_space<vmem>>, vector<14x8xf32>
    %c129_300 = arith.constant 129 : index
    %c0_301 = arith.constant 0 : index
    %235 = vector.load %arg16[%c129_300, %c0_301] : memref<264x8xf32, #tpu.memory_space<vmem>>, vector<14x8xf32>
    tpu.vector_store %arg16[%c129_300, %c0_301], %234 {strides = array<i32>} : memref<264x8xf32, #tpu.memory_space<vmem>>, vector<14x8xf32>,
    %c128_302 = arith.constant 128 : index
    %c0_303 = arith.constant 0 : index
    %236 = vector.load %arg22[%c128_302, %c0_303] : memref<222x32xf32, #tpu.memory_space<vmem>>, vector<14x8xf32>
    %c145_304 = arith.constant 145 : index
    %c0_305 = arith.constant 0 : index
    %237 = vector.load %arg16[%c145_304, %c0_305] : memref<264x8xf32, #tpu.memory_space<vmem>>, vector<14x8xf32>
    tpu.vector_store %arg16[%c145_304, %c0_305], %236 {strides = array<i32>} : memref<264x8xf32, #tpu.memory_space<vmem>>, vector<14x8xf32>,
    %c144_306 = arith.constant 144 : index
    %c0_307 = arith.constant 0 : index
    %238 = vector.load %arg22[%c144_306, %c0_307] : memref<222x32xf32, #tpu.memory_space<vmem>>, vector<14x8xf32>
    %c161_308 = arith.constant 161 : index
    %c0_309 = arith.constant 0 : index
    %239 = vector.load %arg16[%c161_308, %c0_309] : memref<264x8xf32, #tpu.memory_space<vmem>>, vector<14x8xf32>
    tpu.vector_store %arg16[%c161_308, %c0_309], %238 {strides = array<i32>} : memref<264x8xf32, #tpu.memory_space<vmem>>, vector<14x8xf32>,
    %c160_310 = arith.constant 160 : index
    %c0_311 = arith.constant 0 : index
    %240 = vector.load %arg22[%c160_310, %c0_311] : memref<222x32xf32, #tpu.memory_space<vmem>>, vector<14x8xf32>
    %c177_312 = arith.constant 177 : index
    %c0_313 = arith.constant 0 : index
    %241 = vector.load %arg16[%c177_312, %c0_313] : memref<264x8xf32, #tpu.memory_space<vmem>>, vector<14x8xf32>
    tpu.vector_store %arg16[%c177_312, %c0_313], %240 {strides = array<i32>} : memref<264x8xf32, #tpu.memory_space<vmem>>, vector<14x8xf32>,
    %c176_314 = arith.constant 176 : index
    %c0_315 = arith.constant 0 : index
    %242 = vector.load %arg22[%c176_314, %c0_315] : memref<222x32xf32, #tpu.memory_space<vmem>>, vector<14x8xf32>
    %c193_316 = arith.constant 193 : index
    %c0_317 = arith.constant 0 : index
    %243 = vector.load %arg16[%c193_316, %c0_317] : memref<264x8xf32, #tpu.memory_space<vmem>>, vector<14x8xf32>
    tpu.vector_store %arg16[%c193_316, %c0_317], %242 {strides = array<i32>} : memref<264x8xf32, #tpu.memory_space<vmem>>, vector<14x8xf32>,
    %c192_318 = arith.constant 192 : index
    %c0_319 = arith.constant 0 : index
    %244 = vector.load %arg22[%c192_318, %c0_319] : memref<222x32xf32, #tpu.memory_space<vmem>>, vector<14x8xf32>
    %c209_320 = arith.constant 209 : index
    %c0_321 = arith.constant 0 : index
    %245 = vector.load %arg16[%c209_320, %c0_321] : memref<264x8xf32, #tpu.memory_space<vmem>>, vector<14x8xf32>
    tpu.vector_store %arg16[%c209_320, %c0_321], %244 {strides = array<i32>} : memref<264x8xf32, #tpu.memory_space<vmem>>, vector<14x8xf32>,
    %c208_322 = arith.constant 208 : index
    %c0_323 = arith.constant 0 : index
    %246 = vector.load %arg22[%c208_322, %c0_323] : memref<222x32xf32, #tpu.memory_space<vmem>>, vector<14x8xf32>
    %c225_324 = arith.constant 225 : index
    %c0_325 = arith.constant 0 : index
    %247 = vector.load %arg16[%c225_324, %c0_325] : memref<264x8xf32, #tpu.memory_space<vmem>>, vector<14x8xf32>
    tpu.vector_store %arg16[%c225_324, %c0_325], %246 {strides = array<i32>} : memref<264x8xf32, #tpu.memory_space<vmem>>, vector<14x8xf32>,
    %c0_326 = arith.constant 0 : index
    %c0_327 = arith.constant 0 : index
    %248 = vector.load %arg16[%c0_326, %c0_327] : memref<264x8xf32, #tpu.memory_space<vmem>>, vector<264x8xf32>
    %cst_328 = arith.constant 0.000000e+00 : f32
    %249 = vector.broadcast %cst_328 : f32 to vector<264x8xf32>
    %250 = arith.maximumf %248, %249 : vector<264x8xf32>
    %c0_329 = arith.constant 0 : index
    %c0_330 = arith.constant 0 : index
    %251 = vector.load %arg17[%c0_329, %c0_330] : memref<264x8xf32, #tpu.memory_space<vmem>>, vector<264x8xf32>
    tpu.vector_store %arg17[%c0_329, %c0_330], %250 {strides = array<i32>} : memref<264x8xf32, #tpu.memory_space<vmem>>, vector<264x8xf32>,
    %cst_331 = arith.constant 0.000000e+00 : f32
    %252 = vector.broadcast %cst_331 : f32 to vector<103x16xf32>
    %c0_332 = arith.constant 0 : index
    %c0_333 = arith.constant 0 : index
    %253 = tpu.strided_load %arg17[%c0_332, %c0_333] {strides = array<i32: 2, 1>} : memref<264x8xf32, #tpu.memory_space<vmem>>, vector<103x8xf32>
    %c0_334 = arith.constant 0 : index
    %c0_335 = arith.constant 0 : index
    %c0_336 = arith.constant 0 : index
    %254 = vector.load %arg5[%c0_334, %c0_335, %c0_336] : memref<9x8x16xf32, #tpu.memory_space<vmem>>, vector<1x8x16xf32>
    %255 = vector.shape_cast %254 : vector<1x8x16xf32> to vector<8x16xf32>
    %cst_337 = arith.constant dense<0.000000e+00> : vector<103x16xf32>
    %256 = tpu.matmul %253, %255, %cst_337 {dimension_numbers = #tpu.dot_dimension_numbers<[1], [0], [0], [1], [0, 0, 1, 1], [], []>} : vector<103x8xf32>, vector<8x16xf32>, vector<103x16xf32> -> vector<103x16xf32>
    %257 = arith.addf %252, %256 : vector<103x16xf32>
    %c1_338 = arith.constant 1 : index
    %c0_339 = arith.constant 0 : index
    %258 = tpu.strided_load %arg17[%c1_338, %c0_339] {strides = array<i32: 2, 1>} : memref<264x8xf32, #tpu.memory_space<vmem>>, vector<103x8xf32>
    %c1_340 = arith.constant 1 : index
    %c0_341 = arith.constant 0 : index
    %c0_342 = arith.constant 0 : index
    %259 = vector.load %arg5[%c1_340, %c0_341, %c0_342] : memref<9x8x16xf32, #tpu.memory_space<vmem>>, vector<1x8x16xf32>
    %260 = vector.shape_cast %259 : vector<1x8x16xf32> to vector<8x16xf32>
    %cst_343 = arith.constant dense<0.000000e+00> : vector<103x16xf32>
    %261 = tpu.matmul %258, %260, %cst_343 {dimension_numbers = #tpu.dot_dimension_numbers<[1], [0], [0], [1], [0, 0, 1, 1], [], []>} : vector<103x8xf32>, vector<8x16xf32>, vector<103x16xf32> -> vector<103x16xf32>
    %262 = arith.addf %257, %261 : vector<103x16xf32>
    %c2_344 = arith.constant 2 : index
    %c0_345 = arith.constant 0 : index
    %263 = tpu.strided_load %arg17[%c2_344, %c0_345] {strides = array<i32: 2, 1>} : memref<264x8xf32, #tpu.memory_space<vmem>>, vector<103x8xf32>
    %c2_346 = arith.constant 2 : index
    %c0_347 = arith.constant 0 : index
    %c0_348 = arith.constant 0 : index
    %264 = vector.load %arg5[%c2_346, %c0_347, %c0_348] : memref<9x8x16xf32, #tpu.memory_space<vmem>>, vector<1x8x16xf32>
    %265 = vector.shape_cast %264 : vector<1x8x16xf32> to vector<8x16xf32>
    %cst_349 = arith.constant dense<0.000000e+00> : vector<103x16xf32>
    %266 = tpu.matmul %263, %265, %cst_349 {dimension_numbers = #tpu.dot_dimension_numbers<[1], [0], [0], [1], [0, 0, 1, 1], [], []>} : vector<103x8xf32>, vector<8x16xf32>, vector<103x16xf32> -> vector<103x16xf32>
    %267 = arith.addf %262, %266 : vector<103x16xf32>
    %c16_350 = arith.constant 16 : index
    %c0_351 = arith.constant 0 : index
    %268 = tpu.strided_load %arg17[%c16_350, %c0_351] {strides = array<i32: 2, 1>} : memref<264x8xf32, #tpu.memory_space<vmem>>, vector<103x8xf32>
    %c3_352 = arith.constant 3 : index
    %c0_353 = arith.constant 0 : index
    %c0_354 = arith.constant 0 : index
    %269 = vector.load %arg5[%c3_352, %c0_353, %c0_354] : memref<9x8x16xf32, #tpu.memory_space<vmem>>, vector<1x8x16xf32>
    %270 = vector.shape_cast %269 : vector<1x8x16xf32> to vector<8x16xf32>
    %cst_355 = arith.constant dense<0.000000e+00> : vector<103x16xf32>
    %271 = tpu.matmul %268, %270, %cst_355 {dimension_numbers = #tpu.dot_dimension_numbers<[1], [0], [0], [1], [0, 0, 1, 1], [], []>} : vector<103x8xf32>, vector<8x16xf32>, vector<103x16xf32> -> vector<103x16xf32>
    %272 = arith.addf %267, %271 : vector<103x16xf32>
    %c17_356 = arith.constant 17 : index
    %c0_357 = arith.constant 0 : index
    %273 = tpu.strided_load %arg17[%c17_356, %c0_357] {strides = array<i32: 2, 1>} : memref<264x8xf32, #tpu.memory_space<vmem>>, vector<103x8xf32>
    %c4_358 = arith.constant 4 : index
    %c0_359 = arith.constant 0 : index
    %c0_360 = arith.constant 0 : index
    %274 = vector.load %arg5[%c4_358, %c0_359, %c0_360] : memref<9x8x16xf32, #tpu.memory_space<vmem>>, vector<1x8x16xf32>
    %275 = vector.shape_cast %274 : vector<1x8x16xf32> to vector<8x16xf32>
    %cst_361 = arith.constant dense<0.000000e+00> : vector<103x16xf32>
    %276 = tpu.matmul %273, %275, %cst_361 {dimension_numbers = #tpu.dot_dimension_numbers<[1], [0], [0], [1], [0, 0, 1, 1], [], []>} : vector<103x8xf32>, vector<8x16xf32>, vector<103x16xf32> -> vector<103x16xf32>
    %277 = arith.addf %272, %276 : vector<103x16xf32>
    %c18_362 = arith.constant 18 : index
    %c0_363 = arith.constant 0 : index
    %278 = tpu.strided_load %arg17[%c18_362, %c0_363] {strides = array<i32: 2, 1>} : memref<264x8xf32, #tpu.memory_space<vmem>>, vector<103x8xf32>
    %c5_364 = arith.constant 5 : index
    %c0_365 = arith.constant 0 : index
    %c0_366 = arith.constant 0 : index
    %279 = vector.load %arg5[%c5_364, %c0_365, %c0_366] : memref<9x8x16xf32, #tpu.memory_space<vmem>>, vector<1x8x16xf32>
    %280 = vector.shape_cast %279 : vector<1x8x16xf32> to vector<8x16xf32>
    %cst_367 = arith.constant dense<0.000000e+00> : vector<103x16xf32>
    %281 = tpu.matmul %278, %280, %cst_367 {dimension_numbers = #tpu.dot_dimension_numbers<[1], [0], [0], [1], [0, 0, 1, 1], [], []>} : vector<103x8xf32>, vector<8x16xf32>, vector<103x16xf32> -> vector<103x16xf32>
    %282 = arith.addf %277, %281 : vector<103x16xf32>
    %c32_368 = arith.constant 32 : index
    %c0_369 = arith.constant 0 : index
    %283 = tpu.strided_load %arg17[%c32_368, %c0_369] {strides = array<i32: 2, 1>} : memref<264x8xf32, #tpu.memory_space<vmem>>, vector<103x8xf32>
    %c6_370 = arith.constant 6 : index
    %c0_371 = arith.constant 0 : index
    %c0_372 = arith.constant 0 : index
    %284 = vector.load %arg5[%c6_370, %c0_371, %c0_372] : memref<9x8x16xf32, #tpu.memory_space<vmem>>, vector<1x8x16xf32>
    %285 = vector.shape_cast %284 : vector<1x8x16xf32> to vector<8x16xf32>
    %cst_373 = arith.constant dense<0.000000e+00> : vector<103x16xf32>
    %286 = tpu.matmul %283, %285, %cst_373 {dimension_numbers = #tpu.dot_dimension_numbers<[1], [0], [0], [1], [0, 0, 1, 1], [], []>} : vector<103x8xf32>, vector<8x16xf32>, vector<103x16xf32> -> vector<103x16xf32>
    %287 = arith.addf %282, %286 : vector<103x16xf32>
    %c33_374 = arith.constant 33 : index
    %c0_375 = arith.constant 0 : index
    %288 = tpu.strided_load %arg17[%c33_374, %c0_375] {strides = array<i32: 2, 1>} : memref<264x8xf32, #tpu.memory_space<vmem>>, vector<103x8xf32>
    %c7_376 = arith.constant 7 : index
    %c0_377 = arith.constant 0 : index
    %c0_378 = arith.constant 0 : index
    %289 = vector.load %arg5[%c7_376, %c0_377, %c0_378] : memref<9x8x16xf32, #tpu.memory_space<vmem>>, vector<1x8x16xf32>
    %290 = vector.shape_cast %289 : vector<1x8x16xf32> to vector<8x16xf32>
    %cst_379 = arith.constant dense<0.000000e+00> : vector<103x16xf32>
    %291 = tpu.matmul %288, %290, %cst_379 {dimension_numbers = #tpu.dot_dimension_numbers<[1], [0], [0], [1], [0, 0, 1, 1], [], []>} : vector<103x8xf32>, vector<8x16xf32>, vector<103x16xf32> -> vector<103x16xf32>
    %292 = arith.addf %287, %291 : vector<103x16xf32>
    %c34_380 = arith.constant 34 : index
    %c0_381 = arith.constant 0 : index
    %293 = tpu.strided_load %arg17[%c34_380, %c0_381] {strides = array<i32: 2, 1>} : memref<264x8xf32, #tpu.memory_space<vmem>>, vector<103x8xf32>
    %c8_382 = arith.constant 8 : index
    %c0_383 = arith.constant 0 : index
    %c0_384 = arith.constant 0 : index
    %294 = vector.load %arg5[%c8_382, %c0_383, %c0_384] : memref<9x8x16xf32, #tpu.memory_space<vmem>>, vector<1x8x16xf32>
    %295 = vector.shape_cast %294 : vector<1x8x16xf32> to vector<8x16xf32>
    %cst_385 = arith.constant dense<0.000000e+00> : vector<103x16xf32>
    %296 = tpu.matmul %293, %295, %cst_385 {dimension_numbers = #tpu.dot_dimension_numbers<[1], [0], [0], [1], [0, 0, 1, 1], [], []>} : vector<103x8xf32>, vector<8x16xf32>, vector<103x16xf32> -> vector<103x16xf32>
    %297 = arith.addf %292, %296 : vector<103x16xf32>
    %cst_386 = arith.constant 0.000000e+00 : f32
    %298 = vector.broadcast %cst_386 : f32 to vector<103x16xf32>
    %299 = arith.maximumf %297, %298 : vector<103x16xf32>
    %c0_387 = arith.constant 0 : index
    %c0_388 = arith.constant 0 : index
    %300 = vector.load %arg22[%c0_387, %c0_388] : memref<222x32xf32, #tpu.memory_space<vmem>>, vector<103x16xf32>
    tpu.vector_store %arg22[%c0_387, %c0_388], %299 {strides = array<i32>} : memref<222x32xf32, #tpu.memory_space<vmem>>, vector<103x16xf32>,
    %cst_389 = arith.constant 0.000000e+00 : f32
    %301 = vector.broadcast %cst_389 : f32 to vector<89x16xf32>
    %c0_390 = arith.constant 0 : index
    %c0_391 = arith.constant 0 : index
    %302 = vector.load %arg18[%c0_390, %c0_391] : memref<89x16xf32, #tpu.memory_space<vmem>>, vector<89x16xf32>
    tpu.vector_store %arg18[%c0_390, %c0_391], %301 {strides = array<i32>} : memref<89x16xf32, #tpu.memory_space<vmem>>, vector<89x16xf32>,
    %c0_392 = arith.constant 0 : index
    %c0_393 = arith.constant 0 : index
    %303 = vector.load %arg22[%c0_392, %c0_393] : memref<222x32xf32, #tpu.memory_space<vmem>>, vector<7x16xf32>
    %c10 = arith.constant 10 : index
    %c0_394 = arith.constant 0 : index
    %304 = vector.load %arg18[%c10, %c0_394] : memref<89x16xf32, #tpu.memory_space<vmem>>, vector<7x16xf32>
    tpu.vector_store %arg18[%c10, %c0_394], %303 {strides = array<i32>} : memref<89x16xf32, #tpu.memory_space<vmem>>, vector<7x16xf32>,
    %c16_395 = arith.constant 16 : index
    %c0_396 = arith.constant 0 : index
    %305 = vector.load %arg22[%c16_395, %c0_396] : memref<222x32xf32, #tpu.memory_space<vmem>>, vector<7x16xf32>
    %c19 = arith.constant 19 : index
    %c0_397 = arith.constant 0 : index
    %306 = vector.load %arg18[%c19, %c0_397] : memref<89x16xf32, #tpu.memory_space<vmem>>, vector<7x16xf32>
    tpu.vector_store %arg18[%c19, %c0_397], %305 {strides = array<i32>} : memref<89x16xf32, #tpu.memory_space<vmem>>, vector<7x16xf32>,
    %c32_398 = arith.constant 32 : index
    %c0_399 = arith.constant 0 : index
    %307 = vector.load %arg22[%c32_398, %c0_399] : memref<222x32xf32, #tpu.memory_space<vmem>>, vector<7x16xf32>
    %c28 = arith.constant 28 : index
    %c0_400 = arith.constant 0 : index
    %308 = vector.load %arg18[%c28, %c0_400] : memref<89x16xf32, #tpu.memory_space<vmem>>, vector<7x16xf32>
    tpu.vector_store %arg18[%c28, %c0_400], %307 {strides = array<i32>} : memref<89x16xf32, #tpu.memory_space<vmem>>, vector<7x16xf32>,
    %c48_401 = arith.constant 48 : index
    %c0_402 = arith.constant 0 : index
    %309 = vector.load %arg22[%c48_401, %c0_402] : memref<222x32xf32, #tpu.memory_space<vmem>>, vector<7x16xf32>
    %c37 = arith.constant 37 : index
    %c0_403 = arith.constant 0 : index
    %310 = vector.load %arg18[%c37, %c0_403] : memref<89x16xf32, #tpu.memory_space<vmem>>, vector<7x16xf32>
    tpu.vector_store %arg18[%c37, %c0_403], %309 {strides = array<i32>} : memref<89x16xf32, #tpu.memory_space<vmem>>, vector<7x16xf32>,
    %c64_404 = arith.constant 64 : index
    %c0_405 = arith.constant 0 : index
    %311 = vector.load %arg22[%c64_404, %c0_405] : memref<222x32xf32, #tpu.memory_space<vmem>>, vector<7x16xf32>
    %c46 = arith.constant 46 : index
    %c0_406 = arith.constant 0 : index
    %312 = vector.load %arg18[%c46, %c0_406] : memref<89x16xf32, #tpu.memory_space<vmem>>, vector<7x16xf32>
    tpu.vector_store %arg18[%c46, %c0_406], %311 {strides = array<i32>} : memref<89x16xf32, #tpu.memory_space<vmem>>, vector<7x16xf32>,
    %c80_407 = arith.constant 80 : index
    %c0_408 = arith.constant 0 : index
    %313 = vector.load %arg22[%c80_407, %c0_408] : memref<222x32xf32, #tpu.memory_space<vmem>>, vector<7x16xf32>
    %c55 = arith.constant 55 : index
    %c0_409 = arith.constant 0 : index
    %314 = vector.load %arg18[%c55, %c0_409] : memref<89x16xf32, #tpu.memory_space<vmem>>, vector<7x16xf32>
    tpu.vector_store %arg18[%c55, %c0_409], %313 {strides = array<i32>} : memref<89x16xf32, #tpu.memory_space<vmem>>, vector<7x16xf32>,
    %c96_410 = arith.constant 96 : index
    %c0_411 = arith.constant 0 : index
    %315 = vector.load %arg22[%c96_410, %c0_411] : memref<222x32xf32, #tpu.memory_space<vmem>>, vector<7x16xf32>
    %c64_412 = arith.constant 64 : index
    %c0_413 = arith.constant 0 : index
    %316 = vector.load %arg18[%c64_412, %c0_413] : memref<89x16xf32, #tpu.memory_space<vmem>>, vector<7x16xf32>
    tpu.vector_store %arg18[%c64_412, %c0_413], %315 {strides = array<i32>} : memref<89x16xf32, #tpu.memory_space<vmem>>, vector<7x16xf32>,
    %cst_414 = arith.constant 0.000000e+00 : f32
    %317 = vector.broadcast %cst_414 : f32 to vector<61x16xf32>
    %c0_415 = arith.constant 0 : index
    %c0_416 = arith.constant 0 : index
    %318 = vector.load %arg18[%c0_415, %c0_416] : memref<89x16xf32, #tpu.memory_space<vmem>>, vector<61x16xf32>
    %c0_417 = arith.constant 0 : index
    %c0_418 = arith.constant 0 : index
    %c0_419 = arith.constant 0 : index
    %319 = vector.load %arg6[%c0_417, %c0_418, %c0_419] : memref<9x16x16xf32, #tpu.memory_space<vmem>>, vector<1x16x16xf32>
    %320 = vector.shape_cast %319 : vector<1x16x16xf32> to vector<16x16xf32>
    %cst_420 = arith.constant dense<0.000000e+00> : vector<61x16xf32>
    %321 = tpu.matmul %318, %320, %cst_420 {dimension_numbers = #tpu.dot_dimension_numbers<[1], [0], [0], [1], [0, 0, 1, 1], [], []>} : vector<61x16xf32>, vector<16x16xf32>, vector<61x16xf32> -> vector<61x16xf32>
    %322 = arith.addf %317, %321 : vector<61x16xf32>
    %c1_421 = arith.constant 1 : index
    %c0_422 = arith.constant 0 : index
    %323 = vector.load %arg18[%c1_421, %c0_422] : memref<89x16xf32, #tpu.memory_space<vmem>>, vector<61x16xf32>
    %c1_423 = arith.constant 1 : index
    %c0_424 = arith.constant 0 : index
    %c0_425 = arith.constant 0 : index
    %324 = vector.load %arg6[%c1_423, %c0_424, %c0_425] : memref<9x16x16xf32, #tpu.memory_space<vmem>>, vector<1x16x16xf32>
    %325 = vector.shape_cast %324 : vector<1x16x16xf32> to vector<16x16xf32>
    %cst_426 = arith.constant dense<0.000000e+00> : vector<61x16xf32>
    %326 = tpu.matmul %323, %325, %cst_426 {dimension_numbers = #tpu.dot_dimension_numbers<[1], [0], [0], [1], [0, 0, 1, 1], [], []>} : vector<61x16xf32>, vector<16x16xf32>, vector<61x16xf32> -> vector<61x16xf32>
    %327 = arith.addf %322, %326 : vector<61x16xf32>
    %c2_427 = arith.constant 2 : index
    %c0_428 = arith.constant 0 : index
    %328 = vector.load %arg18[%c2_427, %c0_428] : memref<89x16xf32, #tpu.memory_space<vmem>>, vector<61x16xf32>
    %c2_429 = arith.constant 2 : index
    %c0_430 = arith.constant 0 : index
    %c0_431 = arith.constant 0 : index
    %329 = vector.load %arg6[%c2_429, %c0_430, %c0_431] : memref<9x16x16xf32, #tpu.memory_space<vmem>>, vector<1x16x16xf32>
    %330 = vector.shape_cast %329 : vector<1x16x16xf32> to vector<16x16xf32>
    %cst_432 = arith.constant dense<0.000000e+00> : vector<61x16xf32>
    %331 = tpu.matmul %328, %330, %cst_432 {dimension_numbers = #tpu.dot_dimension_numbers<[1], [0], [0], [1], [0, 0, 1, 1], [], []>} : vector<61x16xf32>, vector<16x16xf32>, vector<61x16xf32> -> vector<61x16xf32>
    %332 = arith.addf %327, %331 : vector<61x16xf32>
    %c9 = arith.constant 9 : index
    %c0_433 = arith.constant 0 : index
    %333 = vector.load %arg18[%c9, %c0_433] : memref<89x16xf32, #tpu.memory_space<vmem>>, vector<61x16xf32>
    %c3_434 = arith.constant 3 : index
    %c0_435 = arith.constant 0 : index
    %c0_436 = arith.constant 0 : index
    %334 = vector.load %arg6[%c3_434, %c0_435, %c0_436] : memref<9x16x16xf32, #tpu.memory_space<vmem>>, vector<1x16x16xf32>
    %335 = vector.shape_cast %334 : vector<1x16x16xf32> to vector<16x16xf32>
    %cst_437 = arith.constant dense<0.000000e+00> : vector<61x16xf32>
    %336 = tpu.matmul %333, %335, %cst_437 {dimension_numbers = #tpu.dot_dimension_numbers<[1], [0], [0], [1], [0, 0, 1, 1], [], []>} : vector<61x16xf32>, vector<16x16xf32>, vector<61x16xf32> -> vector<61x16xf32>
    %337 = arith.addf %332, %336 : vector<61x16xf32>
    %c10_438 = arith.constant 10 : index
    %c0_439 = arith.constant 0 : index
    %338 = vector.load %arg18[%c10_438, %c0_439] : memref<89x16xf32, #tpu.memory_space<vmem>>, vector<61x16xf32>
    %c4_440 = arith.constant 4 : index
    %c0_441 = arith.constant 0 : index
    %c0_442 = arith.constant 0 : index
    %339 = vector.load %arg6[%c4_440, %c0_441, %c0_442] : memref<9x16x16xf32, #tpu.memory_space<vmem>>, vector<1x16x16xf32>
    %340 = vector.shape_cast %339 : vector<1x16x16xf32> to vector<16x16xf32>
    %cst_443 = arith.constant dense<0.000000e+00> : vector<61x16xf32>
    %341 = tpu.matmul %338, %340, %cst_443 {dimension_numbers = #tpu.dot_dimension_numbers<[1], [0], [0], [1], [0, 0, 1, 1], [], []>} : vector<61x16xf32>, vector<16x16xf32>, vector<61x16xf32> -> vector<61x16xf32>
    %342 = arith.addf %337, %341 : vector<61x16xf32>
    %c11 = arith.constant 11 : index
    %c0_444 = arith.constant 0 : index
    %343 = vector.load %arg18[%c11, %c0_444] : memref<89x16xf32, #tpu.memory_space<vmem>>, vector<61x16xf32>
    %c5_445 = arith.constant 5 : index
    %c0_446 = arith.constant 0 : index
    %c0_447 = arith.constant 0 : index
    %344 = vector.load %arg6[%c5_445, %c0_446, %c0_447] : memref<9x16x16xf32, #tpu.memory_space<vmem>>, vector<1x16x16xf32>
    %345 = vector.shape_cast %344 : vector<1x16x16xf32> to vector<16x16xf32>
    %cst_448 = arith.constant dense<0.000000e+00> : vector<61x16xf32>
    %346 = tpu.matmul %343, %345, %cst_448 {dimension_numbers = #tpu.dot_dimension_numbers<[1], [0], [0], [1], [0, 0, 1, 1], [], []>} : vector<61x16xf32>, vector<16x16xf32>, vector<61x16xf32> -> vector<61x16xf32>
    %347 = arith.addf %342, %346 : vector<61x16xf32>
    %c18_449 = arith.constant 18 : index
    %c0_450 = arith.constant 0 : index
    %348 = vector.load %arg18[%c18_449, %c0_450] : memref<89x16xf32, #tpu.memory_space<vmem>>, vector<61x16xf32>
    %c6_451 = arith.constant 6 : index
    %c0_452 = arith.constant 0 : index
    %c0_453 = arith.constant 0 : index
    %349 = vector.load %arg6[%c6_451, %c0_452, %c0_453] : memref<9x16x16xf32, #tpu.memory_space<vmem>>, vector<1x16x16xf32>
    %350 = vector.shape_cast %349 : vector<1x16x16xf32> to vector<16x16xf32>
    %cst_454 = arith.constant dense<0.000000e+00> : vector<61x16xf32>
    %351 = tpu.matmul %348, %350, %cst_454 {dimension_numbers = #tpu.dot_dimension_numbers<[1], [0], [0], [1], [0, 0, 1, 1], [], []>} : vector<61x16xf32>, vector<16x16xf32>, vector<61x16xf32> -> vector<61x16xf32>
    %352 = arith.addf %347, %351 : vector<61x16xf32>
    %c19_455 = arith.constant 19 : index
    %c0_456 = arith.constant 0 : index
    %353 = vector.load %arg18[%c19_455, %c0_456] : memref<89x16xf32, #tpu.memory_space<vmem>>, vector<61x16xf32>
    %c7_457 = arith.constant 7 : index
    %c0_458 = arith.constant 0 : index
    %c0_459 = arith.constant 0 : index
    %354 = vector.load %arg6[%c7_457, %c0_458, %c0_459] : memref<9x16x16xf32, #tpu.memory_space<vmem>>, vector<1x16x16xf32>
    %355 = vector.shape_cast %354 : vector<1x16x16xf32> to vector<16x16xf32>
    %cst_460 = arith.constant dense<0.000000e+00> : vector<61x16xf32>
    %356 = tpu.matmul %353, %355, %cst_460 {dimension_numbers = #tpu.dot_dimension_numbers<[1], [0], [0], [1], [0, 0, 1, 1], [], []>} : vector<61x16xf32>, vector<16x16xf32>, vector<61x16xf32> -> vector<61x16xf32>
    %357 = arith.addf %352, %356 : vector<61x16xf32>
    %c20 = arith.constant 20 : index
    %c0_461 = arith.constant 0 : index
    %358 = vector.load %arg18[%c20, %c0_461] : memref<89x16xf32, #tpu.memory_space<vmem>>, vector<61x16xf32>
    %c8_462 = arith.constant 8 : index
    %c0_463 = arith.constant 0 : index
    %c0_464 = arith.constant 0 : index
    %359 = vector.load %arg6[%c8_462, %c0_463, %c0_464] : memref<9x16x16xf32, #tpu.memory_space<vmem>>, vector<1x16x16xf32>
    %360 = vector.shape_cast %359 : vector<1x16x16xf32> to vector<16x16xf32>
    %cst_465 = arith.constant dense<0.000000e+00> : vector<61x16xf32>
    %361 = tpu.matmul %358, %360, %cst_465 {dimension_numbers = #tpu.dot_dimension_numbers<[1], [0], [0], [1], [0, 0, 1, 1], [], []>} : vector<61x16xf32>, vector<16x16xf32>, vector<61x16xf32> -> vector<61x16xf32>
    %362 = arith.addf %357, %361 : vector<61x16xf32>
    %c17_466 = arith.constant 17 : index
    %c0_467 = arith.constant 0 : index
    %363 = tpu.strided_load %arg16[%c17_466, %c0_467] {strides = array<i32: 2, 1>} : memref<264x8xf32, #tpu.memory_space<vmem>>, vector<103x8xf32>
    %c0_468 = arith.constant 0 : index
    %c0_469 = arith.constant 0 : index
    %364 = vector.load %arg7[%c0_468, %c0_469] : memref<8x16xf32, #tpu.memory_space<vmem>>, vector<8x16xf32>
    %cst_470 = arith.constant dense<0.000000e+00> : vector<103x16xf32>
    %365 = tpu.matmul %363, %364, %cst_470 {dimension_numbers = #tpu.dot_dimension_numbers<[1], [0], [0], [1], [0, 0, 1, 1], [], []>} : vector<103x8xf32>, vector<8x16xf32>, vector<103x16xf32> -> vector<103x16xf32>
    %c0_471 = arith.constant 0 : index
    %c0_472 = arith.constant 0 : index
    %366 = vector.load %arg23[%c0_471, %c0_472] : memref<103x32xf32, #tpu.memory_space<vmem>>, vector<103x16xf32>
    tpu.vector_store %arg23[%c0_471, %c0_472], %365 {strides = array<i32>} : memref<103x32xf32, #tpu.memory_space<vmem>>, vector<103x16xf32>,
    %c0_473 = arith.constant 0 : index
    %c0_474 = arith.constant 0 : index
    %367 = vector.load %arg22[%c0_473, %c0_474] : memref<222x32xf32, #tpu.memory_space<vmem>>, vector<61x16xf32>
    tpu.vector_store %arg22[%c0_473, %c0_474], %362 {strides = array<i32>} : memref<222x32xf32, #tpu.memory_space<vmem>>, vector<61x16xf32>,
    %cst_475 = arith.constant 0.000000e+00 : f32
    %368 = vector.broadcast %cst_475 : f32 to vector<89x16xf32>
    %c0_476 = arith.constant 0 : index
    %c0_477 = arith.constant 0 : index
    %369 = vector.load %arg19[%c0_476, %c0_477] : memref<89x16xf32, #tpu.memory_space<vmem>>, vector<89x16xf32>
    tpu.vector_store %arg19[%c0_476, %c0_477], %368 {strides = array<i32>} : memref<89x16xf32, #tpu.memory_space<vmem>>, vector<89x16xf32>,
    %c0_478 = arith.constant 0 : index
    %c0_479 = arith.constant 0 : index
    %370 = vector.load %arg22[%c0_478, %c0_479] : memref<222x32xf32, #tpu.memory_space<vmem>>, vector<7x16xf32>
    %c0_480 = arith.constant 0 : index
    %c0_481 = arith.constant 0 : index
    %371 = vector.load %arg23[%c0_480, %c0_481] : memref<103x32xf32, #tpu.memory_space<vmem>>, vector<7x16xf32>
    %372 = arith.addf %370, %371 : vector<7x16xf32>
    %c10_482 = arith.constant 10 : index
    %c0_483 = arith.constant 0 : index
    %373 = vector.load %arg19[%c10_482, %c0_483] : memref<89x16xf32, #tpu.memory_space<vmem>>, vector<7x16xf32>
    tpu.vector_store %arg19[%c10_482, %c0_483], %372 {strides = array<i32>} : memref<89x16xf32, #tpu.memory_space<vmem>>, vector<7x16xf32>,
    %c9_484 = arith.constant 9 : index
    %c0_485 = arith.constant 0 : index
    %374 = vector.load %arg22[%c9_484, %c0_485] : memref<222x32xf32, #tpu.memory_space<vmem>>, vector<7x16xf32>
    %c16_486 = arith.constant 16 : index
    %c0_487 = arith.constant 0 : index
    %375 = vector.load %arg23[%c16_486, %c0_487] : memref<103x32xf32, #tpu.memory_space<vmem>>, vector<7x16xf32>
    %376 = arith.addf %374, %375 : vector<7x16xf32>
    %c19_488 = arith.constant 19 : index
    %c0_489 = arith.constant 0 : index
    %377 = vector.load %arg19[%c19_488, %c0_489] : memref<89x16xf32, #tpu.memory_space<vmem>>, vector<7x16xf32>
    tpu.vector_store %arg19[%c19_488, %c0_489], %376 {strides = array<i32>} : memref<89x16xf32, #tpu.memory_space<vmem>>, vector<7x16xf32>,
    %c18_490 = arith.constant 18 : index
    %c0_491 = arith.constant 0 : index
    %378 = vector.load %arg22[%c18_490, %c0_491] : memref<222x32xf32, #tpu.memory_space<vmem>>, vector<7x16xf32>
    %c32_492 = arith.constant 32 : index
    %c0_493 = arith.constant 0 : index
    %379 = vector.load %arg23[%c32_492, %c0_493] : memref<103x32xf32, #tpu.memory_space<vmem>>, vector<7x16xf32>
    %380 = arith.addf %378, %379 : vector<7x16xf32>
    %c28_494 = arith.constant 28 : index
    %c0_495 = arith.constant 0 : index
    %381 = vector.load %arg19[%c28_494, %c0_495] : memref<89x16xf32, #tpu.memory_space<vmem>>, vector<7x16xf32>
    tpu.vector_store %arg19[%c28_494, %c0_495], %380 {strides = array<i32>} : memref<89x16xf32, #tpu.memory_space<vmem>>, vector<7x16xf32>,
    %c27 = arith.constant 27 : index
    %c0_496 = arith.constant 0 : index
    %382 = vector.load %arg22[%c27, %c0_496] : memref<222x32xf32, #tpu.memory_space<vmem>>, vector<7x16xf32>
    %c48_497 = arith.constant 48 : index
    %c0_498 = arith.constant 0 : index
    %383 = vector.load %arg23[%c48_497, %c0_498] : memref<103x32xf32, #tpu.memory_space<vmem>>, vector<7x16xf32>
    %384 = arith.addf %382, %383 : vector<7x16xf32>
    %c37_499 = arith.constant 37 : index
    %c0_500 = arith.constant 0 : index
    %385 = vector.load %arg19[%c37_499, %c0_500] : memref<89x16xf32, #tpu.memory_space<vmem>>, vector<7x16xf32>
    tpu.vector_store %arg19[%c37_499, %c0_500], %384 {strides = array<i32>} : memref<89x16xf32, #tpu.memory_space<vmem>>, vector<7x16xf32>,
    %c36 = arith.constant 36 : index
    %c0_501 = arith.constant 0 : index
    %386 = vector.load %arg22[%c36, %c0_501] : memref<222x32xf32, #tpu.memory_space<vmem>>, vector<7x16xf32>
    %c64_502 = arith.constant 64 : index
    %c0_503 = arith.constant 0 : index
    %387 = vector.load %arg23[%c64_502, %c0_503] : memref<103x32xf32, #tpu.memory_space<vmem>>, vector<7x16xf32>
    %388 = arith.addf %386, %387 : vector<7x16xf32>
    %c46_504 = arith.constant 46 : index
    %c0_505 = arith.constant 0 : index
    %389 = vector.load %arg19[%c46_504, %c0_505] : memref<89x16xf32, #tpu.memory_space<vmem>>, vector<7x16xf32>
    tpu.vector_store %arg19[%c46_504, %c0_505], %388 {strides = array<i32>} : memref<89x16xf32, #tpu.memory_space<vmem>>, vector<7x16xf32>,
    %c45 = arith.constant 45 : index
    %c0_506 = arith.constant 0 : index
    %390 = vector.load %arg22[%c45, %c0_506] : memref<222x32xf32, #tpu.memory_space<vmem>>, vector<7x16xf32>
    %c80_507 = arith.constant 80 : index
    %c0_508 = arith.constant 0 : index
    %391 = vector.load %arg23[%c80_507, %c0_508] : memref<103x32xf32, #tpu.memory_space<vmem>>, vector<7x16xf32>
    %392 = arith.addf %390, %391 : vector<7x16xf32>
    %c55_509 = arith.constant 55 : index
    %c0_510 = arith.constant 0 : index
    %393 = vector.load %arg19[%c55_509, %c0_510] : memref<89x16xf32, #tpu.memory_space<vmem>>, vector<7x16xf32>
    tpu.vector_store %arg19[%c55_509, %c0_510], %392 {strides = array<i32>} : memref<89x16xf32, #tpu.memory_space<vmem>>, vector<7x16xf32>,
    %c54 = arith.constant 54 : index
    %c0_511 = arith.constant 0 : index
    %394 = vector.load %arg22[%c54, %c0_511] : memref<222x32xf32, #tpu.memory_space<vmem>>, vector<7x16xf32>
    %c96_512 = arith.constant 96 : index
    %c0_513 = arith.constant 0 : index
    %395 = vector.load %arg23[%c96_512, %c0_513] : memref<103x32xf32, #tpu.memory_space<vmem>>, vector<7x16xf32>
    %396 = arith.addf %394, %395 : vector<7x16xf32>
    %c64_514 = arith.constant 64 : index
    %c0_515 = arith.constant 0 : index
    %397 = vector.load %arg19[%c64_514, %c0_515] : memref<89x16xf32, #tpu.memory_space<vmem>>, vector<7x16xf32>
    tpu.vector_store %arg19[%c64_514, %c0_515], %396 {strides = array<i32>} : memref<89x16xf32, #tpu.memory_space<vmem>>, vector<7x16xf32>,
    %c0_516 = arith.constant 0 : index
    %c0_517 = arith.constant 0 : index
    %398 = vector.load %arg19[%c0_516, %c0_517] : memref<89x16xf32, #tpu.memory_space<vmem>>, vector<89x16xf32>
    %cst_518 = arith.constant 0.000000e+00 : f32
    %399 = vector.broadcast %cst_518 : f32 to vector<89x16xf32>
    %400 = arith.maximumf %398, %399 : vector<89x16xf32>
    %c0_519 = arith.constant 0 : index
    %c0_520 = arith.constant 0 : index
    %401 = vector.load %arg20[%c0_519, %c0_520] : memref<89x16xf32, #tpu.memory_space<vmem>>, vector<89x16xf32>
    tpu.vector_store %arg20[%c0_519, %c0_520], %400 {strides = array<i32>} : memref<89x16xf32, #tpu.memory_space<vmem>>, vector<89x16xf32>,
    %cst_521 = arith.constant 0.000000e+00 : f32
    %402 = vector.broadcast %cst_521 : f32 to vector<31x32xf32>
    %c0_522 = arith.constant 0 : index
    %c0_523 = arith.constant 0 : index
    %403 = tpu.strided_load %arg20[%c0_522, %c0_523] {strides = array<i32: 2, 1>} : memref<89x16xf32, #tpu.memory_space<vmem>>, vector<31x16xf32>
    %c0_524 = arith.constant 0 : index
    %c0_525 = arith.constant 0 : index
    %c0_526 = arith.constant 0 : index
    %404 = vector.load %arg8[%c0_524, %c0_525, %c0_526] : memref<9x16x32xf32, #tpu.memory_space<vmem>>, vector<1x16x32xf32>
    %405 = vector.shape_cast %404 : vector<1x16x32xf32> to vector<16x32xf32>
    %cst_527 = arith.constant dense<0.000000e+00> : vector<31x32xf32>
    %406 = tpu.matmul %403, %405, %cst_527 {dimension_numbers = #tpu.dot_dimension_numbers<[1], [0], [0], [1], [0, 0, 1, 1], [], []>} : vector<31x16xf32>, vector<16x32xf32>, vector<31x32xf32> -> vector<31x32xf32>
    %407 = arith.addf %402, %406 : vector<31x32xf32>
    %c1_528 = arith.constant 1 : index
    %c0_529 = arith.constant 0 : index
    %408 = tpu.strided_load %arg20[%c1_528, %c0_529] {strides = array<i32: 2, 1>} : memref<89x16xf32, #tpu.memory_space<vmem>>, vector<31x16xf32>
    %c1_530 = arith.constant 1 : index
    %c0_531 = arith.constant 0 : index
    %c0_532 = arith.constant 0 : index
    %409 = vector.load %arg8[%c1_530, %c0_531, %c0_532] : memref<9x16x32xf32, #tpu.memory_space<vmem>>, vector<1x16x32xf32>
    %410 = vector.shape_cast %409 : vector<1x16x32xf32> to vector<16x32xf32>
    %cst_533 = arith.constant dense<0.000000e+00> : vector<31x32xf32>
    %411 = tpu.matmul %408, %410, %cst_533 {dimension_numbers = #tpu.dot_dimension_numbers<[1], [0], [0], [1], [0, 0, 1, 1], [], []>} : vector<31x16xf32>, vector<16x32xf32>, vector<31x32xf32> -> vector<31x32xf32>
    %412 = arith.addf %407, %411 : vector<31x32xf32>
    %c2_534 = arith.constant 2 : index
    %c0_535 = arith.constant 0 : index
    %413 = tpu.strided_load %arg20[%c2_534, %c0_535] {strides = array<i32: 2, 1>} : memref<89x16xf32, #tpu.memory_space<vmem>>, vector<31x16xf32>
    %c2_536 = arith.constant 2 : index
    %c0_537 = arith.constant 0 : index
    %c0_538 = arith.constant 0 : index
    %414 = vector.load %arg8[%c2_536, %c0_537, %c0_538] : memref<9x16x32xf32, #tpu.memory_space<vmem>>, vector<1x16x32xf32>
    %415 = vector.shape_cast %414 : vector<1x16x32xf32> to vector<16x32xf32>
    %cst_539 = arith.constant dense<0.000000e+00> : vector<31x32xf32>
    %416 = tpu.matmul %413, %415, %cst_539 {dimension_numbers = #tpu.dot_dimension_numbers<[1], [0], [0], [1], [0, 0, 1, 1], [], []>} : vector<31x16xf32>, vector<16x32xf32>, vector<31x32xf32> -> vector<31x32xf32>
    %417 = arith.addf %412, %416 : vector<31x32xf32>
    %c9_540 = arith.constant 9 : index
    %c0_541 = arith.constant 0 : index
    %418 = tpu.strided_load %arg20[%c9_540, %c0_541] {strides = array<i32: 2, 1>} : memref<89x16xf32, #tpu.memory_space<vmem>>, vector<31x16xf32>
    %c3_542 = arith.constant 3 : index
    %c0_543 = arith.constant 0 : index
    %c0_544 = arith.constant 0 : index
    %419 = vector.load %arg8[%c3_542, %c0_543, %c0_544] : memref<9x16x32xf32, #tpu.memory_space<vmem>>, vector<1x16x32xf32>
    %420 = vector.shape_cast %419 : vector<1x16x32xf32> to vector<16x32xf32>
    %cst_545 = arith.constant dense<0.000000e+00> : vector<31x32xf32>
    %421 = tpu.matmul %418, %420, %cst_545 {dimension_numbers = #tpu.dot_dimension_numbers<[1], [0], [0], [1], [0, 0, 1, 1], [], []>} : vector<31x16xf32>, vector<16x32xf32>, vector<31x32xf32> -> vector<31x32xf32>
    %422 = arith.addf %417, %421 : vector<31x32xf32>
    %c10_546 = arith.constant 10 : index
    %c0_547 = arith.constant 0 : index
    %423 = tpu.strided_load %arg20[%c10_546, %c0_547] {strides = array<i32: 2, 1>} : memref<89x16xf32, #tpu.memory_space<vmem>>, vector<31x16xf32>
    %c4_548 = arith.constant 4 : index
    %c0_549 = arith.constant 0 : index
    %c0_550 = arith.constant 0 : index
    %424 = vector.load %arg8[%c4_548, %c0_549, %c0_550] : memref<9x16x32xf32, #tpu.memory_space<vmem>>, vector<1x16x32xf32>
    %425 = vector.shape_cast %424 : vector<1x16x32xf32> to vector<16x32xf32>
    %cst_551 = arith.constant dense<0.000000e+00> : vector<31x32xf32>
    %426 = tpu.matmul %423, %425, %cst_551 {dimension_numbers = #tpu.dot_dimension_numbers<[1], [0], [0], [1], [0, 0, 1, 1], [], []>} : vector<31x16xf32>, vector<16x32xf32>, vector<31x32xf32> -> vector<31x32xf32>
    %427 = arith.addf %422, %426 : vector<31x32xf32>
    %c11_552 = arith.constant 11 : index
    %c0_553 = arith.constant 0 : index
    %428 = tpu.strided_load %arg20[%c11_552, %c0_553] {strides = array<i32: 2, 1>} : memref<89x16xf32, #tpu.memory_space<vmem>>, vector<31x16xf32>
    %c5_554 = arith.constant 5 : index
    %c0_555 = arith.constant 0 : index
    %c0_556 = arith.constant 0 : index
    %429 = vector.load %arg8[%c5_554, %c0_555, %c0_556] : memref<9x16x32xf32, #tpu.memory_space<vmem>>, vector<1x16x32xf32>
    %430 = vector.shape_cast %429 : vector<1x16x32xf32> to vector<16x32xf32>
    %cst_557 = arith.constant dense<0.000000e+00> : vector<31x32xf32>
    %431 = tpu.matmul %428, %430, %cst_557 {dimension_numbers = #tpu.dot_dimension_numbers<[1], [0], [0], [1], [0, 0, 1, 1], [], []>} : vector<31x16xf32>, vector<16x32xf32>, vector<31x32xf32> -> vector<31x32xf32>
    %432 = arith.addf %427, %431 : vector<31x32xf32>
    %c18_558 = arith.constant 18 : index
    %c0_559 = arith.constant 0 : index
    %433 = tpu.strided_load %arg20[%c18_558, %c0_559] {strides = array<i32: 2, 1>} : memref<89x16xf32, #tpu.memory_space<vmem>>, vector<31x16xf32>
    %c6_560 = arith.constant 6 : index
    %c0_561 = arith.constant 0 : index
    %c0_562 = arith.constant 0 : index
    %434 = vector.load %arg8[%c6_560, %c0_561, %c0_562] : memref<9x16x32xf32, #tpu.memory_space<vmem>>, vector<1x16x32xf32>
    %435 = vector.shape_cast %434 : vector<1x16x32xf32> to vector<16x32xf32>
    %cst_563 = arith.constant dense<0.000000e+00> : vector<31x32xf32>
    %436 = tpu.matmul %433, %435, %cst_563 {dimension_numbers = #tpu.dot_dimension_numbers<[1], [0], [0], [1], [0, 0, 1, 1], [], []>} : vector<31x16xf32>, vector<16x32xf32>, vector<31x32xf32> -> vector<31x32xf32>
    %437 = arith.addf %432, %436 : vector<31x32xf32>
    %c19_564 = arith.constant 19 : index
    %c0_565 = arith.constant 0 : index
    %438 = tpu.strided_load %arg20[%c19_564, %c0_565] {strides = array<i32: 2, 1>} : memref<89x16xf32, #tpu.memory_space<vmem>>, vector<31x16xf32>
    %c7_566 = arith.constant 7 : index
    %c0_567 = arith.constant 0 : index
    %c0_568 = arith.constant 0 : index
    %439 = vector.load %arg8[%c7_566, %c0_567, %c0_568] : memref<9x16x32xf32, #tpu.memory_space<vmem>>, vector<1x16x32xf32>
    %440 = vector.shape_cast %439 : vector<1x16x32xf32> to vector<16x32xf32>
    %cst_569 = arith.constant dense<0.000000e+00> : vector<31x32xf32>
    %441 = tpu.matmul %438, %440, %cst_569 {dimension_numbers = #tpu.dot_dimension_numbers<[1], [0], [0], [1], [0, 0, 1, 1], [], []>} : vector<31x16xf32>, vector<16x32xf32>, vector<31x32xf32> -> vector<31x32xf32>
    %442 = arith.addf %437, %441 : vector<31x32xf32>
    %c20_570 = arith.constant 20 : index
    %c0_571 = arith.constant 0 : index
    %443 = tpu.strided_load %arg20[%c20_570, %c0_571] {strides = array<i32: 2, 1>} : memref<89x16xf32, #tpu.memory_space<vmem>>, vector<31x16xf32>
    %c8_572 = arith.constant 8 : index
    %c0_573 = arith.constant 0 : index
    %c0_574 = arith.constant 0 : index
    %444 = vector.load %arg8[%c8_572, %c0_573, %c0_574] : memref<9x16x32xf32, #tpu.memory_space<vmem>>, vector<1x16x32xf32>
    %445 = vector.shape_cast %444 : vector<1x16x32xf32> to vector<16x32xf32>
    %cst_575 = arith.constant dense<0.000000e+00> : vector<31x32xf32>
    %446 = tpu.matmul %443, %445, %cst_575 {dimension_numbers = #tpu.dot_dimension_numbers<[1], [0], [0], [1], [0, 0, 1, 1], [], []>} : vector<31x16xf32>, vector<16x32xf32>, vector<31x32xf32> -> vector<31x32xf32>
    %447 = arith.addf %442, %446 : vector<31x32xf32>
    %cst_576 = arith.constant 0.000000e+00 : f32
    %448 = vector.broadcast %cst_576 : f32 to vector<31x32xf32>
    %449 = arith.maximumf %447, %448 : vector<31x32xf32>
    %c0_577 = arith.constant 0 : index
    %c0_578 = arith.constant 0 : index
    %450 = vector.load %arg22[%c0_577, %c0_578] : memref<222x32xf32, #tpu.memory_space<vmem>>, vector<31x32xf32>
    tpu.vector_store %arg22[%c0_577, %c0_578], %449 {strides = array<i32>} : memref<222x32xf32, #tpu.memory_space<vmem>>, vector<31x32xf32>,
    %cst_579 = arith.constant 0.000000e+00 : f32
    %451 = vector.broadcast %cst_579 : f32 to vector<44x32xf32>
    %c0_580 = arith.constant 0 : index
    %c0_581 = arith.constant 0 : index
    %452 = vector.load %arg21[%c0_580, %c0_581] : memref<44x32xf32, #tpu.memory_space<vmem>>, vector<44x32xf32>
    tpu.vector_store %arg21[%c0_580, %c0_581], %451 {strides = array<i32>} : memref<44x32xf32, #tpu.memory_space<vmem>>, vector<44x32xf32>,
    %c0_582 = arith.constant 0 : index
    %c0_583 = arith.constant 0 : index
    %453 = vector.load %arg22[%c0_582, %c0_583] : memref<222x32xf32, #tpu.memory_space<vmem>>, vector<4x32xf32>
    %c7_584 = arith.constant 7 : index
    %c0_585 = arith.constant 0 : index
    %454 = vector.load %arg21[%c7_584, %c0_585] : memref<44x32xf32, #tpu.memory_space<vmem>>, vector<4x32xf32>
    tpu.vector_store %arg21[%c7_584, %c0_585], %453 {strides = array<i32>} : memref<44x32xf32, #tpu.memory_space<vmem>>, vector<4x32xf32>,
    %c9_586 = arith.constant 9 : index
    %c0_587 = arith.constant 0 : index
    %455 = vector.load %arg22[%c9_586, %c0_587] : memref<222x32xf32, #tpu.memory_space<vmem>>, vector<4x32xf32>
    %c13 = arith.constant 13 : index
    %c0_588 = arith.constant 0 : index
    %456 = vector.load %arg21[%c13, %c0_588] : memref<44x32xf32, #tpu.memory_space<vmem>>, vector<4x32xf32>
    tpu.vector_store %arg21[%c13, %c0_588], %455 {strides = array<i32>} : memref<44x32xf32, #tpu.memory_space<vmem>>, vector<4x32xf32>,
    %c18_589 = arith.constant 18 : index
    %c0_590 = arith.constant 0 : index
    %457 = vector.load %arg22[%c18_589, %c0_590] : memref<222x32xf32, #tpu.memory_space<vmem>>, vector<4x32xf32>
    %c19_591 = arith.constant 19 : index
    %c0_592 = arith.constant 0 : index
    %458 = vector.load %arg21[%c19_591, %c0_592] : memref<44x32xf32, #tpu.memory_space<vmem>>, vector<4x32xf32>
    tpu.vector_store %arg21[%c19_591, %c0_592], %457 {strides = array<i32>} : memref<44x32xf32, #tpu.memory_space<vmem>>, vector<4x32xf32>,
    %c27_593 = arith.constant 27 : index
    %c0_594 = arith.constant 0 : index
    %459 = vector.load %arg22[%c27_593, %c0_594] : memref<222x32xf32, #tpu.memory_space<vmem>>, vector<4x32xf32>
    %c25 = arith.constant 25 : index
    %c0_595 = arith.constant 0 : index
    %460 = vector.load %arg21[%c25, %c0_595] : memref<44x32xf32, #tpu.memory_space<vmem>>, vector<4x32xf32>
    tpu.vector_store %arg21[%c25, %c0_595], %459 {strides = array<i32>} : memref<44x32xf32, #tpu.memory_space<vmem>>, vector<4x32xf32>,
    %cst_596 = arith.constant 0.000000e+00 : f32
    %461 = vector.broadcast %cst_596 : f32 to vector<22x32xf32>
    %c0_597 = arith.constant 0 : index
    %c0_598 = arith.constant 0 : index
    %462 = vector.load %arg21[%c0_597, %c0_598] : memref<44x32xf32, #tpu.memory_space<vmem>>, vector<22x32xf32>
    %c0_599 = arith.constant 0 : index
    %c0_600 = arith.constant 0 : index
    %c0_601 = arith.constant 0 : index
    %463 = vector.load %arg9[%c0_599, %c0_600, %c0_601] : memref<9x32x32xf32, #tpu.memory_space<vmem>>, vector<1x32x32xf32>
    %464 = vector.shape_cast %463 : vector<1x32x32xf32> to vector<32x32xf32>
    %cst_602 = arith.constant dense<0.000000e+00> : vector<22x32xf32>
    %465 = tpu.matmul %462, %464, %cst_602 {dimension_numbers = #tpu.dot_dimension_numbers<[1], [0], [0], [1], [0, 0, 1, 1], [], []>} : vector<22x32xf32>, vector<32x32xf32>, vector<22x32xf32> -> vector<22x32xf32>
    %466 = arith.addf %461, %465 : vector<22x32xf32>
    %c1_603 = arith.constant 1 : index
    %c0_604 = arith.constant 0 : index
    %467 = vector.load %arg21[%c1_603, %c0_604] : memref<44x32xf32, #tpu.memory_space<vmem>>, vector<22x32xf32>
    %c1_605 = arith.constant 1 : index
    %c0_606 = arith.constant 0 : index
    %c0_607 = arith.constant 0 : index
    %468 = vector.load %arg9[%c1_605, %c0_606, %c0_607] : memref<9x32x32xf32, #tpu.memory_space<vmem>>, vector<1x32x32xf32>
    %469 = vector.shape_cast %468 : vector<1x32x32xf32> to vector<32x32xf32>
    %cst_608 = arith.constant dense<0.000000e+00> : vector<22x32xf32>
    %470 = tpu.matmul %467, %469, %cst_608 {dimension_numbers = #tpu.dot_dimension_numbers<[1], [0], [0], [1], [0, 0, 1, 1], [], []>} : vector<22x32xf32>, vector<32x32xf32>, vector<22x32xf32> -> vector<22x32xf32>
    %471 = arith.addf %466, %470 : vector<22x32xf32>
    %c2_609 = arith.constant 2 : index
    %c0_610 = arith.constant 0 : index
    %472 = vector.load %arg21[%c2_609, %c0_610] : memref<44x32xf32, #tpu.memory_space<vmem>>, vector<22x32xf32>
    %c2_611 = arith.constant 2 : index
    %c0_612 = arith.constant 0 : index
    %c0_613 = arith.constant 0 : index
    %473 = vector.load %arg9[%c2_611, %c0_612, %c0_613] : memref<9x32x32xf32, #tpu.memory_space<vmem>>, vector<1x32x32xf32>
    %474 = vector.shape_cast %473 : vector<1x32x32xf32> to vector<32x32xf32>
    %cst_614 = arith.constant dense<0.000000e+00> : vector<22x32xf32>
    %475 = tpu.matmul %472, %474, %cst_614 {dimension_numbers = #tpu.dot_dimension_numbers<[1], [0], [0], [1], [0, 0, 1, 1], [], []>} : vector<22x32xf32>, vector<32x32xf32>, vector<22x32xf32> -> vector<22x32xf32>
    %476 = arith.addf %471, %475 : vector<22x32xf32>
    %c6_615 = arith.constant 6 : index
    %c0_616 = arith.constant 0 : index
    %477 = vector.load %arg21[%c6_615, %c0_616] : memref<44x32xf32, #tpu.memory_space<vmem>>, vector<22x32xf32>
    %c3_617 = arith.constant 3 : index
    %c0_618 = arith.constant 0 : index
    %c0_619 = arith.constant 0 : index
    %478 = vector.load %arg9[%c3_617, %c0_618, %c0_619] : memref<9x32x32xf32, #tpu.memory_space<vmem>>, vector<1x32x32xf32>
    %479 = vector.shape_cast %478 : vector<1x32x32xf32> to vector<32x32xf32>
    %cst_620 = arith.constant dense<0.000000e+00> : vector<22x32xf32>
    %480 = tpu.matmul %477, %479, %cst_620 {dimension_numbers = #tpu.dot_dimension_numbers<[1], [0], [0], [1], [0, 0, 1, 1], [], []>} : vector<22x32xf32>, vector<32x32xf32>, vector<22x32xf32> -> vector<22x32xf32>
    %481 = arith.addf %476, %480 : vector<22x32xf32>
    %c7_621 = arith.constant 7 : index
    %c0_622 = arith.constant 0 : index
    %482 = vector.load %arg21[%c7_621, %c0_622] : memref<44x32xf32, #tpu.memory_space<vmem>>, vector<22x32xf32>
    %c4_623 = arith.constant 4 : index
    %c0_624 = arith.constant 0 : index
    %c0_625 = arith.constant 0 : index
    %483 = vector.load %arg9[%c4_623, %c0_624, %c0_625] : memref<9x32x32xf32, #tpu.memory_space<vmem>>, vector<1x32x32xf32>
    %484 = vector.shape_cast %483 : vector<1x32x32xf32> to vector<32x32xf32>
    %cst_626 = arith.constant dense<0.000000e+00> : vector<22x32xf32>
    %485 = tpu.matmul %482, %484, %cst_626 {dimension_numbers = #tpu.dot_dimension_numbers<[1], [0], [0], [1], [0, 0, 1, 1], [], []>} : vector<22x32xf32>, vector<32x32xf32>, vector<22x32xf32> -> vector<22x32xf32>
    %486 = arith.addf %481, %485 : vector<22x32xf32>
    %c8_627 = arith.constant 8 : index
    %c0_628 = arith.constant 0 : index
    %487 = vector.load %arg21[%c8_627, %c0_628] : memref<44x32xf32, #tpu.memory_space<vmem>>, vector<22x32xf32>
    %c5_629 = arith.constant 5 : index
    %c0_630 = arith.constant 0 : index
    %c0_631 = arith.constant 0 : index
    %488 = vector.load %arg9[%c5_629, %c0_630, %c0_631] : memref<9x32x32xf32, #tpu.memory_space<vmem>>, vector<1x32x32xf32>
    %489 = vector.shape_cast %488 : vector<1x32x32xf32> to vector<32x32xf32>
    %cst_632 = arith.constant dense<0.000000e+00> : vector<22x32xf32>
    %490 = tpu.matmul %487, %489, %cst_632 {dimension_numbers = #tpu.dot_dimension_numbers<[1], [0], [0], [1], [0, 0, 1, 1], [], []>} : vector<22x32xf32>, vector<32x32xf32>, vector<22x32xf32> -> vector<22x32xf32>
    %491 = arith.addf %486, %490 : vector<22x32xf32>
    %c12 = arith.constant 12 : index
    %c0_633 = arith.constant 0 : index
    %492 = vector.load %arg21[%c12, %c0_633] : memref<44x32xf32, #tpu.memory_space<vmem>>, vector<22x32xf32>
    %c6_634 = arith.constant 6 : index
    %c0_635 = arith.constant 0 : index
    %c0_636 = arith.constant 0 : index
    %493 = vector.load %arg9[%c6_634, %c0_635, %c0_636] : memref<9x32x32xf32, #tpu.memory_space<vmem>>, vector<1x32x32xf32>
    %494 = vector.shape_cast %493 : vector<1x32x32xf32> to vector<32x32xf32>
    %cst_637 = arith.constant dense<0.000000e+00> : vector<22x32xf32>
    %495 = tpu.matmul %492, %494, %cst_637 {dimension_numbers = #tpu.dot_dimension_numbers<[1], [0], [0], [1], [0, 0, 1, 1], [], []>} : vector<22x32xf32>, vector<32x32xf32>, vector<22x32xf32> -> vector<22x32xf32>
    %496 = arith.addf %491, %495 : vector<22x32xf32>
    %c13_638 = arith.constant 13 : index
    %c0_639 = arith.constant 0 : index
    %497 = vector.load %arg21[%c13_638, %c0_639] : memref<44x32xf32, #tpu.memory_space<vmem>>, vector<22x32xf32>
    %c7_640 = arith.constant 7 : index
    %c0_641 = arith.constant 0 : index
    %c0_642 = arith.constant 0 : index
    %498 = vector.load %arg9[%c7_640, %c0_641, %c0_642] : memref<9x32x32xf32, #tpu.memory_space<vmem>>, vector<1x32x32xf32>
    %499 = vector.shape_cast %498 : vector<1x32x32xf32> to vector<32x32xf32>
    %cst_643 = arith.constant dense<0.000000e+00> : vector<22x32xf32>
    %500 = tpu.matmul %497, %499, %cst_643 {dimension_numbers = #tpu.dot_dimension_numbers<[1], [0], [0], [1], [0, 0, 1, 1], [], []>} : vector<22x32xf32>, vector<32x32xf32>, vector<22x32xf32> -> vector<22x32xf32>
    %501 = arith.addf %496, %500 : vector<22x32xf32>
    %c14 = arith.constant 14 : index
    %c0_644 = arith.constant 0 : index
    %502 = vector.load %arg21[%c14, %c0_644] : memref<44x32xf32, #tpu.memory_space<vmem>>, vector<22x32xf32>
    %c8_645 = arith.constant 8 : index
    %c0_646 = arith.constant 0 : index
    %c0_647 = arith.constant 0 : index
    %503 = vector.load %arg9[%c8_645, %c0_646, %c0_647] : memref<9x32x32xf32, #tpu.memory_space<vmem>>, vector<1x32x32xf32>
    %504 = vector.shape_cast %503 : vector<1x32x32xf32> to vector<32x32xf32>
    %cst_648 = arith.constant dense<0.000000e+00> : vector<22x32xf32>
    %505 = tpu.matmul %502, %504, %cst_648 {dimension_numbers = #tpu.dot_dimension_numbers<[1], [0], [0], [1], [0, 0, 1, 1], [], []>} : vector<22x32xf32>, vector<32x32xf32>, vector<22x32xf32> -> vector<22x32xf32>
    %506 = arith.addf %501, %505 : vector<22x32xf32>
    %c10_649 = arith.constant 10 : index
    %c0_650 = arith.constant 0 : index
    %507 = tpu.strided_load %arg19[%c10_649, %c0_650] {strides = array<i32: 2, 1>} : memref<89x16xf32, #tpu.memory_space<vmem>>, vector<31x16xf32>
    %c0_651 = arith.constant 0 : index
    %c0_652 = arith.constant 0 : index
    %508 = vector.load %arg10[%c0_651, %c0_652] : memref<16x32xf32, #tpu.memory_space<vmem>>, vector<16x32xf32>
    %cst_653 = arith.constant dense<0.000000e+00> : vector<31x32xf32>
    %509 = tpu.matmul %507, %508, %cst_653 {dimension_numbers = #tpu.dot_dimension_numbers<[1], [0], [0], [1], [0, 0, 1, 1], [], []>} : vector<31x16xf32>, vector<16x32xf32>, vector<31x32xf32> -> vector<31x32xf32>
    %c0_654 = arith.constant 0 : index
    %c0_655 = arith.constant 0 : index
    %510 = vector.load %arg23[%c0_654, %c0_655] : memref<103x32xf32, #tpu.memory_space<vmem>>, vector<31x32xf32>
    tpu.vector_store %arg23[%c0_654, %c0_655], %509 {strides = array<i32>} : memref<103x32xf32, #tpu.memory_space<vmem>>, vector<31x32xf32>,
    %c0_656 = arith.constant 0 : index
    %c0_657 = arith.constant 0 : index
    %511 = vector.load %arg22[%c0_656, %c0_657] : memref<222x32xf32, #tpu.memory_space<vmem>>, vector<22x32xf32>
    tpu.vector_store %arg22[%c0_656, %c0_657], %506 {strides = array<i32>} : memref<222x32xf32, #tpu.memory_space<vmem>>, vector<22x32xf32>,
    %cst_658 = arith.constant 0.000000e+00 : f32
    %512 = vector.broadcast %cst_658 : f32 to vector<1x32xf32>
    %c0_659 = arith.constant 0 : index
    %c0_660 = arith.constant 0 : index
    %513 = vector.load %arg22[%c0_659, %c0_660] : memref<222x32xf32, #tpu.memory_space<vmem>>, vector<4x32xf32>
    %c0_661 = arith.constant 0 : index
    %c0_662 = arith.constant 0 : index
    %514 = vector.load %arg23[%c0_661, %c0_662] : memref<103x32xf32, #tpu.memory_space<vmem>>, vector<4x32xf32>
    %515 = arith.addf %513, %514 : vector<4x32xf32>
    %cst_663 = arith.constant dense<0.000000e+00> : vector<32xf32>
    %516 = vector.multi_reduction <add>, %515, %cst_663 [0] : vector<4x32xf32> to vector<32xf32>
    %517 = vector.shape_cast %516 : vector<32xf32> to vector<1x32xf32>
    %518 = arith.addf %512, %517 : vector<1x32xf32>
    %c6_664 = arith.constant 6 : index
    %c0_665 = arith.constant 0 : index
    %519 = vector.load %arg22[%c6_664, %c0_665] : memref<222x32xf32, #tpu.memory_space<vmem>>, vector<4x32xf32>
    %c9_666 = arith.constant 9 : index
    %c0_667 = arith.constant 0 : index
    %520 = vector.load %arg23[%c9_666, %c0_667] : memref<103x32xf32, #tpu.memory_space<vmem>>, vector<4x32xf32>
    %521 = arith.addf %519, %520 : vector<4x32xf32>
    %cst_668 = arith.constant dense<0.000000e+00> : vector<32xf32>
    %522 = vector.multi_reduction <add>, %521, %cst_668 [0] : vector<4x32xf32> to vector<32xf32>
    %523 = vector.shape_cast %522 : vector<32xf32> to vector<1x32xf32>
    %524 = arith.addf %518, %523 : vector<1x32xf32>
    %c12_669 = arith.constant 12 : index
    %c0_670 = arith.constant 0 : index
    %525 = vector.load %arg22[%c12_669, %c0_670] : memref<222x32xf32, #tpu.memory_space<vmem>>, vector<4x32xf32>
    %c18_671 = arith.constant 18 : index
    %c0_672 = arith.constant 0 : index
    %526 = vector.load %arg23[%c18_671, %c0_672] : memref<103x32xf32, #tpu.memory_space<vmem>>, vector<4x32xf32>
    %527 = arith.addf %525, %526 : vector<4x32xf32>
    %cst_673 = arith.constant dense<0.000000e+00> : vector<32xf32>
    %528 = vector.multi_reduction <add>, %527, %cst_673 [0] : vector<4x32xf32> to vector<32xf32>
    %529 = vector.shape_cast %528 : vector<32xf32> to vector<1x32xf32>
    %530 = arith.addf %524, %529 : vector<1x32xf32>
    %c18_674 = arith.constant 18 : index
    %c0_675 = arith.constant 0 : index
    %531 = vector.load %arg22[%c18_674, %c0_675] : memref<222x32xf32, #tpu.memory_space<vmem>>, vector<4x32xf32>
    %c27_676 = arith.constant 27 : index
    %c0_677 = arith.constant 0 : index
    %532 = vector.load %arg23[%c27_676, %c0_677] : memref<103x32xf32, #tpu.memory_space<vmem>>, vector<4x32xf32>
    %533 = arith.addf %531, %532 : vector<4x32xf32>
    %cst_678 = arith.constant dense<0.000000e+00> : vector<32xf32>
    %534 = vector.multi_reduction <add>, %533, %cst_678 [0] : vector<4x32xf32> to vector<32xf32>
    %535 = vector.shape_cast %534 : vector<32xf32> to vector<1x32xf32>
    %536 = arith.addf %530, %535 : vector<1x32xf32>
    %cst_679 = arith.constant 6.250000e-02 : f32
    %537 = vector.broadcast %cst_679 : f32 to vector<1x32xf32>
    %538 = arith.mulf %536, %537 : vector<1x32xf32>
    %c0_680 = arith.constant 0 : index
    %c0_681 = arith.constant 0 : index
    %539 = vector.load %arg11[%c0_680, %c0_681] : memref<32x10xf32, #tpu.memory_space<vmem>>, vector<32x10xf32>
    %cst_682 = arith.constant dense<0.000000e+00> : vector<1x10xf32>
    %540 = tpu.matmul %538, %539, %cst_682 {dimension_numbers = #tpu.dot_dimension_numbers<[1], [0], [0], [1], [0, 0, 1, 1], [], []>} : vector<1x32xf32>, vector<32x10xf32>, vector<1x10xf32> -> vector<1x10xf32>
    %c0_683 = arith.constant 0 : index
    %c0_684 = arith.constant 0 : index
    %c0_685 = arith.constant 0 : index
    %541 = vector.load %arg12[%c0_683, %c0_684, %c0_685] : memref<1x1x10xf32, #tpu.memory_space<vmem>>, vector<1x1x10xf32>
    %542 = vector.shape_cast %541 : vector<1x1x10xf32> to vector<1x10xf32>
    %543 = vector.shape_cast %540 : vector<1x10xf32> to vector<1x1x10xf32>
    tpu.vector_store %arg12[%c0_683, %c0_684, %c0_685], %543 {strides = array<i32>} : memref<1x1x10xf32, #tpu.memory_space<vmem>>, vector<1x1x10xf32>,
    return
  }
  func.func @transform_0(%arg0: i32) -> (i32, i32, i32) {
    %c0_i32 = arith.constant 0 : i32
    %c0_i32_0 = arith.constant 0 : i32
    %c0_i32_1 = arith.constant 0 : i32
    return %arg0, %c0_i32, %c0_i32_0 : i32, i32, i32
  }
  func.func @transform_1(%arg0: i32) -> (i32, i32, i32) {
    %c0_i32 = arith.constant 0 : i32
    %c0_i32_0 = arith.constant 0 : i32
    %c0_i32_1 = arith.constant 0 : i32
    %c0_i32_2 = arith.constant 0 : i32
    return %c0_i32, %c0_i32_0, %c0_i32_1 : i32, i32, i32
  }
  func.func @transform_2(%arg0: i32) -> (i32, i32, i32) {
    %c0_i32 = arith.constant 0 : i32
    %c0_i32_0 = arith.constant 0 : i32
    %c0_i32_1 = arith.constant 0 : i32
    %c0_i32_2 = arith.constant 0 : i32
    return %c0_i32, %c0_i32_0, %c0_i32_1 : i32, i32, i32
  }
  func.func @transform_3(%arg0: i32) -> (i32, i32, i32) {
    %c0_i32 = arith.constant 0 : i32
    %c0_i32_0 = arith.constant 0 : i32
    %c0_i32_1 = arith.constant 0 : i32
    %c0_i32_2 = arith.constant 0 : i32
    return %c0_i32, %c0_i32_0, %c0_i32_1 : i32, i32, i32
  }
  func.func @transform_4(%arg0: i32) -> (i32, i32, i32) {
    %c0_i32 = arith.constant 0 : i32
    %c0_i32_0 = arith.constant 0 : i32
    %c0_i32_1 = arith.constant 0 : i32
    %c0_i32_2 = arith.constant 0 : i32
    return %c0_i32, %c0_i32_0, %c0_i32_1 : i32, i32, i32
  }
  func.func @transform_5(%arg0: i32) -> (i32, i32, i32) {
    %c0_i32 = arith.constant 0 : i32
    %c0_i32_0 = arith.constant 0 : i32
    %c0_i32_1 = arith.constant 0 : i32
    %c0_i32_2 = arith.constant 0 : i32
    return %c0_i32, %c0_i32_0, %c0_i32_1 : i32, i32, i32
  }
  func.func @transform_6(%arg0: i32) -> (i32, i32) {
    %c0_i32 = arith.constant 0 : i32
    %c0_i32_0 = arith.constant 0 : i32
    %c0_i32_1 = arith.constant 0 : i32
    return %c0_i32, %c0_i32_0 : i32, i32
  }
  func.func @transform_7(%arg0: i32) -> (i32, i32, i32) {
    %c0_i32 = arith.constant 0 : i32
    %c0_i32_0 = arith.constant 0 : i32
    %c0_i32_1 = arith.constant 0 : i32
    %c0_i32_2 = arith.constant 0 : i32
    return %c0_i32, %c0_i32_0, %c0_i32_1 : i32, i32, i32
  }
  func.func @transform_8(%arg0: i32) -> (i32, i32, i32) {
    %c0_i32 = arith.constant 0 : i32
    %c0_i32_0 = arith.constant 0 : i32
    %c0_i32_1 = arith.constant 0 : i32
    %c0_i32_2 = arith.constant 0 : i32
    return %c0_i32, %c0_i32_0, %c0_i32_1 : i32, i32, i32
  }
  func.func @transform_9(%arg0: i32) -> (i32, i32) {
    %c0_i32 = arith.constant 0 : i32
    %c0_i32_0 = arith.constant 0 : i32
    %c0_i32_1 = arith.constant 0 : i32
    return %c0_i32, %c0_i32_0 : i32, i32
  }
  func.func @transform_10(%arg0: i32) -> (i32, i32) {
    %c0_i32 = arith.constant 0 : i32
    %c0_i32_0 = arith.constant 0 : i32
    %c0_i32_1 = arith.constant 0 : i32
    return %c0_i32, %c0_i32_0 : i32, i32
  }
  func.func @transform_11(%arg0: i32) -> (i32, i32, i32) {
    %c0_i32 = arith.constant 0 : i32
    %c0_i32_0 = arith.constant 0 : i32
    %c0_i32_1 = arith.constant 0 : i32
    return %arg0, %c0_i32, %c0_i32_0 : i32, i32, i32
  }
}

</mosaic_0001>

<bundles_post_ra>
// kernel: forward.1
= control target key start
LH: loop header
LB: loop body
LE: loop exit
PB: predicated region body
PF: predicated region fallthrough
CT: control target
= control target key end

     0   :  { %s25725_s0 = inlined_call_operand.vmem [shape: f32[2,256,3], index: 0, kind: input, shape index: {}]   ;;  %s25726_s1 = inlined_call_operand.vmem [shape: f32[9,3,8], index: 1, kind: input, shape index: {}]   ;;  %s25727_s2 = inlined_call_operand.hbm [shape: f32[9,8,8], index: 2, kind: input, shape index: {}]   ;;  %s25728_s3 = inlined_call_operand.hbm [shape: f32[9,8,8], index: 3, kind: input, shape index: {}]   ;;  %s25729_s4 = inlined_call_operand.hbm [shape: f32[9,8,16], index: 4, kind: input, shape index: {}]   ;;  %s25730_s5 = inlined_call_operand.vmem [shape: f32[9,16,16], index: 5, kind: input, shape index: {}]   ;;  %s25731_s6 = inlined_call_operand.hbm [shape: f32[8,16], index: 6, kind: input, shape index: {}]   ;;  %s25732_s7 = inlined_call_operand.vmem [shape: f32[9,16,32], index: 7, kind: input, shape index: {}]   ;;  %s25733_s8 = inlined_call_operand.vmem [shape: f32[9,32,32], index: 8, kind: input, shape index: {}]   ;;  %s25734_s9 = inlined_call_operand.hbm [shape: f32[16,32], index: 9, kind: input, shape index: {}]   ;;  %s25735_s10 = inlined_call_operand.vmem [shape: f32[32,10], index: 10, kind: input, shape index: {}]   ;;  %s25736_s11 = inlined_call_operand.hbm [shape: f32[2,1,10], index: 11, kind: output, shape index: {}]  }
   0x1   :  { %25848 = sst [smem:[#allocation72_spill]] %s25728_s3 }
   0x2   :  { %25849 = sst [smem:[#allocation73_spill]] %s25736_s11 }
   0x3   :  { %16 = vsyncpa [#allocation14], 0 }
   0x4   :  { %17 = vsyncpa [#allocation17], 0 }
   0x5   :  { %18 = vsyncpa [#allocation20], 0 }
   0x6   :  { %19 = vsyncpa [#allocation15], 0 }
   0x7   :  { %21 = vsyncpa [#allocation15 + $0x1], 0  ;;  %s21859_s17 = smov 0   ;;  %s21861_s18 = smov 0  }
   0x8   :  { %s21863_s19 = smov 0   ;;  %s21865_s20 = smov 0  }
   0x9 LB: > { %25850 = sst [smem:[#allocation27_spill]] %s21774_s17  ;;  %s21880_s21 = sadd.s32 4294967295, %s21786_s20   ;;  %s21786_s20 = sphi %s21865_s20, %s26052_s20   ;;  %s21782_s19 = sphi %s21863_s19, %s26054_s19   ;;  %s21778_s18 = sphi %s21861_s18, %s26056_s18   ;;  %s21774_s17 = sphi %s21859_s17, %s26055_s17  }
   0xa   : > { %25851 = sst [smem:[#allocation28_spill]] %s21782_s19  ;;  %s16041_s22 = sadd.s32 4294967294, %s21786_s20  }
   0xb   : > { %25852 = sst [smem:[#allocation29_spill]] %s21786_s20  ;;  %s21884_s23 = sadd.s32 1, %s21786_s20  }
   0xc   : > { %25853 = sst [smem:[#allocation30_spill]] %s21884_s23  ;;  %s270_s24 = sadd.s32 1, %s21782_s19 }
   0xd   : > { %s267_s25 = ssub.s32 %s21786_s20, %s21884_s23  ;;  %p280_p0 = scmp.ne.s32.totalorder %s21782_s19, %s21778_s18 }
   0xe   : > { %p268_p1 = scmp.eq.s32.totalorder %s267_s25, 0  ;;  %p281_p2 = scmp.eq.s32.totalorder %s21880_s21, 1 }
   0xf   : > { %p286_p3 = scmp.ne.s32.totalorder %s21778_s18, %s21774_s17  ;;  %p287_p4 = scmp.eq.s32.totalorder %s16041_s22, 1 }
  0x10   : > { %s21895_s26 = scalar_select %p268_p1, %s21782_s19, %s270_s24  }
  0x11   : > { %p21897_p5 = por %p281_p2, %p280_p0  ;;  %p21901_p6 = por %p287_p4, %p286_p3 }
  0x12   : > { %25854 = sst [smem:[#allocation31_spill]] %s21895_s26  ;;  %p16042_p7 = scmp.ge.s32.totalorder %s21786_s20, 1 }
  0x13   : > { %s25855_s27 = scalar_select %p21897_p5, 1, 0 }
  0x14   : > { %s25856_s28 = scalar_select %p21901_p6, 1, 0 }
  0x15   : > { %p294_p8 = scmp.lt.s32.totalorder %s21786_s20, 3  ;;  %p25740_p9 = scmp.eq.s32.totalorder %s21880_s21, 0 }
  0x16   : > { %25857 = sst [smem:[#allocation32_spill]] %s25856_s28  ;;  %s21788_s30 = smov [#allocation16]  }
  0x17   : > { %p21908_p10 = pnand %p16042_p7, %p294_p8  ;;  %s322_s12 = sshll.u32 %s21788_s30, 4  ;;  %s21914_s12 = int_to_ptr.vmem [resolvable:$true] %s322_s12 }
  0x18   : > { %s21789_s14 = smov [#allocation19]   ;;  %s21790_s16 = smov [#allocation13]  }
  0x19   : > { %s25858_s29 = scalar_select %p21908_p10, 1, 0 }
  0x1a   : > { %p21499_p11 = pneg %p21908_p10  ;;  %s352_s15 = sshll.u32 %s21789_s14, 4  ;;  %s21922_s15 = int_to_ptr.vmem [resolvable:$true] %s352_s15 }
  0x1b   : > { %s21924_s22 = sshll.u32 %s21790_s16, 4  ;;  %s25860_s3 = sld [smem:[#allocation72_spill]]  ;;  %s310_s22 = int_to_ptr.vmem [resolvable:$true] %s21924_s22 }
  0x1c   : > { %p21918_p12 = pnand %p25740_p9, %p21499_p11 }
  0x1e   : > { %p21934_p0 = pneg %p21918_p12 }
  0x21   : > { %s21572_s26 = scalar_lea.hbm %s25860_s3, 1152 }
  0x22   : > { %p21573_p13 = scmp.ne.s32.totalorder %s25860_s3, %s21572_s26  ;;  %p21579_p3 = scmp.lt.u32.totalorder %s21572_s26, %s25860_s3 }
  0x24   : > { %p21575_p1 = pnand %p21934_p0, %p21573_p13 }
  0x26   : > { %p21576_p2 = pneg %p21575_p1 }
  0x28   : > { %p21581_p4 = pnand %p21579_p3, %p21576_p2 }
  0x2a   : > { %21584 = shalt.err (!%p21581_p4)
}
  0x2b   : > { %s21585_s19 = scalar_lea.vmem %s21914_s12, 1152  ;;  %p21593_p9 = scmp.lt.s32.totalorder %s21914_s12, %s21914_s12 }
  0x2c   : > { %p21586_p7 = scmp.ne.s32.totalorder %s21914_s12, %s21585_s19  ;;  %p21594_p6 = scmp.lt.s32.totalorder %s21585_s19, %s21585_s19 }
  0x2e   : > { %p21588_p8 = pnand %p21586_p7, %p21934_p0  ;;  %p21595_p13 = por %p21594_p6, %p21593_p9 }
  0x30   : > { %p21589_p11 = pneg %p21588_p8 }
  0x32   : > { %p21596_p1 = pnand %p21595_p13, %p21589_p11 }
  0x34   : > { %21599 = shalt.err (!%p21596_p1)
}
  0x35   : > { %s21791_s24 = smov 128   ;;  %s21792_s26 = smov 8  }
  0x36   : > { %21505 = dma.hbm_to_vmem [thread:$0]  (!%p21918_p12), %s25860_s3, 1152, %s21914_s12, [#allocation17], %s21791_s24, %s21791_s24, %s21792_s26  }
  0x37   : > { %s21600_s19 = scalar_lea.hbm %s25731_s6, 128 }
  0x38   : > { %p21601_p6 = scmp.ne.s32.totalorder %s25731_s6, %s21600_s19  ;;  %p21607_p3 = scmp.lt.u32.totalorder %s21600_s19, %s25731_s6 }
  0x3a   : > { %p21603_p9 = pnand %p21601_p6, %p21934_p0 }
  0x3c   : > { %p21604_p2 = pneg %p21603_p9 }
  0x3e   : > { %p21609_p4 = pnand %p21607_p3, %p21604_p2 }
  0x40   : > { %21612 = shalt.err (!%p21609_p4)
}
  0x41   : > { %s21613_s12 = scalar_lea.vmem %s21922_s15, 128  ;;  %p21621_p13 = scmp.lt.s32.totalorder %s21922_s15, %s21922_s15 }
  0x42   : > { %p21614_p7 = scmp.ne.s32.totalorder %s21922_s15, %s21613_s12  ;;  %p21622_p1 = scmp.lt.s32.totalorder %s21613_s12, %s21613_s12 }
  0x44   : > { %p21616_p8 = pnand %p21614_p7, %p21934_p0  ;;  %p21623_p6 = por %p21622_p1, %p21621_p13 }
  0x46   : > { %p21617_p11 = pneg %p21616_p8 }
  0x48   : > { %p21624_p9 = pnand %p21623_p6, %p21617_p11 }
  0x4a   : > { %21627 = shalt.err (!%p21624_p9)
}
  0x4b   : > { %21511 = dma.hbm_to_vmem [thread:$0]  (!%p21918_p12), %s25731_s6, 128, %s21922_s15, [#allocation20]  }
  0x4c   : > { %s21628_s25 = scalar_lea.hbm %s25727_s2, 1152 }
  0x4d   : > { %p21629_p2 = scmp.ne.s32.totalorder %s25727_s2, %s21628_s25  ;;  %p21635_p7 = scmp.lt.u32.totalorder %s21628_s25, %s25727_s2 }
  0x4f   : > { %p21631_p3 = pnand %p21629_p2, %p21934_p0 }
  0x51   : > { %p21632_p4 = pneg %p21631_p3 }
  0x53   : > { %p21637_p8 = pnand %p21635_p7, %p21632_p4 }
  0x55   : > { %21640 = shalt.err (!%p21637_p8)
}
  0x56   : > { %s21641_s12 = scalar_lea.vmem %s310_s22, 1152  ;;  %p21649_p6 = scmp.lt.s32.totalorder %s310_s22, %s310_s22 }
  0x57   : > { %p21642_p11 = scmp.ne.s32.totalorder %s310_s22, %s21641_s12  ;;  %p21650_p9 = scmp.lt.s32.totalorder %s21641_s12, %s21641_s12 }
  0x59   : > { %p21644_p13 = pnand %p21642_p11, %p21934_p0  ;;  %p21651_p5 = por %p21650_p9, %p21649_p6 }
  0x5b   : > { %p21645_p1 = pneg %p21644_p13 }
  0x5d   : > { %p21652_p10 = pnand %p21651_p5, %p21645_p1 }
  0x5f   : > { %21655 = shalt.err (!%p21652_p10)
}
  0x60   : > { %21502 = dma.hbm_to_vmem [thread:$0]  (!%p21918_p12), %s25727_s2, 1152, %s310_s22, [#allocation14], %s21791_s24, %s21791_s24, %s21792_s26  }
  0x61   : > { %s21793_s17 = smov [#allocation18]   ;;  %s21794_s28 = smov [#allocation21]  }
  0x62   : > { %s335_s20 = sshll.u32 %s21793_s17, 4  ;;  %s368_s25 = sshll.u32 %s21794_s28, 4  ;;  %s336_s20 = int_to_ptr.vmem [resolvable:$true] %s335_s20  ;;  %s369_s25 = int_to_ptr.vmem [resolvable:$true] %s368_s25 }
  0x63   : > { %s21656_s16 = scalar_lea.hbm %s25729_s4, 1152 }
  0x64   : > { %p21657_p5 = scmp.ne.s32.totalorder %s25729_s4, %s21656_s16  ;;  %p21663_p3 = scmp.lt.u32.totalorder %s21656_s16, %s25729_s4 }
  0x66   : > { %p21659_p10 = pnand %p21657_p5, %p21934_p0 }
  0x68   : > { %p21660_p2 = pneg %p21659_p10 }
  0x6a   : > { %p21665_p4 = pnand %p21663_p3, %p21660_p2 }
  0x6c   : > { %21668 = shalt.err (!%p21665_p4)
}
  0x6d   : > { %s21669_s22 = scalar_lea.vmem %s336_s20, 1152  ;;  %p21677_p13 = scmp.lt.s32.totalorder %s336_s20, %s336_s20 }
  0x6e   : > { %p21670_p7 = scmp.ne.s32.totalorder %s336_s20, %s21669_s22  ;;  %p21678_p1 = scmp.lt.s32.totalorder %s21669_s22, %s21669_s22 }
  0x70   : > { %p21672_p8 = pnand %p21670_p7, %p21934_p0  ;;  %p21679_p6 = por %p21678_p1, %p21677_p13 }
  0x72   : > { %p21673_p11 = pneg %p21672_p8 }
  0x74   : > { %p21680_p9 = pnand %p21679_p6, %p21673_p11 }
  0x76   : > { %21683 = shalt.err (!%p21680_p9)
}
  0x77   : > { %21508 = dma.hbm_to_vmem [thread:$0]  (!%p21918_p12), %s25729_s4, 1152, %s336_s20, [#allocation17], %s21791_s24, %s21791_s24, %s21792_s26  }
  0x78   : > { %s21684_s30 = scalar_lea.hbm %s25734_s9, 256 }
  0x79   : > { %p21685_p5 = scmp.ne.s32.totalorder %s25734_s9, %s21684_s30  ;;  %p21691_p3 = scmp.lt.u32.totalorder %s21684_s30, %s25734_s9 }
  0x7b   : > { %p21687_p10 = pnand %p21685_p5, %p21934_p0 }
  0x7d   : > { %p21688_p2 = pneg %p21687_p10 }
  0x7f   : > { %p21693_p4 = pnand %p21691_p3, %p21688_p2 }
  0x81   : > { %21696 = shalt.err (!%p21693_p4)
}
  0x82   : > { %s21697_s15 = scalar_lea.vmem %s369_s25, 256  ;;  %p21705_p13 = scmp.lt.s32.totalorder %s369_s25, %s369_s25 }
  0x83   : > { %p21698_p7 = scmp.ne.s32.totalorder %s369_s25, %s21697_s15  ;;  %p21706_p1 = scmp.lt.s32.totalorder %s21697_s15, %s21697_s15 }
  0x85   : > { %p21700_p8 = pnand %p21698_p7, %p21934_p0  ;;  %p21707_p6 = por %p21706_p1, %p21705_p13 }
  0x87   : > { %p21701_p11 = pneg %p21700_p8 }
  0x89   : > { %p21708_p9 = pnand %p21707_p6, %p21701_p11 }
  0x8b   : > { %21711 = shalt.err (!%p21708_p9)
}
  0x8c   : > { %21514 = dma.hbm_to_vmem [thread:$0]  (!%p21918_p12), %s25734_s9, 256, %s369_s25, [#allocation20], %s21791_s24, %s21791_s24, %s21792_s26  }
  0x8d   : > { %p25862_p5 = scmp.ne.s32.totalorder %s25858_s29, 0 }
  0x8f   : > { %395 = sbr.rel (%p25862_p5) target bundleno = 4142 (0x102e), region = 64 }
  0x96   : > { %p25863_p0 = scmp.eq.s32.totalorder %s21880_s21, 0 }
  0x98   : > { %21757 = dma.done.wait (%p25863_p0), [#allocation14], 1152   ;;  %p25864_p10 = pmov %p25863_p0 }
  0x99   : > { %p25865_p2 = pmov %p25863_p0 }
  0x9a   : > { %21759 = vsyncadd (%p25864_p10), [#allocation14], 4294966144 }
  0x9b   : > { %21761 = dma.done.wait (%p25865_p2), [#allocation17], 2304   ;;  %p25866_p3 = pmov %p25863_p0 }
  0x9c   : > { %p25867_p4 = pmov %p25863_p0 }
  0x9d   : > { %21763 = vsyncadd (%p25866_p3), [#allocation17], 4294964992 }
  0x9e   : > { %21765 = dma.done.wait (%p25867_p4), [#allocation20], 384   ;;  %p25868_p12 = pmov %p25863_p0 }
  0x9f   : > { %vm3550_vm0 = vcmask 64512   ;;  %vm12146_vm1 = vcmask 122880   ;;  %v25747_v0 = vmov 0.0   ;;  %p450_p7 = scmp.lt.s32.totalorder %s21880_s21, 1  ;;  %vm599_vm2 = vcmask 1042432   ;;  %s448_s19 = sand.u32 1, %s21778_s18  }
  0xa0   : > { %21767 = vsyncadd (%p25868_p12), [#allocation20], 4294966912  ;;  %3612 = vst.msk [vmem:[#allocation2 + $0x100] sm:$0xff] %vm3550_vm0, %v25747_v0  ;;  %vm514_vm3 = vcmask 23552   ;;  %v16057_v1 = vld [vmem:[%s25726_s1 + $0x4] sm:$0x7] }
  0xa1   : > { %10159 = vst.msk [vmem:[#allocation5 + $0xf0] sm:$0xff] %vm3550_vm0, %v25747_v0  ;;  %10160 = vst.msk [vmem:[#allocation5 + $0xf8] sm:$0xff] %vm3550_vm0, %v25747_v0  ;;  %s451_s23 = scalar_select %p450_p7, %s21880_s21, 1  ;;  %18309 = vmatprep.subr.msk.mxu0 %vm599_vm2, %v16057_v1  ;;  %v483_v4 = vld [vmem:[%s25726_s1] sm:$0x7]  ;;  %vm3578_vm4 = vcmask 62464  }
  0xa2   : > { %10161 = vst.msk [vmem:[#allocation5 + $0x100] sm:$0xff] %vm3550_vm0, %v25747_v0  ;;  %3580 = vst.msk [vmem:[#allocation2] sm:$0xff] %vm3550_vm0, %v25747_v0  ;;  %18310 = vmatpush3.msk.msra.mxu0 %vm599_vm2, %v16057_v1  ;;  %v16116_v11 = vld [vmem:[%s25726_s1 + $0x8] sm:$0x7]  ;;  %v16146_v35 = vld [vmem:[%s25726_s1 + $0xc] sm:$0x7] }
  0xa3   : > { %13706 = vst.msk [vmem:[#allocation8 + $0x58] sm:$0x1] %vm12146_vm1, %v25747_v0  ;;  %s17167_s29 = sshll.u32 %s451_s23, 8  ;;  %18353 = vmatprep.subr.msk.mxu0 %vm599_vm2, %v483_v4  ;;  %v16176_v1 = vld [vmem:[%s25726_s1 + $0x10] sm:$0x7]  ;;  %vm21796_vm5 = vmmov 0  }
  0xa4   : > { %3581 = vst.msk [vmem:[#allocation2 + $0x8] sm:$0xff] %vm3550_vm0, %v25747_v0  ;;  %3582 = vst.msk [vmem:[#allocation2 + $0x10] sm:$0xff] %vm3550_vm0, %v25747_v0  ;;  %s22261_s26 = scalar_lea.vmem %s25725_s0, %s17167_s29  ;;  %vm12120_vm6 = vcmask 130048   ;;  %vm12133_vm7 = vcmask 129024   ;;  %vm13693_vm8 = vcmask 126976   ;;  %vm14770_vm9 = vcmask 261120  }
  0xa5   : > { %3583 = vst.msk [vmem:[#allocation2 + $0x18] sm:$0xff] %vm3550_vm0, %v25747_v0  ;;  %3584 = vst.msk [vmem:[#allocation2 + $0x20] sm:$0xff] %vm3550_vm0, %v25747_v0  ;;  %v484_v2 = vld [vmem:[%s22261_s26 + $0x1] sm:$0xff]  ;;  %v485_v3 = vld [vmem:[%s22261_s26 + $0x9] sm:$0xff]  ;;  %vm14781_vm10 = vcmask 257024   ;;  %vm14774_vm11 = vcmask 260096  }
  0xa6   : > { %3585 = vst.msk [vmem:[#allocation2 + $0x28] sm:$0xff] %vm3550_vm0, %v25747_v0  ;;  %3586 = vst.msk [vmem:[#allocation2 + $0x30] sm:$0xff] %vm3550_vm0, %v25747_v0  ;;  %18311 = vmatprep.mubr.msk.f32.mxu0 %vm514_vm3, %v484_v2  ;;  %v22276_v5 = vld [vmem:[%s22261_s26 + $0x11] sm:$0xff]  ;;  %v22282_v6 = vld [vmem:[%s22261_s26 + $0x19] sm:$0xff]  ;;  %vm15797_vm12 = vcmask 259072   ;;  %s17164_s12 = sshll.u32 %s21880_s21, 4 }
  0xa7   : > { %3587 = vst.msk [vmem:[#allocation2 + $0x38] sm:$0xff] %vm3550_vm0, %v25747_v0  ;;  %3588 = vst.msk [vmem:[#allocation2 + $0x40] sm:$0xff] %vm3550_vm0, %v25747_v0  ;;  %18312 = vmatmul.mubr.msk.f32.vlgmr.msra.gmra.mrb[0].mxu0 %vm514_vm3, %v485_v3  ;;  %v22286_v7 = vld [vmem:[%s22261_s26 + $0x21] sm:$0xff]  ;;  %v22293_v8 = vld [vmem:[%s22261_s26 + $0x29] sm:$0xff]  ;;  %s449_s15 = scalar_lea.vmem [#allocation22], %s448_s19  ;;  %vm15921_vm13 = vcmask 73728  }
  0xa8   : > { %3589 = vst.msk [vmem:[#allocation2 + $0x48] sm:$0xff] %vm3550_vm0, %v25747_v0  ;;  %3590 = vst.msk [vmem:[#allocation2 + $0x50] sm:$0xff] %vm3550_vm0, %v25747_v0  ;;  %18314 = vmatprep.mubr.msk.f32.mxu0 %vm514_vm3, %v22276_v5  ;;  %18354 = vmatpush3.msk.msra.mxu0 %vm599_vm2, %v483_v4  ;;  %v22296_v9 = vld [vmem:[%s22261_s26 + $0x31] sm:$0xff]  ;;  %v22303_v10 = vld [vmem:[%s22261_s26 + $0x39] sm:$0xff]  ;;  %s15936_s20 = sshll.u32 %s449_s15, 4  ;;  %s26046_s29 = sld [smem:[#allocation73_spill]]  ;;  %s25685_s20 = int_to_ptr.vmem [resolvable:$true] %s15936_s20 }
  0xa9   : > { %3591 = vst.msk [vmem:[#allocation2 + $0x58] sm:$0xff] %vm3550_vm0, %v25747_v0  ;;  %3592 = vst.msk [vmem:[#allocation2 + $0x60] sm:$0xff] %vm3550_vm0, %v25747_v0  ;;  %v22309_v12 = vld [vmem:[%s22261_s26 + $0x41] sm:$0xff]  ;;  %18397 = vmatprep.subr.msk.mxu0 %vm599_vm2, %v16116_v11  ;;  %v22317_v13 = vld [vmem:[%s22261_s26 + $0x49] sm:$0xff]  ;;  %s15924_s24 = scalar_lea.sflag [#allocation15], %s448_s19  ;;  %s21712_s25 = scalar_lea.vmem %s25685_s20, 16 }
  0xaa   : > { %3593 = vst.msk [vmem:[#allocation2 + $0x68] sm:$0xff] %vm3550_vm0, %v25747_v0  ;;  %3594 = vst.msk [vmem:[#allocation2 + $0x70] sm:$0xff] %vm3550_vm0, %v25747_v0  ;;  %v22320_v14 = vld [vmem:[%s22261_s26 + $0x51] sm:$0xff]  ;;  %v22327_v15 = vld [vmem:[%s22261_s26 + $0x59] sm:$0xff]  ;;  %p21713_p8 = scmp.ne.s32.totalorder %s25685_s20, %s21712_s25  ;;  %p26047_p11 = scmp.ne.s32.totalorder %s25855_s27, 0 }
  0xab   : > { %3595 = vst.msk [vmem:[#allocation2 + $0x78] sm:$0xff] %vm3550_vm0, %v25747_v0  ;;  %3596 = vst.msk [vmem:[#allocation2 + $0x80] sm:$0xff] %vm3550_vm0, %v25747_v0  ;;  %18315 = vmatmul.mubr.msk.f32.gmra.mrb[2].mxu0 %vm514_vm3, %v22282_v6  ;;  %v22330_v16 = vld [vmem:[%s22261_s26 + $0x61] sm:$0xff]  ;;  %v22337_v17 = vld [vmem:[%s22261_s26 + $0x69] sm:$0xff]  ;;  %s21798_s21 = smov [#allocation22]  }
  0xac   : > { %3597 = vst.msk [vmem:[#allocation2 + $0x88] sm:$0xff] %vm3550_vm0, %v25747_v0  ;;  %3598 = vst.msk [vmem:[#allocation2 + $0x90] sm:$0xff] %vm3550_vm0, %v25747_v0  ;;  %18317 = vmatprep.mubr.msk.f32.mxu0 %vm514_vm3, %v22286_v7  ;;  %v22340_v18 = vld [vmem:[%s22261_s26 + $0x71] sm:$0xff]  ;;  %v22347_v19 = vld [vmem:[%s22261_s26 + $0x79] sm:$0xff]  ;;  %p21714_p13 = pnand %p21713_p8, %p26047_p11 }
  0xad   : > { %3599 = vst.msk [vmem:[#allocation2 + $0x98] sm:$0xff] %vm3550_vm0, %v25747_v0  ;;  %3600 = vst.msk [vmem:[#allocation2 + $0xa0] sm:$0xff] %vm3550_vm0, %v25747_v0  ;;  %v22350_v20 = vld [vmem:[%s22261_s26 + $0x81] sm:$0xff]  ;;  %v22357_v21 = vld [vmem:[%s22261_s26 + $0x89] sm:$0xff] }
  0xae   : > { %3601 = vst.msk [vmem:[#allocation2 + $0xa8] sm:$0xff] %vm3550_vm0, %v25747_v0  ;;  %3602 = vst.msk [vmem:[#allocation2 + $0xb0] sm:$0xff] %vm3550_vm0, %v25747_v0  ;;  %v22360_v22 = vld [vmem:[%s22261_s26 + $0x91] sm:$0xff]  ;;  %v22367_v23 = vld [vmem:[%s22261_s26 + $0x99] sm:$0xff]  ;;  %s25683_s13 = scalar_lea.hbm %s26046_s29, %s17164_s12  ;;  %p21715_p1 = pneg %p21714_p13 }
  0xaf   : > { %3603 = vst.msk [vmem:[#allocation2 + $0xb8] sm:$0xff] %vm3550_vm0, %v25747_v0  ;;  %3604 = vst.msk [vmem:[#allocation2 + $0xc0] sm:$0xff] %vm3550_vm0, %v25747_v0  ;;  %18318 = vmatmul.mubr.msk.f32.gmra.mrb[4].mxu0 %vm514_vm3, %v22293_v8  ;;  %v22370_v24 = vld [vmem:[%s22261_s26 + $0xa1] sm:$0xff]  ;;  %v22377_v25 = vld [vmem:[%s22261_s26 + $0xa9] sm:$0xff] }
  0xb0   : > { %3605 = vst.msk [vmem:[#allocation2 + $0xc8] sm:$0xff] %vm3550_vm0, %v25747_v0  ;;  %3606 = vst.msk [vmem:[#allocation2 + $0xd0] sm:$0xff] %vm3550_vm0, %v25747_v0  ;;  %18320 = vmatprep.mubr.msk.f32.mxu0 %vm514_vm3, %v22296_v9  ;;  %v22380_v26 = vld [vmem:[%s22261_s26 + $0xb1] sm:$0xff]  ;;  %v22387_v27 = vld [vmem:[%s22261_s26 + $0xb9] sm:$0xff] }
  0xb1   : > { %3607 = vst.msk [vmem:[#allocation2 + $0xd8] sm:$0xff] %vm3550_vm0, %v25747_v0  ;;  %3608 = vst.msk [vmem:[#allocation2 + $0xe0] sm:$0xff] %vm3550_vm0, %v25747_v0  ;;  %v22390_v28 = vld [vmem:[%s22261_s26 + $0xc1] sm:$0xff]  ;;  %v22397_v29 = vld [vmem:[%s22261_s26 + $0xc9] sm:$0xff] }
  0xb2   : > { %3609 = vst.msk [vmem:[#allocation2 + $0xe8] sm:$0xff] %vm3550_vm0, %v25747_v0  ;;  %3610 = vst.msk [vmem:[#allocation2 + $0xf0] sm:$0xff] %vm3550_vm0, %v25747_v0  ;;  %v22400_v30 = vld [vmem:[%s22261_s26 + $0xd1] sm:$0xff]  ;;  %v511_v31 = vld [vmem:[%s22261_s26 + $0xd9] sm:$0x3f] }
  0xb3   : > { %3611 = vst.msk [vmem:[#allocation2 + $0xf8] sm:$0xff] %vm3550_vm0, %v25747_v0  ;;  %6890 = vst.msk [vmem:[#allocation4] sm:$0xff] %vm3550_vm0, %v25747_v0  ;;  %18321 = vmatmul.mubr.msk.f32.gmra.mrb[6].mxu0 %vm514_vm3, %v22303_v10  ;;  %v455_v32 = vld [vmem:[%s22261_s26] sm:$0xff]  ;;  %v456_v33 = vld [vmem:[%s22261_s26 + $0x8] sm:$0xff] }
  0xb4   : > { %6891 = vst.msk [vmem:[#allocation4 + $0x8] sm:$0xff] %vm3550_vm0, %v25747_v0  ;;  %6892 = vst.msk [vmem:[#allocation4 + $0x10] sm:$0xff] %vm3550_vm0, %v25747_v0  ;;  %18323 = vmatprep.mubr.msk.f32.mxu0 %vm514_vm3, %v22309_v12  ;;  %v22412_v34 = vld [vmem:[%s22261_s26 + $0x10] sm:$0xff]  ;;  %v22422_v36 = vld [vmem:[%s22261_s26 + $0x18] sm:$0xff] }
  0xb5   : > { %6893 = vst.msk [vmem:[#allocation4 + $0x18] sm:$0xff] %vm3550_vm0, %v25747_v0  ;;  %6894 = vst.msk [vmem:[#allocation4 + $0x20] sm:$0xff] %vm3550_vm0, %v25747_v0  ;;  %v22425_v37 = vld [vmem:[%s22261_s26 + $0x20] sm:$0xff]  ;;  %v22433_v38 = vld [vmem:[%s22261_s26 + $0x28] sm:$0xff] }
  0xb6   : > { %6895 = vst.msk [vmem:[#allocation4 + $0x28] sm:$0xff] %vm3550_vm0, %v25747_v0  ;;  %6896 = vst.msk [vmem:[#allocation4 + $0x30] sm:$0xff] %vm3550_vm0, %v25747_v0  ;;  %v22436_v39 = vld [vmem:[%s22261_s26 + $0x30] sm:$0xff]  ;;  %v22443_v40 = vld [vmem:[%s22261_s26 + $0x38] sm:$0xff] }
  0xb7   : > { %6897 = vst.msk [vmem:[#allocation4 + $0x38] sm:$0xff] %vm3550_vm0, %v25747_v0  ;;  %6898 = vst.msk [vmem:[#allocation4 + $0x40] sm:$0xff] %vm3550_vm0, %v25747_v0  ;;  %18324 = vmatmul.mubr.msk.f32.gmra.mrb[8].mxu0 %vm514_vm3, %v22317_v13  ;;  %v22446_v41 = vld [vmem:[%s22261_s26 + $0x40] sm:$0xff]  ;;  %v22453_v42 = vld [vmem:[%s22261_s26 + $0x48] sm:$0xff] }
  0xb8   : > { %6899 = vst.msk [vmem:[#allocation4 + $0x48] sm:$0xff] %vm3550_vm0, %v25747_v0  ;;  %6900 = vst.msk [vmem:[#allocation4 + $0x50] sm:$0xff] %vm3550_vm0, %v25747_v0  ;;  %18326 = vmatprep.mubr.msk.f32.mxu0 %vm514_vm3, %v22320_v14  ;;  %v22456_v43 = vld [vmem:[%s22261_s26 + $0x50] sm:$0xff]  ;;  %v22463_v44 = vld [vmem:[%s22261_s26 + $0x58] sm:$0xff] }
  0xb9   : > { %6901 = vst.msk [vmem:[#allocation4 + $0x58] sm:$0xff] %vm3550_vm0, %v25747_v0  ;;  %6902 = vst.msk [vmem:[#allocation4 + $0x60] sm:$0xff] %vm3550_vm0, %v25747_v0  ;;  %v22466_v45 = vld [vmem:[%s22261_s26 + $0x60] sm:$0xff]  ;;  %v22473_v46 = vld [vmem:[%s22261_s26 + $0x68] sm:$0xff] }
  0xba   : > { %6903 = vst.msk [vmem:[#allocation4 + $0x68] sm:$0xff] %vm3550_vm0, %v25747_v0  ;;  %6904 = vst.msk [vmem:[#allocation4 + $0x70] sm:$0xff] %vm3550_vm0, %v25747_v0  ;;  %v22476_v47 = vld [vmem:[%s22261_s26 + $0x70] sm:$0xff]  ;;  %v22483_v48 = vld [vmem:[%s22261_s26 + $0x78] sm:$0xff] }
  0xbb   : > { %6905 = vst.msk [vmem:[#allocation4 + $0x78] sm:$0xff] %vm3550_vm0, %v25747_v0  ;;  %6906 = vst.msk [vmem:[#allocation4 + $0x80] sm:$0xff] %vm3550_vm0, %v25747_v0  ;;  %18327 = vmatmul.mubr.msk.f32.gmra.mrb[10].mxu0 %vm514_vm3, %v22327_v15  ;;  %v22486_v49 = vld [vmem:[%s22261_s26 + $0x80] sm:$0xff]  ;;  %v22493_v50 = vld [vmem:[%s22261_s26 + $0x88] sm:$0xff] }
  0xbc   : > { %6907 = vst.msk [vmem:[#allocation4 + $0x88] sm:$0xff] %vm3550_vm0, %v25747_v0  ;;  %6908 = vst.msk [vmem:[#allocation4 + $0x90] sm:$0xff] %vm3550_vm0, %v25747_v0  ;;  %18329 = vmatprep.mubr.msk.f32.mxu0 %vm514_vm3, %v22330_v16  ;;  %v22496_v51 = vld [vmem:[%s22261_s26 + $0x90] sm:$0xff]  ;;  %v22503_v52 = vld [vmem:[%s22261_s26 + $0x98] sm:$0xff] }
  0xbd   : > { %6909 = vst.msk [vmem:[#allocation4 + $0x98] sm:$0xff] %vm3550_vm0, %v25747_v0  ;;  %6910 = vst.msk [vmem:[#allocation4 + $0xa0] sm:$0xff] %vm3550_vm0, %v25747_v0  ;;  %v22506_v53 = vld [vmem:[%s22261_s26 + $0xa0] sm:$0xff]  ;;  %v22513_v54 = vld [vmem:[%s22261_s26 + $0xa8] sm:$0xff] }
  0xbe   : > { %6911 = vst.msk [vmem:[#allocation4 + $0xa8] sm:$0xff] %vm3550_vm0, %v25747_v0  ;;  %6912 = vst.msk [vmem:[#allocation4 + $0xb0] sm:$0xff] %vm3550_vm0, %v25747_v0  ;;  %v22516_v55 = vld [vmem:[%s22261_s26 + $0xb0] sm:$0xff]  ;;  %v22523_v56 = vld [vmem:[%s22261_s26 + $0xb8] sm:$0xff] }
  0xbf   : > { %6913 = vst.msk [vmem:[#allocation4 + $0xb8] sm:$0xff] %vm3550_vm0, %v25747_v0  ;;  %6914 = vst.msk [vmem:[#allocation4 + $0xc0] sm:$0xff] %vm3550_vm0, %v25747_v0  ;;  %18330 = vmatmul.mubr.msk.f32.gmra.mrb[12].mxu0 %vm514_vm3, %v22337_v17  ;;  %v22526_v57 = vld [vmem:[%s22261_s26 + $0xc0] sm:$0xff]  ;;  %v22533_v58 = vld [vmem:[%s22261_s26 + $0xc8] sm:$0xff] }
  0xc0   : > { %6915 = vst.msk [vmem:[#allocation4 + $0xc8] sm:$0xff] %vm3550_vm0, %v25747_v0  ;;  %6916 = vst.msk [vmem:[#allocation4 + $0xd0] sm:$0xff] %vm3550_vm0, %v25747_v0  ;;  %18332 = vmatprep.mubr.msk.f32.mxu0 %vm514_vm3, %v22340_v18  ;;  %v22536_v59 = vld [vmem:[%s22261_s26 + $0xd0] sm:$0xff]  ;;  %v482_v60 = vld [vmem:[%s22261_s26 + $0xd8] sm:$0x3f] }
  0xc1   : > { %6917 = vst.msk [vmem:[#allocation4 + $0xd8] sm:$0xff] %vm3550_vm0, %v25747_v0  ;;  %6918 = vst.msk [vmem:[#allocation4 + $0xe0] sm:$0xff] %vm3550_vm0, %v25747_v0  ;;  %v1100_v61 = vld [vmem:[%s22261_s26 + $0x2] sm:$0xff]  ;;  %v1101_v62 = vld [vmem:[%s22261_s26 + $0xa] sm:$0xff] }
  0xc2   : > { %6919 = vst.msk [vmem:[#allocation4 + $0xe8] sm:$0xff] %vm3550_vm0, %v25747_v0  ;;  %6920 = vst.msk [vmem:[#allocation4 + $0xf0] sm:$0xff] %vm3550_vm0, %v25747_v0  ;;  %v22548_v63 = vld [vmem:[%s22261_s26 + $0x12] sm:$0xff]  ;;  %v22558_v2 = vld [vmem:[%s22261_s26 + $0x1a] sm:$0xff] }
  0xc3   : > { %6921 = vst.msk [vmem:[#allocation4 + $0xf8] sm:$0xff] %vm3550_vm0, %v25747_v0  ;;  %10129 = vst.msk [vmem:[#allocation5] sm:$0xff] %vm3550_vm0, %v25747_v0  ;;  %18333 = vmatmul.mubr.msk.f32.gmra.mrb[14].mxu0 %vm514_vm3, %v22347_v19  ;;  %v22561_v3 = vld [vmem:[%s22261_s26 + $0x22] sm:$0xff]  ;;  %v22569_v4 = vld [vmem:[%s22261_s26 + $0x2a] sm:$0xff] }
  0xc4   : > { %10130 = vst.msk [vmem:[#allocation5 + $0x8] sm:$0xff] %vm3550_vm0, %v25747_v0  ;;  %10131 = vst.msk [vmem:[#allocation5 + $0x10] sm:$0xff] %vm3550_vm0, %v25747_v0  ;;  %18335 = vmatprep.mubr.msk.f32.mxu0 %vm514_vm3, %v22350_v20 }
  0xc5   : > { %10132 = vst.msk [vmem:[#allocation5 + $0x18] sm:$0xff] %vm3550_vm0, %v25747_v0  ;;  %10133 = vst.msk [vmem:[#allocation5 + $0x20] sm:$0xff] %vm3550_vm0, %v25747_v0 }
  0xc6   : > { %10134 = vst.msk [vmem:[#allocation5 + $0x28] sm:$0xff] %vm3550_vm0, %v25747_v0  ;;  %10135 = vst.msk [vmem:[#allocation5 + $0x30] sm:$0xff] %vm3550_vm0, %v25747_v0 }
  0xc7   : > { %10136 = vst.msk [vmem:[#allocation5 + $0x38] sm:$0xff] %vm3550_vm0, %v25747_v0  ;;  %10137 = vst.msk [vmem:[#allocation5 + $0x40] sm:$0xff] %vm3550_vm0, %v25747_v0  ;;  %18336 = vmatmul.mubr.msk.f32.gmra.mrb[16].mxu0 %vm514_vm3, %v22357_v21 }
  0xc8   : > { %10138 = vst.msk [vmem:[#allocation5 + $0x48] sm:$0xff] %vm3550_vm0, %v25747_v0  ;;  %10139 = vst.msk [vmem:[#allocation5 + $0x50] sm:$0xff] %vm3550_vm0, %v25747_v0  ;;  %18338 = vmatprep.mubr.msk.f32.mxu0 %vm514_vm3, %v22360_v22 }
  0xc9   : > { %10140 = vst.msk [vmem:[#allocation5 + $0x58] sm:$0xff] %vm3550_vm0, %v25747_v0  ;;  %10141 = vst.msk [vmem:[#allocation5 + $0x60] sm:$0xff] %vm3550_vm0, %v25747_v0 }
  0xca   : > { %10142 = vst.msk [vmem:[#allocation5 + $0x68] sm:$0xff] %vm3550_vm0, %v25747_v0  ;;  %10143 = vst.msk [vmem:[#allocation5 + $0x70] sm:$0xff] %vm3550_vm0, %v25747_v0 }
  0xcb   : > { %10144 = vst.msk [vmem:[#allocation5 + $0x78] sm:$0xff] %vm3550_vm0, %v25747_v0  ;;  %10145 = vst.msk [vmem:[#allocation5 + $0x80] sm:$0xff] %vm3550_vm0, %v25747_v0  ;;  %18339 = vmatmul.mubr.msk.f32.gmra.mrb[18].mxu0 %vm514_vm3, %v22367_v23 }
  0xcc   : > { %10146 = vst.msk [vmem:[#allocation5 + $0x88] sm:$0xff] %vm3550_vm0, %v25747_v0  ;;  %10147 = vst.msk [vmem:[#allocation5 + $0x90] sm:$0xff] %vm3550_vm0, %v25747_v0  ;;  %18341 = vmatprep.mubr.msk.f32.mxu0 %vm514_vm3, %v22370_v24 }
  0xcd   : > { %10148 = vst.msk [vmem:[#allocation5 + $0x98] sm:$0xff] %vm3550_vm0, %v25747_v0  ;;  %10149 = vst.msk [vmem:[#allocation5 + $0xa0] sm:$0xff] %vm3550_vm0, %v25747_v0 }
  0xce   : > { %10150 = vst.msk [vmem:[#allocation5 + $0xa8] sm:$0xff] %vm3550_vm0, %v25747_v0  ;;  %10151 = vst.msk [vmem:[#allocation5 + $0xb0] sm:$0xff] %vm3550_vm0, %v25747_v0 }
  0xcf   : > { %10152 = vst.msk [vmem:[#allocation5 + $0xb8] sm:$0xff] %vm3550_vm0, %v25747_v0  ;;  %10153 = vst.msk [vmem:[#allocation5 + $0xc0] sm:$0xff] %vm3550_vm0, %v25747_v0  ;;  %18342 = vmatmul.mubr.msk.f32.gmra.mrb[20].mxu0 %vm514_vm3, %v22377_v25 }
  0xd0   : > { %10154 = vst.msk [vmem:[#allocation5 + $0xc8] sm:$0xff] %vm3550_vm0, %v25747_v0  ;;  %10155 = vst.msk [vmem:[#allocation5 + $0xd0] sm:$0xff] %vm3550_vm0, %v25747_v0  ;;  %18344 = vmatprep.mubr.msk.f32.mxu0 %vm514_vm3, %v22380_v26 }
  0xd1   : > { %10156 = vst.msk [vmem:[#allocation5 + $0xd8] sm:$0xff] %vm3550_vm0, %v25747_v0  ;;  %10157 = vst.msk [vmem:[#allocation5 + $0xe0] sm:$0xff] %vm3550_vm0, %v25747_v0 }
  0xd2   : > { %10158 = vst.msk [vmem:[#allocation5 + $0xe8] sm:$0xff] %vm3550_vm0, %v25747_v0  ;;  %v22612_v0 = vld [vmem:[%s22261_s26 + $0x72] sm:$0xff] }
  0xd3   : > { %18345 = vmatmul.mubr.msk.f32.gmra.mrb[22].mxu0 %vm514_vm3, %v22387_v27  ;;  %25877 = vst [vmem:[#allocation41_spill] sm:$0xff] %v22612_v0 }
  0xd4   : > { %18347 = vmatprep.mubr.msk.f32.mxu0 %vm514_vm3, %v22390_v28 }
  0xd7   : > { %18348 = vmatmul.mubr.msk.f32.gmra.mrb[24].mxu0 %vm514_vm3, %v22397_v29 }
  0xd8   : > { %18350 = vmatprep.mubr.msk.f32.mxu0 %vm514_vm3, %v22400_v30 }
  0xdb   : > { %18351 = vmatmul.mubr.msk.f32.gmra.mrb[26].mxu0 %vm514_vm3, %v511_v31  ;;  %v22579_v31 = vld [vmem:[%s22261_s26 + $0x3a] sm:$0xff] }
  0xdc   : > { %18355 = vmatprep.mubr.msk.f32.mxu0 %vm514_vm3, %v455_v32  ;;  %25870 = vst [vmem:[#allocation34_spill] sm:$0xff] %v22579_v31  ;;  %v22582_v32 = vld [vmem:[%s22261_s26 + $0x42] sm:$0xff] }
  0xdd   : > { %25871 = vst [vmem:[#allocation35_spill] sm:$0xff] %v22582_v32 }
  0xdf   : > { %18356 = vmatmul.mubr.msk.f32.vlgmr.msra.gmra.mrb[0].mxu0 %vm514_vm3, %v456_v33  ;;  %v22589_v33 = vld [vmem:[%s22261_s26 + $0x4a] sm:$0xff] }
  0xe0   : > { %18398 = vmatpush3.msk.msra.mxu0 %vm599_vm2, %v16116_v11  ;;  %18358 = vmatprep.mubr.msk.f32.mxu0 %vm514_vm3, %v22412_v34  ;;  %v22572_v11 = vld [vmem:[%s22261_s26 + $0x32] sm:$0xff]  ;;  %25872 = vst [vmem:[#allocation36_spill] sm:$0xff] %v22589_v33 }
  0xe1   : > { %18441 = vmatprep.subr.msk.mxu0 %vm599_vm2, %v16146_v35  ;;  %25869 = vst [vmem:[#allocation33_spill] sm:$0xff] %v22572_v11 }
  0xe3   : > { %18359 = vmatmul.mubr.msk.f32.gmra.mrb[2].mxu0 %vm514_vm3, %v22422_v36 }
  0xe4   : > { %18361 = vmatprep.mubr.msk.f32.mxu0 %vm514_vm3, %v22425_v37 }
  0xe7   : > { %18362 = vmatmul.mubr.msk.f32.gmra.mrb[4].mxu0 %vm514_vm3, %v22433_v38 }
  0xe8   : > { %18364 = vmatprep.mubr.msk.f32.mxu0 %vm514_vm3, %v22436_v39 }
  0xeb   : > { %18365 = vmatmul.mubr.msk.f32.gmra.mrb[6].mxu0 %vm514_vm3, %v22443_v40 }
  0xec   : > { %18367 = vmatprep.mubr.msk.f32.mxu0 %vm514_vm3, %v22446_v41 }
  0xef   : > { %18368 = vmatmul.mubr.msk.f32.gmra.mrb[8].mxu0 %vm514_vm3, %v22453_v42 }
  0xf0   : > { %18370 = vmatprep.mubr.msk.f32.mxu0 %vm514_vm3, %v22456_v43 }
  0xf3   : > { %18371 = vmatmul.mubr.msk.f32.gmra.mrb[10].mxu0 %vm514_vm3, %v22463_v44 }
  0xf4   : > { %18373 = vmatprep.mubr.msk.f32.mxu0 %vm514_vm3, %v22466_v45 }
  0xf7   : > { %18374 = vmatmul.mubr.msk.f32.gmra.mrb[12].mxu0 %vm514_vm3, %v22473_v46 }
  0xf8   : > { %18376 = vmatprep.mubr.msk.f32.mxu0 %vm514_vm3, %v22476_v47 }
  0xfb   : > { %18377 = vmatmul.mubr.msk.f32.gmra.mrb[14].mxu0 %vm514_vm3, %v22483_v48 }
  0xfc   : > { %18379 = vmatprep.mubr.msk.f32.mxu0 %vm514_vm3, %v22486_v49 }
  0xff   : > { %18380 = vmatmul.mubr.msk.f32.gmra.mrb[16].mxu0 %vm514_vm3, %v22493_v50 }
 0x100   : > { %18382 = vmatprep.mubr.msk.f32.mxu0 %vm514_vm3, %v22496_v51 }
 0x103   : > { %18383 = vmatmul.mubr.msk.f32.gmra.mrb[18].mxu0 %vm514_vm3, %v22503_v52 }
 0x104   : > { %18385 = vmatprep.mubr.msk.f32.mxu0 %vm514_vm3, %v22506_v53 }
 0x107   : > { %18386 = vmatmul.mubr.msk.f32.gmra.mrb[20].mxu0 %vm514_vm3, %v22513_v54 }
 0x108   : > { %18388 = vmatprep.mubr.msk.f32.mxu0 %vm514_vm3, %v22516_v55 }
 0x10b   : > { %18389 = vmatmul.mubr.msk.f32.gmra.mrb[22].mxu0 %vm514_vm3, %v22523_v56 }
 0x10c   : > { %18391 = vmatprep.mubr.msk.f32.mxu0 %vm514_vm3, %v22526_v57 }
 0x10f   : > { %18392 = vmatmul.mubr.msk.f32.gmra.mrb[24].mxu0 %vm514_vm3, %v22533_v58 }
 0x110   : > { %18394 = vmatprep.mubr.msk.f32.mxu0 %vm514_vm3, %v22536_v59 }
 0x113   : > { %18395 = vmatmul.mubr.msk.f32.gmra.mrb[26].mxu0 %vm514_vm3, %v482_v60  ;;  %v22599_v60 = vld [vmem:[%s22261_s26 + $0x5a] sm:$0xff] }
 0x114   : > { %18399 = vmatprep.mubr.msk.f32.mxu0 %vm514_vm3, %v1100_v61  ;;  %25874 = vst [vmem:[#allocation38_spill] sm:$0xff] %v22599_v60  ;;  %v22602_v61 = vld [vmem:[%s22261_s26 + $0x62] sm:$0xff] }
 0x115   : > { %25875 = vst [vmem:[#allocation39_spill] sm:$0xff] %v22602_v61 }
 0x117   : > { %18400 = vmatmul.mubr.msk.f32.vlgmr.msra.gmra.mrb[0].mxu0 %vm514_vm3, %v1101_v62  ;;  %v22609_v62 = vld [vmem:[%s22261_s26 + $0x6a] sm:$0xff] }
 0x118   : > { %18442 = vmatpush3.msk.msra.mxu0 %vm599_vm2, %v16146_v35  ;;  %18402 = vmatprep.mubr.msk.f32.mxu0 %vm514_vm3, %v22548_v63  ;;  %v22592_v35 = vld [vmem:[%s22261_s26 + $0x52] sm:$0xff]  ;;  %25876 = vst [vmem:[#allocation40_spill] sm:$0xff] %v22609_v62 }
 0x119   : > { %18485 = vmatprep.subr.msk.mxu0 %vm599_vm2, %v16176_v1  ;;  %25873 = vst [vmem:[#allocation37_spill] sm:$0xff] %v22592_v35 }
 0x11b   : > { %18403 = vmatmul.mubr.msk.f32.gmra.mrb[2].mxu0 %vm514_vm3, %v22558_v2 }
 0x11c   : > { %18405 = vmatprep.mubr.msk.f32.mxu0 %vm514_vm3, %v22561_v3 }
 0x11f   : > { %18406 = vmatmul.mubr.msk.f32.gmra.mrb[4].mxu0 %vm514_vm3, %v22569_v4 }
 0x120   : > { %18408 = vmatprep.mubr.msk.f32.mxu0 %vm514_vm3, %v22572_v11 }
 0x123   : > { %18409 = vmatmul.mubr.msk.f32.gmra.mrb[6].mxu0 %vm514_vm3, %v22579_v31 }
 0x124   : > { %18411 = vmatprep.mubr.msk.f32.mxu0 %vm514_vm3, %v22582_v32 }
 0x127   : > { %18412 = vmatmul.mubr.msk.f32.gmra.mrb[8].mxu0 %vm514_vm3, %v22589_v33  ;;  %v22622_v33 = vld [vmem:[%s22261_s26 + $0x82] sm:$0xff] }
 0x128   : > { %18414 = vmatprep.mubr.msk.f32.mxu0 %vm514_vm3, %v22592_v35  ;;  %v22619_v35 = vld [vmem:[%s22261_s26 + $0x7a] sm:$0xff]  ;;  %25879 = vst [vmem:[#allocation43_spill] sm:$0xff] %v22622_v33 }
 0x129   : > { %25878 = vst [vmem:[#allocation42_spill] sm:$0xff] %v22619_v35 }
 0x12b   : > { %18415 = vmatmul.mubr.msk.f32.gmra.mrb[10].mxu0 %vm514_vm3, %v22599_v60  ;;  %v22632_v60 = vld [vmem:[%s22261_s26 + $0x92] sm:$0xff] }
 0x12c   : > { %18417 = vmatprep.mubr.msk.f32.mxu0 %vm514_vm3, %v22602_v61  ;;  %v22629_v61 = vld [vmem:[%s22261_s26 + $0x8a] sm:$0xff]  ;;  %25881 = vst [vmem:[#allocation45_spill] sm:$0xff] %v22632_v60 }
 0x12d   : > { %25880 = vst [vmem:[#allocation44_spill] sm:$0xff] %v22629_v61 }
 0x12f   : > { %18418 = vmatmul.mubr.msk.f32.gmra.mrb[12].mxu0 %vm514_vm3, %v22609_v62  ;;  %v22642_v62 = vld [vmem:[%s22261_s26 + $0xa2] sm:$0xff] }
 0x130   : > { %18420 = vmatprep.mubr.msk.f32.mxu0 %vm514_vm3, %v22612_v0  ;;  %v22639_v0 = vld [vmem:[%s22261_s26 + $0x9a] sm:$0xff]  ;;  %25883 = vst [vmem:[#allocation47_spill] sm:$0xff] %v22642_v62 }
 0x131   : > { %25882 = vst [vmem:[#allocation46_spill] sm:$0xff] %v22639_v0 }
 0x133   : > { %18421 = vmatmul.mubr.msk.f32.gmra.mrb[14].mxu0 %vm514_vm3, %v22619_v35  ;;  %v22652_v35 = vld [vmem:[%s22261_s26 + $0xb2] sm:$0xff] }
 0x134   : > { %18423 = vmatprep.mubr.msk.f32.mxu0 %vm514_vm3, %v22622_v33  ;;  %v22649_v33 = vld [vmem:[%s22261_s26 + $0xaa] sm:$0xff]  ;;  %25884 = vst [vmem:[#allocation48_spill] sm:$0xff] %v22652_v35 }
 0x137   : > { %18424 = vmatmul.mubr.msk.f32.gmra.mrb[16].mxu0 %vm514_vm3, %v22629_v61  ;;  %v22662_v61 = vld [vmem:[%s22261_s26 + $0xc2] sm:$0xff] }
 0x138   : > { %18426 = vmatprep.mubr.msk.f32.mxu0 %vm514_vm3, %v22632_v60  ;;  %v22659_v60 = vld [vmem:[%s22261_s26 + $0xba] sm:$0xff]  ;;  %25886 = vst [vmem:[#allocation50_spill] sm:$0xff] %v22662_v61 }
 0x139   : > { %25885 = vst [vmem:[#allocation49_spill] sm:$0xff] %v22659_v60 }
 0x13b   : > { %18427 = vmatmul.mubr.msk.f32.gmra.mrb[18].mxu0 %vm514_vm3, %v22639_v0  ;;  %v22672_v0 = vld [vmem:[%s22261_s26 + $0xd2] sm:$0xff] }
 0x13c   : > { %18429 = vmatprep.mubr.msk.f32.mxu0 %vm514_vm3, %v22642_v62  ;;  %v22669_v62 = vld [vmem:[%s22261_s26 + $0xca] sm:$0xff]  ;;  %25887 = vst [vmem:[#allocation51_spill] sm:$0xff] %v22672_v0 }
 0x13f   : > { %18430 = vmatmul.mubr.msk.f32.gmra.mrb[20].mxu0 %vm514_vm3, %v22649_v33 }
 0x140   : > { %18432 = vmatprep.mubr.msk.f32.mxu0 %vm514_vm3, %v22652_v35  ;;  %v1127_v35 = vld [vmem:[%s22261_s26 + $0xda] sm:$0x3f] }
 0x143   : > { %18433 = vmatmul.mubr.msk.f32.gmra.mrb[22].mxu0 %vm514_vm3, %v22659_v60 }
 0x144   : > { %18435 = vmatprep.mubr.msk.f32.mxu0 %vm514_vm3, %v22662_v61  ;;  %v16206_v61 = vld [vmem:[%s25726_s1 + $0x14] sm:$0x7] }
 0x147   : > { %18436 = vmatmul.mubr.msk.f32.gmra.mrb[24].mxu0 %vm514_vm3, %v22669_v62 }
 0x148   : > { %18438 = vmatprep.mubr.msk.f32.mxu0 %vm514_vm3, %v22672_v0 }
 0x14b   : > { %18439 = vmatmul.mubr.msk.f32.gmra.mrb[26].mxu0 %vm514_vm3, %v1127_v35  ;;  %v16236_v35 = vld [vmem:[%s25726_s1 + $0x18] sm:$0x7] }
 0x14c   : > { %18443 = vmatprep.mubr.msk.f32.mxu0 %vm514_vm3, %v22412_v34  ;;  %v22736_v34 = vld [vmem:[%s22261_s26 + $0xd8] sm:$0xff] }
 0x14f   : > { %18444 = vmatmul.mubr.msk.f32.vlgmr.msra.gmra.mrb[0].mxu0 %vm514_vm3, %v22422_v36  ;;  %v22739_v36 = vld [vmem:[%s22261_s26 + $0xe0] sm:$0xff] }
 0x150   : > { %18486 = vmatpush3.msk.msra.mxu0 %vm599_vm2, %v16176_v1  ;;  %18446 = vmatprep.mubr.msk.f32.mxu0 %vm514_vm3, %v22425_v37  ;;  %v1477_v1 = vld [vmem:[%s22261_s26 + $0xe8] sm:$0x3f] }
 0x151   : > { %18529 = vmatprep.subr.msk.mxu0 %vm599_vm2, %v16206_v61 }
 0x153   : > { %18447 = vmatmul.mubr.msk.f32.gmra.mrb[2].mxu0 %vm514_vm3, %v22433_v38 }
 0x154   : > { %18449 = vmatprep.mubr.msk.f32.mxu0 %vm514_vm3, %v22436_v39 }
 0x157   : > { %18450 = vmatmul.mubr.msk.f32.gmra.mrb[4].mxu0 %vm514_vm3, %v22443_v40 }
 0x158   : > { %18452 = vmatprep.mubr.msk.f32.mxu0 %vm514_vm3, %v22446_v41 }
 0x15b   : > { %18453 = vmatmul.mubr.msk.f32.gmra.mrb[6].mxu0 %vm514_vm3, %v22453_v42 }
 0x15c   : > { %18455 = vmatprep.mubr.msk.f32.mxu0 %vm514_vm3, %v22456_v43 }
 0x15f   : > { %18456 = vmatmul.mubr.msk.f32.gmra.mrb[8].mxu0 %vm514_vm3, %v22463_v44 }
 0x160   : > { %18458 = vmatprep.mubr.msk.f32.mxu0 %vm514_vm3, %v22466_v45 }
 0x163   : > { %18459 = vmatmul.mubr.msk.f32.gmra.mrb[10].mxu0 %vm514_vm3, %v22473_v46 }
 0x164   : > { %18461 = vmatprep.mubr.msk.f32.mxu0 %vm514_vm3, %v22476_v47 }
 0x167   : > { %18462 = vmatmul.mubr.msk.f32.gmra.mrb[12].mxu0 %vm514_vm3, %v22483_v48 }
 0x168   : > { %18464 = vmatprep.mubr.msk.f32.mxu0 %vm514_vm3, %v22486_v49 }
 0x16b   : > { %18465 = vmatmul.mubr.msk.f32.gmra.mrb[14].mxu0 %vm514_vm3, %v22493_v50 }
 0x16c   : > { %18467 = vmatprep.mubr.msk.f32.mxu0 %vm514_vm3, %v22496_v51 }
 0x16f   : > { %18468 = vmatmul.mubr.msk.f32.gmra.mrb[16].mxu0 %vm514_vm3, %v22503_v52 }
 0x170   : > { %18470 = vmatprep.mubr.msk.f32.mxu0 %vm514_vm3, %v22506_v53 }
 0x173   : > { %18471 = vmatmul.mubr.msk.f32.gmra.mrb[18].mxu0 %vm514_vm3, %v22513_v54 }
 0x174   : > { %18473 = vmatprep.mubr.msk.f32.mxu0 %vm514_vm3, %v22516_v55 }
 0x177   : > { %18474 = vmatmul.mubr.msk.f32.gmra.mrb[20].mxu0 %vm514_vm3, %v22523_v56 }
 0x178   : > { %18476 = vmatprep.mubr.msk.f32.mxu0 %vm514_vm3, %v22526_v57 }
 0x17b   : > { %18477 = vmatmul.mubr.msk.f32.gmra.mrb[22].mxu0 %vm514_vm3, %v22533_v58 }
 0x17c   : > { %18479 = vmatprep.mubr.msk.f32.mxu0 %vm514_vm3, %v22536_v59 }
 0x17f   : > { %18480 = vmatmul.mubr.msk.f32.gmra.mrb[24].mxu0 %vm514_vm3, %v22736_v34 }
 0x180   : > { %18482 = vmatprep.mubr.msk.f32.mxu0 %vm514_vm3, %v22739_v36 }
 0x183   : > { %18483 = vmatmul.mubr.msk.f32.gmra.mrb[26].mxu0 %vm514_vm3, %v1477_v1  ;;  %v16266_v1 = vld [vmem:[%s25726_s1 + $0x1c] sm:$0x7] }
 0x184   : > { %18487 = vmatprep.mubr.msk.f32.mxu0 %vm514_vm3, %v22276_v5  ;;  %v22803_v5 = vld [vmem:[%s22261_s26 + $0xd9] sm:$0xff] }
 0x187   : > { %18488 = vmatmul.mubr.msk.f32.vlgmr.msra.gmra.mrb[0].mxu0 %vm514_vm3, %v22282_v6  ;;  %v22806_v6 = vld [vmem:[%s22261_s26 + $0xe1] sm:$0xff] }
 0x188   : > { %18530 = vmatpush3.msk.msra.mxu0 %vm599_vm2, %v16206_v61  ;;  %18490 = vmatprep.mubr.msk.f32.mxu0 %vm514_vm3, %v22286_v7  ;;  %v1827_v61 = vld [vmem:[%s22261_s26 + $0xe9] sm:$0x3f] }
 0x189   : > { %18573 = vmatprep.subr.msk.mxu0 %vm599_vm2, %v16236_v35 }
 0x18b   : > { %18491 = vmatmul.mubr.msk.f32.gmra.mrb[2].mxu0 %vm514_vm3, %v22293_v8 }
 0x18c   : > { %18493 = vmatprep.mubr.msk.f32.mxu0 %vm514_vm3, %v22296_v9 }
 0x18f   : > { %18494 = vmatmul.mubr.msk.f32.gmra.mrb[4].mxu0 %vm514_vm3, %v22303_v10 }
 0x190   : > { %18496 = vmatprep.mubr.msk.f32.mxu0 %vm514_vm3, %v22309_v12 }
 0x193   : > { %18497 = vmatmul.mubr.msk.f32.gmra.mrb[6].mxu0 %vm514_vm3, %v22317_v13 }
 0x194   : > { %18499 = vmatprep.mubr.msk.f32.mxu0 %vm514_vm3, %v22320_v14 }
 0x197   : > { %18500 = vmatmul.mubr.msk.f32.gmra.mrb[8].mxu0 %vm514_vm3, %v22327_v15 }
 0x198   : > { %18502 = vmatprep.mubr.msk.f32.mxu0 %vm514_vm3, %v22330_v16 }
 0x19b   : > { %18503 = vmatmul.mubr.msk.f32.gmra.mrb[10].mxu0 %vm514_vm3, %v22337_v17 }
 0x19c   : > { %18505 = vmatprep.mubr.msk.f32.mxu0 %vm514_vm3, %v22340_v18 }
 0x19f   : > { %18506 = vmatmul.mubr.msk.f32.gmra.mrb[12].mxu0 %vm514_vm3, %v22347_v19 }
 0x1a0   : > { %18508 = vmatprep.mubr.msk.f32.mxu0 %vm514_vm3, %v22350_v20 }
 0x1a3   : > { %18509 = vmatmul.mubr.msk.f32.gmra.mrb[14].mxu0 %vm514_vm3, %v22357_v21 }
 0x1a4   : > { %18511 = vmatprep.mubr.msk.f32.mxu0 %vm514_vm3, %v22360_v22 }
 0x1a7   : > { %18512 = vmatmul.mubr.msk.f32.gmra.mrb[16].mxu0 %vm514_vm3, %v22367_v23 }
 0x1a8   : > { %18514 = vmatprep.mubr.msk.f32.mxu0 %vm514_vm3, %v22370_v24 }
 0x1ab   : > { %18515 = vmatmul.mubr.msk.f32.gmra.mrb[18].mxu0 %vm514_vm3, %v22377_v25 }
 0x1ac   : > { %18517 = vmatprep.mubr.msk.f32.mxu0 %vm514_vm3, %v22380_v26 }
 0x1af   : > { %18518 = vmatmul.mubr.msk.f32.gmra.mrb[20].mxu0 %vm514_vm3, %v22387_v27 }
 0x1b0   : > { %18520 = vmatprep.mubr.msk.f32.mxu0 %vm514_vm3, %v22390_v28 }
 0x1b3   : > { %18521 = vmatmul.mubr.msk.f32.gmra.mrb[22].mxu0 %vm514_vm3, %v22397_v29 }
 0x1b4   : > { %18523 = vmatprep.mubr.msk.f32.mxu0 %vm514_vm3, %v22400_v30 }
 0x1b7   : > { %18524 = vmatmul.mubr.msk.f32.gmra.mrb[24].mxu0 %vm514_vm3, %v22803_v5 }
 0x1b8   : > { %18526 = vmatprep.mubr.msk.f32.mxu0 %vm514_vm3, %v22806_v6 }
 0x1bb   : > { %18527 = vmatmul.mubr.msk.f32.gmra.mrb[26].mxu0 %vm514_vm3, %v1827_v61  ;;  %v25891_v61 = vld [vmem:[#allocation39_spill] sm:$0xff] }
 0x1bc   : > { %18531 = vmatprep.mubr.msk.f32.mxu0 %vm514_vm3, %v22548_v63  ;;  %v25888_v63 = vld [vmem:[#allocation36_spill] sm:$0xff] }
 0x1bf   : > { %18532 = vmatmul.mubr.msk.f32.vlgmr.msra.gmra.mrb[0].mxu0 %vm514_vm3, %v22558_v2  ;;  %v25889_v2 = vld [vmem:[#allocation37_spill] sm:$0xff] }
 0x1c0   : > { %18574 = vmatpush3.msk.msra.mxu0 %vm599_vm2, %v16236_v35  ;;  %18534 = vmatprep.mubr.msk.f32.mxu0 %vm514_vm3, %v22561_v3  ;;  %v25890_v35 = vld [vmem:[#allocation38_spill] sm:$0xff] }
 0x1c1   : > { %18617 = vmatprep.subr.msk.mxu0 %vm599_vm2, %v16266_v1 }
 0x1c3   : > { %18535 = vmatmul.mubr.msk.f32.gmra.mrb[2].mxu0 %vm514_vm3, %v22569_v4 }
 0x1c4   : > { %18537 = vmatprep.mubr.msk.f32.mxu0 %vm514_vm3, %v22572_v11  ;;  %v25892_v11 = vld [vmem:[#allocation40_spill] sm:$0xff] }
 0x1c7   : > { %18538 = vmatmul.mubr.msk.f32.gmra.mrb[4].mxu0 %vm514_vm3, %v22579_v31  ;;  %v25893_v31 = vld [vmem:[#allocation41_spill] sm:$0xff] }
 0x1c8   : > { %18540 = vmatprep.mubr.msk.f32.mxu0 %vm514_vm3, %v22582_v32  ;;  %v25894_v32 = vld [vmem:[#allocation42_spill] sm:$0xff] }
 0x1cb   : > { %18541 = vmatmul.mubr.msk.f32.gmra.mrb[6].mxu0 %vm514_vm3, %v25888_v63  ;;  %v25895_v63 = vld [vmem:[#allocation43_spill] sm:$0xff] }
 0x1cc   : > { %18543 = vmatprep.mubr.msk.f32.mxu0 %vm514_vm3, %v25889_v2  ;;  %v25896_v2 = vld [vmem:[#allocation44_spill] sm:$0xff] }
 0x1cf   : > { %18544 = vmatmul.mubr.msk.f32.gmra.mrb[8].mxu0 %vm514_vm3, %v25890_v35  ;;  %v25897_v35 = vld [vmem:[#allocation45_spill] sm:$0xff] }
 0x1d0   : > { %18546 = vmatprep.mubr.msk.f32.mxu0 %vm514_vm3, %v25891_v61  ;;  %v25898_v61 = vld [vmem:[#allocation46_spill] sm:$0xff] }
 0x1d3   : > { %18547 = vmatmul.mubr.msk.f32.gmra.mrb[10].mxu0 %vm514_vm3, %v25892_v11  ;;  %v25899_v11 = vld [vmem:[#allocation47_spill] sm:$0xff] }
 0x1d4   : > { %18549 = vmatprep.mubr.msk.f32.mxu0 %vm514_vm3, %v25893_v31 }
 0x1d7   : > { %18550 = vmatmul.mubr.msk.f32.gmra.mrb[12].mxu0 %vm514_vm3, %v25894_v32  ;;  %v25900_v32 = vld [vmem:[#allocation48_spill] sm:$0xff] }
 0x1d8   : > { %18552 = vmatprep.mubr.msk.f32.mxu0 %vm514_vm3, %v25895_v63  ;;  %v25901_v63 = vld [vmem:[#allocation50_spill] sm:$0xff] }
 0x1db   : > { %18553 = vmatmul.mubr.msk.f32.gmra.mrb[14].mxu0 %vm514_vm3, %v25896_v2 }
 0x1dc   : > { %18555 = vmatprep.mubr.msk.f32.mxu0 %vm514_vm3, %v25897_v35 }
 0x1df   : > { %18556 = vmatmul.mubr.msk.f32.gmra.mrb[16].mxu0 %vm514_vm3, %v25898_v61  ;;  %v22870_v61 = vld [vmem:[%s22261_s26 + $0xda] sm:$0xff] }
 0x1e0   : > { %18558 = vmatprep.mubr.msk.f32.mxu0 %vm514_vm3, %v25899_v11  ;;  %v22873_v11 = vld [vmem:[%s22261_s26 + $0xe2] sm:$0xff] }
 0x1e3   : > { %18559 = vmatmul.mubr.msk.f32.gmra.mrb[18].mxu0 %vm514_vm3, %v22649_v33 }
 0x1e4   : > { %18561 = vmatprep.mubr.msk.f32.mxu0 %vm514_vm3, %v25900_v32 }
 0x1e7   : > { %18562 = vmatmul.mubr.msk.f32.gmra.mrb[20].mxu0 %vm514_vm3, %v22659_v60  ;;  %v2177_v60 = vld [vmem:[%s22261_s26 + $0xea] sm:$0x3f] }
 0x1e8   : > { %18564 = vmatprep.mubr.msk.f32.mxu0 %vm514_vm3, %v25901_v63 }
 0x1eb   : > { %18565 = vmatmul.mubr.msk.f32.gmra.mrb[22].mxu0 %vm514_vm3, %v22669_v62 }
 0x1ec   : > { %18567 = vmatprep.mubr.msk.f32.mxu0 %vm514_vm3, %v22672_v0  ;;  %v16296_v0 = vld [vmem:[%s25726_s1 + $0x20] sm:$0x7] }
 0x1ef   : > { %18568 = vmatmul.mubr.msk.f32.gmra.mrb[24].mxu0 %vm514_vm3, %v22870_v61 }
 0x1f0   : > { %18570 = vmatprep.mubr.msk.f32.mxu0 %vm514_vm3, %v22873_v11 }
 0x1f3   : > { %18571 = vmatmul.mubr.msk.f32.gmra.mrb[26].mxu0 %vm514_vm3, %v2177_v60 }
 0x1f4   : > { %18575 = vmatprep.mubr.msk.f32.mxu0 %vm514_vm3, %v22425_v37  ;;  %v2525_v37 = vld [vmem:[%s22261_s26 + $0xe8] sm:$0xff] }
 0x1f7   : > { %18576 = vmatmul.mubr.msk.f32.vlgmr.msra.gmra.mrb[0].mxu0 %vm514_vm3, %v22433_v38  ;;  %v2526_v38 = vld [vmem:[%s22261_s26 + $0xf0] sm:$0xff] }
 0x1f8   : > { %18618 = vmatpush3.msk.msra.mxu0 %vm599_vm2, %v16266_v1  ;;  %18578 = vmatprep.mubr.msk.f32.mxu0 %vm514_vm3, %v22436_v39  ;;  %v2527_v39 = vld [vmem:[%s22261_s26 + $0xf8] sm:$0x3f] }
 0x1f9   : > { %18661 = vmatprep.subr.msk.mxu0 %vm599_vm2, %v16296_v0 }
 0x1fb   : > { %18579 = vmatmul.mubr.msk.f32.gmra.mrb[2].mxu0 %vm514_vm3, %v22443_v40  ;;  %v3826_v40 = vld [vmem:[#allocation13 + $0x8] sm:$0xff] }
 0x1fc   : > { %18581 = vmatprep.mubr.msk.f32.mxu0 %vm514_vm3, %v22446_v41  ;;  %20451 = vmatprep.subr.mxu1 %v3826_v40 }
 0x1fd   : > { %20452 = vmatpush3.msra.mxu1 %v3826_v40 }
 0x1ff   : > { %18582 = vmatmul.mubr.msk.f32.gmra.mrb[4].mxu0 %vm514_vm3, %v22453_v42  ;;  %v23058_v42 = vld [vmem:[#allocation13] sm:$0xff] }
 0x200   : > { %18584 = vmatprep.mubr.msk.f32.mxu0 %vm514_vm3, %v22456_v43  ;;  %18749 = vmatprep.subr.mxu1 %v23058_v42  ;;  %v3699_v43 = vld [vmem:[#allocation2 + $0xf0] sm:$0xff] }
 0x203   : > { %18585 = vmatmul.mubr.msk.f32.gmra.mrb[6].mxu0 %vm514_vm3, %v22463_v44  ;;  %v3732_v44 = vmax.f32 %v3699_v43, 0.0 }
 0x204   : > { %18587 = vmatprep.mubr.msk.f32.mxu0 %vm514_vm3, %v22466_v45 }
 0x205   : > { %3765 = vst.msk [vmem:[#allocation3 + $0xf0] sm:$0xff] %vm3550_vm0, %v3732_v44 }
 0x207   : > { %18588 = vmatmul.mubr.msk.f32.gmra.mrb[8].mxu0 %vm514_vm3, %v22473_v46 }
 0x208   : > { %18590 = vmatprep.mubr.msk.f32.mxu0 %vm514_vm3, %v22476_v47 }
 0x20b   : > { %18591 = vmatmul.mubr.msk.f32.gmra.mrb[10].mxu0 %vm514_vm3, %v22483_v48 }
 0x20c   : > { %18593 = vmatprep.mubr.msk.f32.mxu0 %vm514_vm3, %v22486_v49 }
 0x20f   : > { %18594 = vmatmul.mubr.msk.f32.gmra.mrb[12].mxu0 %vm514_vm3, %v22493_v50 }
 0x210   : > { %18596 = vmatprep.mubr.msk.f32.mxu0 %vm514_vm3, %v22496_v51 }
 0x213   : > { %18597 = vmatmul.mubr.msk.f32.gmra.mrb[14].mxu0 %vm514_vm3, %v22503_v52 }
 0x214   : > { %18599 = vmatprep.mubr.msk.f32.mxu0 %vm514_vm3, %v22506_v53 }
 0x217   : > { %18600 = vmatmul.mubr.msk.f32.gmra.mrb[16].mxu0 %vm514_vm3, %v22513_v54 }
 0x218   : > { %18602 = vmatprep.mubr.msk.f32.mxu0 %vm514_vm3, %v22516_v55 }
 0x21b   : > { %18603 = vmatmul.mubr.msk.f32.gmra.mrb[18].mxu0 %vm514_vm3, %v22523_v56 }
 0x21c   : > { %18605 = vmatprep.mubr.msk.f32.mxu0 %vm514_vm3, %v22526_v57 }
 0x21f   : > { %18606 = vmatmul.mubr.msk.f32.gmra.mrb[20].mxu0 %vm514_vm3, %v22533_v58 }
 0x220   : > { %18608 = vmatprep.mubr.msk.f32.mxu0 %vm514_vm3, %v22536_v59 }
 0x223   : > { %18609 = vmatmul.mubr.msk.f32.gmra.mrb[22].mxu0 %vm514_vm3, %v22736_v34 }
 0x224   : > { %18611 = vmatprep.mubr.msk.f32.mxu0 %vm514_vm3, %v22739_v36 }
 0x227   : > { %18612 = vmatmul.mubr.msk.f32.gmra.mrb[24].mxu0 %vm514_vm3, %v2525_v37 }
 0x228   : > { %18614 = vmatprep.mubr.msk.f32.mxu0 %vm514_vm3, %v2526_v38 }
 0x22b   : > { %18615 = vmatmul.mubr.msk.f32.gmra.mrb[26].mxu0 %vm514_vm3, %v2527_v39 }
 0x22c   : > { %18619 = vmatprep.mubr.msk.f32.mxu0 %vm514_vm3, %v22286_v7  ;;  %v2876_v7 = vld [vmem:[%s22261_s26 + $0xf1] sm:$0xff] }
 0x22f   : > { %18620 = vmatmul.mubr.msk.f32.vlgmr.msra.gmra.mrb[0].mxu0 %vm514_vm3, %v22293_v8  ;;  %v2877_v8 = vld [vmem:[%s22261_s26 + $0xf9] sm:$0x3f] }
 0x230   : > { %18662 = vmatpush3.msk.msra.mxu0 %vm599_vm2, %v16296_v0  ;;  %18622 = vmatprep.mubr.msk.f32.mxu0 %vm514_vm3, %v22296_v9  ;;  %v2875_v0 = vld [vmem:[%s22261_s26 + $0xe9] sm:$0xff]  ;;  %v25902_v9 = vld [vmem:[#allocation33_spill] sm:$0xff] }
 0x231   : > { %18705 = vmatprep.subr.mxu0 %v3826_v40 }
 0x233   : > { %18623 = vmatmul.mubr.msk.f32.gmra.mrb[2].mxu0 %vm514_vm3, %v22303_v10  ;;  %v25903_v10 = vld [vmem:[#allocation34_spill] sm:$0xff] }
 0x234   : > { %18625 = vmatprep.mubr.msk.f32.mxu0 %vm514_vm3, %v22309_v12  ;;  %v25904_v12 = vld [vmem:[#allocation35_spill] sm:$0xff] }
 0x237   : > { %18626 = vmatmul.mubr.msk.f32.gmra.mrb[4].mxu0 %vm514_vm3, %v22317_v13  ;;  %v25905_v13 = vld [vmem:[#allocation36_spill] sm:$0xff] }
 0x238   : > { %18628 = vmatprep.mubr.msk.f32.mxu0 %vm514_vm3, %v22320_v14  ;;  %v25906_v14 = vld [vmem:[#allocation37_spill] sm:$0xff] }
 0x23b   : > { %18629 = vmatmul.mubr.msk.f32.gmra.mrb[6].mxu0 %vm514_vm3, %v22327_v15  ;;  %v25907_v15 = vld [vmem:[#allocation38_spill] sm:$0xff] }
 0x23c   : > { %18631 = vmatprep.mubr.msk.f32.mxu0 %vm514_vm3, %v22330_v16  ;;  %v25908_v16 = vld [vmem:[#allocation39_spill] sm:$0xff] }
 0x23f   : > { %18632 = vmatmul.mubr.msk.f32.gmra.mrb[8].mxu0 %vm514_vm3, %v22337_v17  ;;  %v25909_v17 = vld [vmem:[#allocation40_spill] sm:$0xff] }
 0x240   : > { %18634 = vmatprep.mubr.msk.f32.mxu0 %vm514_vm3, %v22340_v18  ;;  %v25910_v18 = vld [vmem:[#allocation42_spill] sm:$0xff] }
 0x243   : > { %18635 = vmatmul.mubr.msk.f32.gmra.mrb[10].mxu0 %vm514_vm3, %v22347_v19  ;;  %v25911_v19 = vld [vmem:[#allocation43_spill] sm:$0xff] }
 0x244   : > { %18637 = vmatprep.mubr.msk.f32.mxu0 %vm514_vm3, %v22350_v20  ;;  %v25912_v20 = vld [vmem:[#allocation46_spill] sm:$0xff] }
 0x247   : > { %18638 = vmatmul.mubr.msk.f32.gmra.mrb[12].mxu0 %vm514_vm3, %v22357_v21  ;;  %v25913_v21 = vld [vmem:[#allocation47_spill] sm:$0xff] }
 0x248   : > { %18640 = vmatprep.mubr.msk.f32.mxu0 %vm514_vm3, %v22360_v22  ;;  %v25914_v22 = vld [vmem:[#allocation49_spill] sm:$0xff] }
 0x24b   : > { %18641 = vmatmul.mubr.msk.f32.gmra.mrb[14].mxu0 %vm514_vm3, %v22367_v23  ;;  %v25915_v23 = vld [vmem:[#allocation51_spill] sm:$0xff] }
 0x24c   : > { %18643 = vmatprep.mubr.msk.f32.mxu0 %vm514_vm3, %v22370_v24  ;;  %v3225_v24 = vld [vmem:[%s22261_s26 + $0xea] sm:$0xff] }
 0x24f   : > { %18644 = vmatmul.mubr.msk.f32.gmra.mrb[16].mxu0 %vm514_vm3, %v22377_v25  ;;  %v3226_v25 = vld [vmem:[%s22261_s26 + $0xf2] sm:$0xff] }
 0x250   : > { %18646 = vmatprep.mubr.msk.f32.mxu0 %vm514_vm3, %v22380_v26  ;;  %v3227_v26 = vld [vmem:[%s22261_s26 + $0xfa] sm:$0x3f]  ;;  %s21716_s26 = sshll.u32 %s21798_s21, 4  ;;  %s21717_s26 = int_to_ptr.vmem [resolvable:$false] %s21716_s26 }
 0x251   : > { %s21718_s3 = scalar_lea.vmem %s21717_s26, 32  ;;  %p21719_p6 = scmp.lt.s32.totalorder %s25685_s20, %s21717_s26 }
 0x252   : > { %p21720_p9 = scmp.lt.s32.totalorder %s21718_s3, %s21712_s25 }
 0x253   : > { %18647 = vmatmul.mubr.msk.f32.gmra.mrb[18].mxu0 %vm514_vm3, %v22387_v27  ;;  %v3669_v27 = vld [vmem:[#allocation2] sm:$0xff] }
 0x254   : > { %18649 = vmatprep.mubr.msk.f32.mxu0 %vm514_vm3, %v22390_v28  ;;  %v3670_v28 = vld [vmem:[#allocation2 + $0x8] sm:$0xff]  ;;  %p21721_p5 = por %p21720_p9, %p21719_p6 }
 0x256   : > { %p21722_p0 = pnand %p21721_p5, %p21715_p1 }
 0x257   : > { %18650 = vmatmul.mubr.msk.f32.gmra.mrb[20].mxu0 %vm514_vm3, %v22397_v29  ;;  %v3702_v29 = vmax.f32 %v3669_v27, 0.0 }
 0x258   : > { %18652 = vmatprep.mubr.msk.f32.mxu0 %vm514_vm3, %v22400_v30  ;;  %v3703_v30 = vmax.f32 %v3670_v28, 0.0 }
 0x259   : > { %3735 = vst.msk [vmem:[#allocation3] sm:$0xff] %vm3550_vm0, %v3702_v29 }
 0x25a   : > { %3736 = vst.msk [vmem:[#allocation3 + $0x8] sm:$0xff] %vm3550_vm0, %v3703_v30 }
 0x25b   : > { %18653 = vmatmul.mubr.msk.f32.gmra.mrb[22].mxu0 %vm514_vm3, %v22803_v5 }
 0x25c   : > { %18655 = vmatprep.mubr.msk.f32.mxu0 %vm514_vm3, %v22806_v6 }
 0x25f   : > { %18656 = vmatmul.mubr.msk.f32.gmra.mrb[24].mxu0 %vm514_vm3, %v2875_v0 }
 0x260   : > { %18658 = vmatprep.mubr.msk.f32.mxu0 %vm514_vm3, %v2876_v7 }
 0x261   : > { %v3797_v41 = vld [vmem:[#allocation3 + $0x1] sm:$0xff] }
 0x263   : > { %18659 = vmatmul.mubr.msk.f32.gmra.mrb[26].mxu0 %vm514_vm3, %v2877_v8 }
 0x264   : > { %18663 = vmatprep.mubr.msk.f32.mxu0 %vm514_vm3, %v22561_v3 }
 0x267   : > { %18664 = vmatmul.mubr.msk.f32.vlgmr.msra.gmra.mrb[0].mxu0 %vm514_vm3, %v22569_v4 }
 0x268   : > { %18666 = vmatprep.mubr.msk.f32.mxu0 %vm514_vm3, %v25902_v9  ;;  %18706 = vmatpush3.msra.mxu0 %v3826_v40 }
 0x26b   : > { %18667 = vmatmul.mubr.msk.f32.gmra.mrb[2].mxu0 %vm514_vm3, %v25903_v10 }
 0x26c   : > { %18669 = vmatprep.mubr.msk.f32.mxu0 %vm514_vm3, %v25904_v12 }
 0x26f   : > { %18670 = vmatmul.mubr.msk.f32.gmra.mrb[4].mxu0 %vm514_vm3, %v25905_v13 }
 0x270   : > { %18672 = vmatprep.mubr.msk.f32.mxu0 %vm514_vm3, %v25906_v14 }
 0x273   : > { %18673 = vmatmul.mubr.msk.f32.gmra.mrb[6].mxu0 %vm514_vm3, %v25907_v15 }
 0x274   : > { %18675 = vmatprep.mubr.msk.f32.mxu0 %vm514_vm3, %v25908_v16 }
 0x277   : > { %18676 = vmatmul.mubr.msk.f32.gmra.mrb[8].mxu0 %vm514_vm3, %v25909_v17 }
 0x278   : > { %18678 = vmatprep.mubr.msk.f32.mxu0 %vm514_vm3, %v25893_v31 }
 0x27b   : > { %18679 = vmatmul.mubr.msk.f32.gmra.mrb[10].mxu0 %vm514_vm3, %v25910_v18 }
 0x27c   : > { %18681 = vmatprep.mubr.msk.f32.mxu0 %vm514_vm3, %v25911_v19 }
 0x27f   : > { %18682 = vmatmul.mubr.msk.f32.gmra.mrb[12].mxu0 %vm514_vm3, %v25896_v2 }
 0x280   : > { %18684 = vmatprep.mubr.msk.f32.mxu0 %vm514_vm3, %v25897_v35 }
 0x283   : > { %18685 = vmatmul.mubr.msk.f32.gmra.mrb[14].mxu0 %vm514_vm3, %v25912_v20 }
 0x284   : > { %18687 = vmatprep.mubr.msk.f32.mxu0 %vm514_vm3, %v25913_v21 }
 0x287   : > { %18688 = vmatmul.mubr.msk.f32.gmra.mrb[16].mxu0 %vm514_vm3, %v22649_v33 }
 0x288   : > { %18690 = vmatprep.mubr.msk.f32.mxu0 %vm514_vm3, %v25900_v32 }
 0x28b   : > { %18691 = vmatmul.mubr.msk.f32.gmra.mrb[18].mxu0 %vm514_vm3, %v25914_v22 }
 0x28c   : > { %18693 = vmatprep.mubr.msk.f32.mxu0 %vm514_vm3, %v25901_v63 }
 0x28f   : > { %18694 = vmatmul.mubr.msk.f32.gmra.mrb[20].mxu0 %vm514_vm3, %v22669_v62 }
 0x290   : > { %18696 = vmatprep.mubr.msk.f32.mxu0 %vm514_vm3, %v25915_v23 }
 0x293   : > { %18697 = vmatmul.mubr.msk.f32.gmra.mrb[22].mxu0 %vm514_vm3, %v22870_v61 }
 0x294   : > { %18699 = vmatprep.mubr.msk.f32.mxu0 %vm514_vm3, %v22873_v11 }
 0x297   : > { %18700 = vmatmul.mubr.msk.f32.gmra.mrb[24].mxu0 %vm514_vm3, %v3225_v24 }
 0x298   : > { %18702 = vmatprep.mubr.msk.f32.mxu0 %vm514_vm3, %v3226_v25 }
 0x29b   : > { %18703 = vmatmul.mubr.msk.f32.gmra.mrb[26].mxu0 %vm514_vm3, %v3227_v26 }
 0x29c   : > { %18707 = vmatprep.mubr.msk.f32.mxu0 %vm3550_vm0, %v3797_v41 }
 0x33a   : > { %v18665_v45 = vpop.f32.mrb[0].mxu0 }
 0x33b   : > { %3552 = vst.msk [vmem:[#allocation11 + $0x8] sm:$0xff] %vm3550_vm0, %v18665_v45  ;;  %v3383_v46 = vpop.f32.mrb[1].mxu0 }
 0x33c   : > { %3551 = vst.msk [vmem:[#allocation11] sm:$0xff] %vm3550_vm0, %v3383_v46 }
 0x33e   : > { %v18668_v47 = vpop.f32.mrb[2].mxu0 }
 0x33f   : > { %3554 = vst.msk [vmem:[#allocation11 + $0x18] sm:$0xff] %vm3550_vm0, %v18668_v47  ;;  %v3393_v48 = vpop.f32.mrb[3].mxu0 }
 0x340   : > { %3553 = vst.msk [vmem:[#allocation11 + $0x10] sm:$0xff] %vm3550_vm0, %v3393_v48 }
 0x342   : > { %v3614_v49 = vld [vmem:[#allocation11 + $0x8] sm:$0x3f]  ;;  %v18671_v50 = vpop.f32.mrb[4].mxu0 }
 0x343   : > { %3616 = vst.msk [vmem:[#allocation2 + $0x19] sm:$0x3f] %vm3578_vm4, %v3614_v49  ;;  %v3613_v51 = vld [vmem:[#allocation11] sm:$0xff]  ;;  %v3403_v52 = vpop.f32.mrb[5].mxu0 }
 0x344   : > { %3556 = vst.msk [vmem:[#allocation11 + $0x28] sm:$0xff] %vm3550_vm0, %v18671_v50  ;;  %3615 = vst.msk [vmem:[#allocation2 + $0x11] sm:$0xff] %vm3550_vm0, %v3613_v51 }
 0x345   : > { %3555 = vst.msk [vmem:[#allocation11 + $0x20] sm:$0xff] %vm3550_vm0, %v3403_v52 }
 0x346   : > { %v3618_v53 = vld [vmem:[#allocation11 + $0x18] sm:$0x3f]  ;;  %v18674_v54 = vpop.f32.mrb[6].mxu0 }
 0x347   : > { %3620 = vst.msk [vmem:[#allocation2 + $0x29] sm:$0x3f] %vm3578_vm4, %v3618_v53  ;;  %v3617_v55 = vld [vmem:[#allocation11 + $0x10] sm:$0xff]  ;;  %v3413_v56 = vpop.f32.mrb[7].mxu0 }
 0x348   : > { %3558 = vst.msk [vmem:[#allocation11 + $0x38] sm:$0xff] %vm3550_vm0, %v18674_v54  ;;  %3619 = vst.msk [vmem:[#allocation2 + $0x21] sm:$0xff] %vm3550_vm0, %v3617_v55 }
 0x349   : > { %3557 = vst.msk [vmem:[#allocation11 + $0x30] sm:$0xff] %vm3550_vm0, %v3413_v56 }
 0x34a   : > { %v18677_v58 = vpop.f32.mrb[8].mxu0 }
 0x34b   : > { %v3622_v57 = vld [vmem:[#allocation11 + $0x28] sm:$0x3f]  ;;  %3560 = vst.msk [vmem:[#allocation11 + $0x48] sm:$0xff] %vm3550_vm0, %v18677_v58  ;;  %v3423_v3 = vpop.f32.mrb[9].mxu0  ;;  %v3671_v4 = vld [vmem:[#allocation2 + $0x10] sm:$0xff]  ;;  %v3672_v11 = vld [vmem:[#allocation2 + $0x18] sm:$0xff] }
 0x34c   : > { %3624 = vst.msk [vmem:[#allocation2 + $0x39] sm:$0x3f] %vm3578_vm4, %v3622_v57  ;;  %v3621_v59 = vld [vmem:[#allocation11 + $0x20] sm:$0xff]  ;;  %v3704_v31 = vmax.f32 %v3671_v4, 0.0  ;;  %v3705_v32 = vmax.f32 %v3672_v11, 0.0 }
 0x34d   : > { %3623 = vst.msk [vmem:[#allocation2 + $0x31] sm:$0xff] %vm3550_vm0, %v3621_v59  ;;  %3559 = vst.msk [vmem:[#allocation11 + $0x40] sm:$0xff] %vm3550_vm0, %v3423_v3 }
 0x34e   : > { %v18680_v60 = vpop.f32.mrb[10].mxu0  ;;  %3737 = vst.msk [vmem:[#allocation3 + $0x10] sm:$0xff] %vm3550_vm0, %v3704_v31  ;;  %3738 = vst.msk [vmem:[#allocation3 + $0x18] sm:$0xff] %vm3550_vm0, %v3705_v32 }
 0x34f   : > { %v3626_v33 = vld [vmem:[#allocation11 + $0x38] sm:$0x3f]  ;;  %3562 = vst.msk [vmem:[#allocation11 + $0x58] sm:$0xff] %vm3550_vm0, %v18680_v60  ;;  %v3433_v34 = vpop.f32.mrb[11].mxu0  ;;  %v3673_v36 = vld [vmem:[#allocation2 + $0x20] sm:$0xff]  ;;  %v3674_v5 = vld [vmem:[#allocation2 + $0x28] sm:$0xff] }
 0x350   : > { %3628 = vst.msk [vmem:[#allocation2 + $0x49] sm:$0x3f] %vm3578_vm4, %v3626_v33  ;;  %v3625_v62 = vld [vmem:[#allocation11 + $0x30] sm:$0xff]  ;;  %v3706_v6 = vmax.f32 %v3673_v36, 0.0  ;;  %v3707_v1 = vmax.f32 %v3674_v5, 0.0 }
 0x351   : > { %3627 = vst.msk [vmem:[#allocation2 + $0x41] sm:$0xff] %vm3550_vm0, %v3625_v62  ;;  %3561 = vst.msk [vmem:[#allocation11 + $0x50] sm:$0xff] %vm3550_vm0, %v3433_v34 }
 0x352   : > { %v3630_v63 = vld [vmem:[#allocation11 + $0x48] sm:$0x3f]  ;;  %v18683_v2 = vpop.f32.mrb[12].mxu0  ;;  %3739 = vst.msk [vmem:[#allocation3 + $0x20] sm:$0xff] %vm3550_vm0, %v3706_v6  ;;  %3740 = vst.msk [vmem:[#allocation3 + $0x28] sm:$0xff] %vm3550_vm0, %v3707_v1 }
 0x353   : > { %3632 = vst.msk [vmem:[#allocation2 + $0x59] sm:$0x3f] %vm3578_vm4, %v3630_v63  ;;  %v3443_v61 = vpop.f32.mrb[13].mxu0 }
 0x354   : > { %v3629_v35 = vld [vmem:[#allocation11 + $0x40] sm:$0xff]  ;;  %3564 = vst.msk [vmem:[#allocation11 + $0x68] sm:$0xff] %vm3550_vm0, %v18683_v2  ;;  %v3675_v37 = vld [vmem:[#allocation2 + $0x30] sm:$0xff]  ;;  %3563 = vst.msk [vmem:[#allocation11 + $0x60] sm:$0xff] %vm3550_vm0, %v3443_v61 }
 0x355   : > { %v3676_v38 = vld [vmem:[#allocation2 + $0x38] sm:$0xff]  ;;  %3631 = vst.msk [vmem:[#allocation2 + $0x51] sm:$0xff] %vm3550_vm0, %v3629_v35  ;;  %v3708_v39 = vmax.f32 %v3675_v37, 0.0 }
 0x356   : > { %v3709_v0 = vmax.f32 %v3676_v38, 0.0  ;;  %v3798_v7 = vld [vmem:[#allocation3 + $0x9] sm:$0xff]  ;;  %v23090_v8 = vld [vmem:[#allocation3 + $0x11] sm:$0xff]  ;;  %v18686_v10 = vpop.f32.mrb[14].mxu0 }
 0x357   : > { %v3634_v9 = vld [vmem:[#allocation11 + $0x58] sm:$0x3f]  ;;  %18708 = vmatmul.mubr.msk.f32.vlgmr.msra.gmra.mrb[28].mxu0 %vm3550_vm0, %v3798_v7  ;;  %3741 = vst.msk [vmem:[#allocation3 + $0x30] sm:$0xff] %vm3550_vm0, %v3708_v39  ;;  %3566 = vst.msk [vmem:[#allocation11 + $0x78] sm:$0xff] %vm3550_vm0, %v18686_v10  ;;  %v3453_v13 = vpop.f32.mrb[15].mxu0 }
 0x358   : > { %3742 = vst.msk [vmem:[#allocation3 + $0x38] sm:$0xff] %vm3550_vm0, %v3709_v0  ;;  %v3633_v12 = vld [vmem:[#allocation11 + $0x50] sm:$0xff]  ;;  %18710 = vmatprep.mubr.msk.f32.mxu0 %vm3550_vm0, %v23090_v8  ;;  %v3677_v14 = vld [vmem:[#allocation2 + $0x40] sm:$0xff]  ;;  %3565 = vst.msk [vmem:[#allocation11 + $0x70] sm:$0xff] %vm3550_vm0, %v3453_v13 }
 0x359   : > { %3636 = vst.msk [vmem:[#allocation2 + $0x69] sm:$0x3f] %vm3578_vm4, %v3634_v9  ;;  %v3678_v15 = vld [vmem:[#allocation2 + $0x48] sm:$0xff]  ;;  %v3710_v16 = vmax.f32 %v3677_v14, 0.0 }
 0x35a   : > { %3635 = vst.msk [vmem:[#allocation2 + $0x61] sm:$0xff] %vm3550_vm0, %v3633_v12  ;;  %v3711_v17 = vmax.f32 %v3678_v15, 0.0  ;;  %v23101_v18 = vld [vmem:[#allocation3 + $0x19] sm:$0xff]  ;;  %v23103_v19 = vld [vmem:[#allocation3 + $0x21] sm:$0xff]  ;;  %v18689_v21 = vpop.f32.mrb[16].mxu0 }
 0x35b   : > { %v3638_v20 = vld [vmem:[#allocation11 + $0x68] sm:$0x3f]  ;;  %18711 = vmatmul.mubr.msk.f32.gmra.mrb[30].mxu0 %vm3550_vm0, %v23101_v18  ;;  %3743 = vst.msk [vmem:[#allocation3 + $0x40] sm:$0xff] %vm3550_vm0, %v3710_v16  ;;  %v3637_v22 = vld [vmem:[#allocation11 + $0x60] sm:$0xff]  ;;  %3568 = vst.msk [vmem:[#allocation11 + $0x88] sm:$0xff] %vm3550_vm0, %v18689_v21  ;;  %v3463_v23 = vpop.f32.mrb[17].mxu0 }
 0x35c   : > { %3744 = vst.msk [vmem:[#allocation3 + $0x48] sm:$0xff] %vm3550_vm0, %v3711_v17  ;;  %18713 = vmatprep.mubr.msk.f32.mxu0 %vm3550_vm0, %v23103_v19  ;;  %v3679_v24 = vld [vmem:[#allocation2 + $0x50] sm:$0xff]  ;;  %v3680_v25 = vld [vmem:[#allocation2 + $0x58] sm:$0xff]  ;;  %3639 = vst.msk [vmem:[#allocation2 + $0x71] sm:$0xff] %vm3550_vm0, %v3637_v22 }
 0x35d   : > { %3640 = vst.msk [vmem:[#allocation2 + $0x79] sm:$0x3f] %vm3578_vm4, %v3638_v20  ;;  %v3712_v26 = vmax.f32 %v3679_v24, 0.0  ;;  %v3713_v27 = vmax.f32 %v3680_v25, 0.0 }
 0x35e   : > { %3567 = vst.msk [vmem:[#allocation11 + $0x80] sm:$0xff] %vm3550_vm0, %v3463_v23  ;;  %v23115_v28 = vld [vmem:[#allocation3 + $0x29] sm:$0xff]  ;;  %v18692_v40 = vpop.f32.mrb[18].mxu0 }
 0x35f   : > { %v23117_v29 = vld [vmem:[#allocation3 + $0x31] sm:$0xff]  ;;  %v3642_v30 = vld [vmem:[#allocation11 + $0x78] sm:$0x3f]  ;;  %18714 = vmatmul.mubr.msk.f32.gmra.mrb[32].mxu0 %vm3550_vm0, %v23115_v28  ;;  %3745 = vst.msk [vmem:[#allocation3 + $0x50] sm:$0xff] %vm3550_vm0, %v3712_v26  ;;  %3746 = vst.msk [vmem:[#allocation3 + $0x58] sm:$0xff] %vm3550_vm0, %v3713_v27  ;;  %v3473_v43 = vpop.f32.mrb[19].mxu0 }
 0x360   : > { %3644 = vst.msk [vmem:[#allocation2 + $0x89] sm:$0x3f] %vm3578_vm4, %v3642_v30  ;;  %v3641_v41 = vld [vmem:[#allocation11 + $0x70] sm:$0xff]  ;;  %18716 = vmatprep.mubr.msk.f32.mxu0 %vm3550_vm0, %v23117_v29 }
 0x361   : > { %3570 = vst.msk [vmem:[#allocation11 + $0x98] sm:$0xff] %vm3550_vm0, %v18692_v40  ;;  %v3681_v44 = vld [vmem:[#allocation2 + $0x60] sm:$0xff]  ;;  %v3682_v45 = vld [vmem:[#allocation2 + $0x68] sm:$0xff]  ;;  %3643 = vst.msk [vmem:[#allocation2 + $0x81] sm:$0xff] %vm3550_vm0, %v3641_v41 }
 0x362   : > { %3569 = vst.msk [vmem:[#allocation11 + $0x90] sm:$0xff] %vm3550_vm0, %v3473_v43  ;;  %v3714_v46 = vmax.f32 %v3681_v44, 0.0  ;;  %v3715_v47 = vmax.f32 %v3682_v45, 0.0  ;;  %v23129_v48 = vld [vmem:[#allocation3 + $0x39] sm:$0xff]  ;;  %v18695_v51 = vpop.f32.mrb[20].mxu0 }
 0x363   : > { %v23131_v49 = vld [vmem:[#allocation3 + $0x41] sm:$0xff]  ;;  %v3646_v50 = vld [vmem:[#allocation11 + $0x88] sm:$0x3f]  ;;  %18717 = vmatmul.mubr.msk.f32.gmra.mrb[34].mxu0 %vm3550_vm0, %v23129_v48  ;;  %3572 = vst.msk [vmem:[#allocation11 + $0xa8] sm:$0xff] %vm3550_vm0, %v18695_v51  ;;  %v3483_v53 = vpop.f32.mrb[21].mxu0 }
 0x364   : > { %3747 = vst.msk [vmem:[#allocation3 + $0x60] sm:$0xff] %vm3550_vm0, %v3714_v46  ;;  %3748 = vst.msk [vmem:[#allocation3 + $0x68] sm:$0xff] %vm3550_vm0, %v3715_v47  ;;  %18719 = vmatprep.mubr.msk.f32.mxu0 %vm3550_vm0, %v23131_v49  ;;  %v3683_v54 = vld [vmem:[#allocation2 + $0x70] sm:$0xff]  ;;  %v3684_v55 = vld [vmem:[#allocation2 + $0x78] sm:$0xff] }
 0x365   : > { %3648 = vst.msk [vmem:[#allocation2 + $0x99] sm:$0x3f] %vm3578_vm4, %v3646_v50  ;;  %v3645_v52 = vld [vmem:[#allocation11 + $0x80] sm:$0xff]  ;;  %v3716_v56 = vmax.f32 %v3683_v54, 0.0  ;;  %v3717_v57 = vmax.f32 %v3684_v55, 0.0 }
 0x366   : > { %3647 = vst.msk [vmem:[#allocation2 + $0x91] sm:$0xff] %vm3550_vm0, %v3645_v52  ;;  %3571 = vst.msk [vmem:[#allocation11 + $0xa0] sm:$0xff] %vm3550_vm0, %v3483_v53  ;;  %v23143_v58 = vld [vmem:[#allocation3 + $0x49] sm:$0xff]  ;;  %v23145_v59 = vld [vmem:[#allocation3 + $0x51] sm:$0xff]  ;;  %v18698_v4 = vpop.f32.mrb[22].mxu0 }
 0x367   : > { %18720 = vmatmul.mubr.msk.f32.gmra.mrb[36].mxu0 %vm3550_vm0, %v23143_v58  ;;  %3749 = vst.msk [vmem:[#allocation3 + $0x70] sm:$0xff] %vm3550_vm0, %v3716_v56  ;;  %3750 = vst.msk [vmem:[#allocation3 + $0x78] sm:$0xff] %vm3550_vm0, %v3717_v57  ;;  %v3493_v31 = vpop.f32.mrb[23].mxu0  ;;  %v4434_v56 = vld [vmem:[#allocation13 + $0x10] sm:$0xff] }
 0x368   : > { %v3650_v3 = vld [vmem:[#allocation11 + $0x98] sm:$0x3f]  ;;  %3574 = vst.msk [vmem:[#allocation11 + $0xb8] sm:$0xff] %vm3550_vm0, %v18698_v4  ;;  %18722 = vmatprep.mubr.msk.f32.mxu0 %vm3550_vm0, %v23145_v59  ;;  %v3685_v32 = vld [vmem:[#allocation2 + $0x80] sm:$0xff]  ;;  %v3686_v33 = vld [vmem:[#allocation2 + $0x88] sm:$0xff] }
 0x369   : > { %3652 = vst.msk [vmem:[#allocation2 + $0xa9] sm:$0x3f] %vm3578_vm4, %v3650_v3  ;;  %v3649_v11 = vld [vmem:[#allocation11 + $0x90] sm:$0xff]  ;;  %v3718_v60 = vmax.f32 %v3685_v32, 0.0  ;;  %v3719_v62 = vmax.f32 %v3686_v33, 0.0 }
 0x36a   : > { %3651 = vst.msk [vmem:[#allocation2 + $0xa1] sm:$0xff] %vm3550_vm0, %v3649_v11  ;;  %3573 = vst.msk [vmem:[#allocation11 + $0xb0] sm:$0xff] %vm3550_vm0, %v3493_v31  ;;  %v3654_v5 = vld [vmem:[#allocation11 + $0xa8] sm:$0x3f]  ;;  %v18701_v6 = vpop.f32.mrb[24].mxu0 }
 0x36b   : > { %v23157_v34 = vld [vmem:[#allocation3 + $0x59] sm:$0xff]  ;;  %v23159_v36 = vld [vmem:[#allocation3 + $0x61] sm:$0xff]  ;;  %3751 = vst.msk [vmem:[#allocation3 + $0x80] sm:$0xff] %vm3550_vm0, %v3718_v60  ;;  %3752 = vst.msk [vmem:[#allocation3 + $0x88] sm:$0xff] %vm3550_vm0, %v3719_v62  ;;  %v3503_v63 = vpop.f32.mrb[25].mxu0 }
 0x36c   : > { %18723 = vmatmul.mubr.msk.f32.gmra.mrb[38].mxu0 %vm3550_vm0, %v23157_v34  ;;  %3656 = vst.msk [vmem:[#allocation2 + $0xb9] sm:$0x3f] %vm3578_vm4, %v3654_v5  ;;  %v3768_v60 = vld [vmem:[#allocation3] sm:$0xff]  ;;  %v3769_v5 = vld [vmem:[#allocation3 + $0x8] sm:$0xff] }
 0x36d   : > { %v3653_v1 = vld [vmem:[#allocation11 + $0xa0] sm:$0xff]  ;;  %3576 = vst.msk [vmem:[#allocation11 + $0xc8] sm:$0xff] %vm3550_vm0, %v18701_v6  ;;  %18725 = vmatprep.mubr.msk.f32.mxu0 %vm3550_vm0, %v23159_v36  ;;  %v3687_v2 = vld [vmem:[#allocation2 + $0x90] sm:$0xff]  ;;  %3575 = vst.msk [vmem:[#allocation11 + $0xc0] sm:$0xff] %vm3550_vm0, %v3503_v63 }
 0x36e   : > { %v3688_v35 = vld [vmem:[#allocation2 + $0x98] sm:$0xff]  ;;  %3655 = vst.msk [vmem:[#allocation2 + $0xb1] sm:$0xff] %vm3550_vm0, %v3653_v1  ;;  %v3720_v61 = vmax.f32 %v3687_v2, 0.0  ;;  %v18704_v7 = vpop.f32.mrb[26].mxu0  ;;  %v23258_v63 = vld [vmem:[#allocation3 + $0x18] sm:$0xff]  ;;  %v23262_v2 = vld [vmem:[#allocation3 + $0x20] sm:$0xff] }
 0x36f   : > { %v3721_v37 = vmax.f32 %v3688_v35, 0.0  ;;  %v23171_v38 = vld [vmem:[#allocation3 + $0x69] sm:$0xff]  ;;  %v23173_v39 = vld [vmem:[#allocation3 + $0x71] sm:$0xff]  ;;  %3579 = vst.msk [vmem:[#allocation11 + $0xd8] sm:$0x3f] %vm3578_vm4, %v18704_v7  ;;  %v3513_v10 = vpop.f32.mrb[27].mxu0 }
 0x370   : > { %v3658_v0 = vld [vmem:[#allocation11 + $0xb8] sm:$0x3f]  ;;  %18726 = vmatmul.mubr.msk.f32.gmra.mrb[40].mxu0 %vm3550_vm0, %v23171_v38  ;;  %3753 = vst.msk [vmem:[#allocation3 + $0x90] sm:$0xff] %vm3550_vm0, %v3720_v61  ;;  %3577 = vst.msk [vmem:[#allocation11 + $0xd0] sm:$0xff] %vm3550_vm0, %v3513_v10  ;;  %v23250_v6 = vld [vmem:[#allocation13 + $0x18] sm:$0xff] }
 0x371   : > { %3754 = vst.msk [vmem:[#allocation3 + $0x98] sm:$0xff] %vm3550_vm0, %v3721_v37  ;;  %v3657_v9 = vld [vmem:[#allocation11 + $0xb0] sm:$0xff]  ;;  %18728 = vmatprep.mubr.msk.f32.mxu0 %vm3550_vm0, %v23173_v39  ;;  %v3689_v12 = vld [vmem:[#allocation2 + $0xa0] sm:$0xff]  ;;  %v23253_v1 = vld [vmem:[#allocation3 + $0x10] sm:$0xff] }
 0x372   : > { %3660 = vst.msk [vmem:[#allocation2 + $0xc9] sm:$0x3f] %vm3578_vm4, %v3658_v0  ;;  %v3690_v13 = vld [vmem:[#allocation2 + $0xa8] sm:$0xff]  ;;  %v3722_v14 = vmax.f32 %v3689_v12, 0.0  ;;  %v23266_v35 = vld [vmem:[#allocation3 + $0x28] sm:$0xff]  ;;  %v23270_v61 = vld [vmem:[#allocation3 + $0x30] sm:$0xff] }
 0x373   : > { %3659 = vst.msk [vmem:[#allocation2 + $0xc1] sm:$0xff] %vm3550_vm0, %v3657_v9  ;;  %v3723_v15 = vmax.f32 %v3690_v13, 0.0  ;;  %v23185_v16 = vld [vmem:[#allocation3 + $0x79] sm:$0xff]  ;;  %v23187_v17 = vld [vmem:[#allocation3 + $0x81] sm:$0xff]  ;;  %v23286_v9 = vld [vmem:[#allocation3 + $0x50] sm:$0xff] }
 0x374   : > { %v3662_v20 = vld [vmem:[#allocation11 + $0xc8] sm:$0x3f]  ;;  %18729 = vmatmul.mubr.msk.f32.gmra.mrb[42].mxu0 %vm3550_vm0, %v23185_v16  ;;  %3755 = vst.msk [vmem:[#allocation3 + $0xa0] sm:$0xff] %vm3550_vm0, %v3722_v14  ;;  %v3661_v21 = vld [vmem:[#allocation11 + $0xc0] sm:$0xff]  ;;  %v23278_v0 = vld [vmem:[#allocation3 + $0x40] sm:$0xff] }
 0x375   : > { %3756 = vst.msk [vmem:[#allocation3 + $0xa8] sm:$0xff] %vm3550_vm0, %v3723_v15  ;;  %18731 = vmatprep.mubr.msk.f32.mxu0 %vm3550_vm0, %v23187_v17  ;;  %v3691_v22 = vld [vmem:[#allocation2 + $0xb0] sm:$0xff]  ;;  %v3692_v23 = vld [vmem:[#allocation2 + $0xb8] sm:$0xff]  ;;  %3663 = vst.msk [vmem:[#allocation2 + $0xd1] sm:$0xff] %vm3550_vm0, %v3661_v21 }
 0x376   : > { %3664 = vst.msk [vmem:[#allocation2 + $0xd9] sm:$0x3f] %vm3578_vm4, %v3662_v20  ;;  %v3724_v24 = vmax.f32 %v3691_v22, 0.0  ;;  %v3725_v25 = vmax.f32 %v3692_v23, 0.0  ;;  %v3666_v30 = vld [vmem:[#allocation11 + $0xd8] sm:$0x3f] }
 0x377   : > { %v23197_v26 = vld [vmem:[#allocation3 + $0x89] sm:$0xff]  ;;  %3668 = vst.msk [vmem:[#allocation2 + $0xe9] sm:$0x3f] %vm3578_vm4, %v3666_v30  ;;  %v3665_v40 = vld [vmem:[#allocation11 + $0xd0] sm:$0xff]  ;;  %v23274_v37 = vld [vmem:[#allocation3 + $0x38] sm:$0xff] }
 0x378   : > { %v23199_v27 = vld [vmem:[#allocation3 + $0x91] sm:$0xff]  ;;  %18732 = vmatmul.mubr.msk.f32.gmra.mrb[44].mxu0 %vm3550_vm0, %v23197_v26  ;;  %3757 = vst.msk [vmem:[#allocation3 + $0xb0] sm:$0xff] %vm3550_vm0, %v3724_v24  ;;  %3758 = vst.msk [vmem:[#allocation3 + $0xb8] sm:$0xff] %vm3550_vm0, %v3725_v25  ;;  %v23282_v7 = vld [vmem:[#allocation3 + $0x48] sm:$0xff] }
 0x379   : > { %18734 = vmatprep.mubr.msk.f32.mxu0 %vm3550_vm0, %v23199_v27  ;;  %3667 = vst.msk [vmem:[#allocation2 + $0xe1] sm:$0xff] %vm3550_vm0, %v3665_v40  ;;  %v23290_v10 = vld [vmem:[#allocation3 + $0x58] sm:$0xff]  ;;  %v23294_v12 = vld [vmem:[#allocation3 + $0x60] sm:$0xff]  ;;  %v23298_v13 = vld [vmem:[#allocation3 + $0x68] sm:$0xff] }
 0x37a   : > { %v3693_v41 = vld [vmem:[#allocation2 + $0xc0] sm:$0xff]  ;;  %v3694_v43 = vld [vmem:[#allocation2 + $0xc8] sm:$0xff]  ;;  %v23302_v14 = vld [vmem:[#allocation3 + $0x70] sm:$0xff] }
 0x37b   : > { %v3726_v44 = vmax.f32 %v3693_v41, 0.0  ;;  %v3727_v45 = vmax.f32 %v3694_v43, 0.0  ;;  %v23209_v46 = vld [vmem:[#allocation3 + $0x99] sm:$0xff]  ;;  %v23314_v21 = vld [vmem:[#allocation3 + $0x88] sm:$0xff]  ;;  %v23318_v22 = vld [vmem:[#allocation3 + $0x90] sm:$0xff] }
 0x37c   : > { %v23211_v47 = vld [vmem:[#allocation3 + $0xa1] sm:$0xff]  ;;  %18735 = vmatmul.mubr.msk.f32.gmra.mrb[46].mxu0 %vm3550_vm0, %v23209_v46  ;;  %v23306_v15 = vld [vmem:[#allocation3 + $0x78] sm:$0xff] }
 0x37d   : > { %18737 = vmatprep.mubr.msk.f32.mxu1 %vm3550_vm0, %v23211_v47  ;;  %3759 = vst.msk [vmem:[#allocation3 + $0xc0] sm:$0xff] %vm3550_vm0, %v3726_v44  ;;  %3760 = vst.msk [vmem:[#allocation3 + $0xc8] sm:$0xff] %vm3550_vm0, %v3727_v45  ;;  %v3695_v50 = vld [vmem:[#allocation2 + $0xd0] sm:$0xff]  ;;  %v3696_v51 = vld [vmem:[#allocation2 + $0xd8] sm:$0xff] }
 0x37e   : > { %v3728_v52 = vmax.f32 %v3695_v50, 0.0  ;;  %v3729_v53 = vmax.f32 %v3696_v51, 0.0  ;;  %v23310_v20 = vld [vmem:[#allocation3 + $0x80] sm:$0xff]  ;;  %v23322_v23 = vld [vmem:[#allocation3 + $0x98] sm:$0xff]  ;;  %v23330_v25 = vld [vmem:[#allocation3 + $0xa8] sm:$0xff] }
 0x37f   : > { %v23219_v54 = vld [vmem:[#allocation3 + $0xa9] sm:$0xff]  ;;  %v23221_v55 = vld [vmem:[#allocation3 + $0xb1] sm:$0xff]  ;;  %v23326_v24 = vld [vmem:[#allocation3 + $0xa0] sm:$0xff] }
 0x380   : > { %18738 = vmatmul.mubr.msk.f32.vlgmr.msra.gmra.mrb[0].mxu1 %vm3550_vm0, %v23219_v54  ;;  %3761 = vst.msk [vmem:[#allocation3 + $0xd0] sm:$0xff] %vm3550_vm0, %v3728_v52  ;;  %3762 = vst.msk [vmem:[#allocation3 + $0xd8] sm:$0xff] %vm3550_vm0, %v3729_v53  ;;  %v3697_v57 = vld [vmem:[#allocation2 + $0xe0] sm:$0xff]  ;;  %v3698_v3 = vld [vmem:[#allocation2 + $0xe8] sm:$0xff] }
 0x381   : > { %18740 = vmatprep.mubr.msk.f32.mxu1 %vm3550_vm0, %v23221_v55  ;;  %18750 = vmatpush3.msra.mxu1 %v23058_v42  ;;  %v3730_v4 = vmax.f32 %v3697_v57, 0.0  ;;  %v3731_v11 = vmax.f32 %v3698_v3, 0.0  ;;  %v23334_v30 = vld [vmem:[#allocation3 + $0xb0] sm:$0xff]  ;;  %v23338_v40 = vld [vmem:[#allocation3 + $0xb8] sm:$0xff]  ;;  %v4405_v45 = vld [vmem:[#allocation3 + $0x2] sm:$0xff] }
 0x382   : > { %18793 = vmatprep.subr.mxu1 %v4434_v56  ;;  %25916 = vst [vmem:[#allocation41_spill] sm:$0xff] %v23334_v30  ;;  %v4406_v51 = vld [vmem:[#allocation3 + $0xa] sm:$0xff]  ;;  %v5128_v52 = vld [vmem:[#allocation13 + $0x20] sm:$0xff]  ;;  %v23366_v57 = vld [vmem:[#allocation3 + $0x22] sm:$0xff] }
 0x383   : > { %3763 = vst.msk [vmem:[#allocation3 + $0xe0] sm:$0xff] %vm3550_vm0, %v3730_v4  ;;  %3764 = vst.msk [vmem:[#allocation3 + $0xe8] sm:$0xff] %vm3550_vm0, %v3731_v11  ;;  %v23357_v53 = vld [vmem:[#allocation3 + $0x12] sm:$0xff]  ;;  %v23370_v3 = vld [vmem:[#allocation3 + $0x2a] sm:$0xff] }
 0x384   : > { %v23230_v31 = vld [vmem:[#allocation3 + $0xb9] sm:$0xff]  ;;  %v23232_v32 = vld [vmem:[#allocation3 + $0xc1] sm:$0xff] }
 0x385   : > { %18741 = vmatmul.mubr.msk.f32.gmra.mrb[2].mxu1 %vm3550_vm0, %v23230_v31  ;;  %v23342_v41 = vld [vmem:[#allocation3 + $0xc0] sm:$0xff]  ;;  %v23346_v43 = vld [vmem:[#allocation3 + $0xc8] sm:$0xff]  ;;  %v23374_v4 = vld [vmem:[#allocation3 + $0x32] sm:$0xff] }
 0x386   : > { %18743 = vmatprep.mubr.msk.f32.mxu1 %vm3550_vm0, %v23232_v32  ;;  %25917 = vst [vmem:[#allocation44_spill] sm:$0xff] %v23342_v41  ;;  %25918 = vst [vmem:[#allocation45_spill] sm:$0xff] %v23346_v43  ;;  %v23378_v11 = vld [vmem:[#allocation3 + $0x3a] sm:$0xff] }
 0x387   : > { %v23240_v42 = vld [vmem:[#allocation3 + $0xc9] sm:$0xff]  ;;  %v23242_v33 = vld [vmem:[#allocation3 + $0xd1] sm:$0xff]  ;;  %v3824_v62 = vld [vmem:[#allocation3 + $0xd9] sm:$0x3f] }
 0x388   : > { %v23350_v44 = vld [vmem:[#allocation3 + $0xd0] sm:$0xff]  ;;  %v3795_v50 = vld [vmem:[#allocation3 + $0xd8] sm:$0x3f] }
 0x389   : > { %18744 = vmatmul.mubr.msk.f32.gmra.mrb[4].mxu1 %vm3550_vm0, %v23240_v42  ;;  %25919 = vst [vmem:[#allocation48_spill] sm:$0xff] %v23350_v44 }
 0x38a   : > { %18746 = vmatprep.mubr.msk.f32.mxu1 %vm3550_vm0, %v23242_v33 }
 0x38d   : > { %18747 = vmatmul.mubr.msk.f32.gmra.mrb[6].mxu1 %vm3550_vm0, %v3824_v62  ;;  %v23386_v62 = vld [vmem:[#allocation3 + $0x4a] sm:$0xff] }
 0x38e   : > { %18751 = vmatprep.mubr.msk.f32.mxu1 %vm3550_vm0, %v3768_v60  ;;  %v23382_v60 = vld [vmem:[#allocation3 + $0x42] sm:$0xff] }
 0x391   : > { %18752 = vmatmul.mubr.msk.f32.vlgmr.msra.gmra.mrb[8].mxu1 %vm3550_vm0, %v3769_v5  ;;  %v23390_v5 = vld [vmem:[#allocation3 + $0x52] sm:$0xff] }
 0x392   : > { %18754 = vmatprep.mubr.msk.f32.mxu1 %vm3550_vm0, %v23253_v1  ;;  %18794 = vmatpush3.msra.mxu1 %v4434_v56  ;;  %v23362_v56 = vld [vmem:[#allocation3 + $0x1a] sm:$0xff]  ;;  %25920 = vst [vmem:[#allocation50_spill] sm:$0xff] %v23390_v5 }
 0x393   : > { %18837 = vmatprep.subr.mxu1 %v23250_v6 }
 0x395   : > { %18755 = vmatmul.mubr.msk.f32.gmra.mrb[10].mxu1 %vm3550_vm0, %v23258_v63 }
 0x396   : > { %18757 = vmatprep.mubr.msk.f32.mxu1 %vm3550_vm0, %v23262_v2 }
 0x399   : > { %18758 = vmatmul.mubr.msk.f32.gmra.mrb[12].mxu1 %vm3550_vm0, %v23266_v35 }
 0x39a   : > { %18760 = vmatprep.mubr.msk.f32.mxu1 %vm3550_vm0, %v23270_v61 }
 0x39d   : > { %18761 = vmatmul.mubr.msk.f32.gmra.mrb[14].mxu1 %vm3550_vm0, %v23274_v37 }
 0x39e   : > { %18763 = vmatprep.mubr.msk.f32.mxu1 %vm3550_vm0, %v23278_v0 }
 0x3a1   : > { %18764 = vmatmul.mubr.msk.f32.gmra.mrb[16].mxu1 %vm3550_vm0, %v23282_v7 }
 0x3a2   : > { %18766 = vmatprep.mubr.msk.f32.mxu1 %vm3550_vm0, %v23286_v9 }
 0x3a5   : > { %18767 = vmatmul.mubr.msk.f32.gmra.mrb[18].mxu1 %vm3550_vm0, %v23290_v10 }
 0x3a6   : > { %18769 = vmatprep.mubr.msk.f32.mxu1 %vm3550_vm0, %v23294_v12 }
 0x3a9   : > { %18770 = vmatmul.mubr.msk.f32.gmra.mrb[20].mxu1 %vm3550_vm0, %v23298_v13 }
 0x3aa   : > { %18772 = vmatprep.mubr.msk.f32.mxu1 %vm3550_vm0, %v23302_v14 }
 0x3ad   : > { %18773 = vmatmul.mubr.msk.f32.gmra.mrb[22].mxu1 %vm3550_vm0, %v23306_v15 }
 0x3ae   : > { %18775 = vmatprep.mubr.msk.f32.mxu1 %vm3550_vm0, %v23310_v20 }
 0x3b1   : > { %18776 = vmatmul.mubr.msk.f32.gmra.mrb[24].mxu1 %vm3550_vm0, %v23314_v21 }
 0x3b2   : > { %18778 = vmatprep.mubr.msk.f32.mxu1 %vm3550_vm0, %v23318_v22 }
 0x3b5   : > { %18779 = vmatmul.mubr.msk.f32.gmra.mrb[26].mxu1 %vm3550_vm0, %v23322_v23 }
 0x3b6   : > { %18781 = vmatprep.mubr.msk.f32.mxu1 %vm3550_vm0, %v23326_v24 }
 0x3b9   : > { %18782 = vmatmul.mubr.msk.f32.gmra.mrb[0].mxu1 %vm3550_vm0, %v23330_v25 }
 0x3ba   : > { %18784 = vmatprep.mubr.msk.f32.mxu1 %vm3550_vm0, %v23334_v30 }
 0x3bd   : > { %18785 = vmatmul.mubr.msk.f32.gmra.mrb[2].mxu1 %vm3550_vm0, %v23338_v40 }
 0x3be   : > { %18787 = vmatprep.mubr.msk.f32.mxu1 %vm3550_vm0, %v23342_v41 }
 0x3c1   : > { %18788 = vmatmul.mubr.msk.f32.gmra.mrb[4].mxu1 %vm3550_vm0, %v23346_v43 }
 0x3c2   : > { %18790 = vmatprep.mubr.msk.f32.mxu1 %vm3550_vm0, %v23350_v44 }
 0x3c5   : > { %18791 = vmatmul.mubr.msk.f32.gmra.mrb[6].mxu1 %vm3550_vm0, %v3795_v50  ;;  %v23402_v50 = vld [vmem:[#allocation3 + $0x6a] sm:$0xff] }
 0x3c6   : > { %18795 = vmatprep.mubr.msk.f32.mxu1 %vm3550_vm0, %v4405_v45  ;;  %v23398_v45 = vld [vmem:[#allocation3 + $0x62] sm:$0xff]  ;;  %25923 = vst [vmem:[#allocation35_spill] sm:$0xff] %v23402_v50 }
 0x3c7   : > { %25922 = vst [vmem:[#allocation34_spill] sm:$0xff] %v23398_v45 }
 0x3c9   : > { %18796 = vmatmul.mubr.msk.f32.vlgmr.msra.gmra.mrb[8].mxu1 %vm3550_vm0, %v4406_v51  ;;  %v23406_v51 = vld [vmem:[#allocation3 + $0x72] sm:$0xff] }
 0x3ca   : > { %18798 = vmatprep.mubr.msk.f32.mxu1 %vm3550_vm0, %v23357_v53  ;;  %18838 = vmatpush3.msra.mxu1 %v23250_v6  ;;  %v23394_v6 = vld [vmem:[#allocation3 + $0x5a] sm:$0xff]  ;;  %25924 = vst [vmem:[#allocation36_spill] sm:$0xff] %v23406_v51 }
 0x3cb   : > { %18881 = vmatprep.subr.mxu1 %v5128_v52  ;;  %25921 = vst [vmem:[#allocation33_spill] sm:$0xff] %v23394_v6 }
 0x3cd   : > { %18799 = vmatmul.mubr.msk.f32.gmra.mrb[10].mxu1 %vm3550_vm0, %v23362_v56 }
 0x3ce   : > { %18801 = vmatprep.mubr.msk.f32.mxu1 %vm3550_vm0, %v23366_v57 }
 0x3d1   : > { %18802 = vmatmul.mubr.msk.f32.gmra.mrb[12].mxu1 %vm3550_vm0, %v23370_v3 }
 0x3d2   : > { %18804 = vmatprep.mubr.msk.f32.mxu1 %vm3550_vm0, %v23374_v4 }
 0x3d5   : > { %18805 = vmatmul.mubr.msk.f32.gmra.mrb[14].mxu1 %vm3550_vm0, %v23378_v11 }
 0x3d6   : > { %18807 = vmatprep.mubr.msk.f32.mxu1 %vm3550_vm0, %v23382_v60 }
 0x3d9   : > { %18808 = vmatmul.mubr.msk.f32.gmra.mrb[16].mxu1 %vm3550_vm0, %v23386_v62 }
 0x3da   : > { %18810 = vmatprep.mubr.msk.f32.mxu1 %vm3550_vm0, %v23390_v5  ;;  %v23410_v5 = vld [vmem:[#allocation3 + $0x7a] sm:$0xff] }
 0x3db   : > { %25925 = vst [vmem:[#allocation37_spill] sm:$0xff] %v23410_v5 }
 0x3dd   : > { %18811 = vmatmul.mubr.msk.f32.gmra.mrb[18].mxu1 %vm3550_vm0, %v23394_v6  ;;  %v23414_v6 = vld [vmem:[#allocation3 + $0x82] sm:$0xff] }
 0x3de   : > { %18813 = vmatprep.mubr.msk.f32.mxu1 %vm3550_vm0, %v23398_v45  ;;  %25926 = vst [vmem:[#allocation38_spill] sm:$0xff] %v23414_v6  ;;  %v23418_v45 = vld [vmem:[#allocation3 + $0x8a] sm:$0xff] }
 0x3df   : > { %25927 = vst [vmem:[#allocation39_spill] sm:$0xff] %v23418_v45 }
 0x3e1   : > { %18814 = vmatmul.mubr.msk.f32.gmra.mrb[20].mxu1 %vm3550_vm0, %v23402_v50  ;;  %v23422_v50 = vld [vmem:[#allocation3 + $0x92] sm:$0xff] }
 0x3e2   : > { %18816 = vmatprep.mubr.msk.f32.mxu1 %vm3550_vm0, %v23406_v51  ;;  %25928 = vst [vmem:[#allocation40_spill] sm:$0xff] %v23422_v50  ;;  %v23426_v51 = vld [vmem:[#allocation3 + $0x9a] sm:$0xff] }
 0x3e3   : > { %25929 = vst [vmem:[#allocation42_spill] sm:$0xff] %v23426_v51 }
 0x3e5   : > { %18817 = vmatmul.mubr.msk.f32.gmra.mrb[22].mxu1 %vm3550_vm0, %v23410_v5  ;;  %v23430_v5 = vld [vmem:[#allocation3 + $0xa2] sm:$0xff] }
 0x3e6   : > { %18819 = vmatprep.mubr.msk.f32.mxu1 %vm3550_vm0, %v23414_v6  ;;  %25930 = vst [vmem:[#allocation43_spill] sm:$0xff] %v23430_v5  ;;  %v23434_v6 = vld [vmem:[#allocation3 + $0xaa] sm:$0xff] }
 0x3e7   : > { %25931 = vst [vmem:[#allocation46_spill] sm:$0xff] %v23434_v6 }
 0x3e9   : > { %18820 = vmatmul.mubr.msk.f32.gmra.mrb[24].mxu1 %vm3550_vm0, %v23418_v45  ;;  %v23438_v45 = vld [vmem:[#allocation3 + $0xb2] sm:$0xff] }
 0x3ea   : > { %18822 = vmatprep.mubr.msk.f32.mxu1 %vm3550_vm0, %v23422_v50  ;;  %25932 = vst [vmem:[#allocation47_spill] sm:$0xff] %v23438_v45  ;;  %v23442_v50 = vld [vmem:[#allocation3 + $0xba] sm:$0xff] }
 0x3eb   : > { %25933 = vst [vmem:[#allocation49_spill] sm:$0xff] %v23442_v50 }
 0x3ed   : > { %18823 = vmatmul.mubr.msk.f32.gmra.mrb[26].mxu1 %vm3550_vm0, %v23426_v51  ;;  %v23446_v51 = vld [vmem:[#allocation3 + $0xc2] sm:$0xff] }
 0x3ee   : > { %18825 = vmatprep.mubr.msk.f32.mxu1 %vm3550_vm0, %v23430_v5  ;;  %v23450_v5 = vld [vmem:[#allocation3 + $0xca] sm:$0xff] }
 0x3ef   : > { %25934 = vst [vmem:[#allocation51_spill] sm:$0xff] %v23450_v5 }
 0x3f1   : > { %18826 = vmatmul.mubr.msk.f32.gmra.mrb[0].mxu1 %vm3550_vm0, %v23434_v6  ;;  %v23454_v6 = vld [vmem:[#allocation3 + $0xd2] sm:$0xff] }
 0x3f2   : > { %18828 = vmatprep.mubr.msk.f32.mxu1 %vm3550_vm0, %v23438_v45  ;;  %v4432_v45 = vld [vmem:[#allocation3 + $0xda] sm:$0x3f] }
 0x3f5   : > { %18829 = vmatmul.mubr.msk.f32.gmra.mrb[2].mxu1 %vm3550_vm0, %v23442_v50  ;;  %v5475_v50 = vld [vmem:[#allocation13 + $0x28] sm:$0xff] }
 0x3f6   : > { %18831 = vmatprep.mubr.msk.f32.mxu1 %vm3550_vm0, %v23446_v51 }
 0x3f9   : > { %18832 = vmatmul.mubr.msk.f32.gmra.mrb[4].mxu1 %vm3550_vm0, %v23450_v5 }
 0x3fa   : > { %18834 = vmatprep.mubr.msk.f32.mxu1 %vm3550_vm0, %v23454_v6 }
 0x3fd   : > { %18835 = vmatmul.mubr.msk.f32.gmra.mrb[6].mxu1 %vm3550_vm0, %v4432_v45  ;;  %v23515_v45 = vld [vmem:[#allocation3 + $0xd8] sm:$0xff] }
 0x3fe   : > { %18839 = vmatprep.mubr.msk.f32.mxu1 %vm3550_vm0, %v23253_v1 }
 0x401   : > { %18840 = vmatmul.mubr.msk.f32.vlgmr.msra.gmra.mrb[8].mxu1 %vm3550_vm0, %v23258_v63 }
 0x402   : > { %18842 = vmatprep.mubr.msk.f32.mxu1 %vm3550_vm0, %v23262_v2  ;;  %18882 = vmatpush3.msra.mxu1 %v5128_v52 }
 0x403   : > { %18925 = vmatprep.subr.mxu1 %v5475_v50 }
 0x405   : > { %18843 = vmatmul.mubr.msk.f32.gmra.mrb[10].mxu1 %vm3550_vm0, %v23266_v35 }
 0x406   : > { %18845 = vmatprep.mubr.msk.f32.mxu1 %vm3550_vm0, %v23270_v61 }
 0x409   : > { %18846 = vmatmul.mubr.msk.f32.gmra.mrb[12].mxu1 %vm3550_vm0, %v23274_v37 }
 0x40a   : > { %18848 = vmatprep.mubr.msk.f32.mxu1 %vm3550_vm0, %v23278_v0 }
 0x40d   : > { %18849 = vmatmul.mubr.msk.f32.gmra.mrb[14].mxu1 %vm3550_vm0, %v23282_v7 }
 0x40e   : > { %18851 = vmatprep.mubr.msk.f32.mxu1 %vm3550_vm0, %v23286_v9 }
 0x411   : > { %18852 = vmatmul.mubr.msk.f32.gmra.mrb[16].mxu1 %vm3550_vm0, %v23290_v10 }
 0x412   : > { %18854 = vmatprep.mubr.msk.f32.mxu1 %vm3550_vm0, %v23294_v12 }
 0x415   : > { %18855 = vmatmul.mubr.msk.f32.gmra.mrb[18].mxu1 %vm3550_vm0, %v23298_v13 }
 0x416   : > { %18857 = vmatprep.mubr.msk.f32.mxu1 %vm3550_vm0, %v23302_v14 }
 0x419   : > { %18858 = vmatmul.mubr.msk.f32.gmra.mrb[20].mxu1 %vm3550_vm0, %v23306_v15 }
 0x41a   : > { %18860 = vmatprep.mubr.msk.f32.mxu1 %vm3550_vm0, %v23310_v20 }
 0x41d   : > { %18861 = vmatmul.mubr.msk.f32.gmra.mrb[22].mxu1 %vm3550_vm0, %v23314_v21 }
 0x41e   : > { %18863 = vmatprep.mubr.msk.f32.mxu1 %vm3550_vm0, %v23318_v22 }
 0x421   : > { %18864 = vmatmul.mubr.msk.f32.gmra.mrb[24].mxu1 %vm3550_vm0, %v23322_v23 }
 0x422   : > { %18866 = vmatprep.mubr.msk.f32.mxu1 %vm3550_vm0, %v23326_v24 }
 0x425   : > { %18867 = vmatmul.mubr.msk.f32.gmra.mrb[26].mxu1 %vm3550_vm0, %v23330_v25 }
 0x426   : > { %18869 = vmatprep.mubr.msk.f32.mxu1 %vm3550_vm0, %v23334_v30 }
 0x429   : > { %18870 = vmatmul.mubr.msk.f32.gmra.mrb[0].mxu1 %vm3550_vm0, %v23338_v40 }
 0x42a   : > { %18872 = vmatprep.mubr.msk.f32.mxu1 %vm3550_vm0, %v23342_v41  ;;  %v23505_v1 = vpop.f32.mrb[28].mxu0  ;;  %v23521_v41 = vld [vmem:[#allocation3 + $0xe0] sm:$0xff] }
 0x42b   : > { %25935 = vst [vmem:[#allocation52_spill] sm:$0xff] %v23505_v1  ;;  %v23507_v63 = vpop.f32.mrb[29].mxu0  ;;  %v4779_v1 = vld [vmem:[#allocation3 + $0xe8] sm:$0x3f] }
 0x42c   : > { %25936 = vst [vmem:[#allocation53_spill] sm:$0xff] %v23507_v63 }
 0x42d   : > { %18873 = vmatmul.mubr.msk.f32.gmra.mrb[2].mxu1 %vm3550_vm0, %v23346_v43 }
 0x42e   : > { %18875 = vmatprep.mubr.msk.f32.mxu1 %vm3550_vm0, %v23350_v44  ;;  %v23513_v52 = vpop.f32.mrb[30].mxu0 }
 0x42f   : > { %25937 = vst [vmem:[#allocation54_spill] sm:$0xff] %v23513_v52  ;;  %v23517_v30 = vpop.f32.mrb[31].mxu0 }
 0x430   : > { %25938 = vst [vmem:[#allocation55_spill] sm:$0xff] %v23517_v30  ;;  %v5822_v30 = vld [vmem:[#allocation13 + $0x30] sm:$0xff] }
 0x431   : > { %18876 = vmatmul.mubr.msk.f32.gmra.mrb[4].mxu1 %vm3550_vm0, %v23515_v45 }
 0x432   : > { %18878 = vmatprep.mubr.msk.f32.mxu1 %vm3550_vm0, %v23521_v41  ;;  %v23525_v63 = vpop.f32.mrb[32].mxu0 }
 0x433   : > { %25939 = vst [vmem:[#allocation56_spill] sm:$0xff] %v23525_v63  ;;  %v23527_v43 = vpop.f32.mrb[33].mxu0 }
 0x434   : > { %25940 = vst [vmem:[#allocation57_spill] sm:$0xff] %v23527_v43 }
 0x435   : > { %18879 = vmatmul.mubr.msk.f32.gmra.mrb[6].mxu1 %vm3550_vm0, %v4779_v1 }
 0x436   : > { %18883 = vmatprep.mubr.msk.f32.mxu1 %vm3550_vm0, %v23090_v8  ;;  %v23532_v52 = vpop.f32.mrb[34].mxu0 }
 0x437   : > { %25941 = vst [vmem:[#allocation58_spill] sm:$0xff] %v23532_v52  ;;  %v23534_v44 = vpop.f32.mrb[35].mxu0  ;;  %v25968_v52 = vld [vmem:[#allocation49_spill] sm:$0xff] }
 0x438   : > { %25942 = vst [vmem:[#allocation59_spill] sm:$0xff] %v23534_v44  ;;  %v25967_v44 = vld [vmem:[#allocation47_spill] sm:$0xff] }
 0x439   : > { %18884 = vmatmul.mubr.msk.f32.vlgmr.msra.gmra.mrb[8].mxu1 %vm3550_vm0, %v23101_v18 }
 0x43a   : > { %18886 = vmatprep.mubr.msk.f32.mxu1 %vm3550_vm0, %v23103_v19  ;;  %18926 = vmatpush3.msra.mxu1 %v5475_v50  ;;  %v23540_v63 = vpop.f32.mrb[36].mxu0 }
 0x43b   : > { %18969 = vmatprep.subr.mxu1 %v5822_v30  ;;  %25943 = vst [vmem:[#allocation60_spill] sm:$0xff] %v23540_v63  ;;  %v23542_v43 = vpop.f32.mrb[37].mxu0  ;;  %v25966_v63 = vld [vmem:[#allocation46_spill] sm:$0xff] }
 0x43c   : > { %25944 = vst [vmem:[#allocation61_spill] sm:$0xff] %v23542_v43  ;;  %v25965_v43 = vld [vmem:[#allocation43_spill] sm:$0xff] }
 0x43d   : > { %18887 = vmatmul.mubr.msk.f32.gmra.mrb[10].mxu1 %vm3550_vm0, %v23115_v28 }
 0x43e   : > { %18889 = vmatprep.mubr.msk.f32.mxu1 %vm3550_vm0, %v23117_v29 }
 0x43f   : > { %v23548_v8 = vpop.f32.mrb[38].mxu0 }
 0x440   : > { %25945 = vst [vmem:[#allocation62_spill] sm:$0xff] %v23548_v8  ;;  %v23550_v1 = vpop.f32.mrb[39].mxu0  ;;  %v25964_v8 = vld [vmem:[#allocation42_spill] sm:$0xff] }
 0x441   : > { %25946 = vst [vmem:[#allocation63_spill] sm:$0xff] %v23550_v1  ;;  %18890 = vmatmul.mubr.msk.f32.gmra.mrb[12].mxu1 %vm3550_vm0, %v23129_v48  ;;  %v25963_v1 = vld [vmem:[#allocation40_spill] sm:$0xff] }
 0x442   : > { %18892 = vmatprep.mubr.msk.f32.mxu1 %vm3550_vm0, %v23131_v49 }
 0x443   : > { %v23556_v18 = vpop.f32.mrb[40].mxu0 }
 0x444   : > { %25947 = vst [vmem:[#allocation64_spill] sm:$0xff] %v23556_v18  ;;  %v23558_v19 = vpop.f32.mrb[41].mxu0  ;;  %v25962_v18 = vld [vmem:[#allocation39_spill] sm:$0xff] }
 0x445   : > { %25948 = vst [vmem:[#allocation65_spill] sm:$0xff] %v23558_v19  ;;  %18893 = vmatmul.mubr.msk.f32.gmra.mrb[14].mxu1 %vm3550_vm0, %v23143_v58  ;;  %v25961_v19 = vld [vmem:[#allocation38_spill] sm:$0xff] }
 0x446   : > { %18895 = vmatprep.mubr.msk.f32.mxu1 %vm3550_vm0, %v23145_v59 }
 0x447   : > { %v23564_v28 = vpop.f32.mrb[42].mxu0 }
 0x448   : > { %25949 = vst [vmem:[#allocation66_spill] sm:$0xff] %v23564_v28  ;;  %v23566_v29 = vpop.f32.mrb[43].mxu0  ;;  %v25960_v28 = vld [vmem:[#allocation37_spill] sm:$0xff] }
 0x449   : > { %25950 = vst [vmem:[#allocation67_spill] sm:$0xff] %v23566_v29  ;;  %18896 = vmatmul.mubr.msk.f32.gmra.mrb[16].mxu1 %vm3550_vm0, %v23157_v34  ;;  %v25959_v29 = vld [vmem:[#allocation36_spill] sm:$0xff] }
 0x44a   : > { %18898 = vmatprep.mubr.msk.f32.mxu1 %vm3550_vm0, %v23159_v36 }
 0x44b   : > { %v23572_v48 = vpop.f32.mrb[44].mxu0 }
 0x44c   : > { %25951 = vst [vmem:[#allocation68_spill] sm:$0xff] %v23572_v48  ;;  %v23574_v49 = vpop.f32.mrb[45].mxu0 }
 0x44d   : > { %25952 = vst [vmem:[#allocation69_spill] sm:$0xff] %v23574_v49  ;;  %18899 = vmatmul.mubr.msk.f32.gmra.mrb[18].mxu1 %vm3550_vm0, %v23171_v38  ;;  %v3700_v49 = vld [vmem:[#allocation2 + $0xf8] sm:$0xff] }
 0x44e   : > { %18901 = vmatprep.mubr.msk.f32.mxu1 %vm3550_vm0, %v23173_v39  ;;  %v3733_v48 = vmax.f32 %v3700_v49, 0.0  ;;  %v23613_v49 = vld [vmem:[#allocation3 + $0xe1] sm:$0xff] }
 0x44f   : > { %v23580_v58 = vpop.f32.mrb[46].mxu0 }
 0x450   : > { %25953 = vst [vmem:[#allocation70_spill] sm:$0xff] %v23580_v58  ;;  %v23582_v50 = vpop.f32.mrb[47].mxu0  ;;  %3766 = vst.msk [vmem:[#allocation3 + $0xf8] sm:$0xff] %vm3550_vm0, %v3733_v48  ;;  %v23609_v48 = vld [vmem:[#allocation3 + $0xd9] sm:$0xff]  ;;  %v6169_v58 = vld [vmem:[#allocation13 + $0x38] sm:$0xff] }
 0x451   : > { %25954 = vst [vmem:[#allocation71_spill] sm:$0xff] %v23582_v50  ;;  %18902 = vmatmul.mubr.msk.f32.gmra.mrb[20].mxu1 %vm3550_vm0, %v23185_v16  ;;  %v5126_v50 = vld [vmem:[#allocation3 + $0xe9] sm:$0x3f] }
 0x452   : > { %18904 = vmatprep.mubr.msk.f32.mxu1 %vm3550_vm0, %v23187_v17 }
 0x455   : > { %18905 = vmatmul.mubr.msk.f32.gmra.mrb[22].mxu1 %vm3550_vm0, %v23197_v26 }
 0x456   : > { %18907 = vmatprep.mubr.msk.f32.mxu1 %vm3550_vm0, %v23199_v27 }
 0x459   : > { %18908 = vmatmul.mubr.msk.f32.gmra.mrb[24].mxu1 %vm3550_vm0, %v23209_v46 }
 0x45a   : > { %18910 = vmatprep.mubr.msk.f32.mxu1 %vm3550_vm0, %v23211_v47 }
 0x45d   : > { %18911 = vmatmul.mubr.msk.f32.gmra.mrb[26].mxu1 %vm3550_vm0, %v23219_v54 }
 0x45e   : > { %18913 = vmatprep.mubr.msk.f32.mxu1 %vm3550_vm0, %v23221_v55 }
 0x461   : > { %18914 = vmatmul.mubr.msk.f32.gmra.mrb[0].mxu1 %vm3550_vm0, %v23230_v31 }
 0x462   : > { %18916 = vmatprep.mubr.msk.f32.mxu1 %vm3550_vm0, %v23232_v32 }
 0x465   : > { %18917 = vmatmul.mubr.msk.f32.gmra.mrb[2].mxu1 %vm3550_vm0, %v23240_v42 }
 0x466   : > { %18919 = vmatprep.mubr.msk.f32.mxu1 %vm3550_vm0, %v23242_v33 }
 0x469   : > { %18920 = vmatmul.mubr.msk.f32.gmra.mrb[4].mxu1 %vm3550_vm0, %v23609_v48 }
 0x46a   : > { %18922 = vmatprep.mubr.msk.f32.mxu1 %vm3550_vm0, %v23613_v49 }
 0x46d   : > { %18923 = vmatmul.mubr.msk.f32.gmra.mrb[6].mxu1 %vm3550_vm0, %v5126_v50  ;;  %v25958_v50 = vld [vmem:[#allocation35_spill] sm:$0xff] }
 0x46e   : > { %18927 = vmatprep.mubr.msk.f32.mxu1 %vm3550_vm0, %v23357_v53  ;;  %v25955_v53 = vld [vmem:[#allocation50_spill] sm:$0xff] }
 0x471   : > { %18928 = vmatmul.mubr.msk.f32.vlgmr.msra.gmra.mrb[8].mxu1 %vm3550_vm0, %v23362_v56  ;;  %v25957_v56 = vld [vmem:[#allocation34_spill] sm:$0xff] }
 0x472   : > { %18930 = vmatprep.mubr.msk.f32.mxu1 %vm3550_vm0, %v23366_v57  ;;  %18970 = vmatpush3.msra.mxu1 %v5822_v30  ;;  %v25956_v30 = vld [vmem:[#allocation33_spill] sm:$0xff] }
 0x473   : > { %19013 = vmatprep.subr.mxu1 %v6169_v58 }
 0x475   : > { %18931 = vmatmul.mubr.msk.f32.gmra.mrb[10].mxu1 %vm3550_vm0, %v23370_v3 }
 0x476   : > { %18933 = vmatprep.mubr.msk.f32.mxu1 %vm3550_vm0, %v23374_v4 }
 0x479   : > { %18934 = vmatmul.mubr.msk.f32.gmra.mrb[12].mxu1 %vm3550_vm0, %v23378_v11 }
 0x47a   : > { %18936 = vmatprep.mubr.msk.f32.mxu1 %vm3550_vm0, %v23382_v60 }
 0x47d   : > { %18937 = vmatmul.mubr.msk.f32.gmra.mrb[14].mxu1 %vm3550_vm0, %v23386_v62 }
 0x47e   : > { %18939 = vmatprep.mubr.msk.f32.mxu1 %vm3550_vm0, %v25955_v53 }
 0x481   : > { %18940 = vmatmul.mubr.msk.f32.gmra.mrb[16].mxu1 %vm3550_vm0, %v25956_v30 }
 0x482   : > { %18942 = vmatprep.mubr.msk.f32.mxu1 %vm3550_vm0, %v25957_v56 }
 0x485   : > { %18943 = vmatmul.mubr.msk.f32.gmra.mrb[18].mxu1 %vm3550_vm0, %v25958_v50 }
 0x486   : > { %18945 = vmatprep.mubr.msk.f32.mxu1 %vm3550_vm0, %v25959_v29 }
 0x489   : > { %18946 = vmatmul.mubr.msk.f32.gmra.mrb[20].mxu1 %vm3550_vm0, %v25960_v28 }
 0x48a   : > { %18948 = vmatprep.mubr.msk.f32.mxu1 %vm3550_vm0, %v25961_v19 }
 0x48d   : > { %18949 = vmatmul.mubr.msk.f32.gmra.mrb[22].mxu1 %vm3550_vm0, %v25962_v18 }
 0x48e   : > { %18951 = vmatprep.mubr.msk.f32.mxu1 %vm3550_vm0, %v25963_v1 }
 0x491   : > { %18952 = vmatmul.mubr.msk.f32.gmra.mrb[24].mxu1 %vm3550_vm0, %v25964_v8  ;;  %v23668_v8 = vld [vmem:[#allocation3 + $0xda] sm:$0xff] }
 0x492   : > { %18954 = vmatprep.mubr.msk.f32.mxu1 %vm3550_vm0, %v25965_v43 }
 0x495   : > { %18955 = vmatmul.mubr.msk.f32.gmra.mrb[26].mxu1 %vm3550_vm0, %v25966_v63  ;;  %v23672_v63 = vld [vmem:[#allocation3 + $0xe2] sm:$0xff] }
 0x496   : > { %18957 = vmatprep.mubr.msk.f32.mxu1 %vm3550_vm0, %v25967_v44 }
 0x499   : > { %18958 = vmatmul.mubr.msk.f32.gmra.mrb[0].mxu1 %vm3550_vm0, %v25968_v52  ;;  %v5473_v52 = vld [vmem:[#allocation3 + $0xea] sm:$0x3f] }
 0x49a   : > { %18960 = vmatprep.mubr.msk.f32.mxu1 %vm3550_vm0, %v23446_v51 }
 0x49d   : > { %18961 = vmatmul.mubr.msk.f32.gmra.mrb[2].mxu1 %vm3550_vm0, %v23450_v5  ;;  %v6516_v5 = vld [vmem:[#allocation13 + $0x40] sm:$0xff] }
 0x49e   : > { %18963 = vmatprep.mubr.msk.f32.mxu1 %vm3550_vm0, %v23454_v6 }
 0x4a1   : > { %18964 = vmatmul.mubr.msk.f32.gmra.mrb[4].mxu1 %vm3550_vm0, %v23668_v8 }
 0x4a2   : > { %18966 = vmatprep.mubr.msk.f32.mxu1 %vm3550_vm0, %v23672_v63 }
 0x4a5   : > { %18967 = vmatmul.mubr.msk.f32.gmra.mrb[6].mxu1 %vm3550_vm0, %v5473_v52  ;;  %v25983_v52 = vld [vmem:[#allocation57_spill] sm:$0xff] }
 0x4a6   : > { %18971 = vmatprep.mubr.msk.f32.mxu1 %vm3550_vm0, %v23262_v2  ;;  %v25969_v2 = vld [vmem:[#allocation41_spill] sm:$0xff] }
 0x4a9   : > { %18972 = vmatmul.mubr.msk.f32.vlgmr.msra.gmra.mrb[8].mxu1 %vm3550_vm0, %v23266_v35  ;;  %v7037_v35 = vld [vmem:[#allocation16 + $0x8] sm:$0xff] }
 0x4aa   : > { %18974 = vmatprep.mubr.msk.f32.mxu1 %vm3550_vm0, %v23270_v61  ;;  %19014 = vmatpush3.msra.mxu1 %v6169_v58  ;;  %v25970_v61 = vld [vmem:[#allocation44_spill] sm:$0xff] }
 0x4ab   : > { %19057 = vmatprep.subr.mxu1 %v6516_v5  ;;  %19101 = vmatprep.subr.mxu0 %v7037_v35 }
 0x4ac   : > { %19102 = vmatpush3.msra.mxu0 %v7037_v35  ;;  %v25986_v35 = vld [vmem:[#allocation60_spill] sm:$0xff] }
 0x4ad   : > { %18975 = vmatmul.mubr.msk.f32.gmra.mrb[10].mxu1 %vm3550_vm0, %v23274_v37  ;;  %v25971_v37 = vld [vmem:[#allocation45_spill] sm:$0xff] }
 0x4ae   : > { %18977 = vmatprep.mubr.msk.f32.mxu1 %vm3550_vm0, %v23278_v0  ;;  %v25972_v0 = vld [vmem:[#allocation48_spill] sm:$0xff] }
 0x4b1   : > { %18978 = vmatmul.mubr.msk.f32.gmra.mrb[12].mxu1 %vm3550_vm0, %v23282_v7  ;;  %v5819_v7 = vld [vmem:[#allocation3 + $0xf0] sm:$0xff] }
 0x4b2   : > { %18980 = vmatprep.mubr.msk.f32.mxu1 %vm3550_vm0, %v23286_v9  ;;  %v5818_v9 = vld [vmem:[#allocation3 + $0xe8] sm:$0xff] }
 0x4b5   : > { %18981 = vmatmul.mubr.msk.f32.gmra.mrb[14].mxu1 %vm3550_vm0, %v23290_v10  ;;  %v5820_v10 = vld [vmem:[#allocation3 + $0xf8] sm:$0x3f] }
 0x4b6   : > { %18983 = vmatprep.mubr.msk.f32.mxu1 %vm3550_vm0, %v23294_v12  ;;  %v6140_v12 = vld [vmem:[#allocation3 + $0x21] sm:$0xff] }
 0x4b9   : > { %18984 = vmatmul.mubr.msk.f32.gmra.mrb[16].mxu1 %vm3550_vm0, %v23298_v13  ;;  %v6141_v13 = vld [vmem:[#allocation3 + $0x29] sm:$0xff] }
 0x4ba   : > { %18986 = vmatprep.mubr.msk.f32.mxu1 %vm3550_vm0, %v23302_v14  ;;  %v6142_v14 = vld [vmem:[#allocation3 + $0x31] sm:$0xff] }
 0x4bd   : > { %18987 = vmatmul.mubr.msk.f32.gmra.mrb[18].mxu1 %vm3550_vm0, %v23306_v15  ;;  %v25973_v15 = vmov 0.0  }
 0x4be   : > { %18989 = vmatprep.mubr.msk.f32.mxu1 %vm3550_vm0, %v23310_v20  ;;  %v6143_v20 = vld [vmem:[#allocation3 + $0x39] sm:$0xff] }
 0x4c1   : > { %18990 = vmatmul.mubr.msk.f32.gmra.mrb[20].mxu1 %vm3550_vm0, %v23314_v21  ;;  %v6144_v21 = vld [vmem:[#allocation3 + $0x41] sm:$0xff] }
 0x4c2   : > { %18992 = vmatprep.mubr.msk.f32.mxu1 %vm3550_vm0, %v23318_v22  ;;  %v6145_v22 = vld [vmem:[#allocation3 + $0x49] sm:$0xff] }
 0x4c5   : > { %18993 = vmatmul.mubr.msk.f32.gmra.mrb[22].mxu1 %vm3550_vm0, %v23322_v23 }
 0x4c6   : > { %18995 = vmatprep.mubr.msk.f32.mxu1 %vm3550_vm0, %v23326_v24  ;;  %v25979_v24 = vld [vmem:[#allocation53_spill] sm:$0xff] }
 0x4c9   : > { %18996 = vmatmul.mubr.msk.f32.gmra.mrb[24].mxu1 %vm3550_vm0, %v23330_v25 }
 0x4ca   : > { %18998 = vmatprep.mubr.msk.f32.mxu1 %vm3550_vm0, %v25969_v2 }
 0x4cd   : > { %18999 = vmatmul.mubr.msk.f32.gmra.mrb[26].mxu1 %vm3550_vm0, %v23338_v40 }
 0x4ce   : > { %19001 = vmatprep.mubr.msk.f32.mxu1 %vm3550_vm0, %v25970_v61 }
 0x4d1   : > { %19002 = vmatmul.mubr.msk.f32.gmra.mrb[0].mxu1 %vm3550_vm0, %v25971_v37 }
 0x4d2   : > { %19004 = vmatprep.mubr.msk.f32.mxu1 %vm3550_vm0, %v25972_v0 }
 0x4d5   : > { %19005 = vmatmul.mubr.msk.f32.gmra.mrb[2].mxu1 %vm3550_vm0, %v23515_v45 }
 0x4d6   : > { %19007 = vmatprep.mubr.msk.f32.mxu1 %vm3550_vm0, %v23521_v41 }
 0x4d9   : > { %19008 = vmatmul.mubr.msk.f32.gmra.mrb[4].mxu1 %vm3550_vm0, %v5818_v9 }
 0x4da   : > { %19010 = vmatprep.mubr.msk.f32.mxu1 %vm3550_vm0, %v5819_v7  ;;  %v25987_v7 = vld [vmem:[#allocation61_spill] sm:$0xff] }
 0x4dd   : > { %19011 = vmatmul.mubr.msk.f32.gmra.mrb[6].mxu1 %vm3550_vm0, %v5820_v10 }
 0x4de   : > { %19015 = vmatprep.mubr.msk.f32.mxu1 %vm3550_vm0, %v6140_v12 }
 0x4e1   : > { %19016 = vmatmul.mubr.msk.f32.vlgmr.msra.gmra.mrb[8].mxu1 %vm3550_vm0, %v6141_v13 }
 0x4e2   : > { %19018 = vmatprep.mubr.msk.f32.mxu1 %vm3550_vm0, %v6142_v14  ;;  %19058 = vmatpush3.msra.mxu1 %v6516_v5 }
 0x4e3   : > { %19497 = vmatprep.subr.mxu1 %v25973_v15 }
 0x4e5   : > { %19019 = vmatmul.mubr.msk.f32.gmra.mrb[10].mxu1 %vm3550_vm0, %v6143_v20  ;;  %v25988_v20 = vld [vmem:[#allocation62_spill] sm:$0xff] }
 0x4e6   : > { %19021 = vmatprep.mubr.msk.f32.mxu1 %vm3550_vm0, %v6144_v21 }
 0x4e9   : > { %19022 = vmatmul.mubr.msk.f32.gmra.mrb[12].mxu1 %vm3550_vm0, %v6145_v22 }
 0x4ea   : > { %19024 = vmatprep.mubr.msk.f32.mxu1 %vm3550_vm0, %v23145_v59  ;;  %v6166_v59 = vld [vmem:[#allocation3 + $0xf1] sm:$0xff] }
 0x4ed   : > { %19025 = vmatmul.mubr.msk.f32.gmra.mrb[14].mxu1 %vm3550_vm0, %v23157_v34  ;;  %v6165_v34 = vld [vmem:[#allocation3 + $0xe9] sm:$0xff] }
 0x4ee   : > { %19027 = vmatprep.mubr.msk.f32.mxu1 %vm3550_vm0, %v23159_v36  ;;  %v6167_v36 = vld [vmem:[#allocation3 + $0xf9] sm:$0x3f] }
 0x4f1   : > { %19028 = vmatmul.mubr.msk.f32.gmra.mrb[16].mxu1 %vm3550_vm0, %v23171_v38  ;;  %v25974_v38 = vld [vmem:[#allocation42_spill] sm:$0xff] }
 0x4f2   : > { %19030 = vmatprep.mubr.msk.f32.mxu1 %vm3550_vm0, %v23173_v39  ;;  %v25975_v39 = vld [vmem:[#allocation46_spill] sm:$0xff] }
 0x4f5   : > { %19031 = vmatmul.mubr.msk.f32.gmra.mrb[18].mxu1 %vm3550_vm0, %v23185_v16  ;;  %v25976_v16 = vld [vmem:[#allocation49_spill] sm:$0xff] }
 0x4f6   : > { %19033 = vmatprep.mubr.msk.f32.mxu1 %vm3550_vm0, %v23187_v17  ;;  %v25977_v17 = vld [vmem:[#allocation51_spill] sm:$0xff] }
 0x4f9   : > { %19034 = vmatmul.mubr.msk.f32.gmra.mrb[20].mxu1 %vm3550_vm0, %v23197_v26  ;;  %v6513_v26 = vld [vmem:[#allocation3 + $0xf2] sm:$0xff] }
 0x4fa   : > { %19036 = vmatprep.mubr.msk.f32.mxu1 %vm3550_vm0, %v23199_v27  ;;  %v6512_v27 = vld [vmem:[#allocation3 + $0xea] sm:$0xff] }
 0x4fd   : > { %19037 = vmatmul.mubr.msk.f32.gmra.mrb[22].mxu1 %vm3550_vm0, %v23209_v46  ;;  %v6514_v46 = vld [vmem:[#allocation3 + $0xfa] sm:$0x3f] }
 0x4fe   : > { %19039 = vmatprep.mubr.msk.f32.mxu1 %vm3550_vm0, %v23211_v47  ;;  %v7008_v47 = vld [vmem:[#allocation4 + $0x1] sm:$0xff] }
 0x4ff   : > { %19103 = vmatprep.mubr.msk.f32.mxu0 %vm3550_vm0, %v7008_v47 }
 0x501   : > { %19040 = vmatmul.mubr.msk.f32.gmra.mrb[24].mxu1 %vm3550_vm0, %v23219_v54  ;;  %v7009_v54 = vld [vmem:[#allocation4 + $0x9] sm:$0xff] }
 0x502   : > { %19042 = vmatprep.mubr.msk.f32.mxu1 %vm3550_vm0, %v23221_v55  ;;  %19104 = vmatmul.mubr.msk.f32.vlgmr.msra.gmra.mrb[48].mxu0 %vm3550_vm0, %v7009_v54  ;;  %v7007_v55 = vld [vmem:[#allocation16] sm:$0xff] }
 0x503   : > { %19145 = vmatprep.subr.mxu0 %v7007_v55 }
 0x504   : > { %19146 = vmatpush3.msra.mxu0 %v7007_v55 }
 0x505   : > { %19043 = vmatmul.mubr.msk.f32.gmra.mrb[26].mxu1 %vm3550_vm0, %v23230_v31  ;;  %v23833_v31 = vld [vmem:[#allocation16 + $0x10] sm:$0xff] }
 0x506   : > { %19045 = vmatprep.mubr.msk.f32.mxu1 %vm3550_vm0, %v23232_v32  ;;  %19189 = vmatprep.subr.mxu0 %v23833_v31 }
 0x509   : > { %19046 = vmatmul.mubr.msk.f32.gmra.mrb[0].mxu1 %vm3550_vm0, %v23240_v42  ;;  %v25978_v42 = vld [vmem:[#allocation52_spill] sm:$0xff] }
 0x50a   : > { %19048 = vmatprep.mubr.msk.f32.mxu1 %vm3550_vm0, %v23242_v33 }
 0x50d   : > { %19049 = vmatmul.mubr.msk.f32.gmra.mrb[2].mxu1 %vm3550_vm0, %v23609_v48 }
 0x50e   : > { %19051 = vmatprep.mubr.msk.f32.mxu1 %vm3550_vm0, %v23613_v49  ;;  %v25985_v49 = vld [vmem:[#allocation59_spill] sm:$0xff] }
 0x511   : > { %19052 = vmatmul.mubr.msk.f32.gmra.mrb[4].mxu1 %vm3550_vm0, %v6165_v34 }
 0x512   : > { %19054 = vmatprep.mubr.msk.f32.mxu1 %vm3550_vm0, %v6166_v59 }
 0x515   : > { %19055 = vmatmul.mubr.msk.f32.gmra.mrb[6].mxu1 %vm3550_vm0, %v6167_v36  ;;  %v25989_v36 = vld [vmem:[#allocation63_spill] sm:$0xff] }
 0x516   : > { %19059 = vmatprep.mubr.msk.f32.mxu1 %vm3550_vm0, %v23366_v57 }
 0x519   : > { %19060 = vmatmul.mubr.msk.f32.vlgmr.msra.gmra.mrb[8].mxu1 %vm3550_vm0, %v23370_v3 }
 0x51a   : > { %19062 = vmatprep.mubr.msk.f32.mxu1 %vm3550_vm0, %v23374_v4  ;;  %v25981_v4 = vld [vmem:[#allocation55_spill] sm:$0xff] }
 0x51d   : > { %19063 = vmatmul.mubr.msk.f32.gmra.mrb[10].mxu1 %vm3550_vm0, %v23378_v11 }
 0x51e   : > { %19065 = vmatprep.mubr.msk.f32.mxu1 %vm3550_vm0, %v23382_v60 }
 0x521   : > { %19066 = vmatmul.mubr.msk.f32.gmra.mrb[12].mxu1 %vm3550_vm0, %v23386_v62 }
 0x522   : > { %19068 = vmatprep.mubr.msk.f32.mxu1 %vm3550_vm0, %v25955_v53 }
 0x525   : > { %19069 = vmatmul.mubr.msk.f32.gmra.mrb[14].mxu1 %vm3550_vm0, %v25956_v30 }
 0x526   : > { %19071 = vmatprep.mubr.msk.f32.mxu1 %vm3550_vm0, %v25957_v56 }
 0x529   : > { %19072 = vmatmul.mubr.msk.f32.gmra.mrb[16].mxu1 %vm3550_vm0, %v25958_v50 }
 0x52a   : > { %19074 = vmatprep.mubr.msk.f32.mxu1 %vm3550_vm0, %v25959_v29 }
 0x52d   : > { %19075 = vmatmul.mubr.msk.f32.gmra.mrb[18].mxu1 %vm3550_vm0, %v25960_v28  ;;  %v25984_v28 = vld [vmem:[#allocation58_spill] sm:$0xff] }
 0x52e   : > { %19077 = vmatprep.mubr.msk.f32.mxu1 %vm3550_vm0, %v25961_v19 }
 0x531   : > { %19078 = vmatmul.mubr.msk.f32.gmra.mrb[20].mxu1 %vm3550_vm0, %v25962_v18 }
 0x532   : > { %19080 = vmatprep.mubr.msk.f32.mxu1 %vm3550_vm0, %v25963_v1 }
 0x535   : > { %19081 = vmatmul.mubr.msk.f32.gmra.mrb[22].mxu1 %vm3550_vm0, %v25974_v38 }
 0x536   : > { %19083 = vmatprep.mubr.msk.f32.mxu1 %vm3550_vm0, %v25965_v43 }
 0x539   : > { %19084 = vmatmul.mubr.msk.f32.gmra.mrb[24].mxu1 %vm3550_vm0, %v25975_v39 }
 0x53a   : > { %19086 = vmatprep.mubr.msk.f32.mxu1 %vm3550_vm0, %v25967_v44  ;;  %v25980_v44 = vld [vmem:[#allocation54_spill] sm:$0xff] }
 0x53d   : > { %19087 = vmatmul.mubr.msk.f32.gmra.mrb[26].mxu1 %vm3550_vm0, %v25976_v16 }
 0x53e   : > { %19089 = vmatprep.mubr.msk.f32.mxu1 %vm3550_vm0, %v23446_v51 }
 0x541   : > { %19090 = vmatmul.mubr.msk.f32.gmra.mrb[0].mxu1 %vm3550_vm0, %v25977_v17 }
 0x542   : > { %19092 = vmatprep.mubr.msk.f32.mxu1 %vm3550_vm0, %v23454_v6  ;;  %v25982_v6 = vld [vmem:[#allocation56_spill] sm:$0xff] }
 0x545   : > { %19093 = vmatmul.mubr.msk.f32.gmra.mrb[2].mxu1 %vm3550_vm0, %v23668_v8 }
 0x546   : > { %19095 = vmatprep.mubr.msk.f32.mxu1 %vm3550_vm0, %v23672_v63 }
 0x549   : > { %19096 = vmatmul.mubr.msk.f32.gmra.mrb[4].mxu1 %vm3550_vm0, %v6512_v27 }
 0x54a   : > { %19098 = vmatprep.mubr.msk.f32.mxu1 %vm3550_vm0, %v6513_v26 }
 0x54d   : > { %19099 = vmatmul.mubr.msk.f32.gmra.mrb[6].mxu1 %vm3550_vm0, %v6514_v46  ;;  %v25990_v46 = vld [vmem:[#allocation64_spill] sm:$0xff] }
 0x5ec   : > { %v19061_v32 = vpop.f32.mrb[8].mxu1 }
 0x5ed   : > { %v20453_v33 = vadd.f32 %v19061_v32, %v25978_v42  ;;  %v6667_v23 = vpop.f32.mrb[9].mxu1  ;;  %v25991_v42 = vld [vmem:[#allocation65_spill] sm:$0xff] }
 0x5ee   : > { %v20454_v25 = vadd.f32 %v6667_v23, %v25979_v24 }
 0x5ef   : > { %v6835_v40 = vmax.f32 %v20453_v33, 0.0 }
 0x5f0   : > { %v6834_v41 = vmax.f32 %v20454_v25, 0.0  ;;  %v19064_v43 = vpop.f32.mrb[10].mxu1 }
 0x5f1   : > { %6863 = vst.msk [vmem:[#allocation11 + $0x8] sm:$0xff] %vm3550_vm0, %v6835_v40  ;;  %v20455_v57 = vadd.f32 %v19064_v43, %v25980_v44  ;;  %v6677_v3 = vpop.f32.mrb[11].mxu1  ;;  %v25992_v43 = vld [vmem:[#allocation66_spill] sm:$0xff] }
 0x5f2   : > { %6862 = vst.msk [vmem:[#allocation11] sm:$0xff] %vm3550_vm0, %v6834_v41  ;;  %v20456_v11 = vadd.f32 %v6677_v3, %v25981_v4 }
 0x5f3   : > { %v6837_v60 = vmax.f32 %v20455_v57, 0.0 }
 0x5f4   : > { %v6836_v62 = vmax.f32 %v20456_v11, 0.0  ;;  %v19067_v5 = vpop.f32.mrb[12].mxu1  ;;  %v25993_v11 = vld [vmem:[#allocation67_spill] sm:$0xff] }
 0x5f5   : > { %6865 = vst.msk [vmem:[#allocation11 + $0x18] sm:$0xff] %vm3550_vm0, %v6837_v60  ;;  %v20457_v51 = vadd.f32 %v19067_v5, %v25982_v6  ;;  %v6687_v63 = vpop.f32.mrb[13].mxu1 }
 0x5f6   : > { %6864 = vst.msk [vmem:[#allocation11 + $0x10] sm:$0xff] %vm3550_vm0, %v6836_v62  ;;  %v20458_v45 = vadd.f32 %v6687_v63, %v25983_v52  ;;  %v25994_v52 = vld [vmem:[#allocation68_spill] sm:$0xff] }
 0x5f7   : > { %v6839_v8 = vmax.f32 %v20457_v51, 0.0 }
 0x5f8   : > { %v6838_v1 = vmax.f32 %v20458_v45, 0.0  ;;  %v19070_v18 = vpop.f32.mrb[14].mxu1  ;;  %v6924_v19 = vld [vmem:[#allocation11 + $0x8] sm:$0x3f] }
 0x5f9   : > { %6867 = vst.msk [vmem:[#allocation11 + $0x28] sm:$0xff] %vm3550_vm0, %v6839_v8  ;;  %v20459_v29 = vadd.f32 %v19070_v18, %v25984_v28  ;;  %v6697_v58 = vpop.f32.mrb[15].mxu1  ;;  %v6923_v48 = vld [vmem:[#allocation11] sm:$0xff] }
 0x5fa   : > { %6926 = vst.msk [vmem:[#allocation4 + $0x19] sm:$0x3f] %vm3578_vm4, %v6924_v19  ;;  %v20460_v53 = vadd.f32 %v6697_v58, %v25985_v49  ;;  %v25995_v19 = vld [vmem:[#allocation69_spill] sm:$0xff] }
 0x5fb   : > { %6866 = vst.msk [vmem:[#allocation11 + $0x20] sm:$0xff] %vm3550_vm0, %v6838_v1  ;;  %6925 = vst.msk [vmem:[#allocation4 + $0x11] sm:$0xff] %vm3550_vm0, %v6923_v48  ;;  %v6841_v30 = vmax.f32 %v20459_v29, 0.0 }
 0x5fc   : > { %v6840_v56 = vmax.f32 %v20460_v53, 0.0  ;;  %v19073_v50 = vpop.f32.mrb[16].mxu1  ;;  %v6928_v2 = vld [vmem:[#allocation11 + $0x18] sm:$0x3f] }
 0x5fd   : > { %6869 = vst.msk [vmem:[#allocation11 + $0x38] sm:$0xff] %vm3550_vm0, %v6841_v30  ;;  %v20461_v61 = vadd.f32 %v19073_v50, %v25986_v35  ;;  %v6707_v37 = vpop.f32.mrb[17].mxu1  ;;  %v6927_v0 = vld [vmem:[#allocation11 + $0x10] sm:$0xff]  ;;  %v25996_v30 = vld [vmem:[#allocation70_spill] sm:$0xff] }
 0x5fe   : > { %6930 = vst.msk [vmem:[#allocation4 + $0x29] sm:$0x3f] %vm3578_vm4, %v6928_v2  ;;  %v20462_v9 = vadd.f32 %v6707_v37, %v25987_v7 }
 0x5ff   : > { %6868 = vst.msk [vmem:[#allocation11 + $0x30] sm:$0xff] %vm3550_vm0, %v6840_v56  ;;  %6929 = vst.msk [vmem:[#allocation4 + $0x21] sm:$0xff] %vm3550_vm0, %v6927_v0  ;;  %v6843_v10 = vmax.f32 %v20461_v61, 0.0  ;;  %v25997_v61 = vld [vmem:[#allocation71_spill] sm:$0xff] }
 0x600   : > { %v6842_v12 = vmax.f32 %v20462_v9, 0.0  ;;  %v19076_v13 = vpop.f32.mrb[18].mxu1  ;;  %v6932_v14 = vld [vmem:[#allocation11 + $0x28] sm:$0x3f] }
 0x601   : > { %6871 = vst.msk [vmem:[#allocation11 + $0x48] sm:$0xff] %vm3550_vm0, %v6843_v10  ;;  %v20463_v21 = vadd.f32 %v19076_v13, %v25988_v20  ;;  %v6717_v22 = vpop.f32.mrb[19].mxu1  ;;  %v23867_v39 = vld [vmem:[#allocation4 + $0x19] sm:$0xff] }
 0x602   : > { %v23860_v59 = vld [vmem:[#allocation4 + $0x11] sm:$0xff]  ;;  %v6931_v34 = vld [vmem:[#allocation11 + $0x20] sm:$0xff]  ;;  %6934 = vst.msk [vmem:[#allocation4 + $0x39] sm:$0x3f] %vm3578_vm4, %v6932_v14  ;;  %v20464_v38 = vadd.f32 %v6717_v22, %v25989_v36 }
 0x603   : > { %6870 = vst.msk [vmem:[#allocation11 + $0x40] sm:$0xff] %vm3550_vm0, %v6842_v12  ;;  %19106 = vmatprep.mubr.msk.f32.mxu0 %vm3550_vm0, %v23860_v59  ;;  %6933 = vst.msk [vmem:[#allocation4 + $0x31] sm:$0xff] %vm3550_vm0, %v6931_v34  ;;  %v6845_v16 = vmax.f32 %v20463_v21, 0.0 }
 0x604   : > { %19107 = vmatmul.mubr.msk.f32.gmra.mrb[50].mxu0 %vm3550_vm0, %v23867_v39  ;;  %v6844_v17 = vmax.f32 %v20464_v38, 0.0  ;;  %v19079_v26 = vpop.f32.mrb[20].mxu1  ;;  %v6936_v27 = vld [vmem:[#allocation11 + $0x38] sm:$0x3f] }
 0x605   : > { %6873 = vst.msk [vmem:[#allocation11 + $0x58] sm:$0xff] %vm3550_vm0, %v6845_v16  ;;  %v20465_v47 = vadd.f32 %v19079_v26, %v25990_v46  ;;  %v6727_v54 = vpop.f32.mrb[21].mxu1  ;;  %v23881_v23 = vld [vmem:[#allocation4 + $0x29] sm:$0xff] }
 0x606   : > { %v23874_v55 = vld [vmem:[#allocation4 + $0x21] sm:$0xff]  ;;  %v6935_v32 = vld [vmem:[#allocation11 + $0x30] sm:$0xff]  ;;  %6938 = vst.msk [vmem:[#allocation4 + $0x49] sm:$0x3f] %vm3578_vm4, %v6936_v27  ;;  %v20466_v33 = vadd.f32 %v6727_v54, %v25991_v42 }
 0x607   : > { %6872 = vst.msk [vmem:[#allocation11 + $0x50] sm:$0xff] %vm3550_vm0, %v6844_v17  ;;  %19109 = vmatprep.mubr.msk.f32.mxu0 %vm3550_vm0, %v23874_v55  ;;  %6937 = vst.msk [vmem:[#allocation4 + $0x41] sm:$0xff] %vm3550_vm0, %v6935_v32  ;;  %v6847_v24 = vmax.f32 %v20465_v47, 0.0 }
 0x608   : > { %19110 = vmatmul.mubr.msk.f32.gmra.mrb[52].mxu0 %vm3550_vm0, %v23881_v23  ;;  %v6846_v25 = vmax.f32 %v20466_v33, 0.0  ;;  %v19082_v40 = vpop.f32.mrb[22].mxu1  ;;  %v6940_v41 = vld [vmem:[#allocation11 + $0x48] sm:$0x3f] }
 0x609   : > { %6875 = vst.msk [vmem:[#allocation11 + $0x68] sm:$0xff] %vm3550_vm0, %v6847_v24  ;;  %v20467_v44 = vadd.f32 %v19082_v40, %v25992_v43  ;;  %v6737_v57 = vpop.f32.mrb[23].mxu1  ;;  %v23895_v62 = vld [vmem:[#allocation4 + $0x39] sm:$0xff] }
 0x60a   : > { %v23888_v3 = vld [vmem:[#allocation4 + $0x31] sm:$0xff]  ;;  %v6939_v4 = vld [vmem:[#allocation11 + $0x40] sm:$0xff]  ;;  %6942 = vst.msk [vmem:[#allocation4 + $0x59] sm:$0x3f] %vm3578_vm4, %v6940_v41  ;;  %v20468_v60 = vadd.f32 %v6737_v57, %v25993_v11 }
 0x60b   : > { %6874 = vst.msk [vmem:[#allocation11 + $0x60] sm:$0xff] %vm3550_vm0, %v6846_v25  ;;  %19112 = vmatprep.mubr.msk.f32.mxu0 %vm3550_vm0, %v23888_v3  ;;  %6941 = vst.msk [vmem:[#allocation4 + $0x51] sm:$0xff] %vm3550_vm0, %v6939_v4  ;;  %v6849_v5 = vmax.f32 %v20467_v44, 0.0 }
 0x60c   : > { %19113 = vmatmul.mubr.msk.f32.gmra.mrb[54].mxu0 %vm3550_vm0, %v23895_v62  ;;  %v6848_v6 = vmax.f32 %v20468_v60, 0.0  ;;  %v19085_v51 = vpop.f32.mrb[24].mxu1  ;;  %v6944_v63 = vld [vmem:[#allocation11 + $0x58] sm:$0x3f] }
 0x60d   : > { %6877 = vst.msk [vmem:[#allocation11 + $0x78] sm:$0xff] %vm3550_vm0, %v6849_v5  ;;  %v20469_v45 = vadd.f32 %v19085_v51, %v25994_v52  ;;  %v6747_v8 = vpop.f32.mrb[25].mxu1  ;;  %v23909_v29 = vld [vmem:[#allocation4 + $0x49] sm:$0xff] }
 0x60e   : > { %v23902_v1 = vld [vmem:[#allocation4 + $0x41] sm:$0xff]  ;;  %v6943_v18 = vld [vmem:[#allocation11 + $0x50] sm:$0xff]  ;;  %6946 = vst.msk [vmem:[#allocation4 + $0x69] sm:$0x3f] %vm3578_vm4, %v6944_v63  ;;  %v20470_v28 = vadd.f32 %v6747_v8, %v25995_v19 }
 0x60f   : > { %6876 = vst.msk [vmem:[#allocation11 + $0x70] sm:$0xff] %vm3550_vm0, %v6848_v6  ;;  %19115 = vmatprep.mubr.msk.f32.mxu0 %vm3550_vm0, %v23902_v1  ;;  %6945 = vst.msk [vmem:[#allocation4 + $0x61] sm:$0xff] %vm3550_vm0, %v6943_v18  ;;  %v6851_v58 = vmax.f32 %v20469_v45, 0.0 }
 0x610   : > { %19116 = vmatmul.mubr.msk.f32.gmra.mrb[56].mxu0 %vm3550_vm0, %v23909_v29  ;;  %v6850_v48 = vmax.f32 %v20470_v28, 0.0  ;;  %v19088_v49 = vpop.f32.mrb[26].mxu1  ;;  %v6948_v53 = vld [vmem:[#allocation11 + $0x68] sm:$0x3f] }
 0x611   : > { %6879 = vst.msk [vmem:[#allocation11 + $0x88] sm:$0xff] %vm3550_vm0, %v6851_v58  ;;  %v20471_v56 = vadd.f32 %v19088_v49, %v25996_v30  ;;  %v6757_v50 = vpop.f32.mrb[27].mxu1  ;;  %v23923_v0 = vld [vmem:[#allocation4 + $0x59] sm:$0xff] }
 0x612   : > { %v23916_v2 = vld [vmem:[#allocation4 + $0x51] sm:$0xff]  ;;  %v6947_v35 = vld [vmem:[#allocation11 + $0x60] sm:$0xff]  ;;  %6950 = vst.msk [vmem:[#allocation4 + $0x79] sm:$0x3f] %vm3578_vm4, %v6948_v53  ;;  %v20472_v37 = vadd.f32 %v6757_v50, %v25997_v61 }
 0x613   : > { %6878 = vst.msk [vmem:[#allocation11 + $0x80] sm:$0xff] %vm3550_vm0, %v6850_v48  ;;  %19118 = vmatprep.mubr.msk.f32.mxu0 %vm3550_vm0, %v23916_v2  ;;  %6949 = vst.msk [vmem:[#allocation4 + $0x71] sm:$0xff] %vm3550_vm0, %v6947_v35  ;;  %v6853_v7 = vmax.f32 %v20471_v56, 0.0  ;;  %v6979_v56 = vld [vmem:[#allocation4] sm:$0xff]  ;;  %v6980_v35 = vld [vmem:[#allocation4 + $0x8] sm:$0xff] }
 0x614   : > { %19119 = vmatmul.mubr.msk.f32.gmra.mrb[58].mxu0 %vm3550_vm0, %v23923_v0  ;;  %v6852_v9 = vmax.f32 %v20472_v37, 0.0  ;;  %v19091_v10 = vpop.f32.mrb[0].mxu1  ;;  %v6952_v12 = vld [vmem:[#allocation11 + $0x78] sm:$0x3f]  ;;  %v24014_v61 = vld [vmem:[#allocation16 + $0x18] sm:$0xff] }
 0x615   : > { %6881 = vst.msk [vmem:[#allocation11 + $0x98] sm:$0xff] %vm3550_vm0, %v6853_v7  ;;  %v6855_v13 = vmax.f32 %v19091_v10, 0.0  ;;  %v6767_v14 = vpop.f32.mrb[1].mxu1  ;;  %v23935_v34 = vld [vmem:[#allocation4 + $0x69] sm:$0xff]  ;;  %v24023_v7 = vld [vmem:[#allocation4 + $0x18] sm:$0xff] }
 0x616   : > { %v23929_v20 = vld [vmem:[#allocation4 + $0x61] sm:$0xff]  ;;  %v6951_v21 = vld [vmem:[#allocation11 + $0x70] sm:$0xff]  ;;  %6954 = vst.msk [vmem:[#allocation4 + $0x89] sm:$0x3f] %vm3578_vm4, %v6952_v12  ;;  %v6854_v22 = vmax.f32 %v6767_v14, 0.0  ;;  %v24017_v37 = vld [vmem:[#allocation4 + $0x10] sm:$0xff] }
 0x617   : > { %6880 = vst.msk [vmem:[#allocation11 + $0x90] sm:$0xff] %vm3550_vm0, %v6852_v9  ;;  %19121 = vmatprep.mubr.msk.f32.mxu0 %vm3550_vm0, %v23929_v20  ;;  %6953 = vst.msk [vmem:[#allocation4 + $0x81] sm:$0xff] %vm3550_vm0, %v6951_v21  ;;  %v24027_v9 = vld [vmem:[#allocation4 + $0x20] sm:$0xff]  ;;  %v24031_v10 = vld [vmem:[#allocation4 + $0x28] sm:$0xff] }
 0x618   : > { %6883 = vst.msk [vmem:[#allocation11 + $0xa8] sm:$0xff] %vm3550_vm0, %v6855_v13  ;;  %19122 = vmatmul.mubr.msk.f32.gmra.mrb[60].mxu0 %vm3550_vm0, %v23935_v34  ;;  %6882 = vst.msk [vmem:[#allocation11 + $0xa0] sm:$0xff] %vm3550_vm0, %v6854_v22  ;;  %v19094_v36 = vpop.f32.mrb[2].mxu1  ;;  %v6956_v38 = vld [vmem:[#allocation11 + $0x88] sm:$0x3f]  ;;  %v24043_v13 = vld [vmem:[#allocation4 + $0x40] sm:$0xff] }
 0x619   : > { %v6857_v16 = vmax.f32 %v19094_v36, 0.0  ;;  %v6777_v17 = vpop.f32.mrb[3].mxu1  ;;  %6958 = vst.msk [vmem:[#allocation4 + $0x99] sm:$0x3f] %vm3578_vm4, %v6956_v38  ;;  %v23947_v47 = vld [vmem:[#allocation4 + $0x79] sm:$0xff]  ;;  %v24035_v12 = vld [vmem:[#allocation4 + $0x30] sm:$0xff] }
 0x61a   : > { %v23942_v26 = vld [vmem:[#allocation4 + $0x71] sm:$0xff]  ;;  %v6955_v27 = vld [vmem:[#allocation11 + $0x80] sm:$0xff]  ;;  %v6856_v46 = vmax.f32 %v6777_v17, 0.0  ;;  %v24059_v36 = vld [vmem:[#allocation4 + $0x60] sm:$0xff] }
 0x61b   : > { %19124 = vmatprep.mubr.msk.f32.mxu0 %vm3550_vm0, %v23942_v26  ;;  %6957 = vst.msk [vmem:[#allocation4 + $0x91] sm:$0xff] %vm3550_vm0, %v6955_v27  ;;  %6885 = vst.msk [vmem:[#allocation11 + $0xb8] sm:$0xff] %vm3550_vm0, %v6857_v16  ;;  %v24047_v14 = vld [vmem:[#allocation4 + $0x48] sm:$0xff]  ;;  %v24051_v21 = vld [vmem:[#allocation4 + $0x50] sm:$0xff] }
 0x61c   : > { %19125 = vmatmul.mubr.msk.f32.gmra.mrb[62].mxu0 %vm3550_vm0, %v23947_v47  ;;  %6884 = vst.msk [vmem:[#allocation11 + $0xb0] sm:$0xff] %vm3550_vm0, %v6856_v46  ;;  %v19097_v54 = vpop.f32.mrb[4].mxu1  ;;  %v6960_v32 = vld [vmem:[#allocation11 + $0x98] sm:$0x3f]  ;;  %v24055_v22 = vld [vmem:[#allocation4 + $0x58] sm:$0xff]  ;;  %v24063_v38 = vld [vmem:[#allocation4 + $0x68] sm:$0xff] }
 0x61d   : > { %v6859_v42 = vmax.f32 %v19097_v54, 0.0  ;;  %v6787_v33 = vpop.f32.mrb[5].mxu1  ;;  %6962 = vst.msk [vmem:[#allocation4 + $0xa9] sm:$0x3f] %vm3578_vm4, %v6960_v32  ;;  %v23959_v41 = vld [vmem:[#allocation4 + $0x89] sm:$0xff]  ;;  %v24071_v17 = vld [vmem:[#allocation4 + $0x78] sm:$0xff] }
 0x61e   : > { %v23954_v24 = vld [vmem:[#allocation4 + $0x81] sm:$0xff]  ;;  %v6959_v25 = vld [vmem:[#allocation11 + $0x90] sm:$0xff]  ;;  %v6858_v40 = vmax.f32 %v6787_v33, 0.0  ;;  %v24067_v16 = vld [vmem:[#allocation4 + $0x70] sm:$0xff] }
 0x61f   : > { %19127 = vmatprep.mubr.msk.f32.mxu0 %vm3550_vm0, %v23954_v24  ;;  %6961 = vst.msk [vmem:[#allocation4 + $0xa1] sm:$0xff] %vm3550_vm0, %v6959_v25  ;;  %v6964_v43 = vld [vmem:[#allocation11 + $0xa8] sm:$0x3f]  ;;  %6887 = vst.msk [vmem:[#allocation11 + $0xc8] sm:$0xff] %vm3550_vm0, %v6859_v42  ;;  %v6963_v44 = vld [vmem:[#allocation11 + $0xa0] sm:$0xff] }
 0x620   : > { %19128 = vmatmul.mubr.msk.f32.gmra.mrb[64].mxu0 %vm3550_vm0, %v23959_v41  ;;  %6966 = vst.msk [vmem:[#allocation4 + $0xb9] sm:$0x3f] %vm3578_vm4, %v6964_v43  ;;  %v19100_v57 = vpop.f32.mrb[6].mxu1  ;;  %v23972_v6 = vld [vmem:[#allocation4 + $0x99] sm:$0xff]  ;;  %v24079_v46 = vld [vmem:[#allocation4 + $0x88] sm:$0xff] }
 0x621   : > { %6886 = vst.msk [vmem:[#allocation11 + $0xc0] sm:$0xff] %vm3550_vm0, %v6858_v40  ;;  %6965 = vst.msk [vmem:[#allocation4 + $0xb1] sm:$0xff] %vm3550_vm0, %v6963_v44  ;;  %v6861_v4 = vmax.f32 %v19100_v57, 0.0  ;;  %v6797_v11 = vpop.f32.mrb[7].mxu1  ;;  %v24075_v27 = vld [vmem:[#allocation4 + $0x80] sm:$0xff]  ;;  %v24171_v15 = vld [vmem:[#allocation4 + $0x72] sm:$0xff] }
 0x622   : > { %v23968_v60 = vld [vmem:[#allocation4 + $0x91] sm:$0xff]  ;;  %v6860_v5 = vmax.f32 %v6797_v11, 0.0  ;;  %v6968_v51 = vld [vmem:[#allocation11 + $0xb8] sm:$0x3f]  ;;  %26006 = vst [vmem:[#allocation40_spill] sm:$0xff] %v24171_v15 }
 0x623   : > { %19130 = vmatprep.mubr.msk.f32.mxu0 %vm3550_vm0, %v23968_v60  ;;  %6889 = vst.msk [vmem:[#allocation11 + $0xd8] sm:$0x3f] %vm3578_vm4, %v6861_v4  ;;  %v6967_v63 = vld [vmem:[#allocation11 + $0xb0] sm:$0xff]  ;;  %6970 = vst.msk [vmem:[#allocation4 + $0xc9] sm:$0x3f] %vm3578_vm4, %v6968_v51  ;;  %v24083_v54 = vld [vmem:[#allocation4 + $0x90] sm:$0xff] }
 0x624   : > { %19131 = vmatmul.mubr.msk.f32.gmra.mrb[66].mxu0 %vm3550_vm0, %v23972_v6  ;;  %6888 = vst.msk [vmem:[#allocation11 + $0xd0] sm:$0xff] %vm3550_vm0, %v6860_v5  ;;  %6969 = vst.msk [vmem:[#allocation4 + $0xc1] sm:$0xff] %vm3550_vm0, %v6967_v63  ;;  %v23984_v45 = vld [vmem:[#allocation4 + $0xa9] sm:$0xff]  ;;  %v24087_v32 = vld [vmem:[#allocation4 + $0x98] sm:$0xff] }
 0x625   : > { %v7616_v4 = vld [vmem:[#allocation4 + $0x2] sm:$0xff]  ;;  %v7617_v5 = vld [vmem:[#allocation4 + $0xa] sm:$0xff]  ;;  %v8339_v51 = vld [vmem:[#allocation16 + $0x20] sm:$0xff] }
 0x626   : > { %v23980_v52 = vld [vmem:[#allocation4 + $0xa1] sm:$0xff]  ;;  %v6972_v8 = vld [vmem:[#allocation11 + $0xc8] sm:$0x3f] }
 0x627   : > { %19133 = vmatprep.mubr.msk.f32.mxu0 %vm3550_vm0, %v23980_v52  ;;  %6974 = vst.msk [vmem:[#allocation4 + $0xd9] sm:$0x3f] %vm3578_vm4, %v6972_v8  ;;  %v23994_v28 = vld [vmem:[#allocation4 + $0xb9] sm:$0xff]  ;;  %v24095_v33 = vld [vmem:[#allocation4 + $0xa8] sm:$0xff] }
 0x628   : > { %19134 = vmatmul.mubr.msk.f32.gmra.mrb[68].mxu0 %vm3550_vm0, %v23984_v45  ;;  %v23988_v18 = vld [vmem:[#allocation4 + $0xb1] sm:$0xff]  ;;  %v6971_v19 = vld [vmem:[#allocation11 + $0xc0] sm:$0xff]  ;;  %v24091_v42 = vld [vmem:[#allocation4 + $0xa0] sm:$0xff] }
 0x629   : > { %19136 = vmatprep.mubr.msk.f32.mxu0 %vm3550_vm0, %v23988_v18  ;;  %6973 = vst.msk [vmem:[#allocation4 + $0xd1] sm:$0xff] %vm3550_vm0, %v6971_v19  ;;  %v24099_v25 = vld [vmem:[#allocation4 + $0xb0] sm:$0xff]  ;;  %v24103_v40 = vld [vmem:[#allocation4 + $0xb8] sm:$0xff]  ;;  %v24131_v19 = vld [vmem:[#allocation4 + $0x22] sm:$0xff] }
 0x62a   : > { %v6976_v58 = vld [vmem:[#allocation11 + $0xd8] sm:$0x3f]  ;;  %v24004_v53 = vld [vmem:[#allocation4 + $0xc9] sm:$0xff]  ;;  %v24122_v63 = vld [vmem:[#allocation4 + $0x12] sm:$0xff] }
 0x62b   : > { %v23998_v48 = vld [vmem:[#allocation4 + $0xc1] sm:$0xff]  ;;  %6978 = vst.msk [vmem:[#allocation4 + $0xe9] sm:$0x3f] %vm3578_vm4, %v6976_v58  ;;  %v6975_v49 = vld [vmem:[#allocation11 + $0xd0] sm:$0xff]  ;;  %v24135_v58 = vld [vmem:[#allocation4 + $0x2a] sm:$0xff] }
 0x62c   : > { %19137 = vmatmul.mubr.msk.f32.gmra.mrb[70].mxu0 %vm3550_vm0, %v23994_v28  ;;  %6977 = vst.msk [vmem:[#allocation4 + $0xe1] sm:$0xff] %vm3550_vm0, %v6975_v49  ;;  %v24107_v43 = vld [vmem:[#allocation4 + $0xc0] sm:$0xff]  ;;  %v24111_v44 = vld [vmem:[#allocation4 + $0xc8] sm:$0xff]  ;;  %v24139_v49 = vld [vmem:[#allocation4 + $0x32] sm:$0xff] }
 0x62d   : > { %19139 = vmatprep.mubr.msk.f32.mxu0 %vm3550_vm0, %v23998_v48  ;;  %v24127_v8 = vld [vmem:[#allocation4 + $0x1a] sm:$0xff]  ;;  %25998 = vst [vmem:[#allocation50_spill] sm:$0xff] %v24139_v49 }
 0x62e   : > { %v7035_v50 = vld [vmem:[#allocation4 + $0xd9] sm:$0x3f] }
 0x630   : > { %19140 = vmatmul.mubr.msk.f32.gmra.mrb[72].mxu0 %vm3550_vm0, %v24004_v53  ;;  %v24008_v30 = vld [vmem:[#allocation4 + $0xd1] sm:$0xff] }
 0x631   : > { %19142 = vmatprep.mubr.msk.f32.mxu0 %vm3550_vm0, %v24008_v30  ;;  %v24115_v57 = vld [vmem:[#allocation4 + $0xd0] sm:$0xff]  ;;  %v7006_v11 = vld [vmem:[#allocation4 + $0xd8] sm:$0x3f] }
 0x634   : > { %19143 = vmatmul.mubr.msk.f32.gmra.mrb[74].mxu0 %vm3550_vm0, %v7035_v50  ;;  %v24147_v50 = vld [vmem:[#allocation4 + $0x42] sm:$0xff] }
 0x635   : > { %19147 = vmatprep.mubr.msk.f32.mxu0 %vm3550_vm0, %v6979_v56  ;;  %v24143_v56 = vld [vmem:[#allocation4 + $0x3a] sm:$0xff]  ;;  %26000 = vst [vmem:[#allocation34_spill] sm:$0xff] %v24147_v50 }
 0x636   : > { %25999 = vst [vmem:[#allocation33_spill] sm:$0xff] %v24143_v56 }
 0x638   : > { %19148 = vmatmul.mubr.msk.f32.vlgmr.msra.gmra.mrb[48].mxu0 %vm3550_vm0, %v6980_v35  ;;  %v24151_v35 = vld [vmem:[#allocation4 + $0x4a] sm:$0xff] }
 0x639   : > { %19150 = vmatprep.mubr.msk.f32.mxu0 %vm3550_vm0, %v24017_v37  ;;  %19190 = vmatpush3.msra.mxu0 %v23833_v31  ;;  %v24039_v31 = vld [vmem:[#allocation4 + $0x38] sm:$0xff]  ;;  %26001 = vst [vmem:[#allocation35_spill] sm:$0xff] %v24151_v35 }
 0x63a   : > { %19233 = vmatprep.subr.mxu0 %v24014_v61 }
 0x63c   : > { %19151 = vmatmul.mubr.msk.f32.gmra.mrb[50].mxu0 %vm3550_vm0, %v24023_v7 }
 0x63d   : > { %19153 = vmatprep.mubr.msk.f32.mxu0 %vm3550_vm0, %v24027_v9 }
 0x640   : > { %19154 = vmatmul.mubr.msk.f32.gmra.mrb[52].mxu0 %vm3550_vm0, %v24031_v10 }
 0x641   : > { %19156 = vmatprep.mubr.msk.f32.mxu0 %vm3550_vm0, %v24035_v12 }
 0x644   : > { %19157 = vmatmul.mubr.msk.f32.gmra.mrb[54].mxu0 %vm3550_vm0, %v24039_v31 }
 0x645   : > { %19159 = vmatprep.mubr.msk.f32.mxu0 %vm3550_vm0, %v24043_v13 }
 0x648   : > { %19160 = vmatmul.mubr.msk.f32.gmra.mrb[56].mxu0 %vm3550_vm0, %v24047_v14 }
 0x649   : > { %19162 = vmatprep.mubr.msk.f32.mxu0 %vm3550_vm0, %v24051_v21 }
 0x64c   : > { %19163 = vmatmul.mubr.msk.f32.gmra.mrb[58].mxu0 %vm3550_vm0, %v24055_v22 }
 0x64d   : > { %19165 = vmatprep.mubr.msk.f32.mxu0 %vm3550_vm0, %v24059_v36 }
 0x650   : > { %19166 = vmatmul.mubr.msk.f32.gmra.mrb[60].mxu0 %vm3550_vm0, %v24063_v38 }
 0x651   : > { %19168 = vmatprep.mubr.msk.f32.mxu0 %vm3550_vm0, %v24067_v16 }
 0x654   : > { %19169 = vmatmul.mubr.msk.f32.gmra.mrb[62].mxu0 %vm3550_vm0, %v24071_v17 }
 0x655   : > { %19171 = vmatprep.mubr.msk.f32.mxu0 %vm3550_vm0, %v24075_v27 }
 0x658   : > { %19172 = vmatmul.mubr.msk.f32.gmra.mrb[64].mxu0 %vm3550_vm0, %v24079_v46 }
 0x659   : > { %19174 = vmatprep.mubr.msk.f32.mxu0 %vm3550_vm0, %v24083_v54 }
 0x65c   : > { %19175 = vmatmul.mubr.msk.f32.gmra.mrb[66].mxu0 %vm3550_vm0, %v24087_v32 }
 0x65d   : > { %19177 = vmatprep.mubr.msk.f32.mxu0 %vm3550_vm0, %v24091_v42 }
 0x660   : > { %19178 = vmatmul.mubr.msk.f32.gmra.mrb[68].mxu0 %vm3550_vm0, %v24095_v33 }
 0x661   : > { %19180 = vmatprep.mubr.msk.f32.mxu0 %vm3550_vm0, %v24099_v25 }
 0x664   : > { %19181 = vmatmul.mubr.msk.f32.gmra.mrb[70].mxu0 %vm3550_vm0, %v24103_v40 }
 0x665   : > { %19183 = vmatprep.mubr.msk.f32.mxu0 %vm3550_vm0, %v24107_v43 }
 0x668   : > { %19184 = vmatmul.mubr.msk.f32.gmra.mrb[72].mxu0 %vm3550_vm0, %v24111_v44 }
 0x669   : > { %19186 = vmatprep.mubr.msk.f32.mxu0 %vm3550_vm0, %v24115_v57 }
 0x66c   : > { %19187 = vmatmul.mubr.msk.f32.gmra.mrb[74].mxu0 %vm3550_vm0, %v7006_v11  ;;  %v24163_v11 = vld [vmem:[#allocation4 + $0x62] sm:$0xff] }
 0x66d   : > { %19191 = vmatprep.mubr.msk.f32.mxu0 %vm3550_vm0, %v7616_v4  ;;  %v24159_v4 = vld [vmem:[#allocation4 + $0x5a] sm:$0xff]  ;;  %26004 = vst [vmem:[#allocation38_spill] sm:$0xff] %v24163_v11 }
 0x66e   : > { %26003 = vst [vmem:[#allocation37_spill] sm:$0xff] %v24159_v4 }
 0x670   : > { %19192 = vmatmul.mubr.msk.f32.vlgmr.msra.gmra.mrb[48].mxu0 %vm3550_vm0, %v7617_v5  ;;  %v24167_v5 = vld [vmem:[#allocation4 + $0x6a] sm:$0xff] }
 0x671   : > { %19194 = vmatprep.mubr.msk.f32.mxu0 %vm3550_vm0, %v24122_v63  ;;  %19234 = vmatpush3.msra.mxu0 %v24014_v61  ;;  %v24155_v61 = vld [vmem:[#allocation4 + $0x52] sm:$0xff]  ;;  %26005 = vst [vmem:[#allocation39_spill] sm:$0xff] %v24167_v5 }
 0x672   : > { %19277 = vmatprep.subr.mxu0 %v8339_v51  ;;  %26002 = vst [vmem:[#allocation36_spill] sm:$0xff] %v24155_v61 }
 0x674   : > { %19195 = vmatmul.mubr.msk.f32.gmra.mrb[50].mxu0 %vm3550_vm0, %v24127_v8 }
 0x675   : > { %19197 = vmatprep.mubr.msk.f32.mxu0 %vm3550_vm0, %v24131_v19 }
 0x678   : > { %19198 = vmatmul.mubr.msk.f32.gmra.mrb[52].mxu0 %vm3550_vm0, %v24135_v58 }
 0x679   : > { %19200 = vmatprep.mubr.msk.f32.mxu0 %vm3550_vm0, %v24139_v49 }
 0x67c   : > { %19201 = vmatmul.mubr.msk.f32.gmra.mrb[54].mxu0 %vm3550_vm0, %v24143_v56 }
 0x67d   : > { %19203 = vmatprep.mubr.msk.f32.mxu0 %vm3550_vm0, %v24147_v50 }
 0x680   : > { %19204 = vmatmul.mubr.msk.f32.gmra.mrb[56].mxu0 %vm3550_vm0, %v24151_v35 }
 0x681   : > { %19206 = vmatprep.mubr.msk.f32.mxu0 %vm3550_vm0, %v24155_v61  ;;  %v24175_v61 = vld [vmem:[#allocation4 + $0x7a] sm:$0xff] }
 0x682   : > { %26007 = vst [vmem:[#allocation43_spill] sm:$0xff] %v24175_v61 }
 0x684   : > { %19207 = vmatmul.mubr.msk.f32.gmra.mrb[58].mxu0 %vm3550_vm0, %v24159_v4  ;;  %v24179_v4 = vld [vmem:[#allocation4 + $0x82] sm:$0xff] }
 0x685   : > { %19209 = vmatprep.mubr.msk.f32.mxu0 %vm3550_vm0, %v24163_v11  ;;  %26008 = vst [vmem:[#allocation47_spill] sm:$0xff] %v24179_v4  ;;  %v24183_v11 = vld [vmem:[#allocation4 + $0x8a] sm:$0xff] }
 0x686   : > { %26009 = vst [vmem:[#allocation41_spill] sm:$0xff] %v24183_v11 }
 0x688   : > { %19210 = vmatmul.mubr.msk.f32.gmra.mrb[60].mxu0 %vm3550_vm0, %v24167_v5  ;;  %v24187_v5 = vld [vmem:[#allocation4 + $0x92] sm:$0xff] }
 0x689   : > { %19212 = vmatprep.mubr.msk.f32.mxu0 %vm3550_vm0, %v24171_v15  ;;  %26010 = vst [vmem:[#allocation44_spill] sm:$0xff] %v24187_v5  ;;  %v24191_v15 = vld [vmem:[#allocation4 + $0x9a] sm:$0xff] }
 0x68a   : > { %26011 = vst [vmem:[#allocation45_spill] sm:$0xff] %v24191_v15 }
 0x68c   : > { %19213 = vmatmul.mubr.msk.f32.gmra.mrb[62].mxu0 %vm3550_vm0, %v24175_v61  ;;  %v24195_v61 = vld [vmem:[#allocation4 + $0xa2] sm:$0xff] }
 0x68d   : > { %19215 = vmatprep.mubr.msk.f32.mxu0 %vm3550_vm0, %v24179_v4  ;;  %26012 = vst [vmem:[#allocation48_spill] sm:$0xff] %v24195_v61  ;;  %v24199_v4 = vld [vmem:[#allocation4 + $0xaa] sm:$0xff] }
 0x68e   : > { %26013 = vst [vmem:[#allocation42_spill] sm:$0xff] %v24199_v4 }
 0x690   : > { %19216 = vmatmul.mubr.msk.f32.gmra.mrb[64].mxu0 %vm3550_vm0, %v24183_v11  ;;  %v24203_v11 = vld [vmem:[#allocation4 + $0xb2] sm:$0xff] }
 0x691   : > { %19218 = vmatprep.mubr.msk.f32.mxu0 %vm3550_vm0, %v24187_v5  ;;  %26014 = vst [vmem:[#allocation46_spill] sm:$0xff] %v24203_v11  ;;  %v24207_v5 = vld [vmem:[#allocation4 + $0xba] sm:$0xff] }
 0x692   : > { %26015 = vst [vmem:[#allocation49_spill] sm:$0xff] %v24207_v5 }
 0x694   : > { %19219 = vmatmul.mubr.msk.f32.gmra.mrb[66].mxu0 %vm3550_vm0, %v24191_v15  ;;  %v24211_v15 = vld [vmem:[#allocation4 + $0xc2] sm:$0xff] }
 0x695   : > { %19221 = vmatprep.mubr.msk.f32.mxu0 %vm3550_vm0, %v24195_v61  ;;  %v24215_v61 = vld [vmem:[#allocation4 + $0xca] sm:$0xff] }
 0x696   : > { %26016 = vst [vmem:[#allocation51_spill] sm:$0xff] %v24215_v61 }
 0x698   : > { %19222 = vmatmul.mubr.msk.f32.gmra.mrb[68].mxu0 %vm3550_vm0, %v24199_v4  ;;  %v24219_v4 = vld [vmem:[#allocation4 + $0xd2] sm:$0xff] }
 0x699   : > { %19224 = vmatprep.mubr.msk.f32.mxu0 %vm3550_vm0, %v24203_v11  ;;  %v7643_v11 = vld [vmem:[#allocation4 + $0xda] sm:$0x3f] }
 0x69c   : > { %19225 = vmatmul.mubr.msk.f32.gmra.mrb[70].mxu0 %vm3550_vm0, %v24207_v5  ;;  %v8686_v5 = vld [vmem:[#allocation16 + $0x28] sm:$0xff] }
 0x69d   : > { %19227 = vmatprep.mubr.msk.f32.mxu0 %vm3550_vm0, %v24211_v15 }
 0x6a0   : > { %19228 = vmatmul.mubr.msk.f32.gmra.mrb[72].mxu0 %vm3550_vm0, %v24215_v61 }
 0x6a1   : > { %19230 = vmatprep.mubr.msk.f32.mxu0 %vm3550_vm0, %v24219_v4 }
 0x6a4   : > { %19231 = vmatmul.mubr.msk.f32.gmra.mrb[74].mxu0 %vm3550_vm0, %v7643_v11  ;;  %v9033_v11 = vld [vmem:[#allocation16 + $0x30] sm:$0xff] }
 0x6a5   : > { %19235 = vmatprep.mubr.msk.f32.mxu0 %vm3550_vm0, %v24017_v37  ;;  %v24274_v37 = vld [vmem:[#allocation4 + $0xd8] sm:$0xff] }
 0x6a8   : > { %19236 = vmatmul.mubr.msk.f32.vlgmr.msra.gmra.mrb[48].mxu0 %vm3550_vm0, %v24023_v7  ;;  %v24278_v7 = vld [vmem:[#allocation4 + $0xe0] sm:$0xff] }
 0x6a9   : > { %19238 = vmatprep.mubr.msk.f32.mxu0 %vm3550_vm0, %v24027_v9  ;;  %19278 = vmatpush3.msra.mxu0 %v8339_v51  ;;  %v7990_v51 = vld [vmem:[#allocation4 + $0xe8] sm:$0x3f] }
 0x6aa   : > { %19321 = vmatprep.subr.mxu0 %v8686_v5 }
 0x6ac   : > { %19239 = vmatmul.mubr.msk.f32.gmra.mrb[50].mxu0 %vm3550_vm0, %v24031_v10 }
 0x6ad   : > { %19241 = vmatprep.mubr.msk.f32.mxu0 %vm3550_vm0, %v24035_v12 }
 0x6b0   : > { %19242 = vmatmul.mubr.msk.f32.gmra.mrb[52].mxu0 %vm3550_vm0, %v24039_v31 }
 0x6b1   : > { %19244 = vmatprep.mubr.msk.f32.mxu0 %vm3550_vm0, %v24043_v13 }
 0x6b4   : > { %19245 = vmatmul.mubr.msk.f32.gmra.mrb[54].mxu0 %vm3550_vm0, %v24047_v14 }
 0x6b5   : > { %19247 = vmatprep.mubr.msk.f32.mxu0 %vm3550_vm0, %v24051_v21 }
 0x6b8   : > { %19248 = vmatmul.mubr.msk.f32.gmra.mrb[56].mxu0 %vm3550_vm0, %v24055_v22 }
 0x6b9   : > { %19250 = vmatprep.mubr.msk.f32.mxu0 %vm3550_vm0, %v24059_v36 }
 0x6bc   : > { %19251 = vmatmul.mubr.msk.f32.gmra.mrb[58].mxu0 %vm3550_vm0, %v24063_v38 }
 0x6bd   : > { %19253 = vmatprep.mubr.msk.f32.mxu0 %vm3550_vm0, %v24067_v16 }
 0x6c0   : > { %19254 = vmatmul.mubr.msk.f32.gmra.mrb[60].mxu0 %vm3550_vm0, %v24071_v17 }
 0x6c1   : > { %19256 = vmatprep.mubr.msk.f32.mxu0 %vm3550_vm0, %v24075_v27 }
 0x6c4   : > { %19257 = vmatmul.mubr.msk.f32.gmra.mrb[62].mxu0 %vm3550_vm0, %v24079_v46 }
 0x6c5   : > { %19259 = vmatprep.mubr.msk.f32.mxu0 %vm3550_vm0, %v24083_v54 }
 0x6c8   : > { %19260 = vmatmul.mubr.msk.f32.gmra.mrb[64].mxu0 %vm3550_vm0, %v24087_v32 }
 0x6c9   : > { %19262 = vmatprep.mubr.msk.f32.mxu0 %vm3550_vm0, %v24091_v42 }
 0x6cc   : > { %19263 = vmatmul.mubr.msk.f32.gmra.mrb[66].mxu0 %vm3550_vm0, %v24095_v33 }
 0x6cd   : > { %19265 = vmatprep.mubr.msk.f32.mxu0 %vm3550_vm0, %v24099_v25 }
 0x6d0   : > { %19266 = vmatmul.mubr.msk.f32.gmra.mrb[68].mxu0 %vm3550_vm0, %v24103_v40 }
 0x6d1   : > { %19268 = vmatprep.mubr.msk.f32.mxu0 %vm3550_vm0, %v24107_v43 }
 0x6d4   : > { %19269 = vmatmul.mubr.msk.f32.gmra.mrb[70].mxu0 %vm3550_vm0, %v24111_v44 }
 0x6d5   : > { %19271 = vmatprep.mubr.msk.f32.mxu0 %vm3550_vm0, %v24115_v57 }
 0x6d8   : > { %19272 = vmatmul.mubr.msk.f32.gmra.mrb[72].mxu0 %vm3550_vm0, %v24274_v37 }
 0x6d9   : > { %19274 = vmatprep.mubr.msk.f32.mxu0 %vm3550_vm0, %v24278_v7 }
 0x6dc   : > { %19275 = vmatmul.mubr.msk.f32.gmra.mrb[74].mxu0 %vm3550_vm0, %v7990_v51  ;;  %v9380_v51 = vld [vmem:[#allocation16 + $0x38] sm:$0xff] }
 0x6dd   : > { %19279 = vmatprep.mubr.msk.f32.mxu0 %vm3550_vm0, %v23860_v59  ;;  %v24333_v59 = vld [vmem:[#allocation4 + $0xd9] sm:$0xff] }
 0x6e0   : > { %19280 = vmatmul.mubr.msk.f32.vlgmr.msra.gmra.mrb[48].mxu0 %vm3550_vm0, %v23867_v39  ;;  %v24337_v39 = vld [vmem:[#allocation4 + $0xe1] sm:$0xff] }
 0x6e1   : > { %19282 = vmatprep.mubr.msk.f32.mxu0 %vm3550_vm0, %v23874_v55  ;;  %19322 = vmatpush3.msra.mxu0 %v8686_v5  ;;  %v8337_v5 = vld [vmem:[#allocation4 + $0xe9] sm:$0x3f] }
 0x6e2   : > { %19365 = vmatprep.subr.mxu0 %v9033_v11 }
 0x6e4   : > { %19283 = vmatmul.mubr.msk.f32.gmra.mrb[50].mxu0 %vm3550_vm0, %v23881_v23 }
 0x6e5   : > { %19285 = vmatprep.mubr.msk.f32.mxu0 %vm3550_vm0, %v23888_v3 }
 0x6e8   : > { %19286 = vmatmul.mubr.msk.f32.gmra.mrb[52].mxu0 %vm3550_vm0, %v23895_v62 }
 0x6e9   : > { %19288 = vmatprep.mubr.msk.f32.mxu0 %vm3550_vm0, %v23902_v1 }
 0x6ec   : > { %19289 = vmatmul.mubr.msk.f32.gmra.mrb[54].mxu0 %vm3550_vm0, %v23909_v29 }
 0x6ed   : > { %19291 = vmatprep.mubr.msk.f32.mxu0 %vm3550_vm0, %v23916_v2 }
 0x6f0   : > { %19292 = vmatmul.mubr.msk.f32.gmra.mrb[56].mxu0 %vm3550_vm0, %v23923_v0 }
 0x6f1   : > { %19294 = vmatprep.mubr.msk.f32.mxu0 %vm3550_vm0, %v23929_v20 }
 0x6f4   : > { %19295 = vmatmul.mubr.msk.f32.gmra.mrb[58].mxu0 %vm3550_vm0, %v23935_v34 }
 0x6f5   : > { %19297 = vmatprep.mubr.msk.f32.mxu0 %vm3550_vm0, %v23942_v26 }
 0x6f8   : > { %19298 = vmatmul.mubr.msk.f32.gmra.mrb[60].mxu0 %vm3550_vm0, %v23947_v47 }
 0x6f9   : > { %19300 = vmatprep.mubr.msk.f32.mxu0 %vm3550_vm0, %v23954_v24 }
 0x6fc   : > { %19301 = vmatmul.mubr.msk.f32.gmra.mrb[62].mxu0 %vm3550_vm0, %v23959_v41 }
 0x6fd   : > { %19303 = vmatprep.mubr.msk.f32.mxu0 %vm3550_vm0, %v23968_v60 }
 0x700   : > { %19304 = vmatmul.mubr.msk.f32.gmra.mrb[64].mxu0 %vm3550_vm0, %v23972_v6 }
 0x701   : > { %19306 = vmatprep.mubr.msk.f32.mxu0 %vm3550_vm0, %v23980_v52 }
 0x704   : > { %19307 = vmatmul.mubr.msk.f32.gmra.mrb[66].mxu0 %vm3550_vm0, %v23984_v45 }
 0x705   : > { %19309 = vmatprep.mubr.msk.f32.mxu0 %vm3550_vm0, %v23988_v18 }
 0x708   : > { %19310 = vmatmul.mubr.msk.f32.gmra.mrb[68].mxu0 %vm3550_vm0, %v23994_v28 }
 0x709   : > { %19312 = vmatprep.mubr.msk.f32.mxu0 %vm3550_vm0, %v23998_v48 }
 0x70c   : > { %19313 = vmatmul.mubr.msk.f32.gmra.mrb[70].mxu0 %vm3550_vm0, %v24004_v53 }
 0x70d   : > { %19315 = vmatprep.mubr.msk.f32.mxu0 %vm3550_vm0, %v24008_v30 }
 0x710   : > { %19316 = vmatmul.mubr.msk.f32.gmra.mrb[72].mxu0 %vm3550_vm0, %v24333_v59 }
 0x711   : > { %19318 = vmatprep.mubr.msk.f32.mxu0 %vm3550_vm0, %v24337_v39 }
 0x714   : > { %19319 = vmatmul.mubr.msk.f32.gmra.mrb[74].mxu0 %vm3550_vm0, %v8337_v5  ;;  %v26020_v5 = vld [vmem:[#allocation39_spill] sm:$0xff] }
 0x715   : > { %19323 = vmatprep.mubr.msk.f32.mxu0 %vm3550_vm0, %v24122_v63  ;;  %v26017_v63 = vld [vmem:[#allocation36_spill] sm:$0xff] }
 0x718   : > { %19324 = vmatmul.mubr.msk.f32.vlgmr.msra.gmra.mrb[48].mxu0 %vm3550_vm0, %v24127_v8  ;;  %v26018_v8 = vld [vmem:[#allocation37_spill] sm:$0xff] }
 0x719   : > { %19326 = vmatprep.mubr.msk.f32.mxu0 %vm3550_vm0, %v24131_v19  ;;  %19366 = vmatpush3.msra.mxu0 %v9033_v11  ;;  %v26019_v11 = vld [vmem:[#allocation38_spill] sm:$0xff] }
 0x71a   : > { %19409 = vmatprep.subr.mxu0 %v9380_v51 }
 0x71c   : > { %19327 = vmatmul.mubr.msk.f32.gmra.mrb[50].mxu0 %vm3550_vm0, %v24135_v58 }
 0x71d   : > { %19329 = vmatprep.mubr.msk.f32.mxu0 %vm3550_vm0, %v24139_v49  ;;  %v26021_v49 = vld [vmem:[#allocation40_spill] sm:$0xff] }
 0x720   : > { %19330 = vmatmul.mubr.msk.f32.gmra.mrb[52].mxu0 %vm3550_vm0, %v24143_v56  ;;  %v26022_v56 = vld [vmem:[#allocation43_spill] sm:$0xff] }
 0x721   : > { %19332 = vmatprep.mubr.msk.f32.mxu0 %vm3550_vm0, %v24147_v50  ;;  %v26023_v50 = vld [vmem:[#allocation47_spill] sm:$0xff] }
 0x724   : > { %19333 = vmatmul.mubr.msk.f32.gmra.mrb[54].mxu0 %vm3550_vm0, %v24151_v35  ;;  %v26024_v35 = vld [vmem:[#allocation41_spill] sm:$0xff] }
 0x725   : > { %19335 = vmatprep.mubr.msk.f32.mxu0 %vm3550_vm0, %v26017_v63  ;;  %v26025_v63 = vld [vmem:[#allocation44_spill] sm:$0xff] }
 0x728   : > { %19336 = vmatmul.mubr.msk.f32.gmra.mrb[56].mxu0 %vm3550_vm0, %v26018_v8  ;;  %v26026_v8 = vld [vmem:[#allocation45_spill] sm:$0xff] }
 0x729   : > { %19338 = vmatprep.mubr.msk.f32.mxu0 %vm3550_vm0, %v26019_v11  ;;  %v26027_v11 = vld [vmem:[#allocation48_spill] sm:$0xff] }
 0x72c   : > { %19339 = vmatmul.mubr.msk.f32.gmra.mrb[58].mxu0 %vm3550_vm0, %v26020_v5  ;;  %v26028_v5 = vld [vmem:[#allocation42_spill] sm:$0xff] }
 0x72d   : > { %19341 = vmatprep.mubr.msk.f32.mxu0 %vm3550_vm0, %v26021_v49  ;;  %v26029_v49 = vld [vmem:[#allocation46_spill] sm:$0xff] }
 0x730   : > { %19342 = vmatmul.mubr.msk.f32.gmra.mrb[60].mxu0 %vm3550_vm0, %v26022_v56  ;;  %v26030_v56 = vld [vmem:[#allocation49_spill] sm:$0xff] }
 0x731   : > { %19344 = vmatprep.mubr.msk.f32.mxu0 %vm3550_vm0, %v26023_v50 }
 0x734   : > { %19345 = vmatmul.mubr.msk.f32.gmra.mrb[62].mxu0 %vm3550_vm0, %v26024_v35 }
 0x735   : > { %19347 = vmatprep.mubr.msk.f32.mxu0 %vm3550_vm0, %v26025_v63 }
 0x738   : > { %19348 = vmatmul.mubr.msk.f32.gmra.mrb[64].mxu0 %vm3550_vm0, %v26026_v8  ;;  %v24392_v8 = vld [vmem:[#allocation4 + $0xda] sm:$0xff] }
 0x739   : > { %19350 = vmatprep.mubr.msk.f32.mxu0 %vm3550_vm0, %v26027_v11 }
 0x73c   : > { %19351 = vmatmul.mubr.msk.f32.gmra.mrb[66].mxu0 %vm3550_vm0, %v26028_v5  ;;  %v24396_v5 = vld [vmem:[#allocation4 + $0xe2] sm:$0xff] }
 0x73d   : > { %19353 = vmatprep.mubr.msk.f32.mxu0 %vm3550_vm0, %v26029_v49 }
 0x740   : > { %19354 = vmatmul.mubr.msk.f32.gmra.mrb[68].mxu0 %vm3550_vm0, %v26030_v56  ;;  %v8684_v56 = vld [vmem:[#allocation4 + $0xea] sm:$0x3f] }
 0x741   : > { %19356 = vmatprep.mubr.msk.f32.mxu0 %vm3550_vm0, %v24211_v15 }
 0x744   : > { %19357 = vmatmul.mubr.msk.f32.gmra.mrb[70].mxu0 %vm3550_vm0, %v24215_v61  ;;  %v9727_v61 = vld [vmem:[#allocation16 + $0x40] sm:$0xff] }
 0x745   : > { %19359 = vmatprep.mubr.msk.f32.mxu0 %vm3550_vm0, %v24219_v4 }
 0x748   : > { %19360 = vmatmul.mubr.msk.f32.gmra.mrb[72].mxu0 %vm3550_vm0, %v24392_v8 }
 0x749   : > { %19362 = vmatprep.mubr.msk.f32.mxu0 %vm3550_vm0, %v24396_v5 }
 0x74c   : > { %19363 = vmatmul.mubr.msk.f32.gmra.mrb[74].mxu0 %vm3550_vm0, %v8684_v56 }
 0x74d   : > { %19367 = vmatprep.mubr.msk.f32.mxu0 %vm3550_vm0, %v24027_v9  ;;  %v10370_v9 = vld [vmem:[#allocation18 + $0x8] sm:$0xff] }
 0x74e   : > { %19498 = vmatpush3.msra.mxu1 %v10370_v9  ;;  %v10053_v9 = vld [vmem:[#allocation2 + $0x51] sm:$0xff] }
 0x750   : > { %19368 = vmatmul.mubr.msk.f32.vlgmr.msra.gmra.mrb[48].mxu0 %vm3550_vm0, %v24031_v10  ;;  %v26031_v10 = vmov 0.0  }
 0x751   : > { %19370 = vmatprep.mubr.msk.f32.mxu0 %vm3550_vm0, %v24035_v12  ;;  %19410 = vmatpush3.msra.mxu0 %v9380_v51  ;;  %v9030_v12 = vld [vmem:[#allocation4 + $0xf0] sm:$0xff]  ;;  %12135 = vst.msk [vmem:[#allocation7] sm:$0xff] %vm12120_vm6, %v26031_v10  ;;  %12136 = vst.msk [vmem:[#allocation7 + $0x8] sm:$0xff] %vm12120_vm6, %v26031_v10 }
 0x752   : > { %19453 = vmatprep.subr.mxu0 %v9727_v61  ;;  %19538 = vmatprep.subr.mxu1 %v26031_v10  ;;  %12137 = vst.msk [vmem:[#allocation7 + $0x10] sm:$0xff] %vm12120_vm6, %v26031_v10  ;;  %12138 = vst.msk [vmem:[#allocation7 + $0x18] sm:$0xff] %vm12120_vm6, %v26031_v10 }
 0x753   : > { %19499 = vmatprep.mubr.msk.f32.mxu1 %vm21796_vm5, %v26031_v10  ;;  %12139 = vst.msk [vmem:[#allocation7 + $0x20] sm:$0xff] %vm12120_vm6, %v26031_v10  ;;  %12140 = vst.msk [vmem:[#allocation7 + $0x28] sm:$0xff] %vm12120_vm6, %v26031_v10 }
 0x754   : > { %19371 = vmatmul.mubr.msk.f32.gmra.mrb[50].mxu0 %vm3550_vm0, %v24039_v31  ;;  %v9029_v31 = vld [vmem:[#allocation4 + $0xe8] sm:$0xff]  ;;  %12141 = vst.msk [vmem:[#allocation7 + $0x30] sm:$0xff] %vm12120_vm6, %v26031_v10  ;;  %12142 = vst.msk [vmem:[#allocation7 + $0x38] sm:$0xff] %vm12120_vm6, %v26031_v10 }
 0x755   : > { %19373 = vmatprep.mubr.msk.f32.mxu0 %vm3550_vm0, %v24043_v13  ;;  %v9031_v13 = vld [vmem:[#allocation4 + $0xf8] sm:$0x3f]  ;;  %12143 = vst.msk [vmem:[#allocation7 + $0x40] sm:$0xff] %vm12120_vm6, %v26031_v10  ;;  %12144 = vst.msk [vmem:[#allocation7 + $0x48] sm:$0xff] %vm12120_vm6, %v26031_v10 }
 0x756   : > { %12145 = vst.msk [vmem:[#allocation7 + $0x50] sm:$0xff] %vm12120_vm6, %v26031_v10  ;;  %13695 = vst.msk [vmem:[#allocation8] sm:$0xff] %vm12120_vm6, %v26031_v10 }
 0x757   : > { %13696 = vst.msk [vmem:[#allocation8 + $0x8] sm:$0xff] %vm12120_vm6, %v26031_v10  ;;  %13697 = vst.msk [vmem:[#allocation8 + $0x10] sm:$0xff] %vm12120_vm6, %v26031_v10 }
 0x758   : > { %19374 = vmatmul.mubr.msk.f32.gmra.mrb[52].mxu0 %vm3550_vm0, %v24047_v14  ;;  %13698 = vst.msk [vmem:[#allocation8 + $0x18] sm:$0xff] %vm12120_vm6, %v26031_v10  ;;  %13699 = vst.msk [vmem:[#allocation8 + $0x20] sm:$0xff] %vm12120_vm6, %v26031_v10 }
 0x759   : > { %19376 = vmatprep.mubr.msk.f32.mxu0 %vm3550_vm0, %v24051_v21  ;;  %v10342_v21 = vld [vmem:[#allocation18] sm:$0xff]  ;;  %13700 = vst.msk [vmem:[#allocation8 + $0x28] sm:$0xff] %vm12120_vm6, %v26031_v10  ;;  %13701 = vst.msk [vmem:[#allocation8 + $0x30] sm:$0xff] %vm12120_vm6, %v26031_v10 }
 0x75a   : > { %13702 = vst.msk [vmem:[#allocation8 + $0x38] sm:$0xff] %vm12120_vm6, %v26031_v10  ;;  %13703 = vst.msk [vmem:[#allocation8 + $0x40] sm:$0xff] %vm12120_vm6, %v26031_v10 }
 0x75b   : > { %13704 = vst.msk [vmem:[#allocation8 + $0x48] sm:$0xff] %vm12120_vm6, %v26031_v10  ;;  %13705 = vst.msk [vmem:[#allocation8 + $0x50] sm:$0xff] %vm12120_vm6, %v26031_v10 }
 0x75c   : > { %19377 = vmatmul.mubr.msk.f32.gmra.mrb[54].mxu0 %vm3550_vm0, %v24055_v22  ;;  %14776 = vst.msk [vmem:[#allocation10] sm:$0xff] %vm14770_vm9, %v26031_v10  ;;  %14777 = vst.msk [vmem:[#allocation10 + $0x8] sm:$0xff] %vm14770_vm9, %v26031_v10 }
 0x75d   : > { %19379 = vmatprep.mubr.msk.f32.mxu0 %vm3550_vm0, %v24059_v36  ;;  %14778 = vst.msk [vmem:[#allocation10 + $0x10] sm:$0xff] %vm14770_vm9, %v26031_v10  ;;  %14779 = vst.msk [vmem:[#allocation10 + $0x18] sm:$0xff] %vm14770_vm9, %v26031_v10 }
 0x75e   : > { %14780 = vst.msk [vmem:[#allocation10 + $0x20] sm:$0xff] %vm14770_vm9, %v26031_v10 }
 0x760   : > { %19380 = vmatmul.mubr.msk.f32.gmra.mrb[56].mxu0 %vm3550_vm0, %v24063_v38  ;;  %v10046_v38 = vld [vmem:[#allocation2 + $0x19] sm:$0xff] }
 0x761   : > { %19382 = vmatprep.mubr.msk.f32.mxu0 %vm3550_vm0, %v24067_v16 }
 0x764   : > { %19383 = vmatmul.mubr.msk.f32.gmra.mrb[58].mxu0 %vm3550_vm0, %v24071_v17 }
 0x765   : > { %19385 = vmatprep.mubr.msk.f32.mxu0 %vm3550_vm0, %v24075_v27  ;;  %v10045_v27 = vld [vmem:[#allocation2 + $0x11] sm:$0xff] }
 0x768   : > { %19386 = vmatmul.mubr.msk.f32.gmra.mrb[60].mxu0 %vm3550_vm0, %v24079_v46 }
 0x769   : > { %19388 = vmatprep.mubr.msk.f32.mxu0 %vm3550_vm0, %v24083_v54 }
 0x76c   : > { %19389 = vmatmul.mubr.msk.f32.gmra.mrb[62].mxu0 %vm3550_vm0, %v24087_v32  ;;  %v10048_v32 = vld [vmem:[#allocation2 + $0x29] sm:$0xff] }
 0x76d   : > { %19391 = vmatprep.mubr.msk.f32.mxu0 %vm3550_vm0, %v24091_v42 }
 0x770   : > { %19392 = vmatmul.mubr.msk.f32.gmra.mrb[64].mxu0 %vm3550_vm0, %v24095_v33 }
 0x771   : > { %19394 = vmatprep.mubr.msk.f32.mxu0 %vm3550_vm0, %v24099_v25  ;;  %v10047_v25 = vld [vmem:[#allocation2 + $0x21] sm:$0xff] }
 0x774   : > { %19395 = vmatmul.mubr.msk.f32.gmra.mrb[66].mxu0 %vm3550_vm0, %v24103_v40 }
 0x775   : > { %19397 = vmatprep.mubr.msk.f32.mxu0 %vm3550_vm0, %v24107_v43 }
 0x778   : > { %19398 = vmatmul.mubr.msk.f32.gmra.mrb[68].mxu0 %vm3550_vm0, %v24111_v44  ;;  %v10050_v44 = vld [vmem:[#allocation2 + $0x39] sm:$0xff] }
 0x779   : > { %19400 = vmatprep.mubr.msk.f32.mxu0 %vm3550_vm0, %v24115_v57 }
 0x77c   : > { %19401 = vmatmul.mubr.msk.f32.gmra.mrb[70].mxu0 %vm3550_vm0, %v24274_v37 }
 0x77d   : > { %19403 = vmatprep.mubr.msk.f32.mxu0 %vm3550_vm0, %v24278_v7  ;;  %v10051_v7 = vld [vmem:[#allocation2 + $0x41] sm:$0xff] }
 0x780   : > { %19404 = vmatmul.mubr.msk.f32.gmra.mrb[72].mxu0 %vm3550_vm0, %v9029_v31 }
 0x781   : > { %19406 = vmatprep.mubr.msk.f32.mxu0 %vm3550_vm0, %v9030_v12 }
 0x784   : > { %19407 = vmatmul.mubr.msk.f32.gmra.mrb[74].mxu0 %vm3550_vm0, %v9031_v13 }
 0x785   : > { %19411 = vmatprep.mubr.msk.f32.mxu0 %vm3550_vm0, %v23874_v55  ;;  %v9377_v55 = vld [vmem:[#allocation4 + $0xf1] sm:$0xff] }
 0x788   : > { %19412 = vmatmul.mubr.msk.f32.vlgmr.msra.gmra.mrb[48].mxu0 %vm3550_vm0, %v23881_v23  ;;  %v9376_v23 = vld [vmem:[#allocation4 + $0xe9] sm:$0xff] }
 0x789   : > { %19414 = vmatprep.mubr.msk.f32.mxu0 %vm3550_vm0, %v23888_v3  ;;  %19454 = vmatpush3.msra.mxu0 %v9727_v61  ;;  %v9378_v3 = vld [vmem:[#allocation4 + $0xf9] sm:$0x3f] }
 0x78a   : > { %20010 = vmatprep.subr.mxu0 %v26031_v10  ;;  %v10052_v61 = vld [vmem:[#allocation2 + $0x49] sm:$0xff] }
 0x78c   : > { %19415 = vmatmul.mubr.msk.f32.gmra.mrb[50].mxu0 %vm3550_vm0, %v23895_v62  ;;  %v26032_v62 = vld [vmem:[#allocation50_spill] sm:$0xff] }
 0x78d   : > { %19417 = vmatprep.mubr.msk.f32.mxu0 %vm3550_vm0, %v23902_v1  ;;  %v26033_v1 = vld [vmem:[#allocation33_spill] sm:$0xff] }
 0x790   : > { %19418 = vmatmul.mubr.msk.f32.gmra.mrb[52].mxu0 %vm3550_vm0, %v23909_v29  ;;  %v26034_v29 = vld [vmem:[#allocation34_spill] sm:$0xff] }
 0x791   : > { %19420 = vmatprep.mubr.msk.f32.mxu0 %vm3550_vm0, %v23916_v2  ;;  %v26035_v2 = vld [vmem:[#allocation35_spill] sm:$0xff] }
 0x794   : > { %19421 = vmatmul.mubr.msk.f32.gmra.mrb[54].mxu0 %vm3550_vm0, %v23923_v0  ;;  %v26036_v0 = vld [vmem:[#allocation36_spill] sm:$0xff] }
 0x795   : > { %19423 = vmatprep.mubr.msk.f32.mxu0 %vm3550_vm0, %v23929_v20  ;;  %v26037_v20 = vld [vmem:[#allocation37_spill] sm:$0xff] }
 0x798   : > { %19424 = vmatmul.mubr.msk.f32.gmra.mrb[56].mxu0 %vm3550_vm0, %v23935_v34  ;;  %v26038_v34 = vld [vmem:[#allocation38_spill] sm:$0xff] }
 0x799   : > { %19426 = vmatprep.mubr.msk.f32.mxu0 %vm3550_vm0, %v23942_v26  ;;  %v26039_v26 = vld [vmem:[#allocation39_spill] sm:$0xff] }
 0x79c   : > { %19427 = vmatmul.mubr.msk.f32.gmra.mrb[58].mxu0 %vm3550_vm0, %v23947_v47  ;;  %v26040_v47 = vld [vmem:[#allocation40_spill] sm:$0xff] }
 0x79d   : > { %19429 = vmatprep.mubr.msk.f32.mxu0 %vm3550_vm0, %v23954_v24  ;;  %v26041_v24 = vld [vmem:[#allocation43_spill] sm:$0xff] }
 0x7a0   : > { %19430 = vmatmul.mubr.msk.f32.gmra.mrb[60].mxu0 %vm3550_vm0, %v23959_v41  ;;  %v26042_v41 = vld [vmem:[#allocation45_spill] sm:$0xff] }
 0x7a1   : > { %19432 = vmatprep.mubr.msk.f32.mxu0 %vm3550_vm0, %v23968_v60  ;;  %v26043_v60 = vld [vmem:[#allocation42_spill] sm:$0xff] }
 0x7a4   : > { %19433 = vmatmul.mubr.msk.f32.gmra.mrb[62].mxu0 %vm3550_vm0, %v23972_v6  ;;  %v26044_v6 = vld [vmem:[#allocation49_spill] sm:$0xff] }
 0x7a5   : > { %19435 = vmatprep.mubr.msk.f32.mxu0 %vm3550_vm0, %v23980_v52  ;;  %v26045_v52 = vld [vmem:[#allocation51_spill] sm:$0xff] }
 0x7a8   : > { %19436 = vmatmul.mubr.msk.f32.gmra.mrb[64].mxu0 %vm3550_vm0, %v23984_v45  ;;  %v9724_v45 = vld [vmem:[#allocation4 + $0xf2] sm:$0xff] }
 0x7a9   : > { %19438 = vmatprep.mubr.msk.f32.mxu0 %vm3550_vm0, %v23988_v18  ;;  %v9723_v18 = vld [vmem:[#allocation4 + $0xea] sm:$0xff] }
 0x7ac   : > { %19439 = vmatmul.mubr.msk.f32.gmra.mrb[66].mxu0 %vm3550_vm0, %v23994_v28  ;;  %v9725_v28 = vld [vmem:[#allocation4 + $0xfa] sm:$0x3f] }
 0x7ad   : > { %19441 = vmatprep.mubr.msk.f32.mxu0 %vm3550_vm0, %v23998_v48  ;;  %v10218_v48 = vld [vmem:[#allocation5] sm:$0xff] }
 0x7b0   : > { %19442 = vmatmul.mubr.msk.f32.gmra.mrb[68].mxu0 %vm3550_vm0, %v24004_v53  ;;  %v10219_v53 = vld [vmem:[#allocation5 + $0x8] sm:$0xff] }
 0x7b1   : > { %19444 = vmatprep.mubr.msk.f32.mxu0 %vm3550_vm0, %v24008_v30  ;;  %v10251_v30 = vmax.f32 %v10218_v48, 0.0  ;;  %v10252_v14 = vmax.f32 %v10219_v53, 0.0  ;;  %v10057_v48 = vld [vmem:[#allocation2 + $0x71] sm:$0xff] }
 0x7b3   : > { %10284 = vst.msk [vmem:[#allocation6] sm:$0xff] %vm3550_vm0, %v10251_v30  ;;  %10285 = vst.msk [vmem:[#allocation6 + $0x8] sm:$0xff] %vm3550_vm0, %v10252_v14 }
 0x7b4   : > { %19445 = vmatmul.mubr.msk.f32.gmra.mrb[70].mxu0 %vm3550_vm0, %v24333_v59 }
 0x7b5   : > { %19447 = vmatprep.mubr.msk.f32.mxu0 %vm3550_vm0, %v24337_v39 }
 0x7b8   : > { %19448 = vmatmul.mubr.msk.f32.gmra.mrb[72].mxu0 %vm3550_vm0, %v9376_v23 }
 0x7b9   : > { %19450 = vmatprep.mubr.msk.f32.mxu0 %vm3550_vm0, %v9377_v55 }
 0x7ba   : > { %v10344_v22 = vld [vmem:[#allocation6 + $0x1] ss:$2 sm:$0xff] }
 0x7bb   : > { %19500 = vmatmul.mubr.msk.f32.vlgmr.msra.gmra.mrb[28].mxu1 %vm3550_vm0, %v10344_v22 }
 0x7bc   : > { %19451 = vmatmul.mubr.msk.f32.gmra.mrb[74].mxu0 %vm3550_vm0, %v9378_v3  ;;  %19539 = vmatpush3.msra.mxu1 %v10342_v21 }
 0x7bd   : > { %19455 = vmatprep.mubr.msk.f32.mxu0 %vm3550_vm0, %v24131_v19  ;;  %19502 = vmatprep.mubr.msk.f32.mxu1 %vm21796_vm5, %v26031_v10 }
 0x7be   : > { %19579 = vmatprep.subr.mxu1 %v26031_v10 }
 0x7c0   : > { %19456 = vmatmul.mubr.msk.f32.vlgmr.msra.gmra.mrb[48].mxu0 %vm3550_vm0, %v24135_v58  ;;  %v10049_v58 = vld [vmem:[#allocation2 + $0x31] sm:$0xff] }
 0x7c1   : > { %19458 = vmatprep.mubr.msk.f32.mxu0 %vm3550_vm0, %v26032_v62  ;;  %v10056_v62 = vld [vmem:[#allocation2 + $0x69] sm:$0xff] }
 0x7c4   : > { %19459 = vmatmul.mubr.msk.f32.gmra.mrb[50].mxu0 %vm3550_vm0, %v26033_v1 }
 0x7c5   : > { %19461 = vmatprep.mubr.msk.f32.mxu0 %vm3550_vm0, %v26034_v29 }
 0x7c8   : > { %19462 = vmatmul.mubr.msk.f32.gmra.mrb[52].mxu0 %vm3550_vm0, %v26035_v2 }
 0x7c9   : > { %19464 = vmatprep.mubr.msk.f32.mxu0 %vm3550_vm0, %v26036_v0 }
 0x7cc   : > { %19465 = vmatmul.mubr.msk.f32.gmra.mrb[54].mxu0 %vm3550_vm0, %v26037_v20  ;;  %v10055_v20 = vld [vmem:[#allocation2 + $0x61] sm:$0xff] }
 0x7cd   : > { %19467 = vmatprep.mubr.msk.f32.mxu0 %vm3550_vm0, %v26038_v34 }
 0x7d0   : > { %19468 = vmatmul.mubr.msk.f32.gmra.mrb[56].mxu0 %vm3550_vm0, %v26039_v26 }
 0x7d1   : > { %19470 = vmatprep.mubr.msk.f32.mxu0 %vm3550_vm0, %v26040_v47 }
 0x7d4   : > { %19471 = vmatmul.mubr.msk.f32.gmra.mrb[58].mxu0 %vm3550_vm0, %v26041_v24 }
 0x7d5   : > { %19473 = vmatprep.mubr.msk.f32.mxu0 %vm3550_vm0, %v26023_v50 }
 0x7d8   : > { %19474 = vmatmul.mubr.msk.f32.gmra.mrb[60].mxu0 %vm3550_vm0, %v26024_v35 }
 0x7d9   : > { %19476 = vmatprep.mubr.msk.f32.mxu0 %vm3550_vm0, %v26025_v63 }
 0x7dc   : > { %19477 = vmatmul.mubr.msk.f32.gmra.mrb[62].mxu0 %vm3550_vm0, %v26042_v41 }
 0x7dd   : > { %19479 = vmatprep.mubr.msk.f32.mxu0 %vm3550_vm0, %v26027_v11 }
 0x7e0   : > { %19480 = vmatmul.mubr.msk.f32.gmra.mrb[64].mxu0 %vm3550_vm0, %v26043_v60 }
 0x7e1   : > { %19482 = vmatprep.mubr.msk.f32.mxu0 %vm3550_vm0, %v26029_v49 }
 0x7e4   : > { %19483 = vmatmul.mubr.msk.f32.gmra.mrb[66].mxu0 %vm3550_vm0, %v26044_v6 }
 0x7e5   : > { %19485 = vmatprep.mubr.msk.f32.mxu0 %vm3550_vm0, %v24211_v15  ;;  %v13503_v15 = vld [vmem:[#allocation19] sm:$0xff] }
 0x7e6   : > { %20011 = vmatpush3.msra.mxu0 %v13503_v15 }
 0x7e8   : > { %19486 = vmatmul.mubr.msk.f32.gmra.mrb[68].mxu0 %vm3550_vm0, %v26045_v52  ;;  %v10058_v52 = vld [vmem:[#allocation2 + $0x79] sm:$0xff] }
 0x7e9   : > { %19488 = vmatprep.mubr.msk.f32.mxu0 %vm3550_vm0, %v24219_v4 }
 0x7ec   : > { %19489 = vmatmul.mubr.msk.f32.gmra.mrb[70].mxu0 %vm3550_vm0, %v24392_v8  ;;  %v10054_v8 = vld [vmem:[#allocation2 + $0x59] sm:$0xff] }
 0x7ed   : > { %19491 = vmatprep.mubr.msk.f32.mxu0 %vm3550_vm0, %v24396_v5 }
 0x7f0   : > { %19492 = vmatmul.mubr.msk.f32.gmra.mrb[72].mxu0 %vm3550_vm0, %v9723_v18 }
 0x7f1   : > { %19494 = vmatprep.mubr.msk.f32.mxu0 %vm3550_vm0, %v9724_v45 }
 0x7f4   : > { %19495 = vmatmul.mubr.msk.f32.gmra.mrb[74].mxu0 %vm3550_vm0, %v9725_v28 }
 0x7f5   : > { %20012 = vmatprep.mubr.msk.f32.mxu0 %vm21796_vm5, %v26031_v10 }
 0x893   : > { %v19457_v36 = vpop.f32.mrb[48].mxu0 }
 0x894   : > { %v10074_v16 = vadd.f32 %v19457_v36, %v10046_v38  ;;  %v9878_v17 = vpop.f32.mrb[49].mxu0 }
 0x895   : > { %v10073_v46 = vadd.f32 %v10045_v27, %v9878_v17 }
 0x896   : > { %10102 = vst.msk [vmem:[#allocation11 + $0x8] sm:$0xff] %vm3550_vm0, %v10074_v16  ;;  %v10060_v16 = vld [vmem:[#allocation2 + $0x89] sm:$0xff] }
 0x897   : > { %10101 = vst.msk [vmem:[#allocation11] sm:$0xff] %vm3550_vm0, %v10073_v46  ;;  %v19460_v54 = vpop.f32.mrb[50].mxu0 }
 0x898   : > { %v10076_v42 = vadd.f32 %v19460_v54, %v10048_v32  ;;  %v9888_v33 = vpop.f32.mrb[51].mxu0  ;;  %v10059_v32 = vld [vmem:[#allocation2 + $0x81] sm:$0xff] }
 0x899   : > { %v10075_v40 = vadd.f32 %v10047_v25, %v9888_v33 }
 0x89a   : > { %10104 = vst.msk [vmem:[#allocation11 + $0x18] sm:$0xff] %vm3550_vm0, %v10076_v42 }
 0x89b   : > { %10103 = vst.msk [vmem:[#allocation11 + $0x10] sm:$0xff] %vm3550_vm0, %v10075_v40  ;;  %v19463_v43 = vpop.f32.mrb[52].mxu0 }
 0x89c   : > { %v10078_v57 = vadd.f32 %v19463_v43, %v10050_v44  ;;  %v9898_v19 = vpop.f32.mrb[53].mxu0 }
 0x89d   : > { %v10077_v49 = vadd.f32 %v10049_v58, %v9898_v19  ;;  %v10163_v56 = vld [vmem:[#allocation11 + $0x8] sm:$0x3f] }
 0x89e   : > { %v10162_v50 = vld [vmem:[#allocation11] sm:$0xff]  ;;  %10106 = vst.msk [vmem:[#allocation11 + $0x28] sm:$0xff] %vm3550_vm0, %v10078_v57 }
 0x89f   : > { %10165 = vst.msk [vmem:[#allocation5 + $0x19] sm:$0x3f] %vm3578_vm4, %v10163_v56  ;;  %v19466_v35 = vpop.f32.mrb[54].mxu0  ;;  %v10062_v58 = vld [vmem:[#allocation2 + $0x99] sm:$0xff] }
 0x8a0   : > { %10164 = vst.msk [vmem:[#allocation5 + $0x11] sm:$0xff] %vm3550_vm0, %v10162_v50  ;;  %10105 = vst.msk [vmem:[#allocation11 + $0x20] sm:$0xff] %vm3550_vm0, %v10077_v49  ;;  %v10080_v4 = vadd.f32 %v19466_v35, %v10052_v61  ;;  %v9908_v37 = vpop.f32.mrb[55].mxu0  ;;  %v10061_v61 = vld [vmem:[#allocation2 + $0x91] sm:$0xff] }
 0x8a1   : > { %v10079_v59 = vadd.f32 %v10051_v7, %v9908_v37  ;;  %v10167_v39 = vld [vmem:[#allocation11 + $0x18] sm:$0x3f] }
 0x8a2   : > { %10108 = vst.msk [vmem:[#allocation11 + $0x38] sm:$0xff] %vm3550_vm0, %v10080_v4  ;;  %v10166_v51 = vld [vmem:[#allocation11 + $0x10] sm:$0xff] }
 0x8a3   : > { %10169 = vst.msk [vmem:[#allocation5 + $0x29] sm:$0x3f] %vm3578_vm4, %v10167_v39  ;;  %v19469_v63 = vpop.f32.mrb[56].mxu0 }
 0x8a4   : > { %10107 = vst.msk [vmem:[#allocation11 + $0x30] sm:$0xff] %vm3550_vm0, %v10079_v59  ;;  %10168 = vst.msk [vmem:[#allocation5 + $0x21] sm:$0xff] %vm3550_vm0, %v10166_v51  ;;  %v10082_v11 = vadd.f32 %v19469_v63, %v10054_v8  ;;  %v9918_v5 = vpop.f32.mrb[57].mxu0 }
 0x8a5   : > { %v10081_v12 = vadd.f32 %v10053_v9, %v9918_v5  ;;  %v10171_v31 = vld [vmem:[#allocation11 + $0x28] sm:$0x3f] }
 0x8a6   : > { %10110 = vst.msk [vmem:[#allocation11 + $0x48] sm:$0xff] %vm3550_vm0, %v10082_v11  ;;  %v10064_v11 = vld [vmem:[#allocation2 + $0xa9] sm:$0xff] }
 0x8a7   : > { %v13478_v13 = vld [vmem:[#allocation5 + $0x11] ss:$2 sm:$0xff]  ;;  %v10170_v55 = vld [vmem:[#allocation11 + $0x20] sm:$0xff]  ;;  %10173 = vst.msk [vmem:[#allocation5 + $0x39] sm:$0x3f] %vm3578_vm4, %v10171_v31  ;;  %v19472_v3 = vpop.f32.mrb[58].mxu0 }
 0x8a8   : > { %v10220_v23 = vld [vmem:[#allocation5 + $0x10] sm:$0xff]  ;;  %10109 = vst.msk [vmem:[#allocation11 + $0x40] sm:$0xff] %vm3550_vm0, %v10081_v12  ;;  %20013 = vmatmul.mubr.msk.f32.vlgmr.msra.gmra.mrb[76].mxu0 %vm3550_vm0, %v13478_v13  ;;  %10172 = vst.msk [vmem:[#allocation5 + $0x31] sm:$0xff] %vm3550_vm0, %v10170_v55  ;;  %v10221_v1 = vld [vmem:[#allocation5 + $0x18] sm:$0xff]  ;;  %v10084_v2 = vadd.f32 %v19472_v3, %v10056_v62  ;;  %v9928_v0 = vpop.f32.mrb[59].mxu0 }
 0x8a9   : > { %v10253_v29 = vmax.f32 %v10220_v23, 0.0  ;;  %20015 = vmatprep.mubr.msk.f32.mxu0 %vm21796_vm5, %v26031_v10  ;;  %v10254_v34 = vmax.f32 %v10221_v1, 0.0  ;;  %v10083_v26 = vadd.f32 %v10055_v20, %v9928_v0  ;;  %v10175_v47 = vld [vmem:[#allocation11 + $0x38] sm:$0x3f]  ;;  %v10063_v13 = vld [vmem:[#allocation2 + $0xa1] sm:$0xff]  ;;  %v10066_v20 = vld [vmem:[#allocation2 + $0xb9] sm:$0xff] }
 0x8aa   : > { %10112 = vst.msk [vmem:[#allocation11 + $0x58] sm:$0xff] %vm3550_vm0, %v10084_v2 }
 0x8ab   : > { %10286 = vst.msk [vmem:[#allocation6 + $0x10] sm:$0xff] %vm3550_vm0, %v10253_v29  ;;  %v13480_v24 = vld [vmem:[#allocation5 + $0x21] ss:$2 sm:$0xff]  ;;  %10287 = vst.msk [vmem:[#allocation6 + $0x18] sm:$0xff] %vm3550_vm0, %v10254_v34  ;;  %v10174_v41 = vld [vmem:[#allocation11 + $0x30] sm:$0xff]  ;;  %v19475_v6 = vpop.f32.mrb[60].mxu0 }
 0x8ac   : > { %10177 = vst.msk [vmem:[#allocation5 + $0x49] sm:$0x3f] %vm3578_vm4, %v10175_v47  ;;  %v10222_v60 = vld [vmem:[#allocation5 + $0x20] sm:$0xff]  ;;  %20016 = vmatmul.mubr.msk.f32.gmra.mrb[78].mxu0 %vm3550_vm0, %v13480_v24  ;;  %v10223_v45 = vld [vmem:[#allocation5 + $0x28] sm:$0xff]  ;;  %v10086_v28 = vadd.f32 %v19475_v6, %v10058_v52  ;;  %v9938_v15 = vpop.f32.mrb[61].mxu0 }
 0x8ad   : > { %10111 = vst.msk [vmem:[#allocation11 + $0x50] sm:$0xff] %vm3550_vm0, %v10083_v26  ;;  %10176 = vst.msk [vmem:[#allocation5 + $0x41] sm:$0xff] %vm3550_vm0, %v10174_v41  ;;  %v10255_v18 = vmax.f32 %v10222_v60, 0.0  ;;  %20018 = vmatprep.mubr.msk.f32.mxu0 %vm21796_vm5, %v26031_v10  ;;  %v10256_v53 = vmax.f32 %v10223_v45, 0.0  ;;  %v10085_v30 = vadd.f32 %v10057_v48, %v9938_v15  ;;  %v10179_v14 = vld [vmem:[#allocation11 + $0x48] sm:$0x3f] }
 0x8ae   : > { %10114 = vst.msk [vmem:[#allocation11 + $0x68] sm:$0xff] %vm3550_vm0, %v10086_v28  ;;  %v10065_v41 = vld [vmem:[#allocation2 + $0xb1] sm:$0xff] }
 0x8af   : > { %10288 = vst.msk [vmem:[#allocation6 + $0x20] sm:$0xff] %vm3550_vm0, %v10255_v18  ;;  %v13482_v21 = vld [vmem:[#allocation5 + $0x31] ss:$2 sm:$0xff]  ;;  %10289 = vst.msk [vmem:[#allocation6 + $0x28] sm:$0xff] %vm3550_vm0, %v10256_v53  ;;  %v10178_v22 = vld [vmem:[#allocation11 + $0x40] sm:$0xff]  ;;  %v19478_v38 = vpop.f32.mrb[62].mxu0 }
 0x8b0   : > { %10181 = vst.msk [vmem:[#allocation5 + $0x59] sm:$0x3f] %vm3578_vm4, %v10179_v14  ;;  %v10224_v36 = vld [vmem:[#allocation5 + $0x30] sm:$0xff]  ;;  %20019 = vmatmul.mubr.msk.f32.gmra.mrb[80].mxu0 %vm3550_vm0, %v13482_v21  ;;  %v10225_v17 = vld [vmem:[#allocation5 + $0x38] sm:$0xff]  ;;  %v10088_v46 = vadd.f32 %v19478_v38, %v10060_v16  ;;  %v9948_v54 = vpop.f32.mrb[63].mxu0 }
 0x8b1   : > { %10113 = vst.msk [vmem:[#allocation11 + $0x60] sm:$0xff] %vm3550_vm0, %v10085_v30  ;;  %10180 = vst.msk [vmem:[#allocation5 + $0x51] sm:$0xff] %vm3550_vm0, %v10178_v22  ;;  %v10257_v27 = vmax.f32 %v10224_v36, 0.0  ;;  %20021 = vmatprep.mubr.msk.f32.mxu0 %vm21796_vm5, %v26031_v10  ;;  %v10258_v42 = vmax.f32 %v10225_v17, 0.0  ;;  %v10087_v33 = vadd.f32 %v10059_v32, %v9948_v54  ;;  %v10183_v40 = vld [vmem:[#allocation11 + $0x58] sm:$0x3f] }
 0x8b2   : > { %v10346_v25 = vld [vmem:[#allocation6 + $0x11] ss:$2 sm:$0xff]  ;;  %10116 = vst.msk [vmem:[#allocation11 + $0x78] sm:$0xff] %vm3550_vm0, %v10088_v46  ;;  %v10068_v53 = vld [vmem:[#allocation2 + $0xc9] sm:$0xff]  ;;  %v10067_v36 = vld [vmem:[#allocation2 + $0xc1] sm:$0xff] }
 0x8b3   : > { %10290 = vst.msk [vmem:[#allocation6 + $0x30] sm:$0xff] %vm3550_vm0, %v10257_v27  ;;  %19503 = vmatmul.mubr.msk.f32.gmra.mrb[30].mxu1 %vm3550_vm0, %v10346_v25  ;;  %10291 = vst.msk [vmem:[#allocation6 + $0x38] sm:$0xff] %vm3550_vm0, %v10258_v42  ;;  %v19481_v19 = vpop.f32.mrb[64].mxu0 }
 0x8b4   : > { %v13484_v43 = vld [vmem:[#allocation5 + $0x41] ss:$2 sm:$0xff]  ;;  %v10182_v44 = vld [vmem:[#allocation11 + $0x50] sm:$0xff]  ;;  %10185 = vst.msk [vmem:[#allocation5 + $0x69] sm:$0x3f] %vm3578_vm4, %v10183_v40  ;;  %19505 = vmatprep.mubr.msk.f32.mxu1 %vm21796_vm5, %v26031_v10  ;;  %v10090_v50 = vadd.f32 %v19481_v19, %v10062_v58  ;;  %v9958_v35 = vpop.f32.mrb[65].mxu0 }
 0x8b5   : > { %v10226_v57 = vld [vmem:[#allocation5 + $0x40] sm:$0xff]  ;;  %10115 = vst.msk [vmem:[#allocation11 + $0x70] sm:$0xff] %vm3550_vm0, %v10087_v33  ;;  %20022 = vmatmul.mubr.msk.f32.gmra.mrb[82].mxu0 %vm3550_vm0, %v13484_v43  ;;  %10184 = vst.msk [vmem:[#allocation5 + $0x61] sm:$0xff] %vm3550_vm0, %v10182_v44  ;;  %v10227_v49 = vld [vmem:[#allocation5 + $0x48] sm:$0xff]  ;;  %v10089_v37 = vadd.f32 %v10061_v61, %v9958_v35 }
 0x8b6   : > { %v10259_v56 = vmax.f32 %v10226_v57, 0.0  ;;  %20024 = vmatprep.mubr.msk.f32.mxu0 %vm21796_vm5, %v26031_v10  ;;  %v10260_v4 = vmax.f32 %v10227_v49, 0.0  ;;  %v10348_v7 = vld [vmem:[#allocation6 + $0x21] ss:$2 sm:$0xff]  ;;  %10118 = vst.msk [vmem:[#allocation11 + $0x88] sm:$0xff] %vm3550_vm0, %v10090_v50  ;;  %v10070_v33 = vld [vmem:[#allocation2 + $0xd9] sm:$0xff] }
 0x8b7   : > { %v10187_v59 = vld [vmem:[#allocation11 + $0x68] sm:$0x3f]  ;;  %19506 = vmatmul.mubr.msk.f32.gmra.mrb[32].mxu1 %vm3550_vm0, %v10348_v7  ;;  %10117 = vst.msk [vmem:[#allocation11 + $0x80] sm:$0xff] %vm3550_vm0, %v10089_v37  ;;  %v19484_v8 = vpop.f32.mrb[66].mxu0  ;;  %v10069_v57 = vld [vmem:[#allocation2 + $0xd1] sm:$0xff] }
 0x8b8   : > { %10292 = vst.msk [vmem:[#allocation6 + $0x40] sm:$0xff] %vm3550_vm0, %v10259_v56  ;;  %v13486_v39 = vld [vmem:[#allocation5 + $0x51] ss:$2 sm:$0xff]  ;;  %10293 = vst.msk [vmem:[#allocation6 + $0x48] sm:$0xff] %vm3550_vm0, %v10260_v4  ;;  %v10186_v51 = vld [vmem:[#allocation11 + $0x60] sm:$0xff]  ;;  %19508 = vmatprep.mubr.msk.f32.mxu1 %vm21796_vm5, %v26031_v10  ;;  %v10092_v12 = vadd.f32 %v19484_v8, %v10064_v11  ;;  %v9968_v31 = vpop.f32.mrb[67].mxu0 }
 0x8b9   : > { %10189 = vst.msk [vmem:[#allocation5 + $0x79] sm:$0x3f] %vm3578_vm4, %v10187_v59  ;;  %v10228_v63 = vld [vmem:[#allocation5 + $0x50] sm:$0xff]  ;;  %20025 = vmatmul.mubr.msk.f32.gmra.mrb[84].mxu0 %vm3550_vm0, %v13486_v39  ;;  %v10229_v5 = vld [vmem:[#allocation5 + $0x58] sm:$0xff]  ;;  %v10091_v23 = vadd.f32 %v10063_v13, %v9968_v31 }
 0x8ba   : > { %10188 = vst.msk [vmem:[#allocation5 + $0x71] sm:$0xff] %vm3550_vm0, %v10186_v51  ;;  %v10261_v9 = vmax.f32 %v10228_v63, 0.0  ;;  %20027 = vmatprep.mubr.msk.f32.mxu0 %vm21796_vm5, %v26031_v10  ;;  %v10262_v55 = vmax.f32 %v10229_v5, 0.0  ;;  %v10350_v3 = vld [vmem:[#allocation6 + $0x31] ss:$2 sm:$0xff]  ;;  %10120 = vst.msk [vmem:[#allocation11 + $0x98] sm:$0xff] %vm3550_vm0, %v10092_v12 }
 0x8bb   : > { %v10191_v62 = vld [vmem:[#allocation11 + $0x78] sm:$0x3f]  ;;  %19509 = vmatmul.mubr.msk.f32.gmra.mrb[34].mxu1 %vm3550_vm0, %v10350_v3  ;;  %10119 = vst.msk [vmem:[#allocation11 + $0x90] sm:$0xff] %vm3550_vm0, %v10091_v23  ;;  %v19487_v0 = vpop.f32.mrb[68].mxu0  ;;  %v10072_v37 = vld [vmem:[#allocation2 + $0xe9] sm:$0x3f] }
 0x8bc   : > { %10294 = vst.msk [vmem:[#allocation6 + $0x50] sm:$0xff] %vm3550_vm0, %v10261_v9  ;;  %v13488_v1 = vld [vmem:[#allocation5 + $0x61] ss:$2 sm:$0xff]  ;;  %10295 = vst.msk [vmem:[#allocation6 + $0x58] sm:$0xff] %vm3550_vm0, %v10262_v55  ;;  %v10190_v29 = vld [vmem:[#allocation11 + $0x70] sm:$0xff]  ;;  %19511 = vmatprep.mubr.msk.f32.mxu1 %vm21796_vm5, %v26031_v10  ;;  %v10094_v47 = vadd.f32 %v19487_v0, %v10066_v20  ;;  %v9978_v24 = vpop.f32.mrb[69].mxu0 }
 0x8bd   : > { %10193 = vst.msk [vmem:[#allocation5 + $0x89] sm:$0x3f] %vm3578_vm4, %v10191_v62  ;;  %v10230_v2 = vld [vmem:[#allocation5 + $0x60] sm:$0xff]  ;;  %20028 = vmatmul.mubr.msk.f32.gmra.mrb[86].mxu0 %vm3550_vm0, %v13488_v1  ;;  %v10231_v34 = vld [vmem:[#allocation5 + $0x68] sm:$0xff]  ;;  %v10093_v6 = vadd.f32 %v10065_v41, %v9978_v24 }
 0x8be   : > { %10192 = vst.msk [vmem:[#allocation5 + $0x81] sm:$0xff] %vm3550_vm0, %v10190_v29  ;;  %v10263_v26 = vmax.f32 %v10230_v2, 0.0  ;;  %20030 = vmatprep.mubr.msk.f32.mxu0 %vm21796_vm5, %v26031_v10  ;;  %v10264_v60 = vmax.f32 %v10231_v34, 0.0  ;;  %v10195_v45 = vld [vmem:[#allocation11 + $0x88] sm:$0x3f]  ;;  %10122 = vst.msk [vmem:[#allocation11 + $0xa8] sm:$0xff] %vm3550_vm0, %v10094_v47 }
 0x8bf   : > { %v10352_v52 = vld [vmem:[#allocation6 + $0x41] ss:$2 sm:$0xff]  ;;  %v10194_v28 = vld [vmem:[#allocation11 + $0x80] sm:$0xff]  ;;  %10197 = vst.msk [vmem:[#allocation5 + $0x99] sm:$0x3f] %vm3578_vm4, %v10195_v45  ;;  %v19490_v48 = vpop.f32.mrb[70].mxu0 }
 0x8c0   : > { %10296 = vst.msk [vmem:[#allocation6 + $0x60] sm:$0xff] %vm3550_vm0, %v10263_v26  ;;  %19512 = vmatmul.mubr.msk.f32.gmra.mrb[36].mxu1 %vm3550_vm0, %v10352_v52  ;;  %10297 = vst.msk [vmem:[#allocation6 + $0x68] sm:$0xff] %vm3550_vm0, %v10264_v60  ;;  %v10096_v21 = vadd.f32 %v19490_v48, %v10068_v53  ;;  %v9988_v22 = vpop.f32.mrb[71].mxu0  ;;  %v10071_v63 = vld [vmem:[#allocation2 + $0xe1] sm:$0xff] }
 0x8c1   : > { %v13490_v18 = vld [vmem:[#allocation5 + $0x71] ss:$2 sm:$0xff]  ;;  %10121 = vst.msk [vmem:[#allocation11 + $0xa0] sm:$0xff] %vm3550_vm0, %v10093_v6  ;;  %19514 = vmatprep.mubr.msk.f32.mxu1 %vm21796_vm5, %v26031_v10  ;;  %10196 = vst.msk [vmem:[#allocation5 + $0x91] sm:$0xff] %vm3550_vm0, %v10194_v28  ;;  %v10095_v16 = vadd.f32 %v10067_v36, %v9988_v22  ;;  %v10317_v36 = vld [vmem:[#allocation6] ss:$2 sm:$0xff] }
 0x8c2   : > { %v10232_v15 = vld [vmem:[#allocation5 + $0x70] sm:$0xff]  ;;  %20031 = vmatmul.mubr.msk.f32.gmra.mrb[88].mxu0 %vm3550_vm0, %v13490_v18  ;;  %v10233_v30 = vld [vmem:[#allocation5 + $0x78] sm:$0xff]  ;;  %10124 = vst.msk [vmem:[#allocation11 + $0xb8] sm:$0xff] %vm3550_vm0, %v10096_v21 }
 0x8c3   : > { %v10265_v14 = vmax.f32 %v10232_v15, 0.0  ;;  %20033 = vmatprep.mubr.msk.f32.mxu0 %vm21796_vm5, %v26031_v10  ;;  %v10266_v38 = vmax.f32 %v10233_v30, 0.0  ;;  %v10354_v17 = vld [vmem:[#allocation6 + $0x51] ss:$2 sm:$0xff]  ;;  %v10198_v54 = vld [vmem:[#allocation11 + $0x90] sm:$0xff]  ;;  %10123 = vst.msk [vmem:[#allocation11 + $0xb0] sm:$0xff] %vm3550_vm0, %v10095_v16 }
 0x8c4   : > { %v10199_v27 = vld [vmem:[#allocation11 + $0x98] sm:$0x3f]  ;;  %19515 = vmatmul.mubr.msk.f32.gmra.mrb[38].mxu1 %vm3550_vm0, %v10354_v17  ;;  %v19493_v42 = vpop.f32.mrb[72].mxu0  ;;  %10200 = vst.msk [vmem:[#allocation5 + $0xa1] sm:$0xff] %vm3550_vm0, %v10198_v54 }
 0x8c5   : > { %10298 = vst.msk [vmem:[#allocation6 + $0x70] sm:$0xff] %vm3550_vm0, %v10265_v14  ;;  %v13492_v46 = vld [vmem:[#allocation5 + $0x81] ss:$2 sm:$0xff]  ;;  %10299 = vst.msk [vmem:[#allocation6 + $0x78] sm:$0xff] %vm3550_vm0, %v10266_v38  ;;  %19517 = vmatprep.mubr.msk.f32.mxu1 %vm21796_vm5, %v26031_v10  ;;  %v10098_v43 = vadd.f32 %v19493_v42, %v10070_v33  ;;  %v9998_v44 = vpop.f32.mrb[73].mxu0 }
 0x8c6   : > { %10201 = vst.msk [vmem:[#allocation5 + $0xa9] sm:$0x3f] %vm3578_vm4, %v10199_v27  ;;  %v10234_v32 = vld [vmem:[#allocation5 + $0x80] sm:$0xff]  ;;  %20034 = vmatmul.mubr.msk.f32.gmra.mrb[90].mxu0 %vm3550_vm0, %v13492_v46  ;;  %v10235_v25 = vld [vmem:[#allocation5 + $0x88] sm:$0xff]  ;;  %v10097_v58 = vadd.f32 %v10069_v57, %v9998_v44 }
 0x8c7   : > { %v10267_v40 = vmax.f32 %v10234_v32, 0.0  ;;  %20036 = vmatprep.mubr.msk.f32.mxu0 %vm21796_vm5, %v26031_v10  ;;  %v10268_v19 = vmax.f32 %v10235_v25, 0.0  ;;  %v10356_v49 = vld [vmem:[#allocation6 + $0x61] ss:$2 sm:$0xff]  ;;  %10126 = vst.msk [vmem:[#allocation11 + $0xc8] sm:$0xff] %vm3550_vm0, %v10098_v43  ;;  %v19496_v4 = vpop.f32.mrb[74].mxu0 }
 0x8c8   : > { %v10203_v56 = vld [vmem:[#allocation11 + $0xa8] sm:$0x3f]  ;;  %19518 = vmatmul.mubr.msk.f32.gmra.mrb[40].mxu1 %vm3550_vm0, %v10356_v49  ;;  %v13494_v50 = vld [vmem:[#allocation5 + $0x91] ss:$2 sm:$0xff]  ;;  %v10202_v35 = vld [vmem:[#allocation11 + $0xa0] sm:$0xff]  ;;  %10125 = vst.msk [vmem:[#allocation11 + $0xc0] sm:$0xff] %vm3550_vm0, %v10097_v58  ;;  %v10100_v39 = vadd.f32 %v19496_v4, %v10072_v37 }
 0x8c9   : > { %10300 = vst.msk [vmem:[#allocation6 + $0x80] sm:$0xff] %vm3550_vm0, %v10267_v40  ;;  %10301 = vst.msk [vmem:[#allocation6 + $0x88] sm:$0xff] %vm3550_vm0, %v10268_v19  ;;  %v10236_v61 = vld [vmem:[#allocation5 + $0x90] sm:$0xff]  ;;  %19520 = vmatprep.mubr.msk.f32.mxu1 %vm21796_vm5, %v26031_v10  ;;  %v10237_v7 = vld [vmem:[#allocation5 + $0x98] sm:$0xff]  ;;  %v10008_v51 = vpop.f32.mrb[75].mxu0 }
 0x8ca   : > { %10205 = vst.msk [vmem:[#allocation5 + $0xb9] sm:$0x3f] %vm3578_vm4, %v10203_v56  ;;  %20037 = vmatmul.mubr.msk.f32.gmra.mrb[92].mxu0 %vm3550_vm0, %v13494_v50  ;;  %v10269_v59 = vmax.f32 %v10236_v61, 0.0  ;;  %v10270_v8 = vmax.f32 %v10237_v7, 0.0  ;;  %v10099_v11 = vadd.f32 %v10071_v63, %v10008_v51  ;;  %v10207_v9 = vld [vmem:[#allocation11 + $0xb8] sm:$0x3f] }
 0x8cb   : > { %10204 = vst.msk [vmem:[#allocation5 + $0xb1] sm:$0xff] %vm3550_vm0, %v10202_v35  ;;  %20039 = vmatprep.mubr.msk.f32.mxu0 %vm21796_vm5, %v26031_v10  ;;  %v10206_v31 = vld [vmem:[#allocation11 + $0xb0] sm:$0xff]  ;;  %v10238_v13 = vld [vmem:[#allocation5 + $0xa0] sm:$0xff]  ;;  %v10736_v38 = vld [vmem:[#allocation18 + $0x10] sm:$0xff] }
 0x8cc   : > { %v10358_v5 = vld [vmem:[#allocation6 + $0x71] ss:$2 sm:$0xff]  ;;  %10302 = vst.msk [vmem:[#allocation6 + $0x90] sm:$0xff] %vm3550_vm0, %v10269_v59  ;;  %10303 = vst.msk [vmem:[#allocation6 + $0x98] sm:$0xff] %vm3550_vm0, %v10270_v8  ;;  %v10271_v23 = vmax.f32 %v10238_v13, 0.0  ;;  %v10934_v56 = vld [vmem:[#allocation18 + $0x18] sm:$0xff] }
 0x8cd   : > { %10128 = vst.msk [vmem:[#allocation11 + $0xd8] sm:$0x3f] %vm3578_vm4, %v10100_v39  ;;  %19521 = vmatmul.mubr.msk.f32.gmra.mrb[42].mxu1 %vm3550_vm0, %v10358_v5  ;;  %v13496_v12 = vld [vmem:[#allocation5 + $0xa1] ss:$2 sm:$0xff]  ;;  %10209 = vst.msk [vmem:[#allocation5 + $0xc9] sm:$0x3f] %vm3578_vm4, %v10207_v9 }
 0x8ce   : > { %10127 = vst.msk [vmem:[#allocation11 + $0xd0] sm:$0xff] %vm3550_vm0, %v10099_v11  ;;  %20040 = vmatmul.mubr.msk.f32.gmra.mrb[94].mxu0 %vm3550_vm0, %v13496_v12  ;;  %19523 = vmatprep.mubr.msk.f32.mxu1 %vm21796_vm5, %v26031_v10  ;;  %10208 = vst.msk [vmem:[#allocation5 + $0xc1] sm:$0xff] %vm3550_vm0, %v10206_v31  ;;  %v10239_v55 = vld [vmem:[#allocation5 + $0xa8] sm:$0xff]  ;;  %v10319_v27 = vld [vmem:[#allocation6 + $0x10] ss:$2 sm:$0xff] }
 0x8cf   : > { %20042 = vmatprep.mubr.msk.f32.mxu0 %vm21796_vm5, %v26031_v10  ;;  %v10272_v3 = vmax.f32 %v10239_v55, 0.0  ;;  %10304 = vst.msk [vmem:[#allocation6 + $0xa0] sm:$0xff] %vm3550_vm0, %v10271_v23  ;;  %v10211_v1 = vld [vmem:[#allocation11 + $0xc8] sm:$0x3f]  ;;  %v10210_v2 = vld [vmem:[#allocation11 + $0xc0] sm:$0xff]  ;;  %v11132_v9 = vld [vmem:[#allocation18 + $0x20] sm:$0xff] }
 0x8d0   : > { %v10360_v62 = vld [vmem:[#allocation6 + $0x81] ss:$2 sm:$0xff]  ;;  %10213 = vst.msk [vmem:[#allocation5 + $0xd9] sm:$0x3f] %vm3578_vm4, %v10211_v1  ;;  %v10321_v32 = vld [vmem:[#allocation6 + $0x20] ss:$2 sm:$0xff] }
 0x8d1   : > { %19524 = vmatmul.mubr.msk.f32.gmra.mrb[44].mxu1 %vm3550_vm0, %v10360_v62  ;;  %10305 = vst.msk [vmem:[#allocation6 + $0xa8] sm:$0xff] %vm3550_vm0, %v10272_v3  ;;  %10212 = vst.msk [vmem:[#allocation5 + $0xd1] sm:$0xff] %vm3550_vm0, %v10210_v2  ;;  %v10323_v42 = vld [vmem:[#allocation6 + $0x30] ss:$2 sm:$0xff]  ;;  %v10325_v33 = vld [vmem:[#allocation6 + $0x40] ss:$2 sm:$0xff] }
 0x8d2   : > { %v13498_v29 = vld [vmem:[#allocation5 + $0xb1] ss:$2 sm:$0xff]  ;;  %19526 = vmatprep.mubr.msk.f32.mxu1 %vm21796_vm5, %v26031_v10  ;;  %v10327_v25 = vld [vmem:[#allocation6 + $0x50] ss:$2 sm:$0xff]  ;;  %v10329_v40 = vld [vmem:[#allocation6 + $0x60] ss:$2 sm:$0xff] }
 0x8d3   : > { %v10240_v0 = vld [vmem:[#allocation5 + $0xb0] sm:$0xff]  ;;  %20043 = vmatmul.mubr.msk.f32.gmra.mrb[96].mxu0 %vm3550_vm0, %v13498_v29  ;;  %v10241_v20 = vld [vmem:[#allocation5 + $0xb8] sm:$0xff] }
 0x8d4   : > { %v10273_v34 = vmax.f32 %v10240_v0, 0.0  ;;  %20045 = vmatprep.mubr.msk.f32.mxu0 %vm21796_vm5, %v26031_v10  ;;  %v10274_v26 = vmax.f32 %v10241_v20, 0.0  ;;  %v10215_v47 = vld [vmem:[#allocation11 + $0xd8] sm:$0x3f]  ;;  %v10333_v44 = vld [vmem:[#allocation6 + $0x80] ss:$2 sm:$0xff] }
 0x8d5   : > { %v10362_v24 = vld [vmem:[#allocation6 + $0x91] ss:$2 sm:$0xff]  ;;  %10217 = vst.msk [vmem:[#allocation5 + $0xe9] sm:$0x3f] %vm3578_vm4, %v10215_v47  ;;  %v10214_v41 = vld [vmem:[#allocation11 + $0xd0] sm:$0xff]  ;;  %v10243_v52 = vld [vmem:[#allocation5 + $0xc8] sm:$0xff] }
 0x8d6   : > { %10306 = vst.msk [vmem:[#allocation6 + $0xb0] sm:$0xff] %vm3550_vm0, %v10273_v34  ;;  %19527 = vmatmul.mubr.msk.f32.gmra.mrb[46].mxu1 %vm3550_vm0, %v10362_v24  ;;  %v13500_v60 = vld [vmem:[#allocation5 + $0xc1] ss:$2 sm:$0xff]  ;;  %10307 = vst.msk [vmem:[#allocation6 + $0xb8] sm:$0xff] %vm3550_vm0, %v10274_v26  ;;  %v10276_v18 = vmax.f32 %v10243_v52, 0.0 }
 0x8d7   : > { %v10242_v6 = vld [vmem:[#allocation5 + $0xc0] sm:$0xff]  ;;  %10216 = vst.msk [vmem:[#allocation5 + $0xe1] sm:$0xff] %vm3550_vm0, %v10214_v41  ;;  %20046 = vmatmul.mubr.msk.f32.gmra.mrb[98].mxu0 %vm3550_vm0, %v13500_v60  ;;  %19529 = vmatprep.mubr.msk.f32.mxu1 %vm21796_vm5, %v26031_v10  ;;  %v10710_v50 = vld [vmem:[#allocation6 + $0x2] ss:$2 sm:$0xff]  ;;  %v11118_v52 = vld [vmem:[#allocation6 + $0x21] ss:$2 sm:$0xff] }
 0x8d8   : > { %v10275_v45 = vmax.f32 %v10242_v6, 0.0  ;;  %20048 = vmatprep.mubr.msk.f32.mxu0 %vm21796_vm5, %v26031_v10  ;;  %v10364_v28 = vld [vmem:[#allocation6 + $0xa1] ss:$2 sm:$0xff]  ;;  %10309 = vst.msk [vmem:[#allocation6 + $0xc8] sm:$0xff] %vm3550_vm0, %v10276_v18  ;;  %v10245_v53 = vld [vmem:[#allocation5 + $0xd8] sm:$0xff]  ;;  %v11330_v24 = vld [vmem:[#allocation18 + $0x28] sm:$0xff] }
 0x8d9   : > { %v13502_v15 = vld [vmem:[#allocation5 + $0xd1] ss:$2 sm:$0x7f]  ;;  %v10278_v14 = vmax.f32 %v10245_v53, 0.0  ;;  %v10331_v43 = vld [vmem:[#allocation6 + $0x70] ss:$2 sm:$0xff] }
 0x8da   : > { %10308 = vst.msk [vmem:[#allocation6 + $0xc0] sm:$0xff] %vm3550_vm0, %v10275_v45  ;;  %19530 = vmatmul.mubr.msk.f32.gmra.mrb[48].mxu1 %vm3550_vm0, %v10364_v28  ;;  %v10244_v48 = vld [vmem:[#allocation5 + $0xd0] sm:$0xff]  ;;  %v10335_v57 = vld [vmem:[#allocation6 + $0x90] ss:$2 sm:$0xff]  ;;  %v11117_v41 = vld [vmem:[#allocation6 + $0x11] ss:$2 sm:$0xff] }
 0x8db   : > { %20049 = vmatmul.mubr.msk.f32.gmra.mrb[100].mxu0 %vm3550_vm0, %v13502_v15  ;;  %19532 = vmatprep.mubr.msk.f32.mxu1 %vm21796_vm5, %v26031_v10  ;;  %v10277_v30 = vmax.f32 %v10244_v48, 0.0  ;;  %10311 = vst.msk [vmem:[#allocation6 + $0xd8] sm:$0xff] %vm3550_vm0, %v10278_v14  ;;  %v10337_v19 = vld [vmem:[#allocation6 + $0xa0] ss:$2 sm:$0xff]  ;;  %v10919_v12 = vld [vmem:[#allocation6 + $0x10] ss:$2 sm:$0xff] }
 0x8dc   : > { %v10712_v35 = vld [vmem:[#allocation6 + $0x12] ss:$2 sm:$0xff]  ;;  %v10714_v61 = vld [vmem:[#allocation6 + $0x22] ss:$2 sm:$0xff]  ;;  %v11119_v28 = vld [vmem:[#allocation6 + $0x31] ss:$2 sm:$0xff] }
 0x8dd   : > { %v10366_v21 = vld [vmem:[#allocation6 + $0xb1] ss:$2 sm:$0xff]  ;;  %10310 = vst.msk [vmem:[#allocation6 + $0xd0] sm:$0xff] %vm3550_vm0, %v10277_v30  ;;  %v10339_v58 = vld [vmem:[#allocation6 + $0xb0] ss:$2 sm:$0xff] }
 0x8de   : > { %19533 = vmatmul.mubr.msk.f32.gmra.mrb[50].mxu1 %vm3550_vm0, %v10366_v21  ;;  %v10246_v16 = vld [vmem:[#allocation5 + $0xe0] sm:$0xff]  ;;  %v10247_v17 = vld [vmem:[#allocation5 + $0xe8] sm:$0xff] }
 0x8df   : > { %19535 = vmatprep.mubr.msk.f32.mxu1 %vm21796_vm5, %v26031_v10  ;;  %v10279_v46 = vmax.f32 %v10246_v16, 0.0  ;;  %v10280_v54 = vmax.f32 %v10247_v17, 0.0  ;;  %v10716_v4 = vld [vmem:[#allocation6 + $0x32] ss:$2 sm:$0xff]  ;;  %v10718_v37 = vld [vmem:[#allocation6 + $0x42] ss:$2 sm:$0xff] }
 0x8e0   : > { %v10720_v7 = vld [vmem:[#allocation6 + $0x52] ss:$2 sm:$0xff]  ;;  %v10722_v59 = vld [vmem:[#allocation6 + $0x62] ss:$2 sm:$0xff]  ;;  %v11120_v53 = vld [vmem:[#allocation6 + $0x41] ss:$2 sm:$0xff] }
 0x8e1   : > { %v10368_v22 = vld [vmem:[#allocation6 + $0xc1] ss:$2 sm:$0x7f]  ;;  %10312 = vst.msk [vmem:[#allocation6 + $0xe0] sm:$0xff] %vm3550_vm0, %v10279_v46  ;;  %10313 = vst.msk [vmem:[#allocation6 + $0xe8] sm:$0xff] %vm3550_vm0, %v10280_v54 }
 0x8e2   : > { %19536 = vmatmul.mubr.msk.f32.gmra.mrb[52].mxu1 %vm3550_vm0, %v10368_v22  ;;  %v10341_v49 = vld [vmem:[#allocation6 + $0xc0] ss:$2 sm:$0x7f]  ;;  %v10921_v13 = vld [vmem:[#allocation6 + $0x30] ss:$2 sm:$0xff] }
 0x8e3   : > { %19540 = vmatprep.mubr.msk.f32.mxu1 %vm21796_vm5, %v26031_v10  ;;  %v10724_v39 = vld [vmem:[#allocation6 + $0x72] ss:$2 sm:$0xff]  ;;  %v10726_v51 = vld [vmem:[#allocation6 + $0x82] ss:$2 sm:$0xff]  ;;  %v11121_v21 = vld [vmem:[#allocation6 + $0x51] ss:$2 sm:$0xff] }
 0x8e4   : > { %v10728_v63 = vld [vmem:[#allocation6 + $0x92] ss:$2 sm:$0xff]  ;;  %v10730_v8 = vld [vmem:[#allocation6 + $0xa2] ss:$2 sm:$0xff] }
 0x8e5   : > { %v10732_v11 = vld [vmem:[#allocation6 + $0xb2] ss:$2 sm:$0xff]  ;;  %v10734_v5 = vld [vmem:[#allocation6 + $0xc2] ss:$2 sm:$0x7f] }
 0x8e6   : > { %19541 = vmatmul.mubr.msk.f32.vlgmr.msra.gmra.mrb[28].mxu1 %vm3550_vm0, %v10317_v36  ;;  %v10920_v31 = vld [vmem:[#allocation6 + $0x20] ss:$2 sm:$0xff]  ;;  %v10923_v23 = vld [vmem:[#allocation6 + $0x50] ss:$2 sm:$0xff] }
 0x8e7   : > { %19580 = vmatpush3.msra.mxu1 %v10736_v38  ;;  %19543 = vmatprep.mubr.msk.f32.mxu1 %vm21796_vm5, %v26031_v10  ;;  %v10922_v55 = vld [vmem:[#allocation6 + $0x40] ss:$2 sm:$0xff]  ;;  %v10925_v62 = vld [vmem:[#allocation6 + $0x70] ss:$2 sm:$0xff]  ;;  %v11122_v38 = vld [vmem:[#allocation6 + $0x61] ss:$2 sm:$0xff] }
 0x8e8   : > { %19620 = vmatprep.subr.mxu1 %v26031_v10  ;;  %v10924_v3 = vld [vmem:[#allocation6 + $0x60] ss:$2 sm:$0xff]  ;;  %v10927_v29 = vld [vmem:[#allocation6 + $0x90] ss:$2 sm:$0xff] }
 0x8e9   : > { %v10926_v1 = vld [vmem:[#allocation6 + $0x80] ss:$2 sm:$0xff]  ;;  %v10929_v0 = vld [vmem:[#allocation6 + $0xb0] ss:$2 sm:$0xff] }
 0x8ea   : > { %19544 = vmatmul.mubr.msk.f32.gmra.mrb[30].mxu1 %vm3550_vm0, %v10319_v27  ;;  %v10928_v2 = vld [vmem:[#allocation6 + $0xa0] ss:$2 sm:$0xff]  ;;  %v10932_v34 = vld [vmem:[#allocation6 + $0xd0] ss:$2 sm:$0x7f] }
 0x8eb   : > { %19546 = vmatprep.mubr.msk.f32.mxu1 %vm21796_vm5, %v26031_v10  ;;  %v10930_v20 = vld [vmem:[#allocation6 + $0xc0] ss:$2 sm:$0xff]  ;;  %v11123_v27 = vld [vmem:[#allocation6 + $0x71] ss:$2 sm:$0xff] }
 0x8ee   : > { %19547 = vmatmul.mubr.msk.f32.gmra.mrb[32].mxu1 %vm3550_vm0, %v10321_v32  ;;  %v11124_v32 = vld [vmem:[#allocation6 + $0x81] ss:$2 sm:$0xff] }
 0x8ef   : > { %19549 = vmatprep.mubr.msk.f32.mxu1 %vm21796_vm5, %v26031_v10 }
 0x8f2   : > { %19550 = vmatmul.mubr.msk.f32.gmra.mrb[34].mxu1 %vm3550_vm0, %v10323_v42 }
 0x8f3   : > { %19552 = vmatprep.mubr.msk.f32.mxu1 %vm21796_vm5, %v26031_v10 }
 0x8f6   : > { %19553 = vmatmul.mubr.msk.f32.gmra.mrb[36].mxu1 %vm3550_vm0, %v10325_v33 }
 0x8f7   : > { %19555 = vmatprep.mubr.msk.f32.mxu1 %vm21796_vm5, %v26031_v10 }
 0x8fa   : > { %19556 = vmatmul.mubr.msk.f32.gmra.mrb[38].mxu1 %vm3550_vm0, %v10327_v25  ;;  %v11125_v25 = vld [vmem:[#allocation6 + $0x91] ss:$2 sm:$0xff] }
 0x8fb   : > { %19558 = vmatprep.mubr.msk.f32.mxu1 %vm21796_vm5, %v26031_v10 }
 0x8fe   : > { %19559 = vmatmul.mubr.msk.f32.gmra.mrb[40].mxu1 %vm3550_vm0, %v10329_v40 }
 0x8ff   : > { %19561 = vmatprep.mubr.msk.f32.mxu1 %vm21796_vm5, %v26031_v10 }
 0x902   : > { %19562 = vmatmul.mubr.msk.f32.gmra.mrb[42].mxu1 %vm3550_vm0, %v10331_v43 }
 0x903   : > { %19564 = vmatprep.mubr.msk.f32.mxu1 %vm21796_vm5, %v26031_v10 }
 0x906   : > { %19565 = vmatmul.mubr.msk.f32.gmra.mrb[44].mxu1 %vm3550_vm0, %v10333_v44  ;;  %v11126_v44 = vld [vmem:[#allocation6 + $0xa1] ss:$2 sm:$0xff] }
 0x907   : > { %19567 = vmatprep.mubr.msk.f32.mxu1 %vm21796_vm5, %v26031_v10 }
 0x90a   : > { %19568 = vmatmul.mubr.msk.f32.gmra.mrb[46].mxu1 %vm3550_vm0, %v10335_v57 }
 0x90b   : > { %19570 = vmatprep.mubr.msk.f32.mxu1 %vm21796_vm5, %v26031_v10 }
 0x90e   : > { %19571 = vmatmul.mubr.msk.f32.gmra.mrb[48].mxu1 %vm3550_vm0, %v10337_v19 }
 0x90f   : > { %19573 = vmatprep.mubr.msk.f32.mxu1 %vm21796_vm5, %v26031_v10 }
 0x912   : > { %19574 = vmatmul.mubr.msk.f32.gmra.mrb[50].mxu1 %vm3550_vm0, %v10339_v58  ;;  %v11127_v58 = vld [vmem:[#allocation6 + $0xb1] ss:$2 sm:$0xff] }
 0x913   : > { %19576 = vmatprep.mubr.msk.f32.mxu1 %vm21796_vm5, %v26031_v10 }
 0x916   : > { %19577 = vmatmul.mubr.msk.f32.gmra.mrb[52].mxu1 %vm3550_vm0, %v10341_v49 }
 0x917   : > { %19581 = vmatprep.mubr.msk.f32.mxu1 %vm21796_vm5, %v26031_v10 }
 0x91a   : > { %19582 = vmatmul.mubr.msk.f32.vlgmr.msra.gmra.mrb[28].mxu1 %vm3550_vm0, %v10710_v50  ;;  %v11128_v50 = vld [vmem:[#allocation6 + $0xc1] ss:$2 sm:$0xff] }
 0x91b   : > { %19621 = vmatpush3.msra.mxu1 %v10934_v56  ;;  %19584 = vmatprep.mubr.msk.f32.mxu1 %vm21796_vm5, %v26031_v10 }
 0x91c   : > { %19661 = vmatprep.subr.mxu1 %v26031_v10 }
 0x91e   : > { %19585 = vmatmul.mubr.msk.f32.gmra.mrb[30].mxu1 %vm3550_vm0, %v10712_v35 }
 0x91f   : > { %19587 = vmatprep.mubr.msk.f32.mxu1 %vm21796_vm5, %v26031_v10 }
 0x922   : > { %19588 = vmatmul.mubr.msk.f32.gmra.mrb[32].mxu1 %vm3550_vm0, %v10714_v61 }
 0x923   : > { %19590 = vmatprep.mubr.msk.f32.mxu1 %vm21796_vm5, %v26031_v10 }
 0x926   : > { %19591 = vmatmul.mubr.msk.f32.gmra.mrb[34].mxu1 %vm3550_vm0, %v10716_v4  ;;  %v11130_v4 = vld [vmem:[#allocation6 + $0xd1] ss:$2 sm:$0x7f] }
 0x927   : > { %19593 = vmatprep.mubr.msk.f32.mxu1 %vm21796_vm5, %v26031_v10 }
 0x92a   : > { %19594 = vmatmul.mubr.msk.f32.gmra.mrb[36].mxu1 %vm3550_vm0, %v10718_v37  ;;  %v11528_v37 = vld [vmem:[#allocation18 + $0x30] sm:$0xff] }
 0x92b   : > { %19596 = vmatprep.mubr.msk.f32.mxu1 %vm21796_vm5, %v26031_v10 }
 0x92e   : > { %19597 = vmatmul.mubr.msk.f32.gmra.mrb[38].mxu1 %vm3550_vm0, %v10720_v7  ;;  %v11315_v7 = vld [vmem:[#allocation6 + $0x12] ss:$2 sm:$0xff] }
 0x92f   : > { %19599 = vmatprep.mubr.msk.f32.mxu1 %vm21796_vm5, %v26031_v10 }
 0x932   : > { %19600 = vmatmul.mubr.msk.f32.gmra.mrb[40].mxu1 %vm3550_vm0, %v10722_v59  ;;  %v11316_v59 = vld [vmem:[#allocation6 + $0x22] ss:$2 sm:$0xff] }
 0x933   : > { %19602 = vmatprep.mubr.msk.f32.mxu1 %vm21796_vm5, %v26031_v10 }
 0x936   : > { %19603 = vmatmul.mubr.msk.f32.gmra.mrb[42].mxu1 %vm3550_vm0, %v10724_v39  ;;  %v11317_v39 = vld [vmem:[#allocation6 + $0x32] ss:$2 sm:$0xff] }
 0x937   : > { %19605 = vmatprep.mubr.msk.f32.mxu1 %vm21796_vm5, %v26031_v10 }
 0x93a   : > { %19606 = vmatmul.mubr.msk.f32.gmra.mrb[44].mxu1 %vm3550_vm0, %v10726_v51  ;;  %v11318_v51 = vld [vmem:[#allocation6 + $0x42] ss:$2 sm:$0xff] }
 0x93b   : > { %19608 = vmatprep.mubr.msk.f32.mxu1 %vm21796_vm5, %v26031_v10 }
 0x93e   : > { %19609 = vmatmul.mubr.msk.f32.gmra.mrb[46].mxu1 %vm3550_vm0, %v10728_v63  ;;  %v11319_v63 = vld [vmem:[#allocation6 + $0x52] ss:$2 sm:$0xff] }
 0x93f   : > { %19611 = vmatprep.mubr.msk.f32.mxu1 %vm21796_vm5, %v26031_v10 }
 0x942   : > { %19612 = vmatmul.mubr.msk.f32.gmra.mrb[48].mxu1 %vm3550_vm0, %v10730_v8  ;;  %v11320_v8 = vld [vmem:[#allocation6 + $0x62] ss:$2 sm:$0xff] }
 0x943   : > { %19614 = vmatprep.mubr.msk.f32.mxu1 %vm21796_vm5, %v26031_v10 }
 0x946   : > { %19615 = vmatmul.mubr.msk.f32.gmra.mrb[50].mxu1 %vm3550_vm0, %v10732_v11  ;;  %v11321_v11 = vld [vmem:[#allocation6 + $0x72] ss:$2 sm:$0xff] }
 0x947   : > { %19617 = vmatprep.mubr.msk.f32.mxu1 %vm21796_vm5, %v26031_v10 }
 0x94a   : > { %19618 = vmatmul.mubr.msk.f32.gmra.mrb[52].mxu1 %vm3550_vm0, %v10734_v5  ;;  %v11322_v5 = vld [vmem:[#allocation6 + $0x82] ss:$2 sm:$0xff] }
 0x94b   : > { %19622 = vmatprep.mubr.msk.f32.mxu1 %vm21796_vm5, %v26031_v10 }
 0x94e   : > { %19623 = vmatmul.mubr.msk.f32.vlgmr.msra.gmra.mrb[28].mxu1 %vm3550_vm0, %v10919_v12  ;;  %v11324_v12 = vld [vmem:[#allocation6 + $0xa2] ss:$2 sm:$0xff] }
 0x94f   : > { %19662 = vmatpush3.msra.mxu1 %v11132_v9  ;;  %19625 = vmatprep.mubr.msk.f32.mxu1 %vm21796_vm5, %v26031_v10  ;;  %v11323_v9 = vld [vmem:[#allocation6 + $0x92] ss:$2 sm:$0xff] }
 0x950   : > { %19702 = vmatprep.subr.mxu1 %v26031_v10 }
 0x952   : > { %19626 = vmatmul.mubr.msk.f32.gmra.mrb[30].mxu1 %vm3550_vm0, %v10920_v31  ;;  %v11325_v31 = vld [vmem:[#allocation6 + $0xb2] ss:$2 sm:$0xff] }
 0x953   : > { %19628 = vmatprep.mubr.msk.f32.mxu1 %vm21796_vm5, %v26031_v10 }
 0x956   : > { %19629 = vmatmul.mubr.msk.f32.gmra.mrb[32].mxu1 %vm3550_vm0, %v10921_v13  ;;  %v11326_v13 = vld [vmem:[#allocation6 + $0xc2] ss:$2 sm:$0xff] }
 0x957   : > { %19631 = vmatprep.mubr.msk.f32.mxu1 %vm21796_vm5, %v26031_v10 }
 0x95a   : > { %19632 = vmatmul.mubr.msk.f32.gmra.mrb[34].mxu1 %vm3550_vm0, %v10922_v55  ;;  %v11328_v55 = vld [vmem:[#allocation6 + $0xd2] ss:$2 sm:$0x7f] }
 0x95b   : > { %19634 = vmatprep.mubr.msk.f32.mxu1 %vm21796_vm5, %v26031_v10 }
 0x95e   : > { %19635 = vmatmul.mubr.msk.f32.gmra.mrb[36].mxu1 %vm3550_vm0, %v10923_v23  ;;  %v11726_v23 = vld [vmem:[#allocation18 + $0x38] sm:$0xff] }
 0x95f   : > { %19637 = vmatprep.mubr.msk.f32.mxu1 %vm21796_vm5, %v26031_v10 }
 0x962   : > { %19638 = vmatmul.mubr.msk.f32.gmra.mrb[38].mxu1 %vm3550_vm0, %v10924_v3  ;;  %v11513_v3 = vld [vmem:[#allocation6 + $0x20] ss:$2 sm:$0xff] }
 0x963   : > { %19640 = vmatprep.mubr.msk.f32.mxu1 %vm21796_vm5, %v26031_v10 }
 0x966   : > { %19641 = vmatmul.mubr.msk.f32.gmra.mrb[40].mxu1 %vm3550_vm0, %v10925_v62  ;;  %v11514_v62 = vld [vmem:[#allocation6 + $0x30] ss:$2 sm:$0xff] }
 0x967   : > { %19643 = vmatprep.mubr.msk.f32.mxu1 %vm21796_vm5, %v26031_v10 }
 0x96a   : > { %19644 = vmatmul.mubr.msk.f32.gmra.mrb[42].mxu1 %vm3550_vm0, %v10926_v1  ;;  %v11515_v1 = vld [vmem:[#allocation6 + $0x40] ss:$2 sm:$0xff] }
 0x96b   : > { %19646 = vmatprep.mubr.msk.f32.mxu1 %vm21796_vm5, %v26031_v10 }
 0x96e   : > { %19647 = vmatmul.mubr.msk.f32.gmra.mrb[44].mxu1 %vm3550_vm0, %v10927_v29  ;;  %v11516_v29 = vld [vmem:[#allocation6 + $0x50] ss:$2 sm:$0xff] }
 0x96f   : > { %19649 = vmatprep.mubr.msk.f32.mxu1 %vm21796_vm5, %v26031_v10 }
 0x972   : > { %19650 = vmatmul.mubr.msk.f32.gmra.mrb[46].mxu1 %vm3550_vm0, %v10928_v2  ;;  %v11517_v2 = vld [vmem:[#allocation6 + $0x60] ss:$2 sm:$0xff] }
 0x973   : > { %19652 = vmatprep.mubr.msk.f32.mxu1 %vm21796_vm5, %v26031_v10 }
 0x976   : > { %19653 = vmatmul.mubr.msk.f32.gmra.mrb[48].mxu1 %vm3550_vm0, %v10929_v0  ;;  %v11518_v0 = vld [vmem:[#allocation6 + $0x70] ss:$2 sm:$0xff] }
 0x977   : > { %19655 = vmatprep.mubr.msk.f32.mxu1 %vm21796_vm5, %v26031_v10 }
 0x97a   : > { %19656 = vmatmul.mubr.msk.f32.gmra.mrb[50].mxu1 %vm3550_vm0, %v10930_v20  ;;  %v11519_v20 = vld [vmem:[#allocation6 + $0x80] ss:$2 sm:$0xff] }
 0x97b   : > { %19658 = vmatprep.mubr.msk.f32.mxu1 %vm21796_vm5, %v26031_v10  ;;  %v13609_v26 = vpop.f32.mrb[76].mxu0 }
 0x97c   : > { %13673 = vst.msk [vmem:[#allocation12] sm:$0xff] %vm12120_vm6, %v13609_v26  ;;  %v20014_v47 = vpop.f32.mrb[77].mxu0  ;;  %v11521_v26 = vld [vmem:[#allocation6 + $0xa0] ss:$2 sm:$0xff] }
 0x97d   : > { %v11522_v47 = vld [vmem:[#allocation6 + $0xb0] ss:$2 sm:$0xff] }
 0x97e   : > { %19659 = vmatmul.mubr.msk.f32.gmra.mrb[52].mxu1 %vm3550_vm0, %v10932_v34  ;;  %v11520_v34 = vld [vmem:[#allocation6 + $0x90] ss:$2 sm:$0xff] }
 0x97f   : > { %19663 = vmatprep.mubr.msk.f32.mxu1 %vm21796_vm5, %v26031_v10  ;;  %v13614_v60 = vpop.f32.mrb[78].mxu0 }
 0x980   : > { %13674 = vst.msk [vmem:[#allocation12 + $0x8] sm:$0xff] %vm12120_vm6, %v13614_v60  ;;  %v20017_v6 = vpop.f32.mrb[79].mxu0  ;;  %v11526_v60 = vld [vmem:[#allocation6 + $0xe0] ss:$2 sm:$0x7f] }
 0x981   : > { %v16947_v6 = vld [vmem:[%s25730_s5 + $0x10] sm:$0xff] }
 0x982   : > { %19664 = vmatmul.mubr.msk.f32.vlgmr.msra.gmra.mrb[28].mxu1 %vm3550_vm0, %v11117_v41  ;;  %v11524_v41 = vld [vmem:[#allocation6 + $0xd0] ss:$2 sm:$0xff] }
 0x983   : > { %19703 = vmatpush3.msra.mxu1 %v11330_v24  ;;  %19666 = vmatprep.mubr.msk.f32.mxu1 %vm21796_vm5, %v26031_v10  ;;  %v13619_v45 = vpop.f32.mrb[80].mxu0  ;;  %v11523_v24 = vld [vmem:[#allocation6 + $0xc0] ss:$2 sm:$0xff] }
 0x984   : > { %19743 = vmatprep.subr.mxu1 %v26031_v10  ;;  %13675 = vst.msk [vmem:[#allocation12 + $0x10] sm:$0xff] %vm12120_vm6, %v13619_v45  ;;  %v20020_v18 = vpop.f32.mrb[81].mxu0  ;;  %v11924_v45 = vld [vmem:[#allocation18 + $0x40] sm:$0xff] }
 0x986   : > { %19667 = vmatmul.mubr.msk.f32.gmra.mrb[30].mxu1 %vm3550_vm0, %v11118_v52  ;;  %v16948_v52 = vld [vmem:[%s25730_s5 + $0x18] sm:$0xff] }
 0x987   : > { %19669 = vmatprep.mubr.msk.f32.mxu1 %vm21796_vm5, %v26031_v10  ;;  %v20315_v18 = vpack.c.bf16 %v16948_v52, %v16947_v6 }
 0x988   : > { %v13624_v15 = vpop.f32.mrb[82].mxu0 }
 0x989   : > { %13676 = vst.msk [vmem:[#allocation12 + $0x18] sm:$0xff] %vm12120_vm6, %v13624_v15  ;;  %v20023_v48 = vpop.f32.mrb[83].mxu0  ;;  %v11712_v15 = vld [vmem:[#allocation6 + $0x31] ss:$2 sm:$0xff] }
 0x98a   : > { %19670 = vmatmul.mubr.msk.f32.gmra.mrb[32].mxu1 %vm3550_vm0, %v11119_v28  ;;  %v11711_v28 = vld [vmem:[#allocation6 + $0x21] ss:$2 sm:$0xff] }
 0x98b   : > { %19672 = vmatprep.mubr.msk.f32.mxu1 %vm21796_vm5, %v26031_v10  ;;  %v11713_v48 = vld [vmem:[#allocation6 + $0x41] ss:$2 sm:$0xff] }
 0x98c   : > { %v13629_v30 = vpop.f32.mrb[84].mxu0 }
 0x98d   : > { %13677 = vst.msk [vmem:[#allocation12 + $0x20] sm:$0xff] %vm12120_vm6, %v13629_v30  ;;  %v20026_v14 = vpop.f32.mrb[85].mxu0  ;;  %v11715_v30 = vld [vmem:[#allocation6 + $0x61] ss:$2 sm:$0xff] }
 0x98e   : > { %19673 = vmatmul.mubr.msk.f32.gmra.mrb[34].mxu1 %vm3550_vm0, %v11120_v53  ;;  %v11714_v53 = vld [vmem:[#allocation6 + $0x51] ss:$2 sm:$0xff] }
 0x98f   : > { %19675 = vmatprep.mubr.msk.f32.mxu1 %vm21796_vm5, %v26031_v10  ;;  %v11716_v14 = vld [vmem:[#allocation6 + $0x71] ss:$2 sm:$0xff] }
 0x990   : > { %v13634_v22 = vpop.f32.mrb[86].mxu0 }
 0x991   : > { %v20029_v36 = vpop.f32.mrb[87].mxu0  ;;  %v11718_v22 = vld [vmem:[#allocation6 + $0x91] ss:$2 sm:$0xff] }
 0x992   : > { %19676 = vmatmul.mubr.msk.f32.gmra.mrb[36].mxu1 %vm3550_vm0, %v11121_v21  ;;  %v11717_v21 = vld [vmem:[#allocation6 + $0x81] ss:$2 sm:$0xff] }
 0x993   : > { %19678 = vmatprep.mubr.msk.f32.mxu1 %vm21796_vm5, %v26031_v10  ;;  %v11719_v36 = vld [vmem:[#allocation6 + $0xa1] ss:$2 sm:$0xff] }
 0x995   : > { %v13639_v16 = vpop.f32.mrb[88].mxu0 }
 0x996   : > { %19679 = vmatmul.mubr.msk.f32.gmra.mrb[38].mxu1 %vm3550_vm0, %v11122_v38  ;;  %13679 = vst.msk [vmem:[#allocation12 + $0x30] sm:$0xff] %vm12120_vm6, %v13639_v16  ;;  %v20032_v17 = vpop.f32.mrb[89].mxu0  ;;  %v11720_v38 = vld [vmem:[#allocation6 + $0xb1] ss:$2 sm:$0xff]  ;;  %v11721_v16 = vld [vmem:[#allocation6 + $0xc1] ss:$2 sm:$0xff] }
 0x997   : > { %19681 = vmatprep.mubr.msk.f32.mxu1 %vm21796_vm5, %v26031_v10  ;;  %v11722_v17 = vld [vmem:[#allocation6 + $0xd1] ss:$2 sm:$0xff] }
 0x999   : > { %v13644_v46 = vpop.f32.mrb[90].mxu0 }
 0x99a   : > { %19682 = vmatmul.mubr.msk.f32.gmra.mrb[40].mxu1 %vm3550_vm0, %v11123_v27  ;;  %v20035_v54 = vpop.f32.mrb[91].mxu0  ;;  %v11724_v27 = vld [vmem:[#allocation6 + $0xe1] ss:$2 sm:$0x7f]  ;;  %v11909_v46 = vld [vmem:[#allocation6 + $0x22] ss:$2 sm:$0xff] }
 0x99b   : > { %19684 = vmatprep.mubr.msk.f32.mxu1 %vm21796_vm5, %v26031_v10  ;;  %v11910_v54 = vld [vmem:[#allocation6 + $0x32] ss:$2 sm:$0xff] }
 0x99d   : > { %v13649_v42 = vpop.f32.mrb[92].mxu0 }
 0x99e   : > { %19685 = vmatmul.mubr.msk.f32.gmra.mrb[42].mxu1 %vm3550_vm0, %v11124_v32  ;;  %13681 = vst.msk [vmem:[#allocation12 + $0x40] sm:$0xff] %vm12120_vm6, %v13649_v42  ;;  %v20038_v33 = vpop.f32.mrb[93].mxu0  ;;  %v11911_v32 = vld [vmem:[#allocation6 + $0x42] ss:$2 sm:$0xff]  ;;  %v11912_v42 = vld [vmem:[#allocation6 + $0x52] ss:$2 sm:$0xff] }
 0x99f   : > { %19687 = vmatprep.mubr.msk.f32.mxu1 %vm21796_vm5, %v26031_v10  ;;  %v11913_v33 = vld [vmem:[#allocation6 + $0x62] ss:$2 sm:$0xff] }
 0x9a1   : > { %v13654_v40 = vpop.f32.mrb[94].mxu0 }
 0x9a2   : > { %19688 = vmatmul.mubr.msk.f32.gmra.mrb[44].mxu1 %vm3550_vm0, %v11125_v25  ;;  %v20041_v43 = vpop.f32.mrb[95].mxu0  ;;  %v11914_v25 = vld [vmem:[#allocation6 + $0x72] ss:$2 sm:$0xff]  ;;  %v11915_v40 = vld [vmem:[#allocation6 + $0x82] ss:$2 sm:$0xff] }
 0x9a3   : > { %19690 = vmatprep.mubr.msk.f32.mxu1 %vm21796_vm5, %v26031_v10  ;;  %v11916_v43 = vld [vmem:[#allocation6 + $0x92] ss:$2 sm:$0xff] }
 0x9a6   : > { %19691 = vmatmul.mubr.msk.f32.gmra.mrb[46].mxu1 %vm3550_vm0, %v11126_v44  ;;  %v13659_v57 = vpop.f32.mrb[96].mxu0  ;;  %v11917_v44 = vld [vmem:[#allocation6 + $0xa2] ss:$2 sm:$0xff] }
 0x9a7   : > { %13683 = vst.msk [vmem:[#allocation12 + $0x50] sm:$0xff] %vm12120_vm6, %v13659_v57  ;;  %v20044_v19 = vpop.f32.mrb[97].mxu0  ;;  %19693 = vmatprep.mubr.msk.f32.mxu1 %vm21796_vm5, %v26031_v10  ;;  %v11918_v57 = vld [vmem:[#allocation6 + $0xb2] ss:$2 sm:$0xff] }
 0x9a8   : > { %v11919_v19 = vld [vmem:[#allocation6 + $0xc2] ss:$2 sm:$0xff] }
 0x9aa   : > { %19694 = vmatmul.mubr.msk.f32.gmra.mrb[48].mxu1 %vm3550_vm0, %v11127_v58  ;;  %v13664_v49 = vpop.f32.mrb[98].mxu0  ;;  %v11920_v58 = vld [vmem:[#allocation6 + $0xd2] ss:$2 sm:$0xff] }
 0x9ab   : > { %v20047_v56 = vpop.f32.mrb[99].mxu0  ;;  %19696 = vmatprep.mubr.msk.f32.mxu1 %vm21796_vm5, %v26031_v10  ;;  %v11922_v49 = vld [vmem:[#allocation6 + $0xe2] ss:$2 sm:$0x7f] }
 0x9ac   : > { %v12172_v56 = vld [vmem:[#allocation7 + $0x1] sm:$0xff] }
 0x9ae   : > { %19697 = vmatmul.mubr.msk.f32.gmra.mrb[50].mxu1 %vm3550_vm0, %v11128_v50  ;;  %v13669_v35 = vpop.f32.mrb[100].mxu0  ;;  %v12170_v50 = vld [vmem:[%s25730_s5] sm:$0xff] }
 0x9af   : > { %13685 = vst.msk [vmem:[#allocation12 + $0x60] sm:$0x7f] %vm12133_vm7, %v13669_v35  ;;  %v20050_v61 = vpop.f32.mrb[101].mxu0  ;;  %19699 = vmatprep.mubr.msk.f32.mxu1 %vm21796_vm5, %v26031_v10  ;;  %v12171_v35 = vld [vmem:[%s25730_s5 + $0x8] sm:$0xff] }
 0x9b0   : > { %v20319_v61 = vpack.c.bf16 %v12171_v35, %v12170_v50  ;;  %v17049_v50 = vld [vmem:[%s25732_s7 + $0x18] sm:$0xff] }
 0x9b2   : > { %19700 = vmatmul.mubr.msk.f32.gmra.mrb[52].mxu1 %vm3550_vm0, %v11130_v4 }
 0x9b3   : > { %19704 = vmatprep.mubr.msk.f32.mxu1 %vm21796_vm5, %v26031_v10 }
 0x9b6   : > { %19705 = vmatmul.mubr.msk.f32.vlgmr.msra.gmra.mrb[28].mxu1 %vm3550_vm0, %v11315_v7 }
 0x9b7   : > { %19744 = vmatpush3.msra.mxu1 %v11528_v37  ;;  %19707 = vmatprep.mubr.msk.f32.mxu1 %vm21796_vm5, %v26031_v10 }
 0x9b8   : > { %19784 = vmatprep.subr.mxu1 %v26031_v10 }
 0x9ba   : > { %19708 = vmatmul.mubr.msk.f32.gmra.mrb[30].mxu1 %vm3550_vm0, %v11316_v59 }
 0x9bb   : > { %19710 = vmatprep.mubr.msk.f32.mxu1 %vm21796_vm5, %v26031_v10 }
 0x9be   : > { %19711 = vmatmul.mubr.msk.f32.gmra.mrb[32].mxu1 %vm3550_vm0, %v11317_v39 }
 0x9bf   : > { %19713 = vmatprep.mubr.msk.f32.mxu1 %vm21796_vm5, %v26031_v10 }
 0x9c2   : > { %19714 = vmatmul.mubr.msk.f32.gmra.mrb[34].mxu1 %vm3550_vm0, %v11318_v51 }
 0x9c3   : > { %19716 = vmatprep.mubr.msk.f32.mxu1 %vm21796_vm5, %v26031_v10 }
 0x9c6   : > { %19717 = vmatmul.mubr.msk.f32.gmra.mrb[36].mxu1 %vm3550_vm0, %v11319_v63 }
 0x9c7   : > { %19719 = vmatprep.mubr.msk.f32.mxu1 %vm21796_vm5, %v26031_v10 }
 0x9ca   : > { %19720 = vmatmul.mubr.msk.f32.gmra.mrb[38].mxu1 %vm3550_vm0, %v11320_v8 }
 0x9cb   : > { %19722 = vmatprep.mubr.msk.f32.mxu1 %vm21796_vm5, %v26031_v10 }
 0x9ce   : > { %19723 = vmatmul.mubr.msk.f32.gmra.mrb[40].mxu1 %vm3550_vm0, %v11321_v11 }
 0x9cf   : > { %19725 = vmatprep.mubr.msk.f32.mxu1 %vm21796_vm5, %v26031_v10 }
 0x9d2   : > { %19726 = vmatmul.mubr.msk.f32.gmra.mrb[42].mxu1 %vm3550_vm0, %v11322_v5 }
 0x9d3   : > { %19728 = vmatprep.mubr.msk.f32.mxu1 %vm21796_vm5, %v26031_v10 }
 0x9d6   : > { %19729 = vmatmul.mubr.msk.f32.gmra.mrb[44].mxu1 %vm3550_vm0, %v11323_v9 }
 0x9d7   : > { %19731 = vmatprep.mubr.msk.f32.mxu1 %vm21796_vm5, %v26031_v10 }
 0x9da   : > { %19732 = vmatmul.mubr.msk.f32.gmra.mrb[46].mxu1 %vm3550_vm0, %v11324_v12 }
 0x9db   : > { %19734 = vmatprep.mubr.msk.f32.mxu1 %vm21796_vm5, %v26031_v10 }
 0x9de   : > { %19735 = vmatmul.mubr.msk.f32.gmra.mrb[48].mxu1 %vm3550_vm0, %v11325_v31 }
 0x9df   : > { %19737 = vmatprep.mubr.msk.f32.mxu1 %vm21796_vm5, %v26031_v10 }
 0x9e2   : > { %19738 = vmatmul.mubr.msk.f32.gmra.mrb[50].mxu1 %vm3550_vm0, %v11326_v13  ;;  %v16965_v13 = vld [vmem:[%s25730_s5 + $0x20] sm:$0xff] }
 0x9e3   : > { %19740 = vmatprep.mubr.msk.f32.mxu1 %vm21796_vm5, %v26031_v10 }
 0x9e6   : > { %19741 = vmatmul.mubr.msk.f32.gmra.mrb[52].mxu1 %vm3550_vm0, %v11328_v55  ;;  %v16966_v55 = vld [vmem:[%s25730_s5 + $0x28] sm:$0xff] }
 0x9e7   : > { %19745 = vmatprep.mubr.msk.f32.mxu1 %vm21796_vm5, %v26031_v10 }
 0x9ea   : > { %19746 = vmatmul.mubr.msk.f32.vlgmr.msra.gmra.mrb[28].mxu1 %vm3550_vm0, %v11513_v3 }
 0x9eb   : > { %19785 = vmatpush3.msra.mxu1 %v11726_v23  ;;  %19748 = vmatprep.mubr.msk.f32.mxu1 %vm21796_vm5, %v26031_v10 }
 0x9ec   : > { %19825 = vmatprep.subr.mxu1 %v26031_v10 }
 0x9ee   : > { %19749 = vmatmul.mubr.msk.f32.gmra.mrb[30].mxu1 %vm3550_vm0, %v11514_v62 }
 0x9ef   : > { %19751 = vmatprep.mubr.msk.f32.mxu1 %vm21796_vm5, %v26031_v10 }
 0x9f2   : > { %19752 = vmatmul.mubr.msk.f32.gmra.mrb[32].mxu1 %vm3550_vm0, %v11515_v1  ;;  %v25122_v1 = vpack.c.bf16 %v16966_v55, %v16965_v13 }
 0x9f3   : > { %19754 = vmatprep.mubr.msk.f32.mxu1 %vm21796_vm5, %v26031_v10 }
 0x9f6   : > { %19755 = vmatmul.mubr.msk.f32.gmra.mrb[34].mxu1 %vm3550_vm0, %v11516_v29 }
 0x9f7   : > { %19757 = vmatprep.mubr.msk.f32.mxu1 %vm21796_vm5, %v26031_v10 }
 0x9fa   : > { %19758 = vmatmul.mubr.msk.f32.gmra.mrb[36].mxu1 %vm3550_vm0, %v11517_v2 }
 0x9fb   : > { %19760 = vmatprep.mubr.msk.f32.mxu1 %vm21796_vm5, %v26031_v10 }
 0x9fe   : > { %19761 = vmatmul.mubr.msk.f32.gmra.mrb[38].mxu1 %vm3550_vm0, %v11518_v0 }
 0x9ff   : > { %19763 = vmatprep.mubr.msk.f32.mxu1 %vm21796_vm5, %v26031_v10 }
 0xa02   : > { %19764 = vmatmul.mubr.msk.f32.gmra.mrb[40].mxu1 %vm3550_vm0, %v11519_v20 }
 0xa03   : > { %19766 = vmatprep.mubr.msk.f32.mxu1 %vm21796_vm5, %v26031_v10 }
 0xa06   : > { %19767 = vmatmul.mubr.msk.f32.gmra.mrb[42].mxu1 %vm3550_vm0, %v11520_v34 }
 0xa07   : > { %19769 = vmatprep.mubr.msk.f32.mxu1 %vm21796_vm5, %v26031_v10 }
 0xa0a   : > { %19770 = vmatmul.mubr.msk.f32.gmra.mrb[44].mxu1 %vm3550_vm0, %v11521_v26 }
 0xa0b   : > { %19772 = vmatprep.mubr.msk.f32.mxu1 %vm21796_vm5, %v26031_v10 }
 0xa0e   : > { %19773 = vmatmul.mubr.msk.f32.gmra.mrb[46].mxu1 %vm3550_vm0, %v11522_v47 }
 0xa0f   : > { %19775 = vmatprep.mubr.msk.f32.mxu1 %vm21796_vm5, %v26031_v10 }
 0xa12   : > { %19776 = vmatmul.mubr.msk.f32.gmra.mrb[48].mxu1 %vm3550_vm0, %v11523_v24 }
 0xa13   : > { %19778 = vmatprep.mubr.msk.f32.mxu1 %vm21796_vm5, %v26031_v10 }
 0xa16   : > { %19779 = vmatmul.mubr.msk.f32.gmra.mrb[50].mxu1 %vm3550_vm0, %v11524_v41 }
 0xa17   : > { %19781 = vmatprep.mubr.msk.f32.mxu1 %vm21796_vm5, %v26031_v10 }
 0xa1a   : > { %19782 = vmatmul.mubr.msk.f32.gmra.mrb[52].mxu1 %vm3550_vm0, %v11526_v60 }
 0xa1b   : > { %19786 = vmatprep.mubr.msk.f32.mxu1 %vm21796_vm5, %v26031_v10 }
 0xa1e   : > { %19787 = vmatmul.mubr.msk.f32.vlgmr.msra.gmra.mrb[28].mxu1 %vm3550_vm0, %v11711_v28 }
 0xa1f   : > { %19826 = vmatpush3.msra.mxu1 %v11924_v45  ;;  %19789 = vmatprep.mubr.msk.f32.mxu1 %vm21796_vm5, %v26031_v10 }
 0xa20   : > { %20316 = vmatprep.subr.bf16.mxu1 %v20315_v18 }
 0xa22   : > { %19790 = vmatmul.mubr.msk.f32.gmra.mrb[30].mxu1 %vm3550_vm0, %v11712_v15 }
 0xa23   : > { %19792 = vmatprep.mubr.msk.f32.mxu1 %vm21796_vm5, %v26031_v10 }
 0xa26   : > { %19793 = vmatmul.mubr.msk.f32.gmra.mrb[32].mxu1 %vm3550_vm0, %v11713_v48 }
 0xa27   : > { %19795 = vmatprep.mubr.msk.f32.mxu1 %vm21796_vm5, %v26031_v10 }
 0xa2a   : > { %19796 = vmatmul.mubr.msk.f32.gmra.mrb[34].mxu1 %vm3550_vm0, %v11714_v53 }
 0xa2b   : > { %19798 = vmatprep.mubr.msk.f32.mxu1 %vm21796_vm5, %v26031_v10 }
 0xa2e   : > { %19799 = vmatmul.mubr.msk.f32.gmra.mrb[36].mxu1 %vm3550_vm0, %v11715_v30 }
 0xa2f   : > { %19801 = vmatprep.mubr.msk.f32.mxu1 %vm21796_vm5, %v26031_v10 }
 0xa32   : > { %19802 = vmatmul.mubr.msk.f32.gmra.mrb[38].mxu1 %vm3550_vm0, %v11716_v14 }
 0xa33   : > { %19804 = vmatprep.mubr.msk.f32.mxu1 %vm21796_vm5, %v26031_v10 }
 0xa36   : > { %19805 = vmatmul.mubr.msk.f32.gmra.mrb[40].mxu1 %vm3550_vm0, %v11717_v21 }
 0xa37   : > { %19807 = vmatprep.mubr.msk.f32.mxu1 %vm21796_vm5, %v26031_v10 }
 0xa3a   : > { %19808 = vmatmul.mubr.msk.f32.gmra.mrb[42].mxu1 %vm3550_vm0, %v11718_v22 }
 0xa3b   : > { %19810 = vmatprep.mubr.msk.f32.mxu1 %vm21796_vm5, %v26031_v10 }
 0xa3e   : > { %19811 = vmatmul.mubr.msk.f32.gmra.mrb[44].mxu1 %vm3550_vm0, %v11719_v36 }
 0xa3f   : > { %19813 = vmatprep.mubr.msk.f32.mxu1 %vm21796_vm5, %v26031_v10 }
 0xa42   : > { %19814 = vmatmul.mubr.msk.f32.gmra.mrb[46].mxu1 %vm3550_vm0, %v11720_v38 }
 0xa43   : > { %19816 = vmatprep.mubr.msk.f32.mxu1 %vm21796_vm5, %v26031_v10 }
 0xa46   : > { %19817 = vmatmul.mubr.msk.f32.gmra.mrb[48].mxu1 %vm3550_vm0, %v11721_v16 }
 0xa47   : > { %19819 = vmatprep.mubr.msk.f32.mxu1 %vm21796_vm5, %v26031_v10 }
 0xa4a   : > { %19820 = vmatmul.mubr.msk.f32.gmra.mrb[50].mxu1 %vm3550_vm0, %v11722_v17 }
 0xa4b   : > { %19822 = vmatprep.mubr.msk.f32.mxu1 %vm21796_vm5, %v26031_v10 }
 0xa4e   : > { %19823 = vmatmul.mubr.msk.f32.gmra.mrb[52].mxu1 %vm3550_vm0, %v11724_v27 }
 0xa4f   : > { %19827 = vmatprep.mubr.msk.f32.mxu1 %vm21796_vm5, %v26031_v10 }
 0xa52   : > { %19828 = vmatmul.mubr.msk.f32.vlgmr.msra.gmra.mrb[28].mxu1 %vm3550_vm0, %v11909_v46 }
 0xa53   : > { %19830 = vmatprep.mubr.msk.f32.mxu1 %vm21796_vm5, %v26031_v10  ;;  %20318 = vmatpush3.bf16.msra.mxu1 %v20315_v18 }
 0xa54   : > { %20320 = vmatprep.subr.bf16.mxu1 %v20319_v61 }
 0xa56   : > { %19831 = vmatmul.mubr.msk.f32.gmra.mrb[30].mxu1 %vm3550_vm0, %v11910_v54 }
 0xa57   : > { %19833 = vmatprep.mubr.msk.f32.mxu1 %vm21796_vm5, %v26031_v10 }
 0xa5a   : > { %19834 = vmatmul.mubr.msk.f32.gmra.mrb[32].mxu1 %vm3550_vm0, %v11911_v32 }
 0xa5b   : > { %19836 = vmatprep.mubr.msk.f32.mxu1 %vm21796_vm5, %v26031_v10 }
 0xa5e   : > { %19837 = vmatmul.mubr.msk.f32.gmra.mrb[34].mxu1 %vm3550_vm0, %v11912_v42 }
 0xa5f   : > { %19839 = vmatprep.mubr.msk.f32.mxu1 %vm21796_vm5, %v26031_v10 }
 0xa62   : > { %19840 = vmatmul.mubr.msk.f32.gmra.mrb[36].mxu1 %vm3550_vm0, %v11913_v33 }
 0xa63   : > { %19842 = vmatprep.mubr.msk.f32.mxu1 %vm21796_vm5, %v26031_v10 }
 0xa66   : > { %19843 = vmatmul.mubr.msk.f32.gmra.mrb[38].mxu1 %vm3550_vm0, %v11914_v25 }
 0xa67   : > { %19845 = vmatprep.mubr.msk.f32.mxu1 %vm21796_vm5, %v26031_v10 }
 0xa6a   : > { %19846 = vmatmul.mubr.msk.f32.gmra.mrb[40].mxu1 %vm3550_vm0, %v11915_v40 }
 0xa6b   : > { %19848 = vmatprep.mubr.msk.f32.mxu1 %vm21796_vm5, %v26031_v10 }
 0xa6e   : > { %19849 = vmatmul.mubr.msk.f32.gmra.mrb[42].mxu1 %vm3550_vm0, %v11916_v43 }
 0xa6f   : > { %19851 = vmatprep.mubr.msk.f32.mxu1 %vm21796_vm5, %v26031_v10 }
 0xa72   : > { %19852 = vmatmul.mubr.msk.f32.gmra.mrb[44].mxu1 %vm3550_vm0, %v11917_v44 }
 0xa73   : > { %19854 = vmatprep.mubr.msk.f32.mxu1 %vm21796_vm5, %v26031_v10 }
 0xa76   : > { %19855 = vmatmul.mubr.msk.f32.gmra.mrb[46].mxu1 %vm3550_vm0, %v11918_v57  ;;  %v12162_v57 = vld [vmem:[#allocation7] sm:$0xff] }
 0xa77   : > { %19857 = vmatprep.mubr.msk.f32.mxu1 %vm21796_vm5, %v26031_v10 }
 0xa7a   : > { %19858 = vmatmul.mubr.msk.f32.gmra.mrb[48].mxu1 %vm3550_vm0, %v11919_v19  ;;  %v16975_v19 = vld [vmem:[%s25730_s5 + $0x30] sm:$0xff] }
 0xa7b   : > { %19860 = vmatprep.mubr.msk.f32.mxu1 %vm21796_vm5, %v26031_v10 }
 0xa7e   : > { %19861 = vmatmul.mubr.msk.f32.gmra.mrb[50].mxu1 %vm3550_vm0, %v11920_v58  ;;  %v16976_v58 = vld [vmem:[%s25730_s5 + $0x38] sm:$0xff] }
 0xa7f   : > { %19863 = vmatprep.mubr.msk.f32.mxu1 %vm21796_vm5, %v26031_v10  ;;  %v20327_v35 = vpack.c.bf16 %v16976_v58, %v16975_v19  ;;  %v13778_v19 = vld [vmem:[%s25732_s7] sm:$0xff]  ;;  %v13779_v58 = vld [vmem:[%s25732_s7 + $0x8] sm:$0xff] }
 0xa82   : > { %19864 = vmatmul.mubr.msk.f32.gmra.mrb[52].mxu1 %vm3550_vm0, %v11922_v49 }
 0xa83   : > { %19870 = vmatprep.mubr.msk.f32.mxu1 %vm12120_vm6, %v12172_v56  ;;  %v17048_v56 = vld [vmem:[%s25732_s7 + $0x10] sm:$0xff] }
 0xb25   : > { %v12030_v4 = vpop.f32.mrb[28].mxu1 }
 0xb26   : > { %v12107_v37 = vmax.f32 %v12030_v4, 0.0  ;;  %v19829_v7 = vpop.f32.mrb[29].mxu1 }
 0xb28   : > { %12121 = vst.msk [vmem:[#allocation11] sm:$0xff] %vm12120_vm6, %v12107_v37 }
 0xb29   : > { %v12035_v59 = vpop.f32.mrb[30].mxu1 }
 0xb2a   : > { %v12108_v39 = vmax.f32 %v12035_v59, 0.0  ;;  %v19832_v51 = vpop.f32.mrb[31].mxu1 }
 0xb2c   : > { %12122 = vst.msk [vmem:[#allocation11 + $0x8] sm:$0xff] %vm12120_vm6, %v12108_v39 }
 0xb2d   : > { %v12040_v63 = vpop.f32.mrb[32].mxu1 }
 0xb2e   : > { %v12109_v8 = vmax.f32 %v12040_v63, 0.0  ;;  %v19835_v11 = vpop.f32.mrb[33].mxu1  ;;  %v12441_v63 = vld [vmem:[#allocation7 + $0x2] sm:$0xff] }
 0xb2f   : > { %v12148_v5 = vld [vmem:[#allocation11] sm:$0x7f]  ;;  %v16985_v11 = vld [vmem:[%s25730_s5 + $0x40] sm:$0xff] }
 0xb30   : > { %12149 = vst.msk [vmem:[#allocation7 + $0xa] sm:$0x7f] %vm12133_vm7, %v12148_v5  ;;  %v16986_v5 = vld [vmem:[%s25730_s5 + $0x48] sm:$0xff] }
 0xb31   : > { %12123 = vst.msk [vmem:[#allocation11 + $0x10] sm:$0xff] %vm12120_vm6, %v12109_v8  ;;  %v12045_v9 = vpop.f32.mrb[34].mxu1 }
 0xb32   : > { %v12110_v12 = vmax.f32 %v12045_v9, 0.0  ;;  %v19838_v31 = vpop.f32.mrb[35].mxu1  ;;  %v20331_v9 = vpack.c.bf16 %v16986_v5, %v16985_v11 }
 0xb34   : > { %12124 = vst.msk [vmem:[#allocation11 + $0x18] sm:$0xff] %vm12120_vm6, %v12110_v12 }
 0xb35   : > { %v12050_v23 = vpop.f32.mrb[36].mxu1 }
 0xb36   : > { %v12111_v3 = vmax.f32 %v12050_v23, 0.0  ;;  %v19841_v62 = vpop.f32.mrb[37].mxu1 }
 0xb37   : > { %v25124_v29 = vld [vmem:[#allocation7 + $0x9] sm:$0xff] }
 0xb38   : > { %v12150_v2 = vld [vmem:[#allocation11 + $0x10] sm:$0x7f]  ;;  %12125 = vst.msk [vmem:[#allocation11 + $0x20] sm:$0xff] %vm12120_vm6, %v12111_v3  ;;  %19871 = vmatmul.mubr.msk.f32.vlgmr.msra.gmra.mrb[54].mxu1 %vm12120_vm6, %v25124_v29  ;;  %v12163_v4 = vld [vmem:[#allocation7 + $0x8] sm:$0xff] }
 0xb39   : > { %12151 = vst.msk [vmem:[#allocation7 + $0x13] sm:$0x7f] %vm12133_vm7, %v12150_v2  ;;  %v12055_v0 = vpop.f32.mrb[38].mxu1  ;;  %20322 = vmatpush3.bf16.msra.mxu1 %v20319_v61  ;;  %v20351_v61 = vpack.c.bf16 %v17049_v50, %v17048_v56  ;;  %v12442_v12 = vld [vmem:[#allocation7 + $0xa] sm:$0xff] }
 0xb3a   : > { %v12112_v20 = vmax.f32 %v12055_v0, 0.0  ;;  %v19844_v34 = vpop.f32.mrb[39].mxu1  ;;  %20324 = vmatprep.subr.bf16.mxu1 %v25122_v1  ;;  %v16996_v2 = vld [vmem:[%s25730_s5 + $0x58] sm:$0xff]  ;;  %v13744_v56 = vld [vmem:[#allocation8 + $0x48] sm:$0xff] }
 0xb3b   : > { %20352 = vmatprep.subr.bf16.mxu0 %v20351_v61  ;;  %v17005_v34 = vld [vmem:[%s25730_s5 + $0x60] sm:$0xff]  ;;  %v13745_v50 = vld [vmem:[#allocation8 + $0x50] sm:$0xff] }
 0xb3c   : > { %12126 = vst.msk [vmem:[#allocation11 + $0x28] sm:$0xff] %vm12120_vm6, %v12112_v20  ;;  %20354 = vmatpush3.bf16.msra.mxu0 %v20351_v61  ;;  %v13757_v61 = vmax.f32 %v13745_v50, 0.0  ;;  %v17071_v50 = vld [vmem:[%s25732_s7 + $0x48] sm:$0xff] }
 0xb3d   : > { %v12060_v26 = vpop.f32.mrb[40].mxu1 }
 0xb3e   : > { %v12113_v47 = vmax.f32 %v12060_v26, 0.0  ;;  %v19847_v24 = vpop.f32.mrb[41].mxu1  ;;  %v17006_v26 = vld [vmem:[%s25730_s5 + $0x68] sm:$0xff]  ;;  %13769 = vst.msk [vmem:[#allocation9 + $0x50] sm:$0xff] %vm12120_vm6, %v13757_v61 }
 0xb3f   : > { %v12152_v60 = vld [vmem:[#allocation11 + $0x20] sm:$0x7f] }
 0xb40   : > { %v25132_v41 = vld [vmem:[#allocation7 + $0x11] sm:$0xff]  ;;  %12127 = vst.msk [vmem:[#allocation11 + $0x30] sm:$0xff] %vm12120_vm6, %v12113_v47  ;;  %v20339_v47 = vpack.c.bf16 %v17006_v26, %v17005_v34 }
 0xb41   : > { %19873 = vmatprep.mubr.msk.f32.mxu1 %vm12120_vm6, %v25132_v41  ;;  %12153 = vst.msk [vmem:[#allocation7 + $0x1c] sm:$0x7f] %vm12133_vm7, %v12152_v60  ;;  %v12065_v6 = vpop.f32.mrb[42].mxu1  ;;  %v12164_v37 = vld [vmem:[#allocation7 + $0x10] sm:$0xff]  ;;  %v17015_v60 = vld [vmem:[%s25730_s5 + $0x70] sm:$0xff] }
 0xb42   : > { %v12114_v52 = vmax.f32 %v12065_v6, 0.0  ;;  %v19850_v45 = vpop.f32.mrb[43].mxu1  ;;  %v25194_v31 = vld [vmem:[#allocation7 + $0x12] sm:$0xff] }
 0xb43   : > { %v17016_v6 = vld [vmem:[%s25730_s5 + $0x78] sm:$0xff] }
 0xb44   : > { %12128 = vst.msk [vmem:[#allocation11 + $0x38] sm:$0xff] %vm12120_vm6, %v12114_v52  ;;  %v12885_v52 = vld [vmem:[#allocation7 + $0xb] sm:$0xff]  ;;  %v20343_v45 = vpack.c.bf16 %v17016_v6, %v17015_v60 }
 0xb45   : > { %v12070_v18 = vpop.f32.mrb[44].mxu1  ;;  %v13732_v60 = vld [vmem:[#allocation12 + $0x60] sm:$0x7f] }
 0xb46   : > { %v12115_v28 = vmax.f32 %v12070_v18, 0.0  ;;  %v19853_v15 = vpop.f32.mrb[45].mxu1  ;;  %v12886_v18 = vld [vmem:[#allocation7 + $0x13] sm:$0xff] }
 0xb47   : > { %v12154_v53 = vld [vmem:[#allocation11 + $0x30] sm:$0x7f] }
 0xb48   : > { %v25139_v48 = vld [vmem:[#allocation7 + $0x19] sm:$0xff]  ;;  %12129 = vst.msk [vmem:[#allocation11 + $0x40] sm:$0xff] %vm12120_vm6, %v12115_v28 }
 0xb49   : > { %19874 = vmatmul.mubr.msk.f32.gmra.mrb[56].mxu1 %vm12120_vm6, %v25139_v48  ;;  %12155 = vst.msk [vmem:[#allocation7 + $0x25] sm:$0x7f] %vm12133_vm7, %v12154_v53  ;;  %v12075_v30 = vpop.f32.mrb[46].mxu1  ;;  %v12165_v7 = vld [vmem:[#allocation7 + $0x18] sm:$0xff] }
 0xb4a   : > { %v12116_v14 = vmax.f32 %v12075_v30, 0.0  ;;  %v19856_v21 = vpop.f32.mrb[47].mxu1  ;;  %v25198_v13 = vld [vmem:[#allocation7 + $0x1a] sm:$0xff] }
 0xb4b   : > { %v12887_v28 = vld [vmem:[#allocation7 + $0x1b] sm:$0xff] }
 0xb4c   : > { %12130 = vst.msk [vmem:[#allocation11 + $0x48] sm:$0xff] %vm12120_vm6, %v12116_v14  ;;  %v17025_v21 = vld [vmem:[%s25730_s5 + $0x80] sm:$0xff] }
 0xb4d   : > { %v12080_v22 = vpop.f32.mrb[48].mxu1 }
 0xb4e   : > { %v12117_v36 = vmax.f32 %v12080_v22, 0.0  ;;  %v19859_v38 = vpop.f32.mrb[49].mxu1  ;;  %v17026_v22 = vld [vmem:[%s25730_s5 + $0x88] sm:$0xff] }
 0xb4f   : > { %v12156_v17 = vld [vmem:[#allocation11 + $0x40] sm:$0x7f] }
 0xb50   : > { %v25146_v16 = vld [vmem:[#allocation7 + $0x21] sm:$0xff]  ;;  %12131 = vst.msk [vmem:[#allocation11 + $0x50] sm:$0xff] %vm12120_vm6, %v12117_v36  ;;  %v20347_v36 = vpack.c.bf16 %v17026_v22, %v17025_v21  ;;  %v17058_v22 = vld [vmem:[%s25732_s7 + $0x20] sm:$0xff] }
 0xb51   : > { %19876 = vmatprep.mubr.msk.f32.mxu1 %vm12120_vm6, %v25146_v16  ;;  %12157 = vst.msk [vmem:[#allocation7 + $0x2e] sm:$0x7f] %vm12133_vm7, %v12156_v17  ;;  %v12085_v27 = vpop.f32.mrb[50].mxu1  ;;  %v12166_v59 = vld [vmem:[#allocation7 + $0x20] sm:$0xff] }
 0xb52   : > { %v12118_v46 = vmax.f32 %v12085_v27, 0.0  ;;  %v19862_v54 = vpop.f32.mrb[51].mxu1  ;;  %v25202_v55 = vld [vmem:[#allocation7 + $0x22] sm:$0xff]  ;;  %v13188_v27 = vld [vmem:[#allocation7 + $0x4b] sm:$0x1f] }
 0xb53   : > { %v12888_v15 = vld [vmem:[#allocation7 + $0x23] sm:$0xff] }
 0xb54   : > { %12132 = vst.msk [vmem:[#allocation11 + $0x58] sm:$0xff] %vm12120_vm6, %v12118_v46  ;;  %v13329_v46 = vld [vmem:[#allocation7 + $0x14] sm:$0xff]  ;;  %v13330_v54 = vld [vmem:[#allocation7 + $0x1c] sm:$0xff] }
 0xb55   : > { %v12090_v32 = vpop.f32.mrb[52].mxu1 }
 0xb56   : > { %v12119_v42 = vmax.f32 %v12090_v32, 0.0  ;;  %v19865_v33 = vpop.f32.mrb[53].mxu1  ;;  %v13331_v32 = vld [vmem:[#allocation7 + $0x24] sm:$0xff] }
 0xb57   : > { %v12158_v40 = vld [vmem:[#allocation11 + $0x50] sm:$0x7f] }
 0xb58   : > { %v25153_v25 = vld [vmem:[#allocation7 + $0x29] sm:$0xff]  ;;  %12134 = vst.msk [vmem:[#allocation11 + $0x60] sm:$0x7f] %vm12133_vm7, %v12119_v42  ;;  %12159 = vst.msk [vmem:[#allocation7 + $0x37] sm:$0x7f] %vm12133_vm7, %v12158_v40 }
 0xb59   : > { %19877 = vmatmul.mubr.msk.f32.gmra.mrb[58].mxu1 %vm12120_vm6, %v25153_v25  ;;  %v12167_v39 = vld [vmem:[#allocation7 + $0x28] sm:$0xff] }
 0xb5a   : > { %v25206_v23 = vld [vmem:[#allocation7 + $0x2a] sm:$0xff] }
 0xb5b   : > { %v13332_v42 = vld [vmem:[#allocation7 + $0x2c] sm:$0xff] }
 0xb5f   : > { %v25159_v43 = vld [vmem:[#allocation7 + $0x31] sm:$0xff]  ;;  %v12179_v44 = vld [vmem:[#allocation7 + $0x39] sm:$0x1f] }
 0xb60   : > { %19879 = vmatprep.mubr.msk.f32.mxu1 %vm12120_vm6, %v25159_v43  ;;  %v12160_v49 = vld [vmem:[#allocation11 + $0x60] sm:$0x7f]  ;;  %v12169_v8 = vld [vmem:[#allocation7 + $0x38] sm:$0x1f] }
 0xb61   : > { %19880 = vmatmul.mubr.msk.f32.gmra.mrb[60].mxu1 %vm12120_vm6, %v12179_v44  ;;  %12161 = vst.msk [vmem:[#allocation7 + $0x40] sm:$0x7f] %vm12133_vm7, %v12160_v49  ;;  %v12168_v51 = vld [vmem:[#allocation7 + $0x30] sm:$0xff]  ;;  %v12448_v62 = vld [vmem:[#allocation7 + $0x3a] sm:$0x1f]  ;;  %v13735_v44 = vld [vmem:[#allocation8] sm:$0xff]  ;;  %v25312_v49 = vpack.c.bf16 %v13779_v58, %v13778_v19 }
 0xb62   : > { %19886 = vmatprep.mubr.msk.f32.mxu1 %vm12120_vm6, %v12162_v57  ;;  %v25210_v3 = vld [vmem:[#allocation7 + $0x32] sm:$0xff]  ;;  %v13747_v57 = vmax.f32 %v13735_v44, 0.0 }
 0xb63   : > { %v12890_v53 = vld [vmem:[#allocation7 + $0x33] sm:$0xff]  ;;  %20356 = vmatprep.subr.bf16.mxu0 %v25312_v49 }
 0xb64   : > { %v13333_v33 = vld [vmem:[#allocation7 + $0x34] sm:$0xff]  ;;  %13759 = vst.msk [vmem:[#allocation9] sm:$0xff] %vm12120_vm6, %v13747_v57 }
 0xb65   : > { %19887 = vmatmul.mubr.msk.f32.vlgmr.msra.gmra.mrb[54].mxu1 %vm12120_vm6, %v12163_v4 }
 0xb66   : > { %19889 = vmatprep.mubr.msk.f32.mxu1 %vm12120_vm6, %v12164_v37  ;;  %20326 = vmatpush3.bf16.msra.mxu1 %v25122_v1  ;;  %v16995_v1 = vld [vmem:[%s25730_s5 + $0x50] sm:$0xff] }
 0xb67   : > { %20328 = vmatprep.subr.bf16.mxu1 %v20327_v35  ;;  %v20335_v0 = vpack.c.bf16 %v16996_v2, %v16995_v1  ;;  %v13724_v1 = vld [vmem:[#allocation12 + $0x40] sm:$0x7f] }
 0xb68   : > { %v12595_v20 = vld [vmem:[#allocation7 + $0x39] sm:$0xff]  ;;  %v12892_v14 = vld [vmem:[#allocation7 + $0x43] sm:$0x1f] }
 0xb69   : > { %19890 = vmatmul.mubr.msk.f32.gmra.mrb[56].mxu1 %vm12120_vm6, %v12165_v7  ;;  %v12743_v24 = vld [vmem:[#allocation7 + $0x3a] sm:$0xff]  ;;  %v13039_v38 = vld [vmem:[#allocation7 + $0x42] sm:$0xff] }
 0xb6a   : > { %19892 = vmatprep.mubr.msk.f32.mxu1 %vm12120_vm6, %v12166_v59  ;;  %v12891_v30 = vld [vmem:[#allocation7 + $0x3b] sm:$0xff]  ;;  %v13187_v17 = vld [vmem:[#allocation7 + $0x43] sm:$0xff] }
 0xb6b   : > { %v13335_v40 = vld [vmem:[#allocation7 + $0x44] sm:$0xff] }
 0xb6d   : > { %19893 = vmatmul.mubr.msk.f32.gmra.mrb[58].mxu1 %vm12120_vm6, %v12167_v39  ;;  %v13712_v39 = vld [vmem:[#allocation12 + $0x10] sm:$0x7f] }
 0xb6e   : > { %19895 = vmatprep.mubr.msk.f32.mxu1 %vm12120_vm6, %v12168_v51 }
 0xb71   : > { %19896 = vmatmul.mubr.msk.f32.gmra.mrb[60].mxu1 %vm12120_vm6, %v12169_v8  ;;  %v13708_v8 = vld [vmem:[#allocation12] sm:$0x7f] }
 0xb72   : > { %19902 = vmatprep.mubr.msk.f32.mxu1 %vm12120_vm6, %v12441_v63 }
 0xb75   : > { %19903 = vmatmul.mubr.msk.f32.vlgmr.msra.gmra.mrb[54].mxu1 %vm12120_vm6, %v12442_v12 }
 0xb76   : > { %19905 = vmatprep.mubr.msk.f32.mxu1 %vm12120_vm6, %v25194_v31  ;;  %20330 = vmatpush3.bf16.msra.mxu1 %v20327_v35  ;;  %v13756_v35 = vmax.f32 %v13744_v56, 0.0  ;;  %v17070_v56 = vld [vmem:[%s25732_s7 + $0x40] sm:$0xff] }
 0xb77   : > { %20332 = vmatprep.subr.bf16.mxu1 %v20331_v9  ;;  %v20367_v61 = vpack.c.bf16 %v17071_v50, %v17070_v56 }
 0xb78   : > { %13768 = vst.msk [vmem:[#allocation9 + $0x48] sm:$0xff] %vm12120_vm6, %v13756_v35 }
 0xb79   : > { %19906 = vmatmul.mubr.msk.f32.gmra.mrb[56].mxu1 %vm12120_vm6, %v25198_v13 }
 0xb7a   : > { %19908 = vmatprep.mubr.msk.f32.mxu1 %vm12120_vm6, %v25202_v55 }
 0xb7d   : > { %19909 = vmatmul.mubr.msk.f32.gmra.mrb[58].mxu1 %vm12120_vm6, %v25206_v23 }
 0xb7e   : > { %19911 = vmatprep.mubr.msk.f32.mxu1 %vm12120_vm6, %v25210_v3 }
 0xb81   : > { %19912 = vmatmul.mubr.msk.f32.gmra.mrb[60].mxu1 %vm12120_vm6, %v12448_v62  ;;  %v13720_v62 = vld [vmem:[#allocation12 + $0x30] sm:$0x7f] }
 0xb82   : > { %19918 = vmatprep.mubr.msk.f32.mxu1 %vm12120_vm6, %v25124_v29  ;;  %v12596_v29 = vld [vmem:[#allocation7 + $0x41] sm:$0x1f] }
 0xb85   : > { %19919 = vmatmul.mubr.msk.f32.vlgmr.msra.gmra.mrb[54].mxu1 %vm12120_vm6, %v25132_v41  ;;  %v12744_v41 = vld [vmem:[#allocation7 + $0x42] sm:$0x1f] }
 0xb86   : > { %19921 = vmatprep.mubr.msk.f32.mxu1 %vm12120_vm6, %v25139_v48  ;;  %20334 = vmatpush3.bf16.msra.mxu1 %v20331_v9  ;;  %v12889_v48 = vld [vmem:[#allocation7 + $0x2b] sm:$0xff] }
 0xb87   : > { %20336 = vmatprep.subr.bf16.mxu1 %v20335_v0 }
 0xb89   : > { %19922 = vmatmul.mubr.msk.f32.gmra.mrb[56].mxu1 %vm12120_vm6, %v25146_v16  ;;  %v13040_v16 = vld [vmem:[#allocation7 + $0x4a] sm:$0x1f] }
 0xb8a   : > { %19924 = vmatprep.mubr.msk.f32.mxu1 %vm12120_vm6, %v25153_v25  ;;  %v13334_v25 = vld [vmem:[#allocation7 + $0x3c] sm:$0xff] }
 0xb8d   : > { %19925 = vmatmul.mubr.msk.f32.gmra.mrb[58].mxu1 %vm12120_vm6, %v25159_v43  ;;  %v13336_v43 = vld [vmem:[#allocation7 + $0x4c] sm:$0x1f] }
 0xb8e   : > { %19927 = vmatprep.mubr.msk.f32.mxu1 %vm12120_vm6, %v12595_v20 }
 0xb91   : > { %19928 = vmatmul.mubr.msk.f32.gmra.mrb[60].mxu1 %vm12120_vm6, %v12596_v29 }
 0xb92   : > { %19934 = vmatprep.mubr.msk.f32.mxu1 %vm12120_vm6, %v12442_v12 }
 0xb95   : > { %19935 = vmatmul.mubr.msk.f32.vlgmr.msra.gmra.mrb[54].mxu1 %vm12120_vm6, %v25194_v31 }
 0xb96   : > { %19937 = vmatprep.mubr.msk.f32.mxu1 %vm12120_vm6, %v25198_v13  ;;  %20338 = vmatpush3.bf16.msra.mxu1 %v20335_v0 }
 0xb97   : > { %20340 = vmatprep.subr.bf16.mxu1 %v20339_v47 }
 0xb99   : > { %19938 = vmatmul.mubr.msk.f32.gmra.mrb[56].mxu1 %vm12120_vm6, %v25202_v55 }
 0xb9a   : > { %19940 = vmatprep.mubr.msk.f32.mxu1 %vm12120_vm6, %v25206_v23 }
 0xb9d   : > { %19941 = vmatmul.mubr.msk.f32.gmra.mrb[58].mxu1 %vm12120_vm6, %v25210_v3 }
 0xb9e   : > { %19943 = vmatprep.mubr.msk.f32.mxu1 %vm12120_vm6, %v12743_v24 }
 0xba1   : > { %19944 = vmatmul.mubr.msk.f32.gmra.mrb[60].mxu1 %vm12120_vm6, %v12744_v41 }
 0xba2   : > { %19950 = vmatprep.mubr.msk.f32.mxu1 %vm12120_vm6, %v12885_v52 }
 0xba5   : > { %19951 = vmatmul.mubr.msk.f32.vlgmr.msra.gmra.mrb[54].mxu1 %vm12120_vm6, %v12886_v18 }
 0xba6   : > { %19953 = vmatprep.mubr.msk.f32.mxu1 %vm12120_vm6, %v12887_v28  ;;  %20342 = vmatpush3.bf16.msra.mxu1 %v20339_v47  ;;  %v13728_v47 = vld [vmem:[#allocation12 + $0x50] sm:$0x7f] }
 0xba7   : > { %20344 = vmatprep.subr.bf16.mxu1 %v20343_v45 }
 0xba9   : > { %19954 = vmatmul.mubr.msk.f32.gmra.mrb[56].mxu1 %vm12120_vm6, %v12888_v15 }
 0xbaa   : > { %19956 = vmatprep.mubr.msk.f32.mxu1 %vm12120_vm6, %v12889_v48 }
 0xbad   : > { %19957 = vmatmul.mubr.msk.f32.gmra.mrb[58].mxu1 %vm12120_vm6, %v12890_v53 }
 0xbae   : > { %19959 = vmatprep.mubr.msk.f32.mxu1 %vm12120_vm6, %v12891_v30 }
 0xbb1   : > { %19960 = vmatmul.mubr.msk.f32.gmra.mrb[60].mxu1 %vm12120_vm6, %v12892_v14 }
 0xbb2   : > { %19966 = vmatprep.mubr.msk.f32.mxu1 %vm12120_vm6, %v25194_v31 }
 0xbb5   : > { %19967 = vmatmul.mubr.msk.f32.vlgmr.msra.gmra.mrb[54].mxu1 %vm12120_vm6, %v25198_v13  ;;  %v13716_v13 = vld [vmem:[#allocation12 + $0x20] sm:$0x7f] }
 0xbb6   : > { %19969 = vmatprep.mubr.msk.f32.mxu1 %vm12120_vm6, %v25202_v55  ;;  %20346 = vmatpush3.bf16.msra.mxu1 %v20343_v45 }
 0xbb7   : > { %20348 = vmatprep.subr.bf16.mxu1 %v20347_v36 }
 0xbb9   : > { %19970 = vmatmul.mubr.msk.f32.gmra.mrb[56].mxu1 %vm12120_vm6, %v25206_v23 }
 0xbba   : > { %19972 = vmatprep.mubr.msk.f32.mxu1 %vm12120_vm6, %v25210_v3 }
 0xbbd   : > { %19973 = vmatmul.mubr.msk.f32.gmra.mrb[58].mxu1 %vm12120_vm6, %v12743_v24 }
 0xbbe   : > { %19975 = vmatprep.mubr.msk.f32.mxu1 %vm12120_vm6, %v13039_v38 }
 0xbc1   : > { %19976 = vmatmul.mubr.msk.f32.gmra.mrb[60].mxu1 %vm12120_vm6, %v13040_v16 }
 0xbc2   : > { %19982 = vmatprep.mubr.msk.f32.mxu1 %vm12120_vm6, %v12886_v18 }
 0xbc5   : > { %19983 = vmatmul.mubr.msk.f32.vlgmr.msra.gmra.mrb[54].mxu1 %vm12120_vm6, %v12887_v28 }
 0xbc6   : > { %19985 = vmatprep.mubr.msk.f32.mxu1 %vm12120_vm6, %v12888_v15  ;;  %20350 = vmatpush3.bf16.msra.mxu1 %v20347_v36  ;;  %v17059_v36 = vld [vmem:[%s25732_s7 + $0x28] sm:$0xff] }
 0xbc9   : > { %19986 = vmatmul.mubr.msk.f32.gmra.mrb[56].mxu1 %vm12120_vm6, %v12889_v48 }
 0xbca   : > { %19988 = vmatprep.mubr.msk.f32.mxu1 %vm12120_vm6, %v12890_v53 }
 0xbcd   : > { %19989 = vmatmul.mubr.msk.f32.gmra.mrb[58].mxu1 %vm12120_vm6, %v12891_v30 }
 0xbce   : > { %19991 = vmatprep.mubr.msk.f32.mxu1 %vm12120_vm6, %v13187_v17 }
 0xbd1   : > { %19992 = vmatmul.mubr.msk.f32.gmra.mrb[60].mxu1 %vm12120_vm6, %v13188_v27 }
 0xbd2   : > { %19998 = vmatprep.mubr.msk.f32.mxu1 %vm12120_vm6, %v13329_v46 }
 0xbd5   : > { %19999 = vmatmul.mubr.msk.f32.vlgmr.msra.gmra.mrb[54].mxu1 %vm12120_vm6, %v13330_v54  ;;  %v20359_v54 = vpack.c.bf16 %v17059_v36, %v17058_v22 }
 0xbd6   : > { %20001 = vmatprep.mubr.msk.f32.mxu1 %vm12120_vm6, %v13331_v32 }
 0xbd9   : > { %20002 = vmatmul.mubr.msk.f32.gmra.mrb[56].mxu1 %vm12120_vm6, %v13332_v42 }
 0xbda   : > { %20004 = vmatprep.mubr.msk.f32.mxu1 %vm12120_vm6, %v13333_v33 }
 0xbdd   : > { %20005 = vmatmul.mubr.msk.f32.gmra.mrb[58].mxu1 %vm12120_vm6, %v13334_v25 }
 0xbde   : > { %20007 = vmatprep.mubr.msk.f32.mxu1 %vm12120_vm6, %v13335_v40  ;;  %v17064_v40 = vld [vmem:[%s25732_s7 + $0x30] sm:$0xff] }
 0xbe1   : > { %20008 = vmatmul.mubr.msk.f32.gmra.mrb[60].mxu1 %vm12120_vm6, %v13336_v43  ;;  %v17065_v43 = vld [vmem:[%s25732_s7 + $0x38] sm:$0xff] }
 0xbe2   : > { %20149 = vmatprep.mubr.msk.f32.mxu1 %vm21796_vm5, %v26031_v10  ;;  %v20363_v57 = vpack.c.bf16 %v17065_v43, %v17064_v40 }
 0xca8   : > { %v20000_v4 = vpop.f32.mrb[54].mxu1 }
 0xca9   : > { %13687 = vst.msk [vmem:[#allocation11 + $0x8] sm:$0xff] %vm12120_vm6, %v20000_v4  ;;  %v13430_v37 = vpop.f32.mrb[55].mxu1 }
 0xcaa   : > { %13686 = vst.msk [vmem:[#allocation11] sm:$0xff] %vm12120_vm6, %v13430_v37 }
 0xcac   : > { %v20003_v7 = vpop.f32.mrb[56].mxu1 }
 0xcad   : > { %13689 = vst.msk [vmem:[#allocation11 + $0x18] sm:$0xff] %vm12120_vm6, %v20003_v7  ;;  %v13440_v59 = vpop.f32.mrb[57].mxu1 }
 0xcae   : > { %13688 = vst.msk [vmem:[#allocation11 + $0x10] sm:$0xff] %vm12120_vm6, %v13440_v59  ;;  %v17076_v59 = vld [vmem:[%s25732_s7 + $0x50] sm:$0xff] }
 0xcb0   : > { %v13711_v51 = vld [vmem:[#allocation11 + $0x9] sm:$0x7f]  ;;  %v20006_v63 = vpop.f32.mrb[58].mxu1 }
 0xcb1   : > { %v13713_v11 = vadd.f32 %v13712_v39, %v13711_v51  ;;  %v13707_v5 = vld [vmem:[#allocation11] sm:$0x7f]  ;;  %13691 = vst.msk [vmem:[#allocation11 + $0x28] sm:$0xff] %vm12120_vm6, %v20006_v63  ;;  %v13450_v9 = vpop.f32.mrb[59].mxu1 }
 0xcb2   : > { %v13709_v12 = vadd.f32 %v13708_v8, %v13707_v5  ;;  %13690 = vst.msk [vmem:[#allocation11 + $0x20] sm:$0xff] %vm12120_vm6, %v13450_v9  ;;  %v17077_v39 = vld [vmem:[%s25732_s7 + $0x58] sm:$0xff]  ;;  %v17082_v9 = vld [vmem:[%s25732_s7 + $0x60] sm:$0xff] }
 0xcb3   : > { %13714 = vst.msk [vmem:[#allocation8 + $0x13] sm:$0x7f] %vm12133_vm7, %v13713_v11  ;;  %v20371_v63 = vpack.c.bf16 %v17077_v39, %v17076_v59  ;;  %v14794_v39 = vld [vmem:[%s25733_s8] sm:$0xff] }
 0xcb4   : > { %13710 = vst.msk [vmem:[#allocation8 + $0xa] sm:$0x7f] %vm12133_vm7, %v13709_v12  ;;  %v20009_v31 = vpop.f32.mrb[60].mxu1  ;;  %v17083_v12 = vld [vmem:[%s25732_s7 + $0x68] sm:$0xff] }
 0xcb5   : > { %v13715_v55 = vld [vmem:[#allocation11 + $0x12] sm:$0x7f]  ;;  %13694 = vst.msk [vmem:[#allocation11 + $0x38] sm:$0x1f] %vm13693_vm8, %v20009_v31  ;;  %v13460_v23 = vpop.f32.mrb[61].mxu1 }
 0xcb6   : > { %v13717_v3 = vadd.f32 %v13716_v13, %v13715_v55  ;;  %13692 = vst.msk [vmem:[#allocation11 + $0x30] sm:$0xff] %vm12120_vm6, %v13460_v23  ;;  %v20375_v13 = vpack.c.bf16 %v17083_v12, %v17082_v9  ;;  %v14797_v9 = vld [vmem:[%s25733_s8 + $0x18] sm:$0xff] }
 0xcb8   : > { %13718 = vst.msk [vmem:[#allocation8 + $0x1c] sm:$0x7f] %vm12133_vm7, %v13717_v3 }
 0xcb9   : > { %v13719_v2 = vld [vmem:[#allocation11 + $0x1b] sm:$0x7f]  ;;  %v13723_v0 = vld [vmem:[#allocation11 + $0x24] sm:$0x7f] }
 0xcba   : > { %v13721_v20 = vadd.f32 %v13720_v62, %v13719_v2  ;;  %v13725_v29 = vadd.f32 %v13724_v1, %v13723_v0  ;;  %v17088_v62 = vld [vmem:[%s25732_s7 + $0x70] sm:$0xff]  ;;  %v17089_v1 = vld [vmem:[%s25732_s7 + $0x78] sm:$0xff] }
 0xcbb   : > { %v13736_v34 = vld [vmem:[#allocation8 + $0x8] sm:$0xff]  ;;  %v13737_v26 = vld [vmem:[#allocation8 + $0x10] sm:$0xff]  ;;  %v20379_v0 = vpack.c.bf16 %v17089_v1, %v17088_v62 }
 0xcbc   : > { %13722 = vst.msk [vmem:[#allocation8 + $0x25] sm:$0x7f] %vm12133_vm7, %v13721_v20  ;;  %13726 = vst.msk [vmem:[#allocation8 + $0x2e] sm:$0x7f] %vm12133_vm7, %v13725_v29  ;;  %v13748_v24 = vmax.f32 %v13736_v34, 0.0  ;;  %v13749_v41 = vmax.f32 %v13737_v26, 0.0 }
 0xcbd   : > { %v13727_v6 = vld [vmem:[#allocation11 + $0x2d] sm:$0x7f]  ;;  %v13731_v52 = vld [vmem:[#allocation11 + $0x36] sm:$0x7f] }
 0xcbe   : > { %v13729_v45 = vadd.f32 %v13728_v47, %v13727_v6  ;;  %v13733_v18 = vadd.f32 %v13732_v60, %v13731_v52  ;;  %13760 = vst.msk [vmem:[#allocation9 + $0x8] sm:$0xff] %vm12120_vm6, %v13748_v24  ;;  %13761 = vst.msk [vmem:[#allocation9 + $0x10] sm:$0xff] %vm12120_vm6, %v13749_v41  ;;  %v17094_v26 = vld [vmem:[%s25732_s7 + $0x80] sm:$0xff]  ;;  %v17095_v47 = vld [vmem:[%s25732_s7 + $0x88] sm:$0xff] }
 0xcbf   : > { %v13738_v28 = vld [vmem:[#allocation8 + $0x18] sm:$0xff]  ;;  %v20383_v41 = vpack.c.bf16 %v17095_v47, %v17094_v26  ;;  %v17112_v1 = vld [vmem:[%s25733_s8 + $0x50] sm:$0xff]  ;;  %v17118_v26 = vld [vmem:[%s25733_s8 + $0x68] sm:$0xff] }
 0xcc0   : > { %13730 = vst.msk [vmem:[#allocation8 + $0x37] sm:$0x7f] %vm12133_vm7, %v13729_v45  ;;  %13734 = vst.msk [vmem:[#allocation8 + $0x40] sm:$0x7f] %vm12133_vm7, %v13733_v18  ;;  %v13750_v15 = vmax.f32 %v13738_v28, 0.0  ;;  %v15692_v45 = vld [vmem:[#allocation21] sm:$0xff] }
 0xcc1   : > { %v15693_v18 = vld [vmem:[#allocation21 + $0x8] sm:$0xff] }
 0xcc2   : > { %13762 = vst.msk [vmem:[#allocation9 + $0x18] sm:$0xff] %vm12120_vm6, %v13750_v15  ;;  %v20441_v15 = vpack.c.bf16 %v15693_v18, %v15692_v45  ;;  %v17124_v18 = vld [vmem:[%s25733_s8 + $0x80] sm:$0xff] }
 0xcc3   : > { %v13739_v48 = vld [vmem:[#allocation8 + $0x20] sm:$0xff]  ;;  %v13740_v53 = vld [vmem:[#allocation8 + $0x28] sm:$0xff] }
 0xcc4   : > { %v13751_v30 = vmax.f32 %v13739_v48, 0.0  ;;  %v13752_v14 = vmax.f32 %v13740_v53, 0.0 }
 0xcc5   : > { %v13781_v21 = vld [vmem:[#allocation9 + $0x1] ss:$2 sm:$0xff]  ;;  %v13771_v44 = vld [vmem:[#allocation9] ss:$2 sm:$0xff] }
 0xcc6   : > { %20055 = vmatprep.mubr.msk.f32.mxu0 %vm12120_vm6, %v13781_v21  ;;  %13763 = vst.msk [vmem:[#allocation9 + $0x20] sm:$0xff] %vm12120_vm6, %v13751_v30  ;;  %13764 = vst.msk [vmem:[#allocation9 + $0x28] sm:$0xff] %vm12120_vm6, %v13752_v14  ;;  %v13986_v35 = vld [vmem:[#allocation9 + $0x2] ss:$2 sm:$0xff]  ;;  %v14098_v51 = vld [vmem:[#allocation9 + $0x9] ss:$2 sm:$0xff] }
 0xcc7   : > { %v13741_v38 = vld [vmem:[#allocation8 + $0x30] sm:$0xff]  ;;  %v13742_v16 = vld [vmem:[#allocation8 + $0x38] sm:$0xff]  ;;  %v13743_v17 = vld [vmem:[#allocation8 + $0x40] sm:$0xff] }
 0xcc8   : > { %v13753_v27 = vmax.f32 %v13741_v38, 0.0  ;;  %v13754_v46 = vmax.f32 %v13742_v16, 0.0  ;;  %v13755_v32 = vmax.f32 %v13743_v17, 0.0  ;;  %v15685_v38 = vld [vmem:[#allocation8 + $0xa] ss:$2 sm:$0xff] }
 0xcc9   : > { %v13783_v42 = vld [vmem:[#allocation9 + $0x11] ss:$2 sm:$0xff]  ;;  %v13773_v19 = vld [vmem:[#allocation9 + $0x10] ss:$2 sm:$0xff] }
 0xcca   : > { %20056 = vmatmul.mubr.msk.f32.vlgmr.msra.gmra.mrb[102].mxu0 %vm12120_vm6, %v13783_v42  ;;  %13765 = vst.msk [vmem:[#allocation9 + $0x30] sm:$0xff] %vm12120_vm6, %v13753_v27  ;;  %13766 = vst.msk [vmem:[#allocation9 + $0x38] sm:$0xff] %vm12120_vm6, %v13754_v46  ;;  %v14210_v31 = vld [vmem:[#allocation9 + $0xa] ss:$2 sm:$0xff]  ;;  %v14322_v2 = vld [vmem:[#allocation9 + $0xb] ss:$2 sm:$0xff] }
 0xccb   : > { %13767 = vst.msk [vmem:[#allocation9 + $0x40] sm:$0xff] %vm12120_vm6, %v13755_v32  ;;  %20358 = vmatpush3.bf16.msra.mxu0 %v25312_v49  ;;  %v15687_v16 = vld [vmem:[#allocation8 + $0x1a] ss:$2 sm:$0xff]  ;;  %v15689_v17 = vld [vmem:[#allocation8 + $0x2a] ss:$2 sm:$0xff]  ;;  %v21797_v32 = vmov 0.0|0.0  }
 0xccc   : > { %20360 = vmatprep.subr.bf16.mxu0 %v20359_v54  ;;  %v15691_v27 = vld [vmem:[#allocation8 + $0x3a] ss:$2 sm:$0x7f]  ;;  %20387 = vmatprep.subr.bf16.mxu1 %v21797_v32 }
 0xccd   : > { %v13785_v33 = vld [vmem:[#allocation9 + $0x21] ss:$2 sm:$0xff]  ;;  %v13775_v58 = vld [vmem:[#allocation9 + $0x20] ss:$2 sm:$0xff]  ;;  %v17100_v46 = vld [vmem:[%s25733_s8 + $0x20] sm:$0xff] }
 0xcce   : > { %20058 = vmatprep.mubr.msk.f32.mxu0 %vm12120_vm6, %v13785_v33  ;;  %v13988_v4 = vld [vmem:[#allocation9 + $0x12] ss:$2 sm:$0xff]  ;;  %v14100_v8 = vld [vmem:[#allocation9 + $0x19] ss:$2 sm:$0xff]  ;;  %v17102_v33 = vld [vmem:[%s25733_s8 + $0x30] sm:$0xff] }
 0xccf   : > { %v14212_v55 = vld [vmem:[#allocation9 + $0x1a] ss:$2 sm:$0xff]  ;;  %v14324_v20 = vld [vmem:[#allocation9 + $0x1b] ss:$2 sm:$0xff] }
 0xcd0   : > { %v14433_v24 = vld [vmem:[#allocation9 + $0x12] ss:$2 sm:$0xff]  ;;  %v14543_v28 = vld [vmem:[#allocation9 + $0x13] ss:$2 sm:$0xff] }
 0xcd1   : > { %v13787_v25 = vld [vmem:[#allocation9 + $0x31] ss:$2 sm:$0x7f]  ;;  %v13777_v49 = vld [vmem:[#allocation9 + $0x30] ss:$2 sm:$0x7f] }
 0xcd2   : > { %20059 = vmatmul.mubr.msk.f32.gmra.mrb[104].mxu0 %vm12120_vm6, %v13787_v25  ;;  %v13990_v37 = vld [vmem:[#allocation9 + $0x22] ss:$2 sm:$0xff]  ;;  %v13992_v7 = vld [vmem:[#allocation9 + $0x32] ss:$2 sm:$0x7f] }
 0xcd3   : > { %20065 = vmatprep.mubr.msk.f32.mxu0 %vm12120_vm6, %v13771_v44  ;;  %v14102_v11 = vld [vmem:[#allocation9 + $0x29] ss:$2 sm:$0xff]  ;;  %v14104_v5 = vld [vmem:[#allocation9 + $0x39] ss:$2 sm:$0x7f] }
 0xcd4   : > { %v14214_v23 = vld [vmem:[#allocation9 + $0x2a] ss:$2 sm:$0xff]  ;;  %v14216_v3 = vld [vmem:[#allocation9 + $0x3a] ss:$2 sm:$0x7f] }
 0xcd5   : > { %v14326_v29 = vld [vmem:[#allocation9 + $0x2b] ss:$2 sm:$0xff]  ;;  %v14328_v34 = vld [vmem:[#allocation9 + $0x3b] ss:$2 sm:$0x7f] }
 0xcd6   : > { %20066 = vmatmul.mubr.msk.f32.vlgmr.msra.gmra.mrb[102].mxu0 %vm12120_vm6, %v13773_v19  ;;  %v14434_v60 = vld [vmem:[#allocation9 + $0x22] ss:$2 sm:$0xff]  ;;  %v14435_v6 = vld [vmem:[#allocation9 + $0x32] ss:$2 sm:$0xff]  ;;  %v14545_v48 = vld [vmem:[#allocation9 + $0x23] ss:$2 sm:$0xff] }
 0xcd7   : > { %20068 = vmatprep.mubr.msk.f32.mxu0 %vm12120_vm6, %v13775_v58  ;;  %20362 = vmatpush3.bf16.msra.mxu0 %v20359_v54  ;;  %v14437_v52 = vld [vmem:[#allocation9 + $0x42] ss:$2 sm:$0x7f]  ;;  %v14547_v53 = vld [vmem:[#allocation9 + $0x33] ss:$2 sm:$0xff] }
 0xcd8   : > { %20364 = vmatprep.subr.bf16.mxu0 %v20363_v57  ;;  %v14549_v30 = vld [vmem:[#allocation9 + $0x43] ss:$2 sm:$0x7f]  ;;  %v14655_v14 = vld [vmem:[#allocation9 + $0x14] ss:$2 sm:$0xff] }
 0xcd9   : > { %v14657_v21 = vld [vmem:[#allocation9 + $0x24] ss:$2 sm:$0xff]  ;;  %v14659_v22 = vld [vmem:[#allocation9 + $0x34] ss:$2 sm:$0xff] }
 0xcda   : > { %20069 = vmatmul.mubr.msk.f32.gmra.mrb[104].mxu0 %vm12120_vm6, %v13777_v49  ;;  %v14661_v36 = vld [vmem:[#allocation9 + $0x44] ss:$2 sm:$0x7f] }
 0xcdb   : > { %20075 = vmatprep.mubr.msk.f32.mxu0 %vm12120_vm6, %v13986_v35  ;;  %v17101_v54 = vld [vmem:[%s25733_s8 + $0x28] sm:$0xff]  ;;  %v17103_v25 = vld [vmem:[%s25733_s8 + $0x38] sm:$0xff] }
 0xcdc   : > { %v20388_v42 = vpack.c.bf16 %v17101_v54, %v17100_v46  ;;  %v20391_v40 = vpack.c.bf16 %v17103_v25, %v17102_v33  ;;  %v17134_v46 = vld [vmem:[%s25733_s8 + $0xb8] sm:$0xff]  ;;  %v17138_v25 = vld [vmem:[%s25733_s8 + $0xc0] sm:$0xff] }
 0xcde   : > { %20076 = vmatmul.mubr.msk.f32.vlgmr.msra.gmra.mrb[102].mxu0 %vm12120_vm6, %v13988_v4  ;;  %20389 = vmatpush3.bf16.msra.mxu1 %v20388_v42 }
 0xcdf   : > { %20078 = vmatprep.mubr.msk.f32.mxu0 %vm12120_vm6, %v13990_v37  ;;  %20366 = vmatpush3.bf16.msra.mxu0 %v20363_v57 }
 0xce0   : > { %20368 = vmatprep.subr.bf16.mxu0 %v20367_v61  ;;  %20390 = vmatprep.subr.bf16.mxu1 %v21797_v32 }
 0xce2   : > { %20079 = vmatmul.mubr.msk.f32.gmra.mrb[104].mxu0 %vm12120_vm6, %v13992_v7  ;;  %20392 = vmatpush3.bf16.msra.mxu1 %v20391_v40  ;;  %v17139_v40 = vld [vmem:[%s25733_s8 + $0xc8] sm:$0xff] }
 0xce3   : > { %20085 = vmatprep.mubr.msk.f32.mxu0 %vm12120_vm6, %v14098_v51  ;;  %20393 = vmatprep.subr.bf16.mxu1 %v21797_v32  ;;  %v14795_v51 = vld [vmem:[%s25733_s8 + $0x8] sm:$0xff] }
 0xce6   : > { %20086 = vmatmul.mubr.msk.f32.vlgmr.msra.gmra.mrb[102].mxu0 %vm12120_vm6, %v14100_v8 }
 0xce7   : > { %20088 = vmatprep.mubr.msk.f32.mxu0 %vm12120_vm6, %v14102_v11  ;;  %20370 = vmatpush3.bf16.msra.mxu0 %v20367_v61  ;;  %v20394_v11 = vpack.c.bf16 %v14795_v51, %v14794_v39  ;;  %v17152_v51 = vld [vmem:[%s25733_s8 + $0x100] sm:$0xff] }
 0xce8   : > { %20372 = vmatprep.subr.bf16.mxu0 %v20371_v63 }
 0xcea   : > { %20089 = vmatmul.mubr.msk.f32.gmra.mrb[104].mxu0 %vm12120_vm6, %v14104_v5  ;;  %v14796_v5 = vld [vmem:[%s25733_s8 + $0x10] sm:$0xff] }
 0xceb   : > { %20095 = vmatprep.mubr.msk.f32.mxu0 %vm12120_vm6, %v14210_v31  ;;  %v20397_v31 = vpack.c.bf16 %v14797_v9, %v14796_v5  ;;  %v17154_v5 = vld [vmem:[%s25733_s8 + $0x110] sm:$0xff]  ;;  %v17155_v9 = vld [vmem:[%s25733_s8 + $0x118] sm:$0xff] }
 0xcee   : > { %20096 = vmatmul.mubr.msk.f32.vlgmr.msra.gmra.mrb[102].mxu0 %vm12120_vm6, %v14212_v55  ;;  %v17110_v55 = vld [vmem:[%s25733_s8 + $0x40] sm:$0xff] }
 0xcef   : > { %20098 = vmatprep.mubr.msk.f32.mxu0 %vm12120_vm6, %v14214_v23  ;;  %20374 = vmatpush3.bf16.msra.mxu0 %v20371_v63  ;;  %v17111_v23 = vld [vmem:[%s25733_s8 + $0x48] sm:$0xff] }
 0xcf0   : > { %20376 = vmatprep.subr.bf16.mxu0 %v20375_v13  ;;  %v20400_v62 = vpack.c.bf16 %v17111_v23, %v17110_v55  ;;  %v15486_v55 = vld [vmem:[#allocation10 + $0x1d] sm:$0x3f] }
 0xcf2   : > { %20099 = vmatmul.mubr.msk.f32.gmra.mrb[104].mxu0 %vm12120_vm6, %v14216_v3 }
 0xcf3   : > { %20105 = vmatprep.mubr.msk.f32.mxu0 %vm12120_vm6, %v14322_v2  ;;  %v17113_v2 = vld [vmem:[%s25733_s8 + $0x58] sm:$0xff] }
 0xcf6   : > { %20106 = vmatmul.mubr.msk.f32.vlgmr.msra.gmra.mrb[102].mxu0 %vm12120_vm6, %v14324_v20  ;;  %v20403_v20 = vpack.c.bf16 %v17113_v2, %v17112_v1  ;;  %v15845_v1 = vld [vmem:[%s25735_s10 + $0x8] sm:$0xff]  ;;  %v15846_v2 = vld [vmem:[%s25735_s10 + $0x10] sm:$0xff] }
 0xcf7   : > { %20108 = vmatprep.mubr.msk.f32.mxu0 %vm12120_vm6, %v14326_v29  ;;  %20378 = vmatpush3.bf16.msra.mxu0 %v20375_v13 }
 0xcf8   : > { %20380 = vmatprep.subr.bf16.mxu0 %v20379_v0 }
 0xcfa   : > { %20109 = vmatmul.mubr.msk.f32.gmra.mrb[104].mxu0 %vm12120_vm6, %v14328_v34  ;;  %v17117_v34 = vld [vmem:[%s25733_s8 + $0x60] sm:$0xff] }
 0xcfb   : > { %20115 = vmatprep.mubr.msk.f32.mxu0 %vm12120_vm6, %v14433_v24  ;;  %v20406_v24 = vpack.c.bf16 %v17118_v26, %v17117_v34 }
 0xcfe   : > { %20116 = vmatmul.mubr.msk.f32.vlgmr.msra.gmra.mrb[102].mxu0 %vm12120_vm6, %v14434_v60  ;;  %v17120_v60 = vld [vmem:[%s25733_s8 + $0x78] sm:$0xff] }
 0xcff   : > { %20118 = vmatprep.mubr.msk.f32.mxu0 %vm12120_vm6, %v14435_v6  ;;  %20382 = vmatpush3.bf16.msra.mxu0 %v20379_v0 }
 0xd00   : > { %20384 = vmatprep.subr.bf16.mxu0 %v20383_v41 }
 0xd02   : > { %20119 = vmatmul.mubr.msk.f32.gmra.mrb[104].mxu0 %vm12120_vm6, %v14437_v52 }
 0xd03   : > { %20125 = vmatprep.mubr.msk.f32.mxu0 %vm12120_vm6, %v14543_v28  ;;  %v17125_v28 = vld [vmem:[%s25733_s8 + $0x88] sm:$0xff] }
 0xd06   : > { %20126 = vmatmul.mubr.msk.f32.vlgmr.msra.gmra.mrb[102].mxu0 %vm12120_vm6, %v14545_v48  ;;  %v20412_v48 = vpack.c.bf16 %v17125_v28, %v17124_v18 }
 0xd07   : > { %20128 = vmatprep.mubr.msk.f32.mxu0 %vm12120_vm6, %v14547_v53  ;;  %20386 = vmatpush3.bf16.msra.mxu0 %v20383_v41  ;;  %v17119_v41 = vld [vmem:[%s25733_s8 + $0x70] sm:$0xff] }
 0xd08   : > { %20442 = vmatprep.subr.bf16.mxu0 %v20441_v15  ;;  %v20409_v52 = vpack.c.bf16 %v17120_v60, %v17119_v41  ;;  %v17126_v53 = vld [vmem:[%s25733_s8 + $0x90] sm:$0xff] }
 0xd0a   : > { %20129 = vmatmul.mubr.msk.f32.gmra.mrb[104].mxu0 %vm12120_vm6, %v14549_v30  ;;  %v17127_v30 = vld [vmem:[%s25733_s8 + $0x98] sm:$0xff] }
 0xd0b   : > { %20135 = vmatprep.mubr.msk.f32.mxu0 %vm12120_vm6, %v14655_v14 }
 0xd0e   : > { %20136 = vmatmul.mubr.msk.f32.vlgmr.msra.gmra.mrb[102].mxu0 %vm12120_vm6, %v14657_v21  ;;  %v20415_v21 = vpack.c.bf16 %v17127_v30, %v17126_v53 }
 0xd0f   : > { %20138 = vmatprep.mubr.msk.f32.mxu0 %vm12120_vm6, %v14659_v22  ;;  %20444 = vmatpush3.bf16.msra.mxu0 %v20441_v15 }
 0xd10   : > { %20445 = vmatprep.subr.bf16.mxu0 %v21797_v32 }
 0xd12   : > { %20139 = vmatmul.mubr.msk.f32.gmra.mrb[104].mxu0 %vm12120_vm6, %v14661_v36  ;;  %v17131_v36 = vld [vmem:[%s25733_s8 + $0xa0] sm:$0xff] }
 0xd13   : > { %20298 = vmatprep.mubr.msk.f32.mxu0 %vm12120_vm6, %v15685_v38  ;;  %v17132_v38 = vld [vmem:[%s25733_s8 + $0xa8] sm:$0xff] }
 0xd16   : > { %20299 = vmatmul.mubr.msk.f32.vlgmr.msra.gmra.mrb[106].mxu0 %vm12120_vm6, %v15687_v16 }
 0xd17   : > { %20301 = vmatprep.mubr.msk.f32.mxu0 %vm12120_vm6, %v15689_v17  ;;  %v20418_v17 = vpack.c.bf16 %v17132_v38, %v17131_v36 }
 0xd1a   : > { %20302 = vmatmul.mubr.msk.f32.gmra.mrb[108].mxu0 %vm12120_vm6, %v15691_v27  ;;  %v17133_v27 = vld [vmem:[%s25733_s8 + $0xb0] sm:$0xff] }
 0xd1b   : > { %20312 = vmatprep.mubr.msk.f32.mxu0 %vm21796_vm5, %v26031_v10  ;;  %v20421_v42 = vpack.c.bf16 %v17134_v46, %v17133_v27 }
 0xde1   : > { %v20137_v43 = vpop.f32.mrb[102].mxu0 }
 0xde2   : > { %v14767_v44 = vmax.f32 %v20137_v43, 0.0  ;;  %v14743_v57 = vpop.f32.mrb[103].mxu0 }
 0xde3   : > { %v14766_v19 = vmax.f32 %v14743_v57, 0.0  ;;  %v17140_v57 = vld [vmem:[%s25733_s8 + $0xd0] sm:$0xff] }
 0xde4   : > { %14772 = vst.msk [vmem:[#allocation11 + $0x8] sm:$0xff] %vm14770_vm9, %v14767_v44  ;;  %v20424_v44 = vpack.c.bf16 %v17139_v40, %v17138_v25 }
 0xde5   : > { %14771 = vst.msk [vmem:[#allocation11] sm:$0xff] %vm14770_vm9, %v14766_v19  ;;  %v20140_v58 = vpop.f32.mrb[104].mxu0  ;;  %v17141_v19 = vld [vmem:[%s25733_s8 + $0xd8] sm:$0xff] }
 0xde6   : > { %v14769_v49 = vmax.f32 %v20140_v58, 0.0  ;;  %v14753_v56 = vpop.f32.mrb[105].mxu0  ;;  %v20427_v58 = vpack.c.bf16 %v17141_v19, %v17140_v57 }
 0xde7   : > { %v14768_v50 = vmax.f32 %v14753_v56, 0.0  ;;  %v17145_v56 = vld [vmem:[%s25733_s8 + $0xe0] sm:$0xff] }
 0xde8   : > { %14775 = vst.msk [vmem:[#allocation11 + $0x18] sm:$0x7f] %vm14774_vm11, %v14769_v49 }
 0xde9   : > { %14773 = vst.msk [vmem:[#allocation11 + $0x10] sm:$0xff] %vm14770_vm9, %v14768_v50  ;;  %v20300_v35 = vpop.f32.mrb[106].mxu0  ;;  %v17146_v50 = vld [vmem:[%s25733_s8 + $0xe8] sm:$0xff] }
 0xdea   : > { %15792 = vst.msk [vmem:[#allocation12 + $0x8] sm:$0xff] %vm14770_vm9, %v20300_v35  ;;  %v15772_v61 = vpop.f32.mrb[107].mxu0 }
 0xdeb   : > { %15791 = vst.msk [vmem:[#allocation12] sm:$0xff] %vm14770_vm9, %v15772_v61  ;;  %v14785_v4 = vld [vmem:[#allocation11 + $0x9] sm:$0xf]  ;;  %v20430_v61 = vpack.c.bf16 %v17146_v50, %v17145_v56 }
 0xdec   : > { %v14783_v37 = vld [vmem:[#allocation11] sm:$0xf]  ;;  %14786 = vst.msk [vmem:[#allocation10 + $0xd] sm:$0xf] %vm14781_vm10, %v14785_v4  ;;  %v17147_v4 = vld [vmem:[%s25733_s8 + $0xf0] sm:$0xff] }
 0xded   : > { %v20303_v7 = vpop.f32.mrb[108].mxu0  ;;  %14784 = vst.msk [vmem:[#allocation10 + $0x7] sm:$0xf] %vm14781_vm10, %v14783_v37  ;;  %v17148_v37 = vld [vmem:[%s25733_s8 + $0xf8] sm:$0xff] }
 0xdee   : > { %15794 = vst.msk [vmem:[#allocation12 + $0x18] sm:$0x7f] %vm14774_vm11, %v20303_v7  ;;  %v15782_v59 = vpop.f32.mrb[109].mxu0 }
 0xdef   : > { %15793 = vst.msk [vmem:[#allocation12 + $0x10] sm:$0xff] %vm14770_vm9, %v15782_v59  ;;  %v14789_v63 = vld [vmem:[#allocation11 + $0x1b] sm:$0xf]  ;;  %v20433_v59 = vpack.c.bf16 %v17148_v37, %v17147_v4 }
 0xdf0   : > { %v14787_v8 = vld [vmem:[#allocation11 + $0x12] sm:$0xf]  ;;  %14790 = vst.msk [vmem:[#allocation10 + $0x19] sm:$0xf] %vm14781_vm10, %v14789_v63 }
 0xdf1   : > { %14788 = vst.msk [vmem:[#allocation10 + $0x13] sm:$0xf] %vm14781_vm10, %v14787_v8  ;;  %v17153_v63 = vld [vmem:[%s25733_s8 + $0x108] sm:$0xff]  ;;  %v15811_v18 = vld [vmem:[#allocation12 + $0x9] sm:$0xf] }
 0xdf2   : > { %v15800_v60 = vld [vmem:[#allocation12] sm:$0xf] }
 0xdf4   : > { %v14798_v12 = vld [vmem:[#allocation10 + $0x1] sm:$0xff]  ;;  %v14799_v13 = vld [vmem:[#allocation10 + $0x9] sm:$0xff] }
 0xdf5   : > { %20150 = vmatmul.mubr.msk.f32.vlgmr.msra.gmra.mrb[62].mxu1 %vm14770_vm9, %v14798_v12  ;;  %v14791_v0 = vld [vmem:[#allocation10] sm:$0xff]  ;;  %v25499_v29 = vld [vmem:[#allocation10 + $0x8] sm:$0xff] }
 0xdf6   : > { %20395 = vmatpush3.bf16.msra.mxu1 %v20394_v11  ;;  %20152 = vmatprep.mubr.msk.f32.mxu1 %vm21796_vm5, %v26031_v10  ;;  %v14984_v6 = vld [vmem:[#allocation10 + $0x2] sm:$0xff]  ;;  %v14985_v45 = vld [vmem:[#allocation10 + $0xa] sm:$0xff]  ;;  %v20436_v11 = vpack.c.bf16 %v17153_v63, %v17152_v51 }
 0xdf7   : > { %20396 = vmatprep.subr.bf16.mxu1 %v21797_v32  ;;  %v15084_v14 = vld [vmem:[#allocation10 + $0x6] sm:$0xff]  ;;  %v15186_v43 = vld [vmem:[#allocation10 + $0x17] sm:$0x3f] }
 0xdf8   : > { %v14800_v3 = vld [vmem:[#allocation10 + $0x11] sm:$0x3f]  ;;  %v15184_v54 = vld [vmem:[#allocation10 + $0x7] sm:$0xff]  ;;  %v15286_v35 = vld [vmem:[#allocation10 + $0x18] sm:$0x3f] }
 0xdf9   : > { %20153 = vmatmul.mubr.msk.f32.gmra.mrb[64].mxu1 %vm14770_vm9, %v14799_v13  ;;  %v14793_v47 = vld [vmem:[#allocation10 + $0x10] sm:$0x3f]  ;;  %v15086_v16 = vld [vmem:[#allocation10 + $0x16] sm:$0x3f]  ;;  %v15386_v8 = vld [vmem:[#allocation10 + $0x1c] sm:$0x3f] }
 0xdfa   : > { %20155 = vmatprep.mubr.msk.f32.mxu1 %vm21796_vm5, %v26031_v10  ;;  %20398 = vmatpush3.bf16.msra.mxu1 %v20397_v31  ;;  %v14986_v15 = vld [vmem:[#allocation10 + $0x12] sm:$0x3f]  ;;  %v20439_v31 = vpack.c.bf16 %v17155_v9, %v17154_v5  ;;  %v15833_v36 = vld [vmem:[#allocation12 + $0x1b] sm:$0xf] }
 0xdfb   : > { %20399 = vmatprep.subr.bf16.mxu1 %v21797_v32  ;;  %v25548_v22 = vld [vmem:[#allocation10 + $0xe] sm:$0xff]  ;;  %v15585_v23 = vld [vmem:[#allocation10 + $0x16] sm:$0xff] }
 0xdfc   : > { %v15185_v33 = vld [vmem:[#allocation10 + $0xf] sm:$0xff] }
 0xdfd   : > { %20156 = vmatmul.mubr.msk.f32.gmra.mrb[66].mxu1 %vm14770_vm9, %v14800_v3  ;;  %v15285_v49 = vld [vmem:[#allocation10 + $0x10] sm:$0xff]  ;;  %v15586_v3 = vld [vmem:[#allocation10 + $0x1e] sm:$0x3f] }
 0xdfe   : > { %20166 = vmatprep.mubr.msk.f32.mxu1 %vm21796_vm5, %v26031_v10  ;;  %v15384_v7 = vld [vmem:[#allocation10 + $0xc] sm:$0xff]  ;;  %v15385_v39 = vld [vmem:[#allocation10 + $0x14] sm:$0xff] }
 0xdff   : > { %v15484_v12 = vld [vmem:[#allocation10 + $0xd] sm:$0xff]  ;;  %v15485_v13 = vld [vmem:[#allocation10 + $0x15] sm:$0xff] }
 0xe01   : > { %20167 = vmatmul.mubr.msk.f32.vlgmr.msra.gmra.mrb[62].mxu1 %vm14770_vm9, %v14791_v0 }
 0xe02   : > { %20401 = vmatpush3.bf16.msra.mxu1 %v20400_v62  ;;  %20169 = vmatprep.mubr.msk.f32.mxu1 %vm21796_vm5, %v26031_v10  ;;  %v15844_v62 = vld [vmem:[%s25735_s10] sm:$0xff] }
 0xe03   : > { %20402 = vmatprep.subr.bf16.mxu1 %v21797_v32  ;;  %v20446_v0 = vpack.c.bf16 %v15845_v1, %v15844_v62 }
 0xe05   : > { %20170 = vmatmul.mubr.msk.f32.gmra.mrb[64].mxu1 %vm14770_vm9, %v25499_v29  ;;  %20447 = vmatpush3.bf16.msra.mxu0 %v20446_v0 }
 0xe06   : > { %20172 = vmatprep.mubr.msk.f32.mxu1 %vm21796_vm5, %v26031_v10  ;;  %20404 = vmatpush3.bf16.msra.mxu1 %v20403_v20 }
 0xe07   : > { %20405 = vmatprep.subr.bf16.mxu1 %v21797_v32  ;;  %20448 = vmatprep.subr.bf16.mxu0 %v21797_v32 }
 0xe09   : > { %20173 = vmatmul.mubr.msk.f32.gmra.mrb[66].mxu1 %vm14770_vm9, %v14793_v47 }
 0xe0a   : > { %20183 = vmatprep.mubr.msk.f32.mxu1 %vm21796_vm5, %v26031_v10 }
 0xe0d   : > { %20184 = vmatmul.mubr.msk.f32.vlgmr.msra.gmra.mrb[62].mxu1 %vm14770_vm9, %v14984_v6 }
 0xe0e   : > { %20407 = vmatpush3.bf16.msra.mxu1 %v20406_v24  ;;  %20186 = vmatprep.mubr.msk.f32.mxu1 %vm21796_vm5, %v26031_v10 }
 0xe0f   : > { %20408 = vmatprep.subr.bf16.mxu1 %v21797_v32 }
 0xe11   : > { %20187 = vmatmul.mubr.msk.f32.gmra.mrb[64].mxu1 %vm14770_vm9, %v14985_v45 }
 0xe12   : > { %20189 = vmatprep.mubr.msk.f32.mxu1 %vm21796_vm5, %v26031_v10  ;;  %20410 = vmatpush3.bf16.msra.mxu1 %v20409_v52 }
 0xe13   : > { %20411 = vmatprep.subr.bf16.mxu1 %v21797_v32 }
 0xe15   : > { %20190 = vmatmul.mubr.msk.f32.gmra.mrb[66].mxu1 %vm14770_vm9, %v14986_v15 }
 0xe16   : > { %20200 = vmatprep.mubr.msk.f32.mxu1 %vm21796_vm5, %v26031_v10 }
 0xe19   : > { %20201 = vmatmul.mubr.msk.f32.vlgmr.msra.gmra.mrb[62].mxu1 %vm14770_vm9, %v15084_v14 }
 0xe1a   : > { %20413 = vmatpush3.bf16.msra.mxu1 %v20412_v48  ;;  %20203 = vmatprep.mubr.msk.f32.mxu1 %vm21796_vm5, %v26031_v10 }
 0xe1b   : > { %20414 = vmatprep.subr.bf16.mxu1 %v21797_v32 }
 0xe1d   : > { %20204 = vmatmul.mubr.msk.f32.gmra.mrb[64].mxu1 %vm14770_vm9, %v25548_v22 }
 0xe1e   : > { %20206 = vmatprep.mubr.msk.f32.mxu1 %vm21796_vm5, %v26031_v10  ;;  %20416 = vmatpush3.bf16.msra.mxu1 %v20415_v21 }
 0xe1f   : > { %20417 = vmatprep.subr.bf16.mxu1 %v21797_v32 }
 0xe21   : > { %20207 = vmatmul.mubr.msk.f32.gmra.mrb[66].mxu1 %vm14770_vm9, %v15086_v16 }
 0xe22   : > { %20217 = vmatprep.mubr.msk.f32.mxu1 %vm21796_vm5, %v26031_v10 }
 0xe25   : > { %20218 = vmatmul.mubr.msk.f32.vlgmr.msra.gmra.mrb[62].mxu1 %vm14770_vm9, %v15184_v54 }
 0xe26   : > { %20419 = vmatpush3.bf16.msra.mxu1 %v20418_v17  ;;  %20220 = vmatprep.mubr.msk.f32.mxu1 %vm21796_vm5, %v26031_v10 }
 0xe27   : > { %20420 = vmatprep.subr.bf16.mxu1 %v21797_v32 }
 0xe29   : > { %20221 = vmatmul.mubr.msk.f32.gmra.mrb[64].mxu1 %vm14770_vm9, %v15185_v33 }
 0xe2a   : > { %20223 = vmatprep.mubr.msk.f32.mxu1 %vm21796_vm5, %v26031_v10  ;;  %20422 = vmatpush3.bf16.msra.mxu1 %v20421_v42 }
 0xe2b   : > { %20423 = vmatprep.subr.bf16.mxu1 %v21797_v32 }
 0xe2d   : > { %20224 = vmatmul.mubr.msk.f32.gmra.mrb[66].mxu1 %vm14770_vm9, %v15186_v43 }
 0xe2e   : > { %20234 = vmatprep.mubr.msk.f32.mxu1 %vm21796_vm5, %v26031_v10 }
 0xe31   : > { %20235 = vmatmul.mubr.msk.f32.vlgmr.msra.gmra.mrb[62].mxu1 %vm14770_vm9, %v25499_v29 }
 0xe32   : > { %20425 = vmatpush3.bf16.msra.mxu1 %v20424_v44  ;;  %20237 = vmatprep.mubr.msk.f32.mxu1 %vm21796_vm5, %v26031_v10 }
 0xe33   : > { %20426 = vmatprep.subr.bf16.mxu1 %v21797_v32 }
 0xe35   : > { %20238 = vmatmul.mubr.msk.f32.gmra.mrb[64].mxu1 %vm14770_vm9, %v15285_v49 }
 0xe36   : > { %20240 = vmatprep.mubr.msk.f32.mxu1 %vm21796_vm5, %v26031_v10  ;;  %20428 = vmatpush3.bf16.msra.mxu1 %v20427_v58 }
 0xe37   : > { %20429 = vmatprep.subr.bf16.mxu1 %v21797_v32 }
 0xe39   : > { %20241 = vmatmul.mubr.msk.f32.gmra.mrb[66].mxu1 %vm14770_vm9, %v15286_v35 }
 0xe3a   : > { %20251 = vmatprep.mubr.msk.f32.mxu1 %vm21796_vm5, %v26031_v10 }
 0xe3d   : > { %20252 = vmatmul.mubr.msk.f32.vlgmr.msra.gmra.mrb[62].mxu1 %vm14770_vm9, %v15384_v7 }
 0xe3e   : > { %20431 = vmatpush3.bf16.msra.mxu1 %v20430_v61  ;;  %20254 = vmatprep.mubr.msk.f32.mxu1 %vm21796_vm5, %v26031_v10 }
 0xe3f   : > { %20432 = vmatprep.subr.bf16.mxu1 %v21797_v32 }
 0xe41   : > { %20255 = vmatmul.mubr.msk.f32.gmra.mrb[64].mxu1 %vm14770_vm9, %v15385_v39 }
 0xe42   : > { %20257 = vmatprep.mubr.msk.f32.mxu1 %vm21796_vm5, %v26031_v10  ;;  %20434 = vmatpush3.bf16.msra.mxu1 %v20433_v59 }
 0xe43   : > { %20435 = vmatprep.subr.bf16.mxu1 %v21797_v32 }
 0xe45   : > { %20258 = vmatmul.mubr.msk.f32.gmra.mrb[66].mxu1 %vm14770_vm9, %v15386_v8 }
 0xe46   : > { %20268 = vmatprep.mubr.msk.f32.mxu1 %vm21796_vm5, %v26031_v10 }
 0xe49   : > { %20269 = vmatmul.mubr.msk.f32.vlgmr.msra.gmra.mrb[62].mxu1 %vm14770_vm9, %v15484_v12 }
 0xe4a   : > { %20437 = vmatpush3.bf16.msra.mxu1 %v20436_v11  ;;  %20271 = vmatprep.mubr.msk.f32.mxu1 %vm21796_vm5, %v26031_v10 }
 0xe4b   : > { %20438 = vmatprep.subr.bf16.mxu1 %v21797_v32  ;;  %v15822_v32 = vld [vmem:[#allocation12 + $0x12] sm:$0xf] }
 0xe4d   : > { %20272 = vmatmul.mubr.msk.f32.gmra.mrb[64].mxu1 %vm14770_vm9, %v15485_v13 }
 0xe4e   : > { %20274 = vmatprep.mubr.msk.f32.mxu1 %vm21796_vm5, %v26031_v10  ;;  %20440 = vmatpush3.bf16.msra.mxu1 %v20439_v31 }
 0xe51   : > { %20275 = vmatmul.mubr.msk.f32.gmra.mrb[66].mxu1 %vm14770_vm9, %v15486_v55 }
 0xe52   : > { %20285 = vmatprep.mubr.msk.f32.mxu1 %vm21796_vm5, %v26031_v10 }
 0xe55   : > { %20286 = vmatmul.mubr.msk.f32.vlgmr.msra.gmra.mrb[62].mxu1 %vm14770_vm9, %v25548_v22 }
 0xe56   : > { %20288 = vmatprep.mubr.msk.f32.mxu1 %vm21796_vm5, %v26031_v10 }
 0xe59   : > { %20289 = vmatmul.mubr.msk.f32.gmra.mrb[64].mxu1 %vm14770_vm9, %v15585_v23 }
 0xe5a   : > { %20291 = vmatprep.mubr.msk.f32.mxu1 %vm21796_vm5, %v26031_v10  ;;  %v15847_v10 = vld [vmem:[%s25735_s10 + $0x18] sm:$0xff] }
 0xe5b   : > { %v20449_v20 = vpack.c.bf16 %v15847_v10, %v15846_v2 }
 0xe5d   : > { %20292 = vmatmul.mubr.msk.f32.gmra.mrb[66].mxu1 %vm14770_vm9, %v15586_v3  ;;  %20450 = vmatpush3.bf16.msra.mxu0 %v20449_v20 }
 0xf28   : > { %v15667_v29 = vpop.f32.mrb[62].mxu1 }
 0xf29   : > { %15795 = vst.msk [vmem:[#allocation11] sm:$0xff] %vm14770_vm9, %v15667_v29  ;;  %v20287_v34 = vpop.f32.mrb[63].mxu1 }
 0xf2c   : > { %v15672_v26 = vpop.f32.mrb[64].mxu1 }
 0xf2d   : > { %15796 = vst.msk [vmem:[#allocation11 + $0x8] sm:$0xff] %vm14770_vm9, %v15672_v26  ;;  %v20290_v47 = vpop.f32.mrb[65].mxu1 }
 0xf30   : > { %v15677_v24 = vpop.f32.mrb[66].mxu1  ;;  %v15799_v41 = vld [vmem:[#allocation11] sm:$0xf] }
 0xf31   : > { %15798 = vst.msk [vmem:[#allocation11 + $0x10] sm:$0x3f] %vm15797_vm12, %v15677_v24  ;;  %v20293_v6 = vpop.f32.mrb[67].mxu1  ;;  %v15801_v52 = vadd.f32 %v15800_v60, %v15799_v41 }
 0xf33   : > { %v15802_v45 = vsel %vm14781_vm10, %v15801_v52, 0.0 }
 0xf34   : > { %v15803_v28 = vrot.slane %v15802_v45, 4  ;;  %v15810_v15 = vld [vmem:[#allocation11 + $0x6] sm:$0xf]  ;;  %v15821_v48 = vld [vmem:[#allocation11 + $0xc] sm:$0xf] }
 0xf35   : > { %v15812_v53 = vadd.f32 %v15811_v18, %v15810_v15  ;;  %v15823_v30 = vadd.f32 %v15822_v32, %v15821_v48 }
 0xf36   : > { %v15804_v14 = vadd.f32 %v15803_v28, %v15802_v45 }
 0xf37   : > { %v15813_v21 = vsel %vm14781_vm10, %v15812_v53, 0.0  ;;  %v15824_v22 = vsel %vm14781_vm10, %v15823_v30, 0.0 }
 0xf38   : > { %v15805_v38 = vrot.slane %v15804_v14, 2  ;;  %v15814_v16 = vrot.slane %v15813_v21, 4  ;;  %v15825_v17 = vrot.slane %v15824_v22, 4  ;;  %v15832_v27 = vld [vmem:[#allocation11 + $0x12] sm:$0xf] }
 0xf39   : > { %v15834_v46 = vadd.f32 %v15833_v36, %v15832_v27 }
 0xf3a   : > { %v15806_v54 = vadd.f32 %v15805_v38, %v15804_v14  ;;  %v15815_v42 = vadd.f32 %v15814_v16, %v15813_v21  ;;  %v15826_v33 = vadd.f32 %v15825_v17, %v15824_v22 }
 0xf3b   : > { %v15835_v25 = vsel %vm14781_vm10, %v15834_v46, 0.0 }
 0xf3c   : > { %v15816_v40 = vrot.slane %v15815_v42, 2  ;;  %v15827_v43 = vrot.slane %v15826_v33, 2  ;;  %v15836_v44 = vrot.slane %v15835_v25, 4  ;;  %v15807_v57 = vrot.slane %v15806_v54, 1 }
 0xf3e   : > { %v15817_v19 = vadd.f32 %v15816_v40, %v15815_v42  ;;  %v15828_v58 = vadd.f32 %v15827_v43, %v15826_v33  ;;  %v15837_v49 = vadd.f32 %v15836_v44, %v15835_v25  ;;  %v15808_v61 = vadd.f32 %v15807_v57, %v15806_v54 }
 0xf40   : > { %v15818_v56 = vrot.slane %v15817_v19, 1  ;;  %v15829_v50 = vrot.slane %v15828_v58, 1  ;;  %v15838_v35 = vrot.slane %v15837_v49, 2 }
 0xf42   : > { %v15819_v4 = vadd.f32 %v15818_v56, %v15817_v19  ;;  %v15839_v37 = vadd.f32 %v15838_v35, %v15837_v49  ;;  %v15830_v59 = vadd.f32 %v15829_v50, %v15828_v58 }
 0xf44   : > { %v15820_v7 = vadd.f32 %v15819_v4, %v15808_v61  ;;  %v15840_v39 = vrot.slane %v15839_v37, 1 }
 0xf46   : > { %v15831_v51 = vadd.f32 %v15830_v59, %v15820_v7  ;;  %v15841_v63 = vadd.f32 %v15840_v39, %v15839_v37 }
 0xf48   : > { %v15842_v8 = vadd.f32 %v15841_v63, %v15831_v51 }
 0xf4a   : > { %v15843_v11 = vmul.f32 0.0625, %v15842_v8 }
 0xf4c   : > { %20313 = vmatmul.mubr.msk.f32.vlgmr.msra.gmra.mrb[110].mxu0 %vm14770_vm9, %v15843_v11 }
0x101f   : > { %v15917_v5 = vpop.f32.mrb[110].mxu0 }
0x1020   : > { %15922 = vst.msk [vmem:[%s449_s15] sm:$0x1] %vm15921_vm13, %v15917_v5  ;;  %v20314_v9 = vpop.f32.mrb[111].mxu0 }
0x1021   : > { %21725 = shalt.err (!%p21722_p0)
}
0x1022   : > { %s21726_s11 = scalar_lea.hbm %s25683_s13, 16  ;;  %s21730_s30 = scalar_lea.hbm %s26046_s29, 32 }
0x1023   : > { %p21727_p10 = scmp.ne.s32.totalorder %s25683_s13, %s21726_s11  ;;  %p21731_p4 = scmp.lt.u32.totalorder %s25683_s13, %s26046_s29 }
0x1024   : > { %p21732_p12 = scmp.lt.u32.totalorder %s21730_s30, %s21726_s11  ;;  %p21734_p8 = scmp.lt.u32.totalorder %s21726_s11, %s25683_s13 }
0x1025   : > { %p21728_p2 = pnand %p21727_p10, %p26047_p11 }
0x1026   : > { %p21733_p7 = por %p21732_p12, %p21731_p4 }
0x1027   : > { %p21729_p3 = pneg %p21728_p2 }
0x1028   : > { %p21735_p13 = por %p21734_p8, %p21733_p7 }
0x102a   : > { %p21736_p1 = pnand %p21735_p13, %p21729_p3 }
0x102c   : > { %21739 = shalt.err (!%p21736_p1)
}
0x102d   : > { %21497 = dma.vmem_to_hbm [thread:$0]  (%p26047_p11), %s25685_s20, 16, %s25683_s13, %s15924_s24  }
0x102e PF: > { %s26048_s19 = sld [smem:[#allocation29_spill]]  ;;  %s26049_s12 = sld [smem:[#allocation27_spill]] }
0x102f   : > { %s26050_s15 = sld [smem:[#allocation32_spill]] }
0x1034   : > { %p21529_p6 = scmp.ge.s32.totalorder %s26048_s19, 2  ;;  %s15948_s22 = sand.u32 1, %s26049_s12  }
0x1035   : > { %p26051_p9 = scmp.ne.s32.totalorder %s26050_s15, 0  ;;  %s15949_s23 = scalar_lea.sflag [#allocation15], %s15948_s22 }
0x1037   : > { %p21516_p5 = pnand %p21529_p6, %p26051_p9 }
0x1039   : > { %21769 = dma.done.wait (!%p21516_p5), %s15949_s23, 16  }
0x103a   : > { %21771 = vsyncadd (!%p21516_p5), %s15949_s23, 4294967280  ;;  %s26052_s20 = sld [smem:[#allocation30_spill]]  ;;  %s26053_s25 = sld [smem:[#allocation28_spill]] }
0x103b   : > { %s26054_s19 = sld [smem:[#allocation31_spill]]  ;;  %s26055_s17 = smov %s21778_s18 }
0x1040   : > { %p24_p0 = scmp.ge.s32.totalorder %s26052_s20, 4   ;;  %s26056_s18 = smov %s26053_s25 }
0x1042   :  { %26 = sbr.rel (!%p24_p0) target bundleno = 9 (0x9), region = 269 }
0x1049   :  { %15953 = vsyncpa [#allocation14], 1 }
0x104a   :  { %15955 = vsyncpa [#allocation14 + $0x1], 1 }
0x104b   :  { %15956 = vsyncpa [#allocation17], 1 }
0x104c   :  { %15957 = vsyncpa [#allocation20], 1 }
0x104d   :  { %15958 = vsyncpa [#allocation15], 1 }
0x104e   :  { %15960 = vsyncpa [#allocation15 + $0x1], 1 }

</bundles_post_ra>
